<compile_context>
chip_gen: v7x
topology: tpu7x:2x2x1
jax: 0.10.0
libtpu: 0.0.40
codegen_flags: <defaults>
</compile_context>

<pallas_src>
import jax
import jax.numpy as jnp
from jax.experimental import pallas as pl
from jax.experimental.pallas import tpu as pltpu

# ---- hyperparameters matching the PyTorch module ----
N_EMBD = 256
BLOCK_SIZE = 4
N_HEAD = 4
N_LAYER = 4
VOCAB_SIZE = 65                  # len(sorted(set(text))) for the Shakespeare char set
HEAD_SIZE = N_EMBD // N_HEAD
LN_EPS = 1e-5
ATTN_SCALE = N_EMBD ** (-0.5)    # reference quirk: scales by C**-0.5 with C = n_embd
NEG_INF = -1e30                  # finite mask value; exp() underflows to exactly 0


def _layernorm(x, g, b):
    # PyTorch nn.LayerNorm: biased variance over last dim, eps=1e-5.
    mu = jnp.mean(x, axis=-1, keepdims=True)
    var = jnp.mean((x - mu) ** 2, axis=-1, keepdims=True)
    return (x - mu) * jax.lax.rsqrt(var + LN_EPS) * g + b


def fused_forward_kernel(x_ref, mask_ref, vecs_ref, wqkv_ref, wproj_ref,
                         w1_ref, w2_ref, lm_w_ref, out_ref):
    x = x_ref[...]                                  # (N, C) f32, N = B*T
    mask = mask_ref[...]                            # (N, N) f32 additive causal mask

    # ---------------- transformer blocks (statically unrolled) ----------------
    for l in range(N_LAYER):
        vl = vecs_ref[l]                            # (12, C) packed f32 vectors
        ln1_g, ln1_b = vl[0:1], vl[1:2]
        ln2_g, ln2_b = vl[2:3], vl[3:4]
        b_proj, b2 = vl[4:5], vl[5:6]
        # rows 6..9 hold the (4C,) ffn bias b1; rebuild via lane-concat (no relayout-heavy reshape)
        b1 = jnp.concatenate([vl[6:7], vl[7:8], vl[8:9], vl[9:10]], axis=-1)   # (1, 4C)

        # --- x = x + proj(multi-head causal self-attention(ln1(x))) ---
        xn = _layernorm(x, ln1_g, ln1_b)
        qkv = jnp.dot(xn.astype(jnp.bfloat16), wqkv_ref[l],
                      preferred_element_type=jnp.float32)                       # (N, 3C) f32

        # head-major stacks (H, N, D) -> one batched score einsum + one softmax
        q = jnp.stack([qkv[:, h * HEAD_SIZE:(h + 1) * HEAD_SIZE]
                       for h in range(N_HEAD)], axis=0)
        k = jnp.stack([qkv[:, N_EMBD + h * HEAD_SIZE:N_EMBD + (h + 1) * HEAD_SIZE]
                       for h in range(N_HEAD)], axis=0)
        v = jnp.stack([qkv[:, 2 * N_EMBD + h * HEAD_SIZE:2 * N_EMBD + (h + 1) * HEAD_SIZE]
                       for h in range(N_HEAD)], axis=0)

        s = jnp.einsum('hnd,hmd->hnm', q, k,
                       preferred_element_type=jnp.float32) * ATTN_SCALE         # (H, N, N)
        s = s + mask[None, :, :]
        s = s - jnp.max(s, axis=-1, keepdims=True)
        p = jnp.exp(s)
        p = p * pl.reciprocal(jnp.sum(p, axis=-1, keepdims=True), approx=True)
        # TODO(synk): nn.Dropout on attention weights / residuals / ffn omitted (eval mode).
        o = jnp.einsum('hnm,hmd->hnd', p, v,
                       preferred_element_type=jnp.float32)                      # (H, N, D)
        attn = jnp.concatenate([o[h] for h in range(N_HEAD)], axis=-1)          # (N, C)
        sa = jnp.dot(attn.astype(jnp.bfloat16), wproj_ref[l],
                     preferred_element_type=jnp.float32) + b_proj
        x = x + sa

        # --- x = x + W2(relu(W1(ln2(x)))) ---
        xn2 = _layernorm(x, ln2_g, ln2_b)
        h1 = jnp.dot(xn2.astype(jnp.bfloat16), w1_ref[l],
                     preferred_element_type=jnp.float32) + b1
        h1 = jnp.maximum(h1, 0.0)
        ff = jnp.dot(h1.astype(jnp.bfloat16), w2_ref[l],
                     preferred_element_type=jnp.float32) + b2
        x = x + ff

    # ---------------- final LayerNorm + lm_head ----------------
    vf = vecs_ref[N_LAYER]
    lnf_g, lnf_b, lm_b = vf[0:1], vf[1:2], vf[4:5]
    xn = _layernorm(x, lnf_g, lnf_b)
    # lm_head weight zero-padded to (C, C): lane-dense store; wrapper slices to vocab.
    out_ref[...] = jnp.dot(xn.astype(jnp.bfloat16), lm_w_ref[...],
                           preferred_element_type=jnp.float32) + lm_b


def _causal_mask(B, T):
    """Additive mask over flattened (B*T) rows: block-diagonal causal."""
    n = B * T
    idx = jnp.arange(n, dtype=jnp.int32)
    same_batch = (idx[:, None] // T) == (idx[None, :] // T)
    causal = (idx[None, :] % T) <= (idx[:, None] % T)
    return jnp.where(same_batch & causal, 0.0, NEG_INF).astype(jnp.float32)


def _fused_forward(x_flat, mask, params):
    n, C = x_flat.shape
    vmem = pl.BlockSpec(memory_space=pltpu.MemorySpace.VMEM)   # whole array resident in VMEM
    return pl.pallas_call(
        fused_forward_kernel,
        out_shape=jax.ShapeDtypeStruct((n, C), jnp.float32),
        in_specs=[vmem] * 8,
        out_specs=vmem,
        compiler_params=pltpu.CompilerParams(vmem_limit_bytes=32 * 1024 * 1024),
    )(x_flat, mask, params['vecs'], params['wqkv'], params['wproj'],
      params['w1'], params['w2'], params['lm_w'])


def init_params(key):
    keys = iter(jax.random.split(key, 64))

    def nrm(shape, std=0.02):
        return jax.random.normal(next(keys), shape, jnp.float32) * std

    C = N_EMBD
    tok_emb = nrm((VOCAB_SIZE, C))
    pos_emb = nrm((BLOCK_SIZE, C))

    ones_c = jnp.ones((C,), jnp.float32)
    zeros_c = jnp.zeros((C,), jnp.float32)

    wqkv, wproj, w1, w2, vecs = [], [], [], [], []
    for _ in range(N_LAYER):
        wq, wk, wv = nrm((C, C)), nrm((C, C)), nrm((C, C))
        wqkv.append(jnp.concatenate([wq, wk, wv], axis=1))          # (C, 3C)
        wproj.append(nrm((C, C)))
        w1.append(nrm((C, 4 * C)))
        w2.append(nrm((4 * C, C)))
        b_proj, b1, b2 = nrm((C,)), nrm((4 * C,)), nrm((C,))
        # rows: 0=ln1_g 1=ln1_b 2=ln2_g 3=ln2_b 4=b_proj 5=b2 6..9=b1 10,11=unused
        rows = [ones_c, zeros_c, ones_c, zeros_c, b_proj, b2] \
             + list(b1.reshape(4, C)) + [zeros_c, zeros_c]
        vecs.append(jnp.stack(rows, axis=0))                        # (12, C)

    # final LayerNorm + lm_head live in the "layer N_LAYER" vec slot
    lm_w = nrm((C, VOCAB_SIZE))
    lm_w_pad = jnp.zeros((C, C), jnp.float32).at[:, :VOCAB_SIZE].set(lm_w)
    lm_b = nrm((VOCAB_SIZE,))
    lm_b_pad = jnp.zeros((C,), jnp.float32).at[:VOCAB_SIZE].set(lm_b)
    # rows: 0=lnf_g 1=lnf_b 4=lm_b (others unused)
    rows = [ones_c, zeros_c, zeros_c, zeros_c, lm_b_pad] + [zeros_c] * 7
    vecs.append(jnp.stack(rows, axis=0))

    return {
        'tok_emb': tok_emb,
        'pos_emb': pos_emb,
        'wqkv': jnp.stack(wqkv).astype(jnp.bfloat16),    # (L,   C, 3C)
        'wproj': jnp.stack(wproj).astype(jnp.bfloat16),  # (L,   C,  C)
        'w1': jnp.stack(w1).astype(jnp.bfloat16),        # (L,   C, 4C)
        'w2': jnp.stack(w2).astype(jnp.bfloat16),        # (L,  4C,  C)
        'lm_w': lm_w_pad.astype(jnp.bfloat16),           # (C, C) vocab zero-padded
        'vecs': jnp.stack(vecs).astype(jnp.float32),     # (L+1, 12, C)
    }


def bigram_forward(idx, params):
    """idx: (B, T) int32 token ids, T <= BLOCK_SIZE. Returns logits (B, T, vocab)."""
    B, T = idx.shape
    tok = params['tok_emb'][idx]                         # glue: embedding gather
    pos = params['pos_emb'][:T]
    x = (tok + pos[None, :, :]).astype(jnp.float32).reshape(B * T, N_EMBD)
    mask = _causal_mask(B, T)
    logits = _fused_forward(x, mask, params)             # (B*T, 256) lane-padded
    # targets=None path of the reference forward => loss is None.
    return logits.reshape(B, T, N_EMBD)[:, :, :VOCAB_SIZE]


def _reference_forward(idx, params):
    """Pure-JAX mirror of the kernel math (same bf16 rounding points, exact softmax)."""
    B, T = idx.shape
    C = N_EMBD
    tok = params['tok_emb'][idx]
    pos = params['pos_emb'][:T]
    x = (tok + pos[None, :, :]).astype(jnp.float32).reshape(B * T, C)
    mask = _causal_mask(B, T)

    def bf16(a):
        return a.astype(jnp.bfloat16).astype(jnp.float32)

    vecs = params['vecs']
    wqkv = params['wqkv'].astype(jnp.float32)
    wproj = params['wproj'].astype(jnp.float32)
    w1 = params['w1'].astype(jnp.float32)
    w2 = params['w2'].astype(jnp.float32)
    for l in range(N_LAYER):
        vl = vecs[l]
        b1 = vl[6:10].reshape(1, 4 * C)
        xn = _layernorm(x, vl[0:1], vl[1:2])
        qkv = bf16(xn) @ wqkv[l]
        outs = []
        for h in range(N_HEAD):
            qh = qkv[:, h * HEAD_SIZE:(h + 1) * HEAD_SIZE]
            kh = qkv[:, N_EMBD + h * HEAD_SIZE:N_EMBD + (h + 1) * HEAD_SIZE]
            vh = qkv[:, 2 * N_EMBD + h * HEAD_SIZE:2 * N_EMBD + (h + 1) * HEAD_SIZE]
            s = qh @ kh.T * ATTN_SCALE + mask
            outs.append(jax.nn.softmax(s, axis=-1) @ vh)
        attn = jnp.concatenate(outs, axis=-1)
        x = x + bf16(attn) @ wproj[l] + vl[4:5]
        xn2 = _layernorm(x, vl[2:3], vl[3:4])
        h1 = jnp.maximum(bf16(xn2) @ w1[l] + b1, 0.0)
        x = x + bf16(h1) @ w2[l] + vl[5:6]
    vf = vecs[N_LAYER]
    xn = _layernorm(x, vf[0:1], vf[1:2])
    logits = bf16(xn) @ params['lm_w'].astype(jnp.float32) + vf[4:5]
    return logits.reshape(B, T, C)[:, :, :VOCAB_SIZE]


if __name__ == "__main__":
    key = jax.random.PRNGKey(0)
    pkey, ikey = jax.random.split(key)
    params = init_params(pkey)
    B, T = 2, BLOCK_SIZE
    idx = jax.random.randint(ikey, (B, T), 0, VOCAB_SIZE, dtype=jnp.int32)

    forward = jax.jit(bigram_forward)
    logits = forward(idx, params)
    jax.block_until_ready(logits)
    assert logits.shape == (B, T, VOCAB_SIZE) and logits.dtype == jnp.float32
    assert bool(jnp.all(jnp.isfinite(logits)))

    # Tolerance-based correctness check vs. a pure-JAX mirror (bf16 weights +
    # approx-reciprocal softmax => expect ~1e-2-level absolute differences).
    ref = _reference_forward(idx, params)
    max_err = float(jnp.max(jnp.abs(logits - ref)))
    assert max_err < 5e-2, f"kernel vs reference mismatch: max_abs_err={max_err}"
    print("KERNEL_OK")
</pallas_src>

<mosaic_0001>
module attributes {stable_mosaic.version = 11 : i64} {
  func.func @fused_forward_kernel(%arg0: memref<8x256xf32, #tpu.memory_space<vmem>>, %arg1: memref<8x8xf32, #tpu.memory_space<vmem>>, %arg2: memref<5x12x256xf32, #tpu.memory_space<vmem>>, %arg3: memref<4x256x768xbf16, #tpu.memory_space<vmem>>, %arg4: memref<4x256x256xbf16, #tpu.memory_space<vmem>>, %arg5: memref<4x256x1024xbf16, #tpu.memory_space<vmem>>, %arg6: memref<4x1024x256xbf16, #tpu.memory_space<vmem>>, %arg7: memref<256x256xbf16, #tpu.memory_space<vmem>>, %arg8: memref<8x256xf32, #tpu.memory_space<vmem>>) attributes {dimension_semantics = [], scalar_prefetch = 0 : i64, scratch_operands = 0 : i64, tpu.core_type = #tpu.core_type<tc>} {
    %c0 = arith.constant 0 : index
    %c0_0 = arith.constant 0 : index
    %0 = vector.load %arg0[%c0, %c0_0] : memref<8x256xf32, #tpu.memory_space<vmem>>, vector<8x256xf32>
    %c0_1 = arith.constant 0 : index
    %c0_2 = arith.constant 0 : index
    %1 = vector.load %arg1[%c0_1, %c0_2] : memref<8x8xf32, #tpu.memory_space<vmem>>, vector<8x8xf32>
    %c0_3 = arith.constant 0 : index
    %c0_4 = arith.constant 0 : index
    %c0_5 = arith.constant 0 : index
    %2 = vector.load %arg2[%c0_3, %c0_4, %c0_5] : memref<5x12x256xf32, #tpu.memory_space<vmem>>, vector<1x12x256xf32>
    %3 = vector.shape_cast %2 : vector<1x12x256xf32> to vector<12x256xf32>
    %4 = vector.extract_strided_slice %3 {offsets = [0, 0], sizes = [1, 256], strides = [1, 1]} : vector<12x256xf32> to vector<1x256xf32>
    %5 = vector.extract_strided_slice %3 {offsets = [1, 0], sizes = [1, 256], strides = [1, 1]} : vector<12x256xf32> to vector<1x256xf32>
    %6 = vector.extract_strided_slice %3 {offsets = [2, 0], sizes = [1, 256], strides = [1, 1]} : vector<12x256xf32> to vector<1x256xf32>
    %7 = vector.extract_strided_slice %3 {offsets = [3, 0], sizes = [1, 256], strides = [1, 1]} : vector<12x256xf32> to vector<1x256xf32>
    %8 = vector.extract_strided_slice %3 {offsets = [4, 0], sizes = [1, 256], strides = [1, 1]} : vector<12x256xf32> to vector<1x256xf32>
    %9 = vector.extract_strided_slice %3 {offsets = [5, 0], sizes = [1, 256], strides = [1, 1]} : vector<12x256xf32> to vector<1x256xf32>
    %10 = vector.extract_strided_slice %3 {offsets = [6, 0], sizes = [1, 256], strides = [1, 1]} : vector<12x256xf32> to vector<1x256xf32>
    %11 = vector.extract_strided_slice %3 {offsets = [7, 0], sizes = [1, 256], strides = [1, 1]} : vector<12x256xf32> to vector<1x256xf32>
    %12 = vector.extract_strided_slice %3 {offsets = [8, 0], sizes = [1, 256], strides = [1, 1]} : vector<12x256xf32> to vector<1x256xf32>
    %13 = vector.extract_strided_slice %3 {offsets = [9, 0], sizes = [1, 256], strides = [1, 1]} : vector<12x256xf32> to vector<1x256xf32>
    %14 = tpu.concatenate %10, %11, %12, %13 in 1 : vector<1x256xf32>, vector<1x256xf32>, vector<1x256xf32>, vector<1x256xf32> -> vector<1x1024xf32>
    %cst = arith.constant dense<0.000000e+00> : vector<8xf32>
    %15 = vector.multi_reduction <add>, %0, %cst [1] : vector<8x256xf32> to vector<8xf32>
    %16 = vector.shape_cast %15 : vector<8xf32> to vector<8x1xf32>
    %cst_6 = arith.constant 2.560000e+02 : f32
    %17 = vector.broadcast %cst_6 : f32 to vector<8x1xf32>
    %18 = arith.divf %16, %17 : vector<8x1xf32>
    %19 = vector.broadcast %18 : vector<8x1xf32> to vector<8x256xf32>
    %20 = arith.subf %0, %19 : vector<8x256xf32>
    %21 = arith.mulf %20, %20 : vector<8x256xf32>
    %cst_7 = arith.constant dense<0.000000e+00> : vector<8xf32>
    %22 = vector.multi_reduction <add>, %21, %cst_7 [1] : vector<8x256xf32> to vector<8xf32>
    %23 = vector.shape_cast %22 : vector<8xf32> to vector<8x1xf32>
    %cst_8 = arith.constant 2.560000e+02 : f32
    %24 = vector.broadcast %cst_8 : f32 to vector<8x1xf32>
    %25 = arith.divf %23, %24 : vector<8x1xf32>
    %26 = vector.broadcast %18 : vector<8x1xf32> to vector<8x256xf32>
    %27 = arith.subf %0, %26 : vector<8x256xf32>
    %cst_9 = arith.constant 9.99999974E-6 : f32
    %28 = vector.broadcast %cst_9 : f32 to vector<8x1xf32>
    %29 = arith.addf %25, %28 : vector<8x1xf32>
    %30 = math.rsqrt %29 : vector<8x1xf32>
    %31 = vector.broadcast %30 : vector<8x1xf32> to vector<8x256xf32>
    %32 = arith.mulf %27, %31 : vector<8x256xf32>
    %33 = vector.broadcast %4 : vector<1x256xf32> to vector<8x256xf32>
    %34 = arith.mulf %32, %33 : vector<8x256xf32>
    %35 = vector.broadcast %5 : vector<1x256xf32> to vector<8x256xf32>
    %36 = arith.addf %34, %35 : vector<8x256xf32>
    %37 = arith.truncf %36 : vector<8x256xf32> to vector<8x256xbf16>
    %c0_10 = arith.constant 0 : index
    %c0_11 = arith.constant 0 : index
    %c0_12 = arith.constant 0 : index
    %38 = vector.load %arg3[%c0_10, %c0_11, %c0_12] : memref<4x256x768xbf16, #tpu.memory_space<vmem>>, vector<1x256x768xbf16>
    %39 = vector.shape_cast %38 : vector<1x256x768xbf16> to vector<256x768xbf16>
    %cst_13 = arith.constant dense<0.000000e+00> : vector<8x768xf32>
    %40 = tpu.matmul %37, %39, %cst_13 {dimension_numbers = #tpu.dot_dimension_numbers<[1], [0], [0], [1], [0, 0, 1, 1], [], []>} : vector<8x256xbf16>, vector<256x768xbf16>, vector<8x768xf32> -> vector<8x768xf32>
    %41 = vector.extract_strided_slice %40 {offsets = [0, 0], sizes = [8, 64], strides = [1, 1]} : vector<8x768xf32> to vector<8x64xf32>
    %42 = vector.extract_strided_slice %40 {offsets = [0, 64], sizes = [8, 64], strides = [1, 1]} : vector<8x768xf32> to vector<8x64xf32>
    %43 = vector.extract_strided_slice %40 {offsets = [0, 128], sizes = [8, 64], strides = [1, 1]} : vector<8x768xf32> to vector<8x64xf32>
    %44 = vector.extract_strided_slice %40 {offsets = [0, 192], sizes = [8, 64], strides = [1, 1]} : vector<8x768xf32> to vector<8x64xf32>
    %45 = vector.shape_cast %41 : vector<8x64xf32> to vector<1x8x64xf32>
    %46 = vector.shape_cast %42 : vector<8x64xf32> to vector<1x8x64xf32>
    %47 = vector.shape_cast %43 : vector<8x64xf32> to vector<1x8x64xf32>
    %48 = vector.shape_cast %44 : vector<8x64xf32> to vector<1x8x64xf32>
    %49 = tpu.concatenate %45, %46, %47, %48 in 0 : vector<1x8x64xf32>, vector<1x8x64xf32>, vector<1x8x64xf32>, vector<1x8x64xf32> -> vector<4x8x64xf32>
    %50 = vector.extract_strided_slice %40 {offsets = [0, 256], sizes = [8, 64], strides = [1, 1]} : vector<8x768xf32> to vector<8x64xf32>
    %51 = vector.extract_strided_slice %40 {offsets = [0, 320], sizes = [8, 64], strides = [1, 1]} : vector<8x768xf32> to vector<8x64xf32>
    %52 = vector.extract_strided_slice %40 {offsets = [0, 384], sizes = [8, 64], strides = [1, 1]} : vector<8x768xf32> to vector<8x64xf32>
    %53 = vector.extract_strided_slice %40 {offsets = [0, 448], sizes = [8, 64], strides = [1, 1]} : vector<8x768xf32> to vector<8x64xf32>
    %54 = vector.shape_cast %50 : vector<8x64xf32> to vector<1x8x64xf32>
    %55 = vector.shape_cast %51 : vector<8x64xf32> to vector<1x8x64xf32>
    %56 = vector.shape_cast %52 : vector<8x64xf32> to vector<1x8x64xf32>
    %57 = vector.shape_cast %53 : vector<8x64xf32> to vector<1x8x64xf32>
    %58 = tpu.concatenate %54, %55, %56, %57 in 0 : vector<1x8x64xf32>, vector<1x8x64xf32>, vector<1x8x64xf32>, vector<1x8x64xf32> -> vector<4x8x64xf32>
    %59 = vector.extract_strided_slice %40 {offsets = [0, 512], sizes = [8, 64], strides = [1, 1]} : vector<8x768xf32> to vector<8x64xf32>
    %60 = vector.extract_strided_slice %40 {offsets = [0, 576], sizes = [8, 64], strides = [1, 1]} : vector<8x768xf32> to vector<8x64xf32>
    %61 = vector.extract_strided_slice %40 {offsets = [0, 640], sizes = [8, 64], strides = [1, 1]} : vector<8x768xf32> to vector<8x64xf32>
    %62 = vector.extract_strided_slice %40 {offsets = [0, 704], sizes = [8, 64], strides = [1, 1]} : vector<8x768xf32> to vector<8x64xf32>
    %63 = vector.shape_cast %59 : vector<8x64xf32> to vector<1x8x64xf32>
    %64 = vector.shape_cast %60 : vector<8x64xf32> to vector<1x8x64xf32>
    %65 = vector.shape_cast %61 : vector<8x64xf32> to vector<1x8x64xf32>
    %66 = vector.shape_cast %62 : vector<8x64xf32> to vector<1x8x64xf32>
    %67 = tpu.concatenate %63, %64, %65, %66 in 0 : vector<1x8x64xf32>, vector<1x8x64xf32>, vector<1x8x64xf32>, vector<1x8x64xf32> -> vector<4x8x64xf32>
    "tpu.trace_start"() <{level = 10 : i32, message = "hnd,hmd->hnm"}> : () -> ()
    %cst_14 = arith.constant dense<0.000000e+00> : vector<4x8x8xf32>
    %68 = tpu.matmul %49, %58, %cst_14 {dimension_numbers = #tpu.dot_dimension_numbers<[2], [2], [1], [1], [0, 0, 0, 1, 1, 1], [0], [0]>} : vector<4x8x64xf32>, vector<4x8x64xf32>, vector<4x8x8xf32> -> vector<4x8x8xf32>
    "tpu.trace_stop"() : () -> ()
    %cst_15 = arith.constant 6.250000e-02 : f32
    %69 = vector.broadcast %cst_15 : f32 to vector<4x8x8xf32>
    %70 = arith.mulf %68, %69 : vector<4x8x8xf32>
    %71 = vector.shape_cast %1 : vector<8x8xf32> to vector<1x8x8xf32>
    %72 = vector.broadcast %71 : vector<1x8x8xf32> to vector<4x8x8xf32>
    %73 = arith.addf %70, %72 : vector<4x8x8xf32>
    %cst_16 = arith.constant dense<0xFF800000> : vector<4x8xf32>
    %74 = vector.multi_reduction <maximumf>, %73, %cst_16 [2] : vector<4x8x8xf32> to vector<4x8xf32>
    %75 = vector.shape_cast %74 : vector<4x8xf32> to vector<4x8x1xf32>
    %76 = vector.broadcast %75 : vector<4x8x1xf32> to vector<4x8x8xf32>
    %77 = arith.subf %73, %76 : vector<4x8x8xf32>
    %78 = math.exp %77 : vector<4x8x8xf32>
    %cst_17 = arith.constant dense<0.000000e+00> : vector<4x8xf32>
    %79 = vector.multi_reduction <add>, %78, %cst_17 [2] : vector<4x8x8xf32> to vector<4x8xf32>
    %80 = vector.shape_cast %79 : vector<4x8xf32> to vector<4x8x1xf32>
    %81 = tpu.reciprocal %80 {approx = true} : vector<4x8x1xf32> -> vector<4x8x1xf32>
    %82 = vector.broadcast %81 : vector<4x8x1xf32> to vector<4x8x8xf32>
    %83 = arith.mulf %78, %82 : vector<4x8x8xf32>
    "tpu.trace_start"() <{level = 10 : i32, message = "hnm,hmd->hnd"}> : () -> ()
    %cst_18 = arith.constant dense<0.000000e+00> : vector<4x8x64xf32>
    %84 = tpu.matmul %83, %67, %cst_18 {dimension_numbers = #tpu.dot_dimension_numbers<[2], [1], [1], [2], [0, 0, 0, 1, 1, 2], [0], [0]>} : vector<4x8x8xf32>, vector<4x8x64xf32>, vector<4x8x64xf32> -> vector<4x8x64xf32>
    "tpu.trace_stop"() : () -> ()
    %85 = vector.extract_strided_slice %84 {offsets = [0, 0, 0], sizes = [1, 8, 64], strides = [1, 1, 1]} : vector<4x8x64xf32> to vector<1x8x64xf32>
    %86 = vector.shape_cast %85 : vector<1x8x64xf32> to vector<8x64xf32>
    %87 = vector.extract_strided_slice %84 {offsets = [1, 0, 0], sizes = [1, 8, 64], strides = [1, 1, 1]} : vector<4x8x64xf32> to vector<1x8x64xf32>
    %88 = vector.shape_cast %87 : vector<1x8x64xf32> to vector<8x64xf32>
    %89 = vector.extract_strided_slice %84 {offsets = [2, 0, 0], sizes = [1, 8, 64], strides = [1, 1, 1]} : vector<4x8x64xf32> to vector<1x8x64xf32>
    %90 = vector.shape_cast %89 : vector<1x8x64xf32> to vector<8x64xf32>
    %91 = vector.extract_strided_slice %84 {offsets = [3, 0, 0], sizes = [1, 8, 64], strides = [1, 1, 1]} : vector<4x8x64xf32> to vector<1x8x64xf32>
    %92 = vector.shape_cast %91 : vector<1x8x64xf32> to vector<8x64xf32>
    %93 = tpu.concatenate %86, %88, %90, %92 in 1 : vector<8x64xf32>, vector<8x64xf32>, vector<8x64xf32>, vector<8x64xf32> -> vector<8x256xf32>
    %94 = arith.truncf %93 : vector<8x256xf32> to vector<8x256xbf16>
    %c0_19 = arith.constant 0 : index
    %c0_20 = arith.constant 0 : index
    %c0_21 = arith.constant 0 : index
    %95 = vector.load %arg4[%c0_19, %c0_20, %c0_21] : memref<4x256x256xbf16, #tpu.memory_space<vmem>>, vector<1x256x256xbf16>
    %96 = vector.shape_cast %95 : vector<1x256x256xbf16> to vector<256x256xbf16>
    %cst_22 = arith.constant dense<0.000000e+00> : vector<8x256xf32>
    %97 = tpu.matmul %94, %96, %cst_22 {dimension_numbers = #tpu.dot_dimension_numbers<[1], [0], [0], [1], [0, 0, 1, 1], [], []>} : vector<8x256xbf16>, vector<256x256xbf16>, vector<8x256xf32> -> vector<8x256xf32>
    %98 = vector.broadcast %8 : vector<1x256xf32> to vector<8x256xf32>
    %99 = arith.addf %97, %98 : vector<8x256xf32>
    %100 = arith.addf %0, %99 : vector<8x256xf32>
    %cst_23 = arith.constant dense<0.000000e+00> : vector<8xf32>
    %101 = vector.multi_reduction <add>, %100, %cst_23 [1] : vector<8x256xf32> to vector<8xf32>
    %102 = vector.shape_cast %101 : vector<8xf32> to vector<8x1xf32>
    %cst_24 = arith.constant 2.560000e+02 : f32
    %103 = vector.broadcast %cst_24 : f32 to vector<8x1xf32>
    %104 = arith.divf %102, %103 : vector<8x1xf32>
    %105 = vector.broadcast %104 : vector<8x1xf32> to vector<8x256xf32>
    %106 = arith.subf %100, %105 : vector<8x256xf32>
    %107 = arith.mulf %106, %106 : vector<8x256xf32>
    %cst_25 = arith.constant dense<0.000000e+00> : vector<8xf32>
    %108 = vector.multi_reduction <add>, %107, %cst_25 [1] : vector<8x256xf32> to vector<8xf32>
    %109 = vector.shape_cast %108 : vector<8xf32> to vector<8x1xf32>
    %cst_26 = arith.constant 2.560000e+02 : f32
    %110 = vector.broadcast %cst_26 : f32 to vector<8x1xf32>
    %111 = arith.divf %109, %110 : vector<8x1xf32>
    %112 = vector.broadcast %104 : vector<8x1xf32> to vector<8x256xf32>
    %113 = arith.subf %100, %112 : vector<8x256xf32>
    %cst_27 = arith.constant 9.99999974E-6 : f32
    %114 = vector.broadcast %cst_27 : f32 to vector<8x1xf32>
    %115 = arith.addf %111, %114 : vector<8x1xf32>
    %116 = math.rsqrt %115 : vector<8x1xf32>
    %117 = vector.broadcast %116 : vector<8x1xf32> to vector<8x256xf32>
    %118 = arith.mulf %113, %117 : vector<8x256xf32>
    %119 = vector.broadcast %6 : vector<1x256xf32> to vector<8x256xf32>
    %120 = arith.mulf %118, %119 : vector<8x256xf32>
    %121 = vector.broadcast %7 : vector<1x256xf32> to vector<8x256xf32>
    %122 = arith.addf %120, %121 : vector<8x256xf32>
    %123 = arith.truncf %122 : vector<8x256xf32> to vector<8x256xbf16>
    %c0_28 = arith.constant 0 : index
    %c0_29 = arith.constant 0 : index
    %c0_30 = arith.constant 0 : index
    %124 = vector.load %arg5[%c0_28, %c0_29, %c0_30] : memref<4x256x1024xbf16, #tpu.memory_space<vmem>>, vector<1x256x1024xbf16>
    %125 = vector.shape_cast %124 : vector<1x256x1024xbf16> to vector<256x1024xbf16>
    %cst_31 = arith.constant dense<0.000000e+00> : vector<8x1024xf32>
    %126 = tpu.matmul %123, %125, %cst_31 {dimension_numbers = #tpu.dot_dimension_numbers<[1], [0], [0], [1], [0, 0, 1, 1], [], []>} : vector<8x256xbf16>, vector<256x1024xbf16>, vector<8x1024xf32> -> vector<8x1024xf32>
    %127 = vector.broadcast %14 : vector<1x1024xf32> to vector<8x1024xf32>
    %128 = arith.addf %126, %127 : vector<8x1024xf32>
    %cst_32 = arith.constant 0.000000e+00 : f32
    %129 = vector.broadcast %cst_32 : f32 to vector<8x1024xf32>
    %130 = arith.maximumf %128, %129 : vector<8x1024xf32>
    %131 = arith.truncf %130 : vector<8x1024xf32> to vector<8x1024xbf16>
    %c0_33 = arith.constant 0 : index
    %c0_34 = arith.constant 0 : index
    %c0_35 = arith.constant 0 : index
    %132 = vector.load %arg6[%c0_33, %c0_34, %c0_35] : memref<4x1024x256xbf16, #tpu.memory_space<vmem>>, vector<1x1024x256xbf16>
    %133 = vector.shape_cast %132 : vector<1x1024x256xbf16> to vector<1024x256xbf16>
    %cst_36 = arith.constant dense<0.000000e+00> : vector<8x256xf32>
    %134 = tpu.matmul %131, %133, %cst_36 {dimension_numbers = #tpu.dot_dimension_numbers<[1], [0], [0], [1], [0, 0, 1, 1], [], []>} : vector<8x1024xbf16>, vector<1024x256xbf16>, vector<8x256xf32> -> vector<8x256xf32>
    %135 = vector.broadcast %9 : vector<1x256xf32> to vector<8x256xf32>
    %136 = arith.addf %134, %135 : vector<8x256xf32>
    %137 = arith.addf %100, %136 : vector<8x256xf32>
    %c1 = arith.constant 1 : index
    %c0_37 = arith.constant 0 : index
    %c0_38 = arith.constant 0 : index
    %138 = vector.load %arg2[%c1, %c0_37, %c0_38] : memref<5x12x256xf32, #tpu.memory_space<vmem>>, vector<1x12x256xf32>
    %139 = vector.shape_cast %138 : vector<1x12x256xf32> to vector<12x256xf32>
    %140 = vector.extract_strided_slice %139 {offsets = [0, 0], sizes = [1, 256], strides = [1, 1]} : vector<12x256xf32> to vector<1x256xf32>
    %141 = vector.extract_strided_slice %139 {offsets = [1, 0], sizes = [1, 256], strides = [1, 1]} : vector<12x256xf32> to vector<1x256xf32>
    %142 = vector.extract_strided_slice %139 {offsets = [2, 0], sizes = [1, 256], strides = [1, 1]} : vector<12x256xf32> to vector<1x256xf32>
    %143 = vector.extract_strided_slice %139 {offsets = [3, 0], sizes = [1, 256], strides = [1, 1]} : vector<12x256xf32> to vector<1x256xf32>
    %144 = vector.extract_strided_slice %139 {offsets = [4, 0], sizes = [1, 256], strides = [1, 1]} : vector<12x256xf32> to vector<1x256xf32>
    %145 = vector.extract_strided_slice %139 {offsets = [5, 0], sizes = [1, 256], strides = [1, 1]} : vector<12x256xf32> to vector<1x256xf32>
    %146 = vector.extract_strided_slice %139 {offsets = [6, 0], sizes = [1, 256], strides = [1, 1]} : vector<12x256xf32> to vector<1x256xf32>
    %147 = vector.extract_strided_slice %139 {offsets = [7, 0], sizes = [1, 256], strides = [1, 1]} : vector<12x256xf32> to vector<1x256xf32>
    %148 = vector.extract_strided_slice %139 {offsets = [8, 0], sizes = [1, 256], strides = [1, 1]} : vector<12x256xf32> to vector<1x256xf32>
    %149 = vector.extract_strided_slice %139 {offsets = [9, 0], sizes = [1, 256], strides = [1, 1]} : vector<12x256xf32> to vector<1x256xf32>
    %150 = tpu.concatenate %146, %147, %148, %149 in 1 : vector<1x256xf32>, vector<1x256xf32>, vector<1x256xf32>, vector<1x256xf32> -> vector<1x1024xf32>
    %cst_39 = arith.constant dense<0.000000e+00> : vector<8xf32>
    %151 = vector.multi_reduction <add>, %137, %cst_39 [1] : vector<8x256xf32> to vector<8xf32>
    %152 = vector.shape_cast %151 : vector<8xf32> to vector<8x1xf32>
    %cst_40 = arith.constant 2.560000e+02 : f32
    %153 = vector.broadcast %cst_40 : f32 to vector<8x1xf32>
    %154 = arith.divf %152, %153 : vector<8x1xf32>
    %155 = vector.broadcast %154 : vector<8x1xf32> to vector<8x256xf32>
    %156 = arith.subf %137, %155 : vector<8x256xf32>
    %157 = arith.mulf %156, %156 : vector<8x256xf32>
    %cst_41 = arith.constant dense<0.000000e+00> : vector<8xf32>
    %158 = vector.multi_reduction <add>, %157, %cst_41 [1] : vector<8x256xf32> to vector<8xf32>
    %159 = vector.shape_cast %158 : vector<8xf32> to vector<8x1xf32>
    %cst_42 = arith.constant 2.560000e+02 : f32
    %160 = vector.broadcast %cst_42 : f32 to vector<8x1xf32>
    %161 = arith.divf %159, %160 : vector<8x1xf32>
    %162 = vector.broadcast %154 : vector<8x1xf32> to vector<8x256xf32>
    %163 = arith.subf %137, %162 : vector<8x256xf32>
    %cst_43 = arith.constant 9.99999974E-6 : f32
    %164 = vector.broadcast %cst_43 : f32 to vector<8x1xf32>
    %165 = arith.addf %161, %164 : vector<8x1xf32>
    %166 = math.rsqrt %165 : vector<8x1xf32>
    %167 = vector.broadcast %166 : vector<8x1xf32> to vector<8x256xf32>
    %168 = arith.mulf %163, %167 : vector<8x256xf32>
    %169 = vector.broadcast %140 : vector<1x256xf32> to vector<8x256xf32>
    %170 = arith.mulf %168, %169 : vector<8x256xf32>
    %171 = vector.broadcast %141 : vector<1x256xf32> to vector<8x256xf32>
    %172 = arith.addf %170, %171 : vector<8x256xf32>
    %173 = arith.truncf %172 : vector<8x256xf32> to vector<8x256xbf16>
    %c1_44 = arith.constant 1 : index
    %c0_45 = arith.constant 0 : index
    %c0_46 = arith.constant 0 : index
    %174 = vector.load %arg3[%c1_44, %c0_45, %c0_46] : memref<4x256x768xbf16, #tpu.memory_space<vmem>>, vector<1x256x768xbf16>
    %175 = vector.shape_cast %174 : vector<1x256x768xbf16> to vector<256x768xbf16>
    %cst_47 = arith.constant dense<0.000000e+00> : vector<8x768xf32>
    %176 = tpu.matmul %173, %175, %cst_47 {dimension_numbers = #tpu.dot_dimension_numbers<[1], [0], [0], [1], [0, 0, 1, 1], [], []>} : vector<8x256xbf16>, vector<256x768xbf16>, vector<8x768xf32> -> vector<8x768xf32>
    %177 = vector.extract_strided_slice %176 {offsets = [0, 0], sizes = [8, 64], strides = [1, 1]} : vector<8x768xf32> to vector<8x64xf32>
    %178 = vector.extract_strided_slice %176 {offsets = [0, 64], sizes = [8, 64], strides = [1, 1]} : vector<8x768xf32> to vector<8x64xf32>
    %179 = vector.extract_strided_slice %176 {offsets = [0, 128], sizes = [8, 64], strides = [1, 1]} : vector<8x768xf32> to vector<8x64xf32>
    %180 = vector.extract_strided_slice %176 {offsets = [0, 192], sizes = [8, 64], strides = [1, 1]} : vector<8x768xf32> to vector<8x64xf32>
    %181 = vector.shape_cast %177 : vector<8x64xf32> to vector<1x8x64xf32>
    %182 = vector.shape_cast %178 : vector<8x64xf32> to vector<1x8x64xf32>
    %183 = vector.shape_cast %179 : vector<8x64xf32> to vector<1x8x64xf32>
    %184 = vector.shape_cast %180 : vector<8x64xf32> to vector<1x8x64xf32>
    %185 = tpu.concatenate %181, %182, %183, %184 in 0 : vector<1x8x64xf32>, vector<1x8x64xf32>, vector<1x8x64xf32>, vector<1x8x64xf32> -> vector<4x8x64xf32>
    %186 = vector.extract_strided_slice %176 {offsets = [0, 256], sizes = [8, 64], strides = [1, 1]} : vector<8x768xf32> to vector<8x64xf32>
    %187 = vector.extract_strided_slice %176 {offsets = [0, 320], sizes = [8, 64], strides = [1, 1]} : vector<8x768xf32> to vector<8x64xf32>
    %188 = vector.extract_strided_slice %176 {offsets = [0, 384], sizes = [8, 64], strides = [1, 1]} : vector<8x768xf32> to vector<8x64xf32>
    %189 = vector.extract_strided_slice %176 {offsets = [0, 448], sizes = [8, 64], strides = [1, 1]} : vector<8x768xf32> to vector<8x64xf32>
    %190 = vector.shape_cast %186 : vector<8x64xf32> to vector<1x8x64xf32>
    %191 = vector.shape_cast %187 : vector<8x64xf32> to vector<1x8x64xf32>
    %192 = vector.shape_cast %188 : vector<8x64xf32> to vector<1x8x64xf32>
    %193 = vector.shape_cast %189 : vector<8x64xf32> to vector<1x8x64xf32>
    %194 = tpu.concatenate %190, %191, %192, %193 in 0 : vector<1x8x64xf32>, vector<1x8x64xf32>, vector<1x8x64xf32>, vector<1x8x64xf32> -> vector<4x8x64xf32>
    %195 = vector.extract_strided_slice %176 {offsets = [0, 512], sizes = [8, 64], strides = [1, 1]} : vector<8x768xf32> to vector<8x64xf32>
    %196 = vector.extract_strided_slice %176 {offsets = [0, 576], sizes = [8, 64], strides = [1, 1]} : vector<8x768xf32> to vector<8x64xf32>
    %197 = vector.extract_strided_slice %176 {offsets = [0, 640], sizes = [8, 64], strides = [1, 1]} : vector<8x768xf32> to vector<8x64xf32>
    %198 = vector.extract_strided_slice %176 {offsets = [0, 704], sizes = [8, 64], strides = [1, 1]} : vector<8x768xf32> to vector<8x64xf32>
    %199 = vector.shape_cast %195 : vector<8x64xf32> to vector<1x8x64xf32>
    %200 = vector.shape_cast %196 : vector<8x64xf32> to vector<1x8x64xf32>
    %201 = vector.shape_cast %197 : vector<8x64xf32> to vector<1x8x64xf32>
    %202 = vector.shape_cast %198 : vector<8x64xf32> to vector<1x8x64xf32>
    %203 = tpu.concatenate %199, %200, %201, %202 in 0 : vector<1x8x64xf32>, vector<1x8x64xf32>, vector<1x8x64xf32>, vector<1x8x64xf32> -> vector<4x8x64xf32>
    "tpu.trace_start"() <{level = 10 : i32, message = "hnd,hmd->hnm"}> : () -> ()
    %cst_48 = arith.constant dense<0.000000e+00> : vector<4x8x8xf32>
    %204 = tpu.matmul %185, %194, %cst_48 {dimension_numbers = #tpu.dot_dimension_numbers<[2], [2], [1], [1], [0, 0, 0, 1, 1, 1], [0], [0]>} : vector<4x8x64xf32>, vector<4x8x64xf32>, vector<4x8x8xf32> -> vector<4x8x8xf32>
    "tpu.trace_stop"() : () -> ()
    %cst_49 = arith.constant 6.250000e-02 : f32
    %205 = vector.broadcast %cst_49 : f32 to vector<4x8x8xf32>
    %206 = arith.mulf %204, %205 : vector<4x8x8xf32>
    %207 = vector.shape_cast %1 : vector<8x8xf32> to vector<1x8x8xf32>
    %208 = vector.broadcast %207 : vector<1x8x8xf32> to vector<4x8x8xf32>
    %209 = arith.addf %206, %208 : vector<4x8x8xf32>
    %cst_50 = arith.constant dense<0xFF800000> : vector<4x8xf32>
    %210 = vector.multi_reduction <maximumf>, %209, %cst_50 [2] : vector<4x8x8xf32> to vector<4x8xf32>
    %211 = vector.shape_cast %210 : vector<4x8xf32> to vector<4x8x1xf32>
    %212 = vector.broadcast %211 : vector<4x8x1xf32> to vector<4x8x8xf32>
    %213 = arith.subf %209, %212 : vector<4x8x8xf32>
    %214 = math.exp %213 : vector<4x8x8xf32>
    %cst_51 = arith.constant dense<0.000000e+00> : vector<4x8xf32>
    %215 = vector.multi_reduction <add>, %214, %cst_51 [2] : vector<4x8x8xf32> to vector<4x8xf32>
    %216 = vector.shape_cast %215 : vector<4x8xf32> to vector<4x8x1xf32>
    %217 = tpu.reciprocal %216 {approx = true} : vector<4x8x1xf32> -> vector<4x8x1xf32>
    %218 = vector.broadcast %217 : vector<4x8x1xf32> to vector<4x8x8xf32>
    %219 = arith.mulf %214, %218 : vector<4x8x8xf32>
    "tpu.trace_start"() <{level = 10 : i32, message = "hnm,hmd->hnd"}> : () -> ()
    %cst_52 = arith.constant dense<0.000000e+00> : vector<4x8x64xf32>
    %220 = tpu.matmul %219, %203, %cst_52 {dimension_numbers = #tpu.dot_dimension_numbers<[2], [1], [1], [2], [0, 0, 0, 1, 1, 2], [0], [0]>} : vector<4x8x8xf32>, vector<4x8x64xf32>, vector<4x8x64xf32> -> vector<4x8x64xf32>
    "tpu.trace_stop"() : () -> ()
    %221 = vector.extract_strided_slice %220 {offsets = [0, 0, 0], sizes = [1, 8, 64], strides = [1, 1, 1]} : vector<4x8x64xf32> to vector<1x8x64xf32>
    %222 = vector.shape_cast %221 : vector<1x8x64xf32> to vector<8x64xf32>
    %223 = vector.extract_strided_slice %220 {offsets = [1, 0, 0], sizes = [1, 8, 64], strides = [1, 1, 1]} : vector<4x8x64xf32> to vector<1x8x64xf32>
    %224 = vector.shape_cast %223 : vector<1x8x64xf32> to vector<8x64xf32>
    %225 = vector.extract_strided_slice %220 {offsets = [2, 0, 0], sizes = [1, 8, 64], strides = [1, 1, 1]} : vector<4x8x64xf32> to vector<1x8x64xf32>
    %226 = vector.shape_cast %225 : vector<1x8x64xf32> to vector<8x64xf32>
    %227 = vector.extract_strided_slice %220 {offsets = [3, 0, 0], sizes = [1, 8, 64], strides = [1, 1, 1]} : vector<4x8x64xf32> to vector<1x8x64xf32>
    %228 = vector.shape_cast %227 : vector<1x8x64xf32> to vector<8x64xf32>
    %229 = tpu.concatenate %222, %224, %226, %228 in 1 : vector<8x64xf32>, vector<8x64xf32>, vector<8x64xf32>, vector<8x64xf32> -> vector<8x256xf32>
    %230 = arith.truncf %229 : vector<8x256xf32> to vector<8x256xbf16>
    %c1_53 = arith.constant 1 : index
    %c0_54 = arith.constant 0 : index
    %c0_55 = arith.constant 0 : index
    %231 = vector.load %arg4[%c1_53, %c0_54, %c0_55] : memref<4x256x256xbf16, #tpu.memory_space<vmem>>, vector<1x256x256xbf16>
    %232 = vector.shape_cast %231 : vector<1x256x256xbf16> to vector<256x256xbf16>
    %cst_56 = arith.constant dense<0.000000e+00> : vector<8x256xf32>
    %233 = tpu.matmul %230, %232, %cst_56 {dimension_numbers = #tpu.dot_dimension_numbers<[1], [0], [0], [1], [0, 0, 1, 1], [], []>} : vector<8x256xbf16>, vector<256x256xbf16>, vector<8x256xf32> -> vector<8x256xf32>
    %234 = vector.broadcast %144 : vector<1x256xf32> to vector<8x256xf32>
    %235 = arith.addf %233, %234 : vector<8x256xf32>
    %236 = arith.addf %137, %235 : vector<8x256xf32>
    %cst_57 = arith.constant dense<0.000000e+00> : vector<8xf32>
    %237 = vector.multi_reduction <add>, %236, %cst_57 [1] : vector<8x256xf32> to vector<8xf32>
    %238 = vector.shape_cast %237 : vector<8xf32> to vector<8x1xf32>
    %cst_58 = arith.constant 2.560000e+02 : f32
    %239 = vector.broadcast %cst_58 : f32 to vector<8x1xf32>
    %240 = arith.divf %238, %239 : vector<8x1xf32>
    %241 = vector.broadcast %240 : vector<8x1xf32> to vector<8x256xf32>
    %242 = arith.subf %236, %241 : vector<8x256xf32>
    %243 = arith.mulf %242, %242 : vector<8x256xf32>
    %cst_59 = arith.constant dense<0.000000e+00> : vector<8xf32>
    %244 = vector.multi_reduction <add>, %243, %cst_59 [1] : vector<8x256xf32> to vector<8xf32>
    %245 = vector.shape_cast %244 : vector<8xf32> to vector<8x1xf32>
    %cst_60 = arith.constant 2.560000e+02 : f32
    %246 = vector.broadcast %cst_60 : f32 to vector<8x1xf32>
    %247 = arith.divf %245, %246 : vector<8x1xf32>
    %248 = vector.broadcast %240 : vector<8x1xf32> to vector<8x256xf32>
    %249 = arith.subf %236, %248 : vector<8x256xf32>
    %cst_61 = arith.constant 9.99999974E-6 : f32
    %250 = vector.broadcast %cst_61 : f32 to vector<8x1xf32>
    %251 = arith.addf %247, %250 : vector<8x1xf32>
    %252 = math.rsqrt %251 : vector<8x1xf32>
    %253 = vector.broadcast %252 : vector<8x1xf32> to vector<8x256xf32>
    %254 = arith.mulf %249, %253 : vector<8x256xf32>
    %255 = vector.broadcast %142 : vector<1x256xf32> to vector<8x256xf32>
    %256 = arith.mulf %254, %255 : vector<8x256xf32>
    %257 = vector.broadcast %143 : vector<1x256xf32> to vector<8x256xf32>
    %258 = arith.addf %256, %257 : vector<8x256xf32>
    %259 = arith.truncf %258 : vector<8x256xf32> to vector<8x256xbf16>
    %c1_62 = arith.constant 1 : index
    %c0_63 = arith.constant 0 : index
    %c0_64 = arith.constant 0 : index
    %260 = vector.load %arg5[%c1_62, %c0_63, %c0_64] : memref<4x256x1024xbf16, #tpu.memory_space<vmem>>, vector<1x256x1024xbf16>
    %261 = vector.shape_cast %260 : vector<1x256x1024xbf16> to vector<256x1024xbf16>
    %cst_65 = arith.constant dense<0.000000e+00> : vector<8x1024xf32>
    %262 = tpu.matmul %259, %261, %cst_65 {dimension_numbers = #tpu.dot_dimension_numbers<[1], [0], [0], [1], [0, 0, 1, 1], [], []>} : vector<8x256xbf16>, vector<256x1024xbf16>, vector<8x1024xf32> -> vector<8x1024xf32>
    %263 = vector.broadcast %150 : vector<1x1024xf32> to vector<8x1024xf32>
    %264 = arith.addf %262, %263 : vector<8x1024xf32>
    %cst_66 = arith.constant 0.000000e+00 : f32
    %265 = vector.broadcast %cst_66 : f32 to vector<8x1024xf32>
    %266 = arith.maximumf %264, %265 : vector<8x1024xf32>
    %267 = arith.truncf %266 : vector<8x1024xf32> to vector<8x1024xbf16>
    %c1_67 = arith.constant 1 : index
    %c0_68 = arith.constant 0 : index
    %c0_69 = arith.constant 0 : index
    %268 = vector.load %arg6[%c1_67, %c0_68, %c0_69] : memref<4x1024x256xbf16, #tpu.memory_space<vmem>>, vector<1x1024x256xbf16>
    %269 = vector.shape_cast %268 : vector<1x1024x256xbf16> to vector<1024x256xbf16>
    %cst_70 = arith.constant dense<0.000000e+00> : vector<8x256xf32>
    %270 = tpu.matmul %267, %269, %cst_70 {dimension_numbers = #tpu.dot_dimension_numbers<[1], [0], [0], [1], [0, 0, 1, 1], [], []>} : vector<8x1024xbf16>, vector<1024x256xbf16>, vector<8x256xf32> -> vector<8x256xf32>
    %271 = vector.broadcast %145 : vector<1x256xf32> to vector<8x256xf32>
    %272 = arith.addf %270, %271 : vector<8x256xf32>
    %273 = arith.addf %236, %272 : vector<8x256xf32>
    %c2 = arith.constant 2 : index
    %c0_71 = arith.constant 0 : index
    %c0_72 = arith.constant 0 : index
    %274 = vector.load %arg2[%c2, %c0_71, %c0_72] : memref<5x12x256xf32, #tpu.memory_space<vmem>>, vector<1x12x256xf32>
    %275 = vector.shape_cast %274 : vector<1x12x256xf32> to vector<12x256xf32>
    %276 = vector.extract_strided_slice %275 {offsets = [0, 0], sizes = [1, 256], strides = [1, 1]} : vector<12x256xf32> to vector<1x256xf32>
    %277 = vector.extract_strided_slice %275 {offsets = [1, 0], sizes = [1, 256], strides = [1, 1]} : vector<12x256xf32> to vector<1x256xf32>
    %278 = vector.extract_strided_slice %275 {offsets = [2, 0], sizes = [1, 256], strides = [1, 1]} : vector<12x256xf32> to vector<1x256xf32>
    %279 = vector.extract_strided_slice %275 {offsets = [3, 0], sizes = [1, 256], strides = [1, 1]} : vector<12x256xf32> to vector<1x256xf32>
    %280 = vector.extract_strided_slice %275 {offsets = [4, 0], sizes = [1, 256], strides = [1, 1]} : vector<12x256xf32> to vector<1x256xf32>
    %281 = vector.extract_strided_slice %275 {offsets = [5, 0], sizes = [1, 256], strides = [1, 1]} : vector<12x256xf32> to vector<1x256xf32>
    %282 = vector.extract_strided_slice %275 {offsets = [6, 0], sizes = [1, 256], strides = [1, 1]} : vector<12x256xf32> to vector<1x256xf32>
    %283 = vector.extract_strided_slice %275 {offsets = [7, 0], sizes = [1, 256], strides = [1, 1]} : vector<12x256xf32> to vector<1x256xf32>
    %284 = vector.extract_strided_slice %275 {offsets = [8, 0], sizes = [1, 256], strides = [1, 1]} : vector<12x256xf32> to vector<1x256xf32>
    %285 = vector.extract_strided_slice %275 {offsets = [9, 0], sizes = [1, 256], strides = [1, 1]} : vector<12x256xf32> to vector<1x256xf32>
    %286 = tpu.concatenate %282, %283, %284, %285 in 1 : vector<1x256xf32>, vector<1x256xf32>, vector<1x256xf32>, vector<1x256xf32> -> vector<1x1024xf32>
    %cst_73 = arith.constant dense<0.000000e+00> : vector<8xf32>
    %287 = vector.multi_reduction <add>, %273, %cst_73 [1] : vector<8x256xf32> to vector<8xf32>
    %288 = vector.shape_cast %287 : vector<8xf32> to vector<8x1xf32>
    %cst_74 = arith.constant 2.560000e+02 : f32
    %289 = vector.broadcast %cst_74 : f32 to vector<8x1xf32>
    %290 = arith.divf %288, %289 : vector<8x1xf32>
    %291 = vector.broadcast %290 : vector<8x1xf32> to vector<8x256xf32>
    %292 = arith.subf %273, %291 : vector<8x256xf32>
    %293 = arith.mulf %292, %292 : vector<8x256xf32>
    %cst_75 = arith.constant dense<0.000000e+00> : vector<8xf32>
    %294 = vector.multi_reduction <add>, %293, %cst_75 [1] : vector<8x256xf32> to vector<8xf32>
    %295 = vector.shape_cast %294 : vector<8xf32> to vector<8x1xf32>
    %cst_76 = arith.constant 2.560000e+02 : f32
    %296 = vector.broadcast %cst_76 : f32 to vector<8x1xf32>
    %297 = arith.divf %295, %296 : vector<8x1xf32>
    %298 = vector.broadcast %290 : vector<8x1xf32> to vector<8x256xf32>
    %299 = arith.subf %273, %298 : vector<8x256xf32>
    %cst_77 = arith.constant 9.99999974E-6 : f32
    %300 = vector.broadcast %cst_77 : f32 to vector<8x1xf32>
    %301 = arith.addf %297, %300 : vector<8x1xf32>
    %302 = math.rsqrt %301 : vector<8x1xf32>
    %303 = vector.broadcast %302 : vector<8x1xf32> to vector<8x256xf32>
    %304 = arith.mulf %299, %303 : vector<8x256xf32>
    %305 = vector.broadcast %276 : vector<1x256xf32> to vector<8x256xf32>
    %306 = arith.mulf %304, %305 : vector<8x256xf32>
    %307 = vector.broadcast %277 : vector<1x256xf32> to vector<8x256xf32>
    %308 = arith.addf %306, %307 : vector<8x256xf32>
    %309 = arith.truncf %308 : vector<8x256xf32> to vector<8x256xbf16>
    %c2_78 = arith.constant 2 : index
    %c0_79 = arith.constant 0 : index
    %c0_80 = arith.constant 0 : index
    %310 = vector.load %arg3[%c2_78, %c0_79, %c0_80] : memref<4x256x768xbf16, #tpu.memory_space<vmem>>, vector<1x256x768xbf16>
    %311 = vector.shape_cast %310 : vector<1x256x768xbf16> to vector<256x768xbf16>
    %cst_81 = arith.constant dense<0.000000e+00> : vector<8x768xf32>
    %312 = tpu.matmul %309, %311, %cst_81 {dimension_numbers = #tpu.dot_dimension_numbers<[1], [0], [0], [1], [0, 0, 1, 1], [], []>} : vector<8x256xbf16>, vector<256x768xbf16>, vector<8x768xf32> -> vector<8x768xf32>
    %313 = vector.extract_strided_slice %312 {offsets = [0, 0], sizes = [8, 64], strides = [1, 1]} : vector<8x768xf32> to vector<8x64xf32>
    %314 = vector.extract_strided_slice %312 {offsets = [0, 64], sizes = [8, 64], strides = [1, 1]} : vector<8x768xf32> to vector<8x64xf32>
    %315 = vector.extract_strided_slice %312 {offsets = [0, 128], sizes = [8, 64], strides = [1, 1]} : vector<8x768xf32> to vector<8x64xf32>
    %316 = vector.extract_strided_slice %312 {offsets = [0, 192], sizes = [8, 64], strides = [1, 1]} : vector<8x768xf32> to vector<8x64xf32>
    %317 = vector.shape_cast %313 : vector<8x64xf32> to vector<1x8x64xf32>
    %318 = vector.shape_cast %314 : vector<8x64xf32> to vector<1x8x64xf32>
    %319 = vector.shape_cast %315 : vector<8x64xf32> to vector<1x8x64xf32>
    %320 = vector.shape_cast %316 : vector<8x64xf32> to vector<1x8x64xf32>
    %321 = tpu.concatenate %317, %318, %319, %320 in 0 : vector<1x8x64xf32>, vector<1x8x64xf32>, vector<1x8x64xf32>, vector<1x8x64xf32> -> vector<4x8x64xf32>
    %322 = vector.extract_strided_slice %312 {offsets = [0, 256], sizes = [8, 64], strides = [1, 1]} : vector<8x768xf32> to vector<8x64xf32>
    %323 = vector.extract_strided_slice %312 {offsets = [0, 320], sizes = [8, 64], strides = [1, 1]} : vector<8x768xf32> to vector<8x64xf32>
    %324 = vector.extract_strided_slice %312 {offsets = [0, 384], sizes = [8, 64], strides = [1, 1]} : vector<8x768xf32> to vector<8x64xf32>
    %325 = vector.extract_strided_slice %312 {offsets = [0, 448], sizes = [8, 64], strides = [1, 1]} : vector<8x768xf32> to vector<8x64xf32>
    %326 = vector.shape_cast %322 : vector<8x64xf32> to vector<1x8x64xf32>
    %327 = vector.shape_cast %323 : vector<8x64xf32> to vector<1x8x64xf32>
    %328 = vector.shape_cast %324 : vector<8x64xf32> to vector<1x8x64xf32>
    %329 = vector.shape_cast %325 : vector<8x64xf32> to vector<1x8x64xf32>
    %330 = tpu.concatenate %326, %327, %328, %329 in 0 : vector<1x8x64xf32>, vector<1x8x64xf32>, vector<1x8x64xf32>, vector<1x8x64xf32> -> vector<4x8x64xf32>
    %331 = vector.extract_strided_slice %312 {offsets = [0, 512], sizes = [8, 64], strides = [1, 1]} : vector<8x768xf32> to vector<8x64xf32>
    %332 = vector.extract_strided_slice %312 {offsets = [0, 576], sizes = [8, 64], strides = [1, 1]} : vector<8x768xf32> to vector<8x64xf32>
    %333 = vector.extract_strided_slice %312 {offsets = [0, 640], sizes = [8, 64], strides = [1, 1]} : vector<8x768xf32> to vector<8x64xf32>
    %334 = vector.extract_strided_slice %312 {offsets = [0, 704], sizes = [8, 64], strides = [1, 1]} : vector<8x768xf32> to vector<8x64xf32>
    %335 = vector.shape_cast %331 : vector<8x64xf32> to vector<1x8x64xf32>
    %336 = vector.shape_cast %332 : vector<8x64xf32> to vector<1x8x64xf32>
    %337 = vector.shape_cast %333 : vector<8x64xf32> to vector<1x8x64xf32>
    %338 = vector.shape_cast %334 : vector<8x64xf32> to vector<1x8x64xf32>
    %339 = tpu.concatenate %335, %336, %337, %338 in 0 : vector<1x8x64xf32>, vector<1x8x64xf32>, vector<1x8x64xf32>, vector<1x8x64xf32> -> vector<4x8x64xf32>
    "tpu.trace_start"() <{level = 10 : i32, message = "hnd,hmd->hnm"}> : () -> ()
    %cst_82 = arith.constant dense<0.000000e+00> : vector<4x8x8xf32>
    %340 = tpu.matmul %321, %330, %cst_82 {dimension_numbers = #tpu.dot_dimension_numbers<[2], [2], [1], [1], [0, 0, 0, 1, 1, 1], [0], [0]>} : vector<4x8x64xf32>, vector<4x8x64xf32>, vector<4x8x8xf32> -> vector<4x8x8xf32>
    "tpu.trace_stop"() : () -> ()
    %cst_83 = arith.constant 6.250000e-02 : f32
    %341 = vector.broadcast %cst_83 : f32 to vector<4x8x8xf32>
    %342 = arith.mulf %340, %341 : vector<4x8x8xf32>
    %343 = vector.shape_cast %1 : vector<8x8xf32> to vector<1x8x8xf32>
    %344 = vector.broadcast %343 : vector<1x8x8xf32> to vector<4x8x8xf32>
    %345 = arith.addf %342, %344 : vector<4x8x8xf32>
    %cst_84 = arith.constant dense<0xFF800000> : vector<4x8xf32>
    %346 = vector.multi_reduction <maximumf>, %345, %cst_84 [2] : vector<4x8x8xf32> to vector<4x8xf32>
    %347 = vector.shape_cast %346 : vector<4x8xf32> to vector<4x8x1xf32>
    %348 = vector.broadcast %347 : vector<4x8x1xf32> to vector<4x8x8xf32>
    %349 = arith.subf %345, %348 : vector<4x8x8xf32>
    %350 = math.exp %349 : vector<4x8x8xf32>
    %cst_85 = arith.constant dense<0.000000e+00> : vector<4x8xf32>
    %351 = vector.multi_reduction <add>, %350, %cst_85 [2] : vector<4x8x8xf32> to vector<4x8xf32>
    %352 = vector.shape_cast %351 : vector<4x8xf32> to vector<4x8x1xf32>
    %353 = tpu.reciprocal %352 {approx = true} : vector<4x8x1xf32> -> vector<4x8x1xf32>
    %354 = vector.broadcast %353 : vector<4x8x1xf32> to vector<4x8x8xf32>
    %355 = arith.mulf %350, %354 : vector<4x8x8xf32>
    "tpu.trace_start"() <{level = 10 : i32, message = "hnm,hmd->hnd"}> : () -> ()
    %cst_86 = arith.constant dense<0.000000e+00> : vector<4x8x64xf32>
    %356 = tpu.matmul %355, %339, %cst_86 {dimension_numbers = #tpu.dot_dimension_numbers<[2], [1], [1], [2], [0, 0, 0, 1, 1, 2], [0], [0]>} : vector<4x8x8xf32>, vector<4x8x64xf32>, vector<4x8x64xf32> -> vector<4x8x64xf32>
    "tpu.trace_stop"() : () -> ()
    %357 = vector.extract_strided_slice %356 {offsets = [0, 0, 0], sizes = [1, 8, 64], strides = [1, 1, 1]} : vector<4x8x64xf32> to vector<1x8x64xf32>
    %358 = vector.shape_cast %357 : vector<1x8x64xf32> to vector<8x64xf32>
    %359 = vector.extract_strided_slice %356 {offsets = [1, 0, 0], sizes = [1, 8, 64], strides = [1, 1, 1]} : vector<4x8x64xf32> to vector<1x8x64xf32>
    %360 = vector.shape_cast %359 : vector<1x8x64xf32> to vector<8x64xf32>
    %361 = vector.extract_strided_slice %356 {offsets = [2, 0, 0], sizes = [1, 8, 64], strides = [1, 1, 1]} : vector<4x8x64xf32> to vector<1x8x64xf32>
    %362 = vector.shape_cast %361 : vector<1x8x64xf32> to vector<8x64xf32>
    %363 = vector.extract_strided_slice %356 {offsets = [3, 0, 0], sizes = [1, 8, 64], strides = [1, 1, 1]} : vector<4x8x64xf32> to vector<1x8x64xf32>
    %364 = vector.shape_cast %363 : vector<1x8x64xf32> to vector<8x64xf32>
    %365 = tpu.concatenate %358, %360, %362, %364 in 1 : vector<8x64xf32>, vector<8x64xf32>, vector<8x64xf32>, vector<8x64xf32> -> vector<8x256xf32>
    %366 = arith.truncf %365 : vector<8x256xf32> to vector<8x256xbf16>
    %c2_87 = arith.constant 2 : index
    %c0_88 = arith.constant 0 : index
    %c0_89 = arith.constant 0 : index
    %367 = vector.load %arg4[%c2_87, %c0_88, %c0_89] : memref<4x256x256xbf16, #tpu.memory_space<vmem>>, vector<1x256x256xbf16>
    %368 = vector.shape_cast %367 : vector<1x256x256xbf16> to vector<256x256xbf16>
    %cst_90 = arith.constant dense<0.000000e+00> : vector<8x256xf32>
    %369 = tpu.matmul %366, %368, %cst_90 {dimension_numbers = #tpu.dot_dimension_numbers<[1], [0], [0], [1], [0, 0, 1, 1], [], []>} : vector<8x256xbf16>, vector<256x256xbf16>, vector<8x256xf32> -> vector<8x256xf32>
    %370 = vector.broadcast %280 : vector<1x256xf32> to vector<8x256xf32>
    %371 = arith.addf %369, %370 : vector<8x256xf32>
    %372 = arith.addf %273, %371 : vector<8x256xf32>
    %cst_91 = arith.constant dense<0.000000e+00> : vector<8xf32>
    %373 = vector.multi_reduction <add>, %372, %cst_91 [1] : vector<8x256xf32> to vector<8xf32>
    %374 = vector.shape_cast %373 : vector<8xf32> to vector<8x1xf32>
    %cst_92 = arith.constant 2.560000e+02 : f32
    %375 = vector.broadcast %cst_92 : f32 to vector<8x1xf32>
    %376 = arith.divf %374, %375 : vector<8x1xf32>
    %377 = vector.broadcast %376 : vector<8x1xf32> to vector<8x256xf32>
    %378 = arith.subf %372, %377 : vector<8x256xf32>
    %379 = arith.mulf %378, %378 : vector<8x256xf32>
    %cst_93 = arith.constant dense<0.000000e+00> : vector<8xf32>
    %380 = vector.multi_reduction <add>, %379, %cst_93 [1] : vector<8x256xf32> to vector<8xf32>
    %381 = vector.shape_cast %380 : vector<8xf32> to vector<8x1xf32>
    %cst_94 = arith.constant 2.560000e+02 : f32
    %382 = vector.broadcast %cst_94 : f32 to vector<8x1xf32>
    %383 = arith.divf %381, %382 : vector<8x1xf32>
    %384 = vector.broadcast %376 : vector<8x1xf32> to vector<8x256xf32>
    %385 = arith.subf %372, %384 : vector<8x256xf32>
    %cst_95 = arith.constant 9.99999974E-6 : f32
    %386 = vector.broadcast %cst_95 : f32 to vector<8x1xf32>
    %387 = arith.addf %383, %386 : vector<8x1xf32>
    %388 = math.rsqrt %387 : vector<8x1xf32>
    %389 = vector.broadcast %388 : vector<8x1xf32> to vector<8x256xf32>
    %390 = arith.mulf %385, %389 : vector<8x256xf32>
    %391 = vector.broadcast %278 : vector<1x256xf32> to vector<8x256xf32>
    %392 = arith.mulf %390, %391 : vector<8x256xf32>
    %393 = vector.broadcast %279 : vector<1x256xf32> to vector<8x256xf32>
    %394 = arith.addf %392, %393 : vector<8x256xf32>
    %395 = arith.truncf %394 : vector<8x256xf32> to vector<8x256xbf16>
    %c2_96 = arith.constant 2 : index
    %c0_97 = arith.constant 0 : index
    %c0_98 = arith.constant 0 : index
    %396 = vector.load %arg5[%c2_96, %c0_97, %c0_98] : memref<4x256x1024xbf16, #tpu.memory_space<vmem>>, vector<1x256x1024xbf16>
    %397 = vector.shape_cast %396 : vector<1x256x1024xbf16> to vector<256x1024xbf16>
    %cst_99 = arith.constant dense<0.000000e+00> : vector<8x1024xf32>
    %398 = tpu.matmul %395, %397, %cst_99 {dimension_numbers = #tpu.dot_dimension_numbers<[1], [0], [0], [1], [0, 0, 1, 1], [], []>} : vector<8x256xbf16>, vector<256x1024xbf16>, vector<8x1024xf32> -> vector<8x1024xf32>
    %399 = vector.broadcast %286 : vector<1x1024xf32> to vector<8x1024xf32>
    %400 = arith.addf %398, %399 : vector<8x1024xf32>
    %cst_100 = arith.constant 0.000000e+00 : f32
    %401 = vector.broadcast %cst_100 : f32 to vector<8x1024xf32>
    %402 = arith.maximumf %400, %401 : vector<8x1024xf32>
    %403 = arith.truncf %402 : vector<8x1024xf32> to vector<8x1024xbf16>
    %c2_101 = arith.constant 2 : index
    %c0_102 = arith.constant 0 : index
    %c0_103 = arith.constant 0 : index
    %404 = vector.load %arg6[%c2_101, %c0_102, %c0_103] : memref<4x1024x256xbf16, #tpu.memory_space<vmem>>, vector<1x1024x256xbf16>
    %405 = vector.shape_cast %404 : vector<1x1024x256xbf16> to vector<1024x256xbf16>
    %cst_104 = arith.constant dense<0.000000e+00> : vector<8x256xf32>
    %406 = tpu.matmul %403, %405, %cst_104 {dimension_numbers = #tpu.dot_dimension_numbers<[1], [0], [0], [1], [0, 0, 1, 1], [], []>} : vector<8x1024xbf16>, vector<1024x256xbf16>, vector<8x256xf32> -> vector<8x256xf32>
    %407 = vector.broadcast %281 : vector<1x256xf32> to vector<8x256xf32>
    %408 = arith.addf %406, %407 : vector<8x256xf32>
    %409 = arith.addf %372, %408 : vector<8x256xf32>
    %c3 = arith.constant 3 : index
    %c0_105 = arith.constant 0 : index
    %c0_106 = arith.constant 0 : index
    %410 = vector.load %arg2[%c3, %c0_105, %c0_106] : memref<5x12x256xf32, #tpu.memory_space<vmem>>, vector<1x12x256xf32>
    %411 = vector.shape_cast %410 : vector<1x12x256xf32> to vector<12x256xf32>
    %412 = vector.extract_strided_slice %411 {offsets = [0, 0], sizes = [1, 256], strides = [1, 1]} : vector<12x256xf32> to vector<1x256xf32>
    %413 = vector.extract_strided_slice %411 {offsets = [1, 0], sizes = [1, 256], strides = [1, 1]} : vector<12x256xf32> to vector<1x256xf32>
    %414 = vector.extract_strided_slice %411 {offsets = [2, 0], sizes = [1, 256], strides = [1, 1]} : vector<12x256xf32> to vector<1x256xf32>
    %415 = vector.extract_strided_slice %411 {offsets = [3, 0], sizes = [1, 256], strides = [1, 1]} : vector<12x256xf32> to vector<1x256xf32>
    %416 = vector.extract_strided_slice %411 {offsets = [4, 0], sizes = [1, 256], strides = [1, 1]} : vector<12x256xf32> to vector<1x256xf32>
    %417 = vector.extract_strided_slice %411 {offsets = [5, 0], sizes = [1, 256], strides = [1, 1]} : vector<12x256xf32> to vector<1x256xf32>
    %418 = vector.extract_strided_slice %411 {offsets = [6, 0], sizes = [1, 256], strides = [1, 1]} : vector<12x256xf32> to vector<1x256xf32>
    %419 = vector.extract_strided_slice %411 {offsets = [7, 0], sizes = [1, 256], strides = [1, 1]} : vector<12x256xf32> to vector<1x256xf32>
    %420 = vector.extract_strided_slice %411 {offsets = [8, 0], sizes = [1, 256], strides = [1, 1]} : vector<12x256xf32> to vector<1x256xf32>
    %421 = vector.extract_strided_slice %411 {offsets = [9, 0], sizes = [1, 256], strides = [1, 1]} : vector<12x256xf32> to vector<1x256xf32>
    %422 = tpu.concatenate %418, %419, %420, %421 in 1 : vector<1x256xf32>, vector<1x256xf32>, vector<1x256xf32>, vector<1x256xf32> -> vector<1x1024xf32>
    %cst_107 = arith.constant dense<0.000000e+00> : vector<8xf32>
    %423 = vector.multi_reduction <add>, %409, %cst_107 [1] : vector<8x256xf32> to vector<8xf32>
    %424 = vector.shape_cast %423 : vector<8xf32> to vector<8x1xf32>
    %cst_108 = arith.constant 2.560000e+02 : f32
    %425 = vector.broadcast %cst_108 : f32 to vector<8x1xf32>
    %426 = arith.divf %424, %425 : vector<8x1xf32>
    %427 = vector.broadcast %426 : vector<8x1xf32> to vector<8x256xf32>
    %428 = arith.subf %409, %427 : vector<8x256xf32>
    %429 = arith.mulf %428, %428 : vector<8x256xf32>
    %cst_109 = arith.constant dense<0.000000e+00> : vector<8xf32>
    %430 = vector.multi_reduction <add>, %429, %cst_109 [1] : vector<8x256xf32> to vector<8xf32>
    %431 = vector.shape_cast %430 : vector<8xf32> to vector<8x1xf32>
    %cst_110 = arith.constant 2.560000e+02 : f32
    %432 = vector.broadcast %cst_110 : f32 to vector<8x1xf32>
    %433 = arith.divf %431, %432 : vector<8x1xf32>
    %434 = vector.broadcast %426 : vector<8x1xf32> to vector<8x256xf32>
    %435 = arith.subf %409, %434 : vector<8x256xf32>
    %cst_111 = arith.constant 9.99999974E-6 : f32
    %436 = vector.broadcast %cst_111 : f32 to vector<8x1xf32>
    %437 = arith.addf %433, %436 : vector<8x1xf32>
    %438 = math.rsqrt %437 : vector<8x1xf32>
    %439 = vector.broadcast %438 : vector<8x1xf32> to vector<8x256xf32>
    %440 = arith.mulf %435, %439 : vector<8x256xf32>
    %441 = vector.broadcast %412 : vector<1x256xf32> to vector<8x256xf32>
    %442 = arith.mulf %440, %441 : vector<8x256xf32>
    %443 = vector.broadcast %413 : vector<1x256xf32> to vector<8x256xf32>
    %444 = arith.addf %442, %443 : vector<8x256xf32>
    %445 = arith.truncf %444 : vector<8x256xf32> to vector<8x256xbf16>
    %c3_112 = arith.constant 3 : index
    %c0_113 = arith.constant 0 : index
    %c0_114 = arith.constant 0 : index
    %446 = vector.load %arg3[%c3_112, %c0_113, %c0_114] : memref<4x256x768xbf16, #tpu.memory_space<vmem>>, vector<1x256x768xbf16>
    %447 = vector.shape_cast %446 : vector<1x256x768xbf16> to vector<256x768xbf16>
    %cst_115 = arith.constant dense<0.000000e+00> : vector<8x768xf32>
    %448 = tpu.matmul %445, %447, %cst_115 {dimension_numbers = #tpu.dot_dimension_numbers<[1], [0], [0], [1], [0, 0, 1, 1], [], []>} : vector<8x256xbf16>, vector<256x768xbf16>, vector<8x768xf32> -> vector<8x768xf32>
    %449 = vector.extract_strided_slice %448 {offsets = [0, 0], sizes = [8, 64], strides = [1, 1]} : vector<8x768xf32> to vector<8x64xf32>
    %450 = vector.extract_strided_slice %448 {offsets = [0, 64], sizes = [8, 64], strides = [1, 1]} : vector<8x768xf32> to vector<8x64xf32>
    %451 = vector.extract_strided_slice %448 {offsets = [0, 128], sizes = [8, 64], strides = [1, 1]} : vector<8x768xf32> to vector<8x64xf32>
    %452 = vector.extract_strided_slice %448 {offsets = [0, 192], sizes = [8, 64], strides = [1, 1]} : vector<8x768xf32> to vector<8x64xf32>
    %453 = vector.shape_cast %449 : vector<8x64xf32> to vector<1x8x64xf32>
    %454 = vector.shape_cast %450 : vector<8x64xf32> to vector<1x8x64xf32>
    %455 = vector.shape_cast %451 : vector<8x64xf32> to vector<1x8x64xf32>
    %456 = vector.shape_cast %452 : vector<8x64xf32> to vector<1x8x64xf32>
    %457 = tpu.concatenate %453, %454, %455, %456 in 0 : vector<1x8x64xf32>, vector<1x8x64xf32>, vector<1x8x64xf32>, vector<1x8x64xf32> -> vector<4x8x64xf32>
    %458 = vector.extract_strided_slice %448 {offsets = [0, 256], sizes = [8, 64], strides = [1, 1]} : vector<8x768xf32> to vector<8x64xf32>
    %459 = vector.extract_strided_slice %448 {offsets = [0, 320], sizes = [8, 64], strides = [1, 1]} : vector<8x768xf32> to vector<8x64xf32>
    %460 = vector.extract_strided_slice %448 {offsets = [0, 384], sizes = [8, 64], strides = [1, 1]} : vector<8x768xf32> to vector<8x64xf32>
    %461 = vector.extract_strided_slice %448 {offsets = [0, 448], sizes = [8, 64], strides = [1, 1]} : vector<8x768xf32> to vector<8x64xf32>
    %462 = vector.shape_cast %458 : vector<8x64xf32> to vector<1x8x64xf32>
    %463 = vector.shape_cast %459 : vector<8x64xf32> to vector<1x8x64xf32>
    %464 = vector.shape_cast %460 : vector<8x64xf32> to vector<1x8x64xf32>
    %465 = vector.shape_cast %461 : vector<8x64xf32> to vector<1x8x64xf32>
    %466 = tpu.concatenate %462, %463, %464, %465 in 0 : vector<1x8x64xf32>, vector<1x8x64xf32>, vector<1x8x64xf32>, vector<1x8x64xf32> -> vector<4x8x64xf32>
    %467 = vector.extract_strided_slice %448 {offsets = [0, 512], sizes = [8, 64], strides = [1, 1]} : vector<8x768xf32> to vector<8x64xf32>
    %468 = vector.extract_strided_slice %448 {offsets = [0, 576], sizes = [8, 64], strides = [1, 1]} : vector<8x768xf32> to vector<8x64xf32>
    %469 = vector.extract_strided_slice %448 {offsets = [0, 640], sizes = [8, 64], strides = [1, 1]} : vector<8x768xf32> to vector<8x64xf32>
    %470 = vector.extract_strided_slice %448 {offsets = [0, 704], sizes = [8, 64], strides = [1, 1]} : vector<8x768xf32> to vector<8x64xf32>
    %471 = vector.shape_cast %467 : vector<8x64xf32> to vector<1x8x64xf32>
    %472 = vector.shape_cast %468 : vector<8x64xf32> to vector<1x8x64xf32>
    %473 = vector.shape_cast %469 : vector<8x64xf32> to vector<1x8x64xf32>
    %474 = vector.shape_cast %470 : vector<8x64xf32> to vector<1x8x64xf32>
    %475 = tpu.concatenate %471, %472, %473, %474 in 0 : vector<1x8x64xf32>, vector<1x8x64xf32>, vector<1x8x64xf32>, vector<1x8x64xf32> -> vector<4x8x64xf32>
    "tpu.trace_start"() <{level = 10 : i32, message = "hnd,hmd->hnm"}> : () -> ()
    %cst_116 = arith.constant dense<0.000000e+00> : vector<4x8x8xf32>
    %476 = tpu.matmul %457, %466, %cst_116 {dimension_numbers = #tpu.dot_dimension_numbers<[2], [2], [1], [1], [0, 0, 0, 1, 1, 1], [0], [0]>} : vector<4x8x64xf32>, vector<4x8x64xf32>, vector<4x8x8xf32> -> vector<4x8x8xf32>
    "tpu.trace_stop"() : () -> ()
    %cst_117 = arith.constant 6.250000e-02 : f32
    %477 = vector.broadcast %cst_117 : f32 to vector<4x8x8xf32>
    %478 = arith.mulf %476, %477 : vector<4x8x8xf32>
    %479 = vector.shape_cast %1 : vector<8x8xf32> to vector<1x8x8xf32>
    %480 = vector.broadcast %479 : vector<1x8x8xf32> to vector<4x8x8xf32>
    %481 = arith.addf %478, %480 : vector<4x8x8xf32>
    %cst_118 = arith.constant dense<0xFF800000> : vector<4x8xf32>
    %482 = vector.multi_reduction <maximumf>, %481, %cst_118 [2] : vector<4x8x8xf32> to vector<4x8xf32>
    %483 = vector.shape_cast %482 : vector<4x8xf32> to vector<4x8x1xf32>
    %484 = vector.broadcast %483 : vector<4x8x1xf32> to vector<4x8x8xf32>
    %485 = arith.subf %481, %484 : vector<4x8x8xf32>
    %486 = math.exp %485 : vector<4x8x8xf32>
    %cst_119 = arith.constant dense<0.000000e+00> : vector<4x8xf32>
    %487 = vector.multi_reduction <add>, %486, %cst_119 [2] : vector<4x8x8xf32> to vector<4x8xf32>
    %488 = vector.shape_cast %487 : vector<4x8xf32> to vector<4x8x1xf32>
    %489 = tpu.reciprocal %488 {approx = true} : vector<4x8x1xf32> -> vector<4x8x1xf32>
    %490 = vector.broadcast %489 : vector<4x8x1xf32> to vector<4x8x8xf32>
    %491 = arith.mulf %486, %490 : vector<4x8x8xf32>
    "tpu.trace_start"() <{level = 10 : i32, message = "hnm,hmd->hnd"}> : () -> ()
    %cst_120 = arith.constant dense<0.000000e+00> : vector<4x8x64xf32>
    %492 = tpu.matmul %491, %475, %cst_120 {dimension_numbers = #tpu.dot_dimension_numbers<[2], [1], [1], [2], [0, 0, 0, 1, 1, 2], [0], [0]>} : vector<4x8x8xf32>, vector<4x8x64xf32>, vector<4x8x64xf32> -> vector<4x8x64xf32>
    "tpu.trace_stop"() : () -> ()
    %493 = vector.extract_strided_slice %492 {offsets = [0, 0, 0], sizes = [1, 8, 64], strides = [1, 1, 1]} : vector<4x8x64xf32> to vector<1x8x64xf32>
    %494 = vector.shape_cast %493 : vector<1x8x64xf32> to vector<8x64xf32>
    %495 = vector.extract_strided_slice %492 {offsets = [1, 0, 0], sizes = [1, 8, 64], strides = [1, 1, 1]} : vector<4x8x64xf32> to vector<1x8x64xf32>
    %496 = vector.shape_cast %495 : vector<1x8x64xf32> to vector<8x64xf32>
    %497 = vector.extract_strided_slice %492 {offsets = [2, 0, 0], sizes = [1, 8, 64], strides = [1, 1, 1]} : vector<4x8x64xf32> to vector<1x8x64xf32>
    %498 = vector.shape_cast %497 : vector<1x8x64xf32> to vector<8x64xf32>
    %499 = vector.extract_strided_slice %492 {offsets = [3, 0, 0], sizes = [1, 8, 64], strides = [1, 1, 1]} : vector<4x8x64xf32> to vector<1x8x64xf32>
    %500 = vector.shape_cast %499 : vector<1x8x64xf32> to vector<8x64xf32>
    %501 = tpu.concatenate %494, %496, %498, %500 in 1 : vector<8x64xf32>, vector<8x64xf32>, vector<8x64xf32>, vector<8x64xf32> -> vector<8x256xf32>
    %502 = arith.truncf %501 : vector<8x256xf32> to vector<8x256xbf16>
    %c3_121 = arith.constant 3 : index
    %c0_122 = arith.constant 0 : index
    %c0_123 = arith.constant 0 : index
    %503 = vector.load %arg4[%c3_121, %c0_122, %c0_123] : memref<4x256x256xbf16, #tpu.memory_space<vmem>>, vector<1x256x256xbf16>
    %504 = vector.shape_cast %503 : vector<1x256x256xbf16> to vector<256x256xbf16>
    %cst_124 = arith.constant dense<0.000000e+00> : vector<8x256xf32>
    %505 = tpu.matmul %502, %504, %cst_124 {dimension_numbers = #tpu.dot_dimension_numbers<[1], [0], [0], [1], [0, 0, 1, 1], [], []>} : vector<8x256xbf16>, vector<256x256xbf16>, vector<8x256xf32> -> vector<8x256xf32>
    %506 = vector.broadcast %416 : vector<1x256xf32> to vector<8x256xf32>
    %507 = arith.addf %505, %506 : vector<8x256xf32>
    %508 = arith.addf %409, %507 : vector<8x256xf32>
    %cst_125 = arith.constant dense<0.000000e+00> : vector<8xf32>
    %509 = vector.multi_reduction <add>, %508, %cst_125 [1] : vector<8x256xf32> to vector<8xf32>
    %510 = vector.shape_cast %509 : vector<8xf32> to vector<8x1xf32>
    %cst_126 = arith.constant 2.560000e+02 : f32
    %511 = vector.broadcast %cst_126 : f32 to vector<8x1xf32>
    %512 = arith.divf %510, %511 : vector<8x1xf32>
    %513 = vector.broadcast %512 : vector<8x1xf32> to vector<8x256xf32>
    %514 = arith.subf %508, %513 : vector<8x256xf32>
    %515 = arith.mulf %514, %514 : vector<8x256xf32>
    %cst_127 = arith.constant dense<0.000000e+00> : vector<8xf32>
    %516 = vector.multi_reduction <add>, %515, %cst_127 [1] : vector<8x256xf32> to vector<8xf32>
    %517 = vector.shape_cast %516 : vector<8xf32> to vector<8x1xf32>
    %cst_128 = arith.constant 2.560000e+02 : f32
    %518 = vector.broadcast %cst_128 : f32 to vector<8x1xf32>
    %519 = arith.divf %517, %518 : vector<8x1xf32>
    %520 = vector.broadcast %512 : vector<8x1xf32> to vector<8x256xf32>
    %521 = arith.subf %508, %520 : vector<8x256xf32>
    %cst_129 = arith.constant 9.99999974E-6 : f32
    %522 = vector.broadcast %cst_129 : f32 to vector<8x1xf32>
    %523 = arith.addf %519, %522 : vector<8x1xf32>
    %524 = math.rsqrt %523 : vector<8x1xf32>
    %525 = vector.broadcast %524 : vector<8x1xf32> to vector<8x256xf32>
    %526 = arith.mulf %521, %525 : vector<8x256xf32>
    %527 = vector.broadcast %414 : vector<1x256xf32> to vector<8x256xf32>
    %528 = arith.mulf %526, %527 : vector<8x256xf32>
    %529 = vector.broadcast %415 : vector<1x256xf32> to vector<8x256xf32>
    %530 = arith.addf %528, %529 : vector<8x256xf32>
    %531 = arith.truncf %530 : vector<8x256xf32> to vector<8x256xbf16>
    %c3_130 = arith.constant 3 : index
    %c0_131 = arith.constant 0 : index
    %c0_132 = arith.constant 0 : index
    %532 = vector.load %arg5[%c3_130, %c0_131, %c0_132] : memref<4x256x1024xbf16, #tpu.memory_space<vmem>>, vector<1x256x1024xbf16>
    %533 = vector.shape_cast %532 : vector<1x256x1024xbf16> to vector<256x1024xbf16>
    %cst_133 = arith.constant dense<0.000000e+00> : vector<8x1024xf32>
    %534 = tpu.matmul %531, %533, %cst_133 {dimension_numbers = #tpu.dot_dimension_numbers<[1], [0], [0], [1], [0, 0, 1, 1], [], []>} : vector<8x256xbf16>, vector<256x1024xbf16>, vector<8x1024xf32> -> vector<8x1024xf32>
    %535 = vector.broadcast %422 : vector<1x1024xf32> to vector<8x1024xf32>
    %536 = arith.addf %534, %535 : vector<8x1024xf32>
    %cst_134 = arith.constant 0.000000e+00 : f32
    %537 = vector.broadcast %cst_134 : f32 to vector<8x1024xf32>
    %538 = arith.maximumf %536, %537 : vector<8x1024xf32>
    %539 = arith.truncf %538 : vector<8x1024xf32> to vector<8x1024xbf16>
    %c3_135 = arith.constant 3 : index
    %c0_136 = arith.constant 0 : index
    %c0_137 = arith.constant 0 : index
    %540 = vector.load %arg6[%c3_135, %c0_136, %c0_137] : memref<4x1024x256xbf16, #tpu.memory_space<vmem>>, vector<1x1024x256xbf16>
    %541 = vector.shape_cast %540 : vector<1x1024x256xbf16> to vector<1024x256xbf16>
    %cst_138 = arith.constant dense<0.000000e+00> : vector<8x256xf32>
    %542 = tpu.matmul %539, %541, %cst_138 {dimension_numbers = #tpu.dot_dimension_numbers<[1], [0], [0], [1], [0, 0, 1, 1], [], []>} : vector<8x1024xbf16>, vector<1024x256xbf16>, vector<8x256xf32> -> vector<8x256xf32>
    %543 = vector.broadcast %417 : vector<1x256xf32> to vector<8x256xf32>
    %544 = arith.addf %542, %543 : vector<8x256xf32>
    %545 = arith.addf %508, %544 : vector<8x256xf32>
    %c4 = arith.constant 4 : index
    %c0_139 = arith.constant 0 : index
    %c0_140 = arith.constant 0 : index
    %546 = vector.load %arg2[%c4, %c0_139, %c0_140] : memref<5x12x256xf32, #tpu.memory_space<vmem>>, vector<1x12x256xf32>
    %547 = vector.shape_cast %546 : vector<1x12x256xf32> to vector<12x256xf32>
    %548 = vector.extract_strided_slice %547 {offsets = [0, 0], sizes = [1, 256], strides = [1, 1]} : vector<12x256xf32> to vector<1x256xf32>
    %549 = vector.extract_strided_slice %547 {offsets = [1, 0], sizes = [1, 256], strides = [1, 1]} : vector<12x256xf32> to vector<1x256xf32>
    %550 = vector.extract_strided_slice %547 {offsets = [4, 0], sizes = [1, 256], strides = [1, 1]} : vector<12x256xf32> to vector<1x256xf32>
    %cst_141 = arith.constant dense<0.000000e+00> : vector<8xf32>
    %551 = vector.multi_reduction <add>, %545, %cst_141 [1] : vector<8x256xf32> to vector<8xf32>
    %552 = vector.shape_cast %551 : vector<8xf32> to vector<8x1xf32>
    %cst_142 = arith.constant 2.560000e+02 : f32
    %553 = vector.broadcast %cst_142 : f32 to vector<8x1xf32>
    %554 = arith.divf %552, %553 : vector<8x1xf32>
    %555 = vector.broadcast %554 : vector<8x1xf32> to vector<8x256xf32>
    %556 = arith.subf %545, %555 : vector<8x256xf32>
    %557 = arith.mulf %556, %556 : vector<8x256xf32>
    %cst_143 = arith.constant dense<0.000000e+00> : vector<8xf32>
    %558 = vector.multi_reduction <add>, %557, %cst_143 [1] : vector<8x256xf32> to vector<8xf32>
    %559 = vector.shape_cast %558 : vector<8xf32> to vector<8x1xf32>
    %cst_144 = arith.constant 2.560000e+02 : f32
    %560 = vector.broadcast %cst_144 : f32 to vector<8x1xf32>
    %561 = arith.divf %559, %560 : vector<8x1xf32>
    %562 = vector.broadcast %554 : vector<8x1xf32> to vector<8x256xf32>
    %563 = arith.subf %545, %562 : vector<8x256xf32>
    %cst_145 = arith.constant 9.99999974E-6 : f32
    %564 = vector.broadcast %cst_145 : f32 to vector<8x1xf32>
    %565 = arith.addf %561, %564 : vector<8x1xf32>
    %566 = math.rsqrt %565 : vector<8x1xf32>
    %567 = vector.broadcast %566 : vector<8x1xf32> to vector<8x256xf32>
    %568 = arith.mulf %563, %567 : vector<8x256xf32>
    %569 = vector.broadcast %548 : vector<1x256xf32> to vector<8x256xf32>
    %570 = arith.mulf %568, %569 : vector<8x256xf32>
    %571 = vector.broadcast %549 : vector<1x256xf32> to vector<8x256xf32>
    %572 = arith.addf %570, %571 : vector<8x256xf32>
    %573 = arith.truncf %572 : vector<8x256xf32> to vector<8x256xbf16>
    %c0_146 = arith.constant 0 : index
    %c0_147 = arith.constant 0 : index
    %574 = vector.load %arg7[%c0_146, %c0_147] : memref<256x256xbf16, #tpu.memory_space<vmem>>, vector<256x256xbf16>
    %cst_148 = arith.constant dense<0.000000e+00> : vector<8x256xf32>
    %575 = tpu.matmul %573, %574, %cst_148 {dimension_numbers = #tpu.dot_dimension_numbers<[1], [0], [0], [1], [0, 0, 1, 1], [], []>} : vector<8x256xbf16>, vector<256x256xbf16>, vector<8x256xf32> -> vector<8x256xf32>
    %576 = vector.broadcast %550 : vector<1x256xf32> to vector<8x256xf32>
    %577 = arith.addf %575, %576 : vector<8x256xf32>
    %c0_149 = arith.constant 0 : index
    %c0_150 = arith.constant 0 : index
    %578 = vector.load %arg8[%c0_149, %c0_150] : memref<8x256xf32, #tpu.memory_space<vmem>>, vector<8x256xf32>
    tpu.vector_store %arg8[%c0_149, %c0_150], %577 {strides = array<i32>} : memref<8x256xf32, #tpu.memory_space<vmem>>, vector<8x256xf32>,
    return
  }
}

</mosaic_0001>

<bundles_post_ra>
// kernel: bigram_forward.1
= control target key start
LH: loop header
LB: loop body
LE: loop exit
PB: predicated region body
PF: predicated region fallthrough
CT: control target
= control target key end

     0   :  { %13 = vsyncpa [#allocation3], 0  ;;  %s19460_s0 = inlined_call_operand.vmem [shape: f32[8,256], index: 0, kind: input, shape index: {}]   ;;  %s19461_s1 = inlined_call_operand.vmem [shape: f32[8,8], index: 1, kind: input, shape index: {}]   ;;  %s19462_s2 = inlined_call_operand.hbm [shape: f32[5,12,256], index: 2, kind: input, shape index: {}]   ;;  %s19463_s3 = inlined_call_operand.hbm [shape: bf16[4,256,768], index: 3, kind: input, shape index: {}]   ;;  %s19464_s4 = inlined_call_operand.hbm [shape: bf16[4,256,256], index: 4, kind: input, shape index: {}]   ;;  %s19465_s5 = inlined_call_operand.hbm [shape: bf16[4,256,1024], index: 5, kind: input, shape index: {}]   ;;  %s19466_s6 = inlined_call_operand.hbm [shape: bf16[4,1024,256], index: 6, kind: input, shape index: {}]   ;;  %s19467_s7 = inlined_call_operand.hbm [shape: bf16[256,256], index: 7, kind: input, shape index: {}]   ;;  %s19468_s8 = inlined_call_operand.vmem [shape: f32[8,256], index: 8, kind: output, shape index: {}]  }
   0x1   :  { %14 = vsyncpa [#allocation5], 0 }
   0x2   :  { %15 = vsyncpa [#allocation8], 0 }
   0x3   :  { %16 = vsyncpa [#allocation11], 0  ;;  %s18656_s27 = smov [#allocation4]   ;;  %s18516_s9 = scalar_lea.hbm %s19463_s3, 49152 }
   0x4   :  { %s38_s28 = sshll.u32 %s18656_s27, 4  ;;  %p18517_p0 = scmp.ne.s32.totalorder %s19463_s3, %s18516_s9  ;;  %s39_s28 = int_to_ptr.vmem [resolvable:$true] %s38_s28 }
   0x5   :  { %p18520_p1 = scmp.lt.u32.totalorder %s18516_s9, %s19463_s3 }
   0x7   :  { %p18522_p2 = pnand %p18520_p1, %p18517_p0 }
   0x9   :  { %18525 = shalt.err (!%p18522_p2)
}
   0xa   :  { %s18526_s14 = scalar_lea.vmem %s39_s28, 49152  ;;  %p18531_p4 = scmp.lt.s32.totalorder %s39_s28, %s39_s28 }
   0xb   :  { %p18527_p3 = scmp.ne.s32.totalorder %s39_s28, %s18526_s14  ;;  %p18532_p5 = scmp.lt.s32.totalorder %s18526_s14, %s18526_s14 }
   0xd   :  { %p18533_p6 = por %p18532_p5, %p18531_p4 }
   0xf   :  { %p18534_p7 = pnand %p18533_p6, %p18527_p3 }
  0x11   :  { %18537 = shalt.err (!%p18534_p7)
}
  0x12   :  { %s18657_s15 = smov 384   ;;  %s18658_s16 = smov 24  }
  0x13   :  { %44 = dma.hbm_to_vmem [thread:$0]  %s19463_s3, 49152, %s39_s28, [#allocation5], %s18657_s15, %s18657_s15, %s18658_s16  }
  0x14   :  { %s18659_s19 = smov [#allocation7]   ;;  %s18538_s23 = scalar_lea.hbm %s19465_s5, 65536 }
  0x15   :  { %s62_s20 = sshll.u32 %s18659_s19, 4  ;;  %p18539_p8 = scmp.ne.s32.totalorder %s19465_s5, %s18538_s23  ;;  %s63_s20 = int_to_ptr.vmem [resolvable:$true] %s62_s20 }
  0x16   :  { %p18542_p9 = scmp.lt.u32.totalorder %s18538_s23, %s19465_s5 }
  0x18   :  { %p18544_p10 = pnand %p18542_p9, %p18539_p8 }
  0x1a   :  { %18547 = shalt.err (!%p18544_p10)
}
  0x1b   :  { %s18548_s29 = scalar_lea.vmem %s63_s20, 65536  ;;  %p18553_p12 = scmp.lt.s32.totalorder %s63_s20, %s63_s20 }
  0x1c   :  { %p18549_p11 = scmp.ne.s32.totalorder %s63_s20, %s18548_s29  ;;  %p18554_p13 = scmp.lt.s32.totalorder %s18548_s29, %s18548_s29 }
  0x1e   :  { %p18555_p0 = por %p18554_p13, %p18553_p12 }
  0x20   :  { %p18556_p1 = pnand %p18555_p0, %p18549_p11 }
  0x22   :  { %18559 = shalt.err (!%p18556_p1)
}
  0x23   :  { %s18660_s3 = smov 512   ;;  %s18661_s28 = smov 32  }
  0x24   :  { %68 = dma.hbm_to_vmem [thread:$0]  %s19465_s5, 65536, %s63_s20, [#allocation8], %s18660_s3, %s18660_s3, %s18661_s28  }
  0x25   :  { %s18662_s10 = smov [#allocation2]   ;;  %s18560_s14 = scalar_lea.hbm %s19462_s2, 2560 }
  0x26   :  { %s26_s11 = sshll.u32 %s18662_s10, 4  ;;  %p18561_p2 = scmp.ne.s32.totalorder %s19462_s2, %s18560_s14  ;;  %s27_s11 = int_to_ptr.vmem [resolvable:$true] %s26_s11 }
  0x27   :  { %p18564_p3 = scmp.lt.u32.totalorder %s18560_s14, %s19462_s2 }
  0x29   :  { %p18566_p4 = pnand %p18564_p3, %p18561_p2 }
  0x2b   :  { %18569 = shalt.err (!%p18566_p4)
}
  0x2c   :  { %s18570_s19 = scalar_lea.vmem %s27_s11, 2560  ;;  %p18575_p6 = scmp.lt.s32.totalorder %s27_s11, %s27_s11 }
  0x2d   :  { %p18571_p5 = scmp.ne.s32.totalorder %s27_s11, %s18570_s19  ;;  %p18576_p7 = scmp.lt.s32.totalorder %s18570_s19, %s18570_s19 }
  0x2f   :  { %p18577_p8 = por %p18576_p7, %p18575_p6 }
  0x31   :  { %p18578_p9 = pnand %p18577_p8, %p18571_p5 }
  0x33   :  { %18581 = shalt.err (!%p18578_p9)
}
  0x34   :  { %s18663_s5 = smov 256   ;;  %s18664_s20 = smov 16  }
  0x35   :  { %32 = dma.hbm_to_vmem [thread:$0]  %s19462_s2, 2560, %s27_s11, [#allocation3], %s18663_s5, %s18663_s5, %s18664_s20  }
  0x36   :  { %s18665_s23 = smov [#allocation6]   ;;  %s18582_s27 = scalar_lea.hbm %s19464_s4, 16384 }
  0x37   :  { %s50_s24 = sshll.u32 %s18665_s23, 4  ;;  %p18583_p10 = scmp.ne.s32.totalorder %s19464_s4, %s18582_s27  ;;  %s51_s24 = int_to_ptr.vmem [resolvable:$true] %s50_s24 }
  0x38   :  { %p18586_p11 = scmp.lt.u32.totalorder %s18582_s27, %s19464_s4 }
  0x3a   :  { %p18588_p12 = pnand %p18586_p11, %p18583_p10 }
  0x3c   :  { %18591 = shalt.err (!%p18588_p12)
}
  0x3d   :  { %s18592_s9 = scalar_lea.vmem %s51_s24, 16384  ;;  %p18597_p0 = scmp.lt.s32.totalorder %s51_s24, %s51_s24 }
  0x3e   :  { %p18593_p13 = scmp.ne.s32.totalorder %s51_s24, %s18592_s9  ;;  %p18598_p1 = scmp.lt.s32.totalorder %s18592_s9, %s18592_s9 }
  0x40   :  { %p18599_p2 = por %p18598_p1, %p18597_p0 }
  0x42   :  { %p18600_p3 = pnand %p18599_p2, %p18593_p13 }
  0x44   :  { %18603 = shalt.err (!%p18600_p3)
}
  0x45   :  { %s18666_s2 = smov 128   ;;  %s18667_s10 = smov 8  }
  0x46   :  { %56 = dma.hbm_to_vmem [thread:$0]  %s19464_s4, 16384, %s51_s24, [#allocation5], %s18666_s2, %s18666_s2, %s18667_s10  }
  0x47   :  { %s18668_s13 = smov [#allocation9]   ;;  %s18669_s15 = smov [#allocation10]  }
  0x48   :  { %s74_s14 = sshll.u32 %s18668_s13, 4  ;;  %s86_s16 = sshll.u32 %s18669_s15, 4  ;;  %s75_s14 = int_to_ptr.vmem [resolvable:$true] %s74_s14  ;;  %s18769_s16 = int_to_ptr.vmem [resolvable:$true] %s86_s16 }
  0x49   :  { %s18604_s19 = scalar_lea.hbm %s19466_s6, 65536 }
  0x4a   :  { %p18605_p4 = scmp.ne.s32.totalorder %s19466_s6, %s18604_s19  ;;  %p18608_p5 = scmp.lt.u32.totalorder %s18604_s19, %s19466_s6 }
  0x4c   :  { %p18610_p6 = pnand %p18608_p5, %p18605_p4 }
  0x4e   :  { %18613 = shalt.err (!%p18610_p6)
}
  0x4f   :  { %s18614_s4 = scalar_lea.vmem %s75_s14, 65536  ;;  %p18619_p8 = scmp.lt.s32.totalorder %s75_s14, %s75_s14 }
  0x50   :  { %p18615_p7 = scmp.ne.s32.totalorder %s75_s14, %s18614_s4  ;;  %p18620_p9 = scmp.lt.s32.totalorder %s18614_s4, %s18614_s4 }
  0x52   :  { %p18621_p10 = por %p18620_p9, %p18619_p8 }
  0x54   :  { %p18622_p11 = pnand %p18621_p10, %p18615_p7 }
  0x56   :  { %18625 = shalt.err (!%p18622_p11)
}
  0x57   :  { %80 = dma.hbm_to_vmem [thread:$0]  %s19466_s6, 65536, %s75_s14, [#allocation8], %s18666_s2, %s18666_s2, %s18667_s10  }
  0x58   :  { %s18626_s27 = scalar_lea.hbm %s19467_s7, 4096 }
  0x59   :  { %p18627_p12 = scmp.ne.s32.totalorder %s19467_s7, %s18626_s27  ;;  %p18630_p13 = scmp.lt.u32.totalorder %s18626_s27, %s19467_s7 }
  0x5b   :  { %p18632_p0 = pnand %p18630_p13, %p18627_p12 }
  0x5d   :  { %18635 = shalt.err (!%p18632_p0)
}
  0x5e   :  { %s18636_s9 = scalar_lea.vmem %s18769_s16, 4096  ;;  %p18641_p2 = scmp.lt.s32.totalorder %s18769_s16, %s18769_s16 }
  0x5f   :  { %p18637_p1 = scmp.ne.s32.totalorder %s18769_s16, %s18636_s9  ;;  %p18642_p3 = scmp.lt.s32.totalorder %s18636_s9, %s18636_s9 }
  0x61   :  { %p18643_p4 = por %p18642_p3, %p18641_p2 }
  0x63   :  { %p18644_p5 = pnand %p18643_p4, %p18637_p1 }
  0x65   :  { %18647 = shalt.err (!%p18644_p5)
}
  0x66   :  { %92 = dma.hbm_to_vmem [thread:$0]  %s19467_s7, 4096, %s18769_s16, [#allocation11], %s18666_s2, %s18666_s2, %s18667_s10  }
  0x67   :  { %18648 = dma.done.wait [#allocation3], 2560  }
  0x68   :  { %18649 = vsyncadd [#allocation3], 4294964736 }
  0x69   :  { %18650 = dma.done.wait [#allocation5], 65536  }
  0x6a   :  { %18651 = vsyncadd [#allocation5], 4294901760 }
  0x6b   :  { %18652 = dma.done.wait [#allocation8], 131072  }
  0x6c   :  { %18653 = vsyncadd [#allocation8], 4294836224 }
  0x6d   :  { %18654 = dma.done.wait [#allocation11], 4096  }
  0x6e   :  { %18655 = vsyncadd [#allocation11], 4294963200  ;;  %v18809_v0 = vld [vmem:[%s19460_s0] sm:$0xff]  ;;  %v18814_v1 = vld [vmem:[%s19460_s0 + $0x8] sm:$0xff]  ;;  %vm18671_vm0 = vmmov 0   ;;  %vm892_vm1 = vcmask 523264  }
  0x6f   :  { %v134_v2 = vadd.f32 %v18814_v1, %v18809_v0  ;;  %v16829_v3 = vld [vmem:[#allocation4 + $0x4] ss:$24 sps:$4 sm:$0xff]   ;;  %v16831_v4 = vld [vmem:[#allocation4] ss:$24 sps:$4 sm:$0xff]   ;;  %v16835_v7 = vld [vmem:[#allocation4 + $0x34] ss:$24 sps:$4 sm:$0xff]  }
  0x70   :  { %v16832_v5 = vld [vmem:[#allocation4 + $0xc] ss:$24 sps:$4 sm:$0xff]   ;;  %v16834_v6 = vld [vmem:[#allocation4 + $0x8] ss:$24 sps:$4 sm:$0xff]   ;;  %749 = vmatprep.subr.bf16.mxu0 %v16829_v3  ;;  %v16838_v8 = vld [vmem:[#allocation4 + $0x3c] ss:$24 sps:$4 sm:$0xff]  }
  0x71   :  { %135 = vadd.xlane.f32.xlu0 %v134_v2  ;;  %790 = vmatprep.subr.bf16.mxu1 %v16832_v5  ;;  %v16837_v9 = vld [vmem:[#allocation4 + $0x30] ss:$24 sps:$4 sm:$0xff]   ;;  %v16841_v11 = vld [vmem:[#allocation4 + $0x64] ss:$24 sps:$4 sm:$0xff]   ;;  %v16843_v13 = vld [vmem:[#allocation4 + $0x60] ss:$24 sps:$4 sm:$0xff]  }
  0x72   :  { %750 = vmatpush1.bf16.msra.mxu0 %v16831_v4  ;;  %791 = vmatpush1.bf16.msra.mxu1 %v16834_v6  ;;  %v16840_v10 = vld [vmem:[#allocation4 + $0x38] ss:$24 sps:$4 sm:$0xff]   ;;  %v16844_v12 = vld [vmem:[#allocation4 + $0x6c] ss:$24 sps:$4 sm:$0xff]   ;;  %v16846_v14 = vld [vmem:[#allocation4 + $0x68] ss:$24 sps:$4 sm:$0xff]  }
  0x73   :  { %751 = vmatprep.subr.bf16.mxu0 %v16835_v7  ;;  %792 = vmatprep.subr.bf16.mxu1 %v16838_v8  ;;  %v16847_v15 = vld [vmem:[#allocation4 + $0x94] ss:$24 sps:$4 sm:$0xff]   ;;  %v16849_v17 = vld [vmem:[#allocation4 + $0x90] ss:$24 sps:$4 sm:$0xff]   ;;  %v16853_v19 = vld [vmem:[#allocation4 + $0xc4] ss:$24 sps:$4 sm:$0xff]  }
  0x74   :  { %v16850_v16 = vld [vmem:[#allocation4 + $0x9c] ss:$24 sps:$4 sm:$0xff]   ;;  %v16852_v18 = vld [vmem:[#allocation4 + $0x98] ss:$24 sps:$4 sm:$0xff]   ;;  %v16856_v20 = vld [vmem:[#allocation4 + $0xcc] ss:$24 sps:$4 sm:$0xff]  }
  0x75   :  { %v16855_v21 = vld [vmem:[#allocation4 + $0xc0] ss:$24 sps:$4 sm:$0xff]   ;;  %v16859_v23 = vld [vmem:[#allocation4 + $0xf4] ss:$24 sps:$4 sm:$0xff]   ;;  %v16861_v25 = vld [vmem:[#allocation4 + $0xf0] ss:$24 sps:$4 sm:$0xff]  }
  0x76   :  { %752 = vmatpush1.bf16.msra.mxu0 %v16837_v9  ;;  %793 = vmatpush1.bf16.msra.mxu1 %v16840_v10  ;;  %v16858_v22 = vld [vmem:[#allocation4 + $0xc8] ss:$24 sps:$4 sm:$0xff]   ;;  %v16862_v24 = vld [vmem:[#allocation4 + $0xfc] ss:$24 sps:$4 sm:$0xff]   ;;  %v16864_v26 = vld [vmem:[#allocation4 + $0xf8] ss:$24 sps:$4 sm:$0xff]  }
  0x77   :  { %753 = vmatprep.subr.bf16.mxu0 %v16841_v11  ;;  %794 = vmatprep.subr.bf16.mxu1 %v16844_v12  ;;  %v16865_v27 = vld [vmem:[#allocation4 + $0x124] ss:$24 sps:$4 sm:$0xff]   ;;  %v16867_v29 = vld [vmem:[#allocation4 + $0x120] ss:$24 sps:$4 sm:$0xff]   ;;  %v16871_v31 = vld [vmem:[#allocation4 + $0x154] ss:$24 sps:$4 sm:$0xff]  }
  0x78   :  { %v16868_v28 = vld [vmem:[#allocation4 + $0x12c] ss:$24 sps:$4 sm:$0xff]   ;;  %v16870_v30 = vld [vmem:[#allocation4 + $0x128] ss:$24 sps:$4 sm:$0xff]   ;;  %v16874_v32 = vld [vmem:[#allocation4 + $0x15c] ss:$24 sps:$4 sm:$0xff]  }
  0x79   :  { %v16873_v33 = vld [vmem:[#allocation4 + $0x150] ss:$24 sps:$4 sm:$0xff]   ;;  %v16877_v35 = vld [vmem:[#allocation4 + $0x184] ss:$24 sps:$4 sm:$0xff]   ;;  %v16879_v37 = vld [vmem:[#allocation4 + $0x180] ss:$24 sps:$4 sm:$0xff]  }
  0x7a   :  { %754 = vmatpush1.bf16.msra.mxu0 %v16843_v13  ;;  %795 = vmatpush1.bf16.msra.mxu1 %v16846_v14  ;;  %v16876_v34 = vld [vmem:[#allocation4 + $0x158] ss:$24 sps:$4 sm:$0xff]   ;;  %v16880_v36 = vld [vmem:[#allocation4 + $0x18c] ss:$24 sps:$4 sm:$0xff]   ;;  %v16882_v38 = vld [vmem:[#allocation4 + $0x188] ss:$24 sps:$4 sm:$0xff]   ;;  %v151_v13 = vlaneseq }
  0x7b   :  { %755 = vmatprep.subr.bf16.mxu0 %v16847_v15  ;;  %796 = vmatprep.subr.bf16.mxu1 %v16850_v16  ;;  %v16883_v39 = vld [vmem:[#allocation4 + $0x1b4] ss:$24 sps:$4 sm:$0xff]   ;;  %v16885_v41 = vld [vmem:[#allocation4 + $0x1b0] ss:$24 sps:$4 sm:$0xff]   ;;  %v16889_v43 = vld [vmem:[#allocation4 + $0x1e4] ss:$24 sps:$4 sm:$0xff]  }
  0x7c   :  { %v16886_v40 = vld [vmem:[#allocation4 + $0x1bc] ss:$24 sps:$4 sm:$0xff]   ;;  %v16888_v42 = vld [vmem:[#allocation4 + $0x1b8] ss:$24 sps:$4 sm:$0xff]   ;;  %v16892_v52 = vld [vmem:[#allocation4 + $0x1ec] ss:$24 sps:$4 sm:$0xff]  }
  0x7d   :  { %v16891_v51 = vld [vmem:[#allocation4 + $0x1e0] ss:$24 sps:$4 sm:$0xff]   ;;  %v16895_v54 = vld [vmem:[#allocation4 + $0x214] ss:$24 sps:$4 sm:$0xff]   ;;  %v16897_v55 = vld [vmem:[#allocation4 + $0x210] ss:$24 sps:$4 sm:$0xff]  }
  0x7e   :  { %756 = vmatpush1.bf16.msra.mxu0 %v16849_v17  ;;  %797 = vmatpush1.bf16.msra.mxu1 %v16852_v18  ;;  %v16894_v53 = vld [vmem:[#allocation4 + $0x1e8] ss:$24 sps:$4 sm:$0xff]   ;;  %v16898_v56 = vld [vmem:[#allocation4 + $0x21c] ss:$24 sps:$4 sm:$0xff]   ;;  %v16900_v57 = vld [vmem:[#allocation4 + $0x218] ss:$24 sps:$4 sm:$0xff]  }
  0x7f   :  { %757 = vmatprep.subr.bf16.mxu0 %v16853_v19  ;;  %798 = vmatprep.subr.bf16.mxu1 %v16856_v20  ;;  %v16901_v58 = vld [vmem:[#allocation4 + $0x244] ss:$24 sps:$4 sm:$0xff]   ;;  %v16903_v59 = vld [vmem:[#allocation4 + $0x240] ss:$24 sps:$4 sm:$0xff]   ;;  %v16907_v62 = vld [vmem:[#allocation4 + $0x274] ss:$24 sps:$4 sm:$0xff]  }
  0x80   :  { %v16904_v60 = vld [vmem:[#allocation4 + $0x24c] ss:$24 sps:$4 sm:$0xff]   ;;  %v16906_v61 = vld [vmem:[#allocation4 + $0x248] ss:$24 sps:$4 sm:$0xff]   ;;  %v16910_v63 = vld [vmem:[#allocation4 + $0x27c] ss:$24 sps:$4 sm:$0xff]  }
  0x81   :  { %v16913_v2 = vld [vmem:[#allocation4 + $0x2a4] ss:$24 sps:$4 sm:$0xff]   ;;  %v16915_v4 = vld [vmem:[#allocation4 + $0x2a0] ss:$24 sps:$4 sm:$0xff]   ;;  %v16919_v6 = vld [vmem:[#allocation4 + $0x2d4] ss:$24 sps:$4 sm:$0xff]  }
  0x82   :  { %758 = vmatpush1.bf16.msra.mxu0 %v16855_v21  ;;  %799 = vmatpush1.bf16.msra.mxu1 %v16858_v22  ;;  %v16916_v3 = vld [vmem:[#allocation4 + $0x2ac] ss:$24 sps:$4 sm:$0xff]   ;;  %v16918_v5 = vld [vmem:[#allocation4 + $0x2a8] ss:$24 sps:$4 sm:$0xff]   ;;  %v16922_v8 = vld [vmem:[#allocation4 + $0x2dc] ss:$24 sps:$4 sm:$0xff]  }
  0x83   :  { %759 = vmatprep.subr.bf16.mxu0 %v16859_v23  ;;  %800 = vmatprep.subr.bf16.mxu1 %v16862_v24  ;;  %v16921_v7 = vld [vmem:[#allocation4 + $0x2d0] ss:$24 sps:$4 sm:$0xff]   ;;  %v16927_v10 = vld [vmem:[#allocation4 + $0x14] ss:$24 sps:$4 sm:$0xff]   ;;  %v18828_v15 = vshrl.u32 %v151_v13, 7  ;;  %v114_v17 = vld [vmem:[#allocation2] sm:$0xff] }
  0x84   :  { %v16924_v9 = vld [vmem:[#allocation4 + $0x2d8] ss:$24 sps:$4 sm:$0xff]   ;;  %v115_v16 = vld [vmem:[#allocation2 + $0x8] sm:$0xff]  ;;  %s18672_s7 = smov 64   ;;  %vm1197_vm2 = vcmask 64512  }
  0x85   :  { %v18831_v18 = vsub.s32 0, %v18828_v15  ;;  %v18834_v19 = vsub.s32 1, %v18828_v15 }
  0x86   :  { %760 = vmatpush1.bf16.msra.mxu0 %v16861_v25  ;;  %801 = vmatpush1.bf16.msra.mxu1 %v16864_v26 }
  0x87   :  { %761 = vmatprep.subr.bf16.mxu0 %v16865_v27  ;;  %802 = vmatprep.subr.bf16.mxu1 %v16868_v28  ;;  %v158_v20 = vrot.slane %v115_v16, %v18831_v18  ;;  %v154_v21 = vrot.slane %v114_v17, %v18831_v18  ;;  %v168_v24 = vrot.slane %v115_v16, %v18834_v19 }
  0x88   :  { %v164_v26 = vrot.slane %v114_v17, %v18834_v19 }
  0x8a   :  { %762 = vmatpush1.bf16.msra.mxu0 %v16867_v29  ;;  %803 = vmatpush1.bf16.msra.mxu1 %v16870_v30  ;;  %v16925_v30 = vld [vmem:[#allocation4 + $0x10] ss:$24 sps:$4 sm:$0xff]  }
  0x8b   :  { %763 = vmatprep.subr.bf16.mxu0 %v16871_v31  ;;  %804 = vmatprep.subr.bf16.mxu1 %v16874_v32  ;;  %v16930_v32 = vld [vmem:[#allocation4 + $0x44] ss:$24 sps:$4 sm:$0xff]  }
  0x8e   :  { %764 = vmatpush1.bf16.msra.mxu0 %v16873_v33  ;;  %805 = vmatpush1.bf16.msra.mxu1 %v16876_v34 }
  0x8f   :  { %765 = vmatprep.subr.bf16.mxu0 %v16877_v35  ;;  %806 = vmatprep.subr.bf16.mxu1 %v16880_v36  ;;  %v16928_v35 = vld [vmem:[#allocation4 + $0x40] ss:$24 sps:$4 sm:$0xff]   ;;  %v16933_v36 = vld [vmem:[#allocation4 + $0x74] ss:$24 sps:$4 sm:$0xff]  }
  0x92   :  { %766 = vmatpush1.bf16.msra.mxu0 %v16879_v37  ;;  %807 = vmatpush1.bf16.msra.mxu1 %v16882_v38  ;;  %v16931_v37 = vld [vmem:[#allocation4 + $0x70] ss:$24 sps:$4 sm:$0xff]   ;;  %v16936_v38 = vld [vmem:[#allocation4 + $0xa4] ss:$24 sps:$4 sm:$0xff]  }
  0x93   :  { %767 = vmatprep.subr.bf16.mxu0 %v16883_v39  ;;  %808 = vmatprep.subr.bf16.mxu1 %v16886_v40  ;;  %v16934_v39 = vld [vmem:[#allocation4 + $0xa0] ss:$24 sps:$4 sm:$0xff]   ;;  %v16939_v40 = vld [vmem:[#allocation4 + $0xd4] ss:$24 sps:$4 sm:$0xff]  }
  0x96   :  { %768 = vmatpush1.bf16.msra.mxu0 %v16885_v41  ;;  %809 = vmatpush1.bf16.msra.mxu1 %v16888_v42  ;;  %v16937_v41 = vld [vmem:[#allocation4 + $0xd0] ss:$24 sps:$4 sm:$0xff]   ;;  %v16942_v42 = vld [vmem:[#allocation4 + $0x104] ss:$24 sps:$4 sm:$0xff]  }
  0x97   :  { %769 = vmatprep.subr.bf16.mxu0 %v16889_v43  ;;  %810 = vmatprep.subr.bf16.mxu1 %v16892_v52  ;;  %v16940_v43 = vld [vmem:[#allocation4 + $0x100] ss:$24 sps:$4 sm:$0xff]   ;;  %v16957_v52 = vld [vmem:[#allocation4 + $0x1f4] ss:$24 sps:$4 sm:$0xff]  }
  0x9a   :  { %770 = vmatpush1.bf16.msra.mxu0 %v16891_v51  ;;  %811 = vmatpush1.bf16.msra.mxu1 %v16894_v53  ;;  %v16952_v51 = vld [vmem:[#allocation4 + $0x1c0] ss:$24 sps:$4 sm:$0xff]   ;;  %v16955_v53 = vld [vmem:[#allocation4 + $0x1f0] ss:$24 sps:$4 sm:$0xff]  }
  0x9b   :  { %771 = vmatprep.subr.bf16.mxu0 %v16895_v54  ;;  %812 = vmatprep.subr.bf16.mxu1 %v16898_v56  ;;  %v16960_v54 = vld [vmem:[#allocation4 + $0x224] ss:$24 sps:$4 sm:$0xff]   ;;  %v16963_v56 = vld [vmem:[#allocation4 + $0x254] ss:$24 sps:$4 sm:$0xff]  }
  0x9e   :  { %772 = vmatpush1.bf16.msra.mxu0 %v16897_v55  ;;  %813 = vmatpush1.bf16.msra.mxu1 %v16900_v57  ;;  %v16958_v55 = vld [vmem:[#allocation4 + $0x220] ss:$24 sps:$4 sm:$0xff]   ;;  %v16961_v57 = vld [vmem:[#allocation4 + $0x250] ss:$24 sps:$4 sm:$0xff]  }
  0x9f   :  { %773 = vmatprep.subr.bf16.mxu0 %v16901_v58  ;;  %814 = vmatprep.subr.bf16.mxu1 %v16904_v60  ;;  %v16966_v58 = vld [vmem:[#allocation4 + $0x284] ss:$24 sps:$4 sm:$0xff]   ;;  %v16969_v60 = vld [vmem:[#allocation4 + $0x2b4] ss:$24 sps:$4 sm:$0xff]  }
  0xa2   :  { %774 = vmatpush1.bf16.msra.mxu0 %v16903_v59  ;;  %815 = vmatpush1.bf16.msra.mxu1 %v16906_v61  ;;  %v16964_v59 = vld [vmem:[#allocation4 + $0x280] ss:$24 sps:$4 sm:$0xff]   ;;  %v16967_v61 = vld [vmem:[#allocation4 + $0x2b0] ss:$24 sps:$4 sm:$0xff]  }
  0xa3   :  { %775 = vmatprep.subr.bf16.mxu0 %v16907_v62  ;;  %816 = vmatprep.subr.bf16.mxu1 %v16910_v63  ;;  %v16972_v62 = vld [vmem:[#allocation4 + $0x2e4] ss:$24 sps:$4 sm:$0xff]   ;;  %v16970_v63 = vld [vmem:[#allocation4 + $0x2e0] ss:$24 sps:$4 sm:$0xff]  }
  0xfe   :  { %v136_v44 = vpop.xlane.xlu0 %135 }
  0xff   :  { %v138_v45 = vmul.f32 0.00390625, %v136_v44  ;;  %v16945_v44 = vld [vmem:[#allocation4 + $0x134] ss:$24 sps:$4 sm:$0xff]  }
 0x101   :  { %v18819_v46 = vsub.f32 %v18809_v0, %v138_v45  ;;  %v18822_v47 = vsub.f32 %v18814_v1, %v138_v45  ;;  %v16909_v0 = vld [vmem:[#allocation4 + $0x270] ss:$24 sps:$4 sm:$0xff]  }
 0x102   :  { %v16912_v1 = vld [vmem:[#allocation4 + $0x278] ss:$24 sps:$4 sm:$0xff]   ;;  %776 = vmatpush1.bf16.msra.mxu0 %v16909_v0  ;;  %v18670_v0 = vmov 0.0  }
 0x103   :  { %v141_v48 = vmul.f32 %v18819_v46, %v18819_v46  ;;  %v142_v49 = vmul.f32 %v18822_v47, %v18822_v47  ;;  %817 = vmatpush1.bf16.msra.mxu1 %v16912_v1  ;;  %777 = vmatprep.subr.bf16.mxu0 %v16913_v2  ;;  %v16943_v45 = vld [vmem:[#allocation4 + $0x130] ss:$24 sps:$4 sm:$0xff]  }
 0x104   :  { %818 = vmatprep.subr.bf16.mxu1 %v16916_v3 }
 0x105   :  { %v143_v50 = vadd.f32 %v142_v49, %v141_v48  ;;  %v16951_v48 = vld [vmem:[#allocation4 + $0x194] ss:$24 sps:$4 sm:$0xff]   ;;  %v16949_v49 = vld [vmem:[#allocation4 + $0x190] ss:$24 sps:$4 sm:$0xff]  }
 0x106   :  { %778 = vmatpush1.bf16.msra.mxu0 %v16915_v4 }
 0x107   :  { %144 = vadd.xlane.f32.xlu0 %v143_v50  ;;  %819 = vmatpush1.bf16.msra.mxu1 %v16918_v5  ;;  %v16954_v50 = vld [vmem:[#allocation4 + $0x1c4] ss:$24 sps:$4 sm:$0xff]  }
 0x108   :  { %779 = vmatprep.subr.bf16.mxu0 %v16919_v6  ;;  %820 = vmatprep.subr.bf16.mxu1 %v16922_v8 }
 0x10a   :  { %780 = vmatpush1.bf16.msra.mxu0 %v16921_v7 }
 0x10b   :  { %821 = vmatpush1.bf16.msra.mxu1 %v16924_v9  ;;  %831 = vmatprep.subr.bf16.mxu0 %v16927_v10 }
 0x10c   :  { %16632 = vmatprep.subr.mxu1 %v18670_v0 }
 0x194   :  { %v145_v11 = vpop.xlane.xlu0 %144 }
 0x195   :  { %v146_v12 = vmul.f32 0.00390625, %v145_v11 }
 0x197   :  { %v147_v14 = vadd.f32 1e-05, %v146_v12 }
 0x199   :  { %18413 = vrsqrt.f32 %v147_v14 }
 0x1a3   :  { %v18414_v22 = vpop.eup %18413 }
 0x1a4   :  { %v150_v23 = vmul.f32 %v18414_v22, %v18822_v47  ;;  %v149_v25 = vmul.f32 %v18414_v22, %v18819_v46  ;;  %v16948_v46 = vld [vmem:[#allocation4 + $0x164] ss:$24 sps:$4 sm:$0xff]   ;;  %v16946_v47 = vld [vmem:[#allocation4 + $0x160] ss:$24 sps:$4 sm:$0xff]  }
 0x1a6   :  { %v160_v27 = vmul.f32 %v158_v20, %v150_v23  ;;  %v159_v28 = vmul.f32 %v154_v21, %v149_v25  ;;  %v113_v21 = vld [vmem:[%s19461_s1] sm:$0xff] }
 0x1a8   :  { %v170_v29 = vadd.f32 %v168_v24, %v160_v27  ;;  %v169_v31 = vadd.f32 %v164_v26, %v159_v28 }
 0x1aa   :  { %v172_v33 = vpack.c.bf16 %v170_v29, %v170_v29  ;;  %v18842_v34 = vpack.c.bf16 %v169_v31, %v169_v31 }
 0x1ac   :  { %781 = vmatprep.mubr.bf16.mxu0 %v172_v33  ;;  %822 = vmatprep.mubr.bf16.mxu1 %v172_v33 }
 0x1ad   :  { %782 = vmatmul.mubr.bf16.vlgmr.msra.gmra.mrb[0].mxu0 %v18842_v34  ;;  %823 = vmatmul.mubr.bf16.vlgmr.msra.gmra.mrb[0].mxu1 %v18842_v34 }
 0x1ae   :  { %832 = vmatpush1.bf16.msra.mxu0 %v16925_v30  ;;  %863 = vmatprep.mubr.bf16.mxu0 %v172_v33 }
 0x1af   :  { %833 = vmatprep.subr.bf16.mxu0 %v16930_v32  ;;  %16634 = vmatprep.mubr.msk.f32.mxu1 %vm18671_vm0, %v18670_v0 }
 0x1b2   :  { %834 = vmatpush1.bf16.msra.mxu0 %v16928_v35 }
 0x1b3   :  { %835 = vmatprep.subr.bf16.mxu0 %v16933_v36 }
 0x1b6   :  { %836 = vmatpush1.bf16.msra.mxu0 %v16931_v37 }
 0x1b7   :  { %837 = vmatprep.subr.bf16.mxu0 %v16936_v38 }
 0x1ba   :  { %838 = vmatpush1.bf16.msra.mxu0 %v16934_v39 }
 0x1bb   :  { %839 = vmatprep.subr.bf16.mxu0 %v16939_v40 }
 0x1be   :  { %840 = vmatpush1.bf16.msra.mxu0 %v16937_v41 }
 0x1bf   :  { %841 = vmatprep.subr.bf16.mxu0 %v16942_v42 }
 0x1c2   :  { %842 = vmatpush1.bf16.msra.mxu0 %v16940_v43 }
 0x1c3   :  { %843 = vmatprep.subr.bf16.mxu0 %v16945_v44 }
 0x1c6   :  { %844 = vmatpush1.bf16.msra.mxu0 %v16943_v45 }
 0x1c7   :  { %845 = vmatprep.subr.bf16.mxu0 %v16948_v46 }
 0x1ca   :  { %846 = vmatpush1.bf16.msra.mxu0 %v16946_v47 }
 0x1cb   :  { %847 = vmatprep.subr.bf16.mxu0 %v16951_v48 }
 0x1ce   :  { %848 = vmatpush1.bf16.msra.mxu0 %v16949_v49 }
 0x1cf   :  { %849 = vmatprep.subr.bf16.mxu0 %v16954_v50 }
 0x1d2   :  { %850 = vmatpush1.bf16.msra.mxu0 %v16952_v51 }
 0x1d3   :  { %851 = vmatprep.subr.bf16.mxu0 %v16957_v52 }
 0x1d6   :  { %852 = vmatpush1.bf16.msra.mxu0 %v16955_v53 }
 0x1d7   :  { %853 = vmatprep.subr.bf16.mxu0 %v16960_v54 }
 0x1da   :  { %854 = vmatpush1.bf16.msra.mxu0 %v16958_v55 }
 0x1db   :  { %855 = vmatprep.subr.bf16.mxu0 %v16963_v56 }
 0x1de   :  { %856 = vmatpush1.bf16.msra.mxu0 %v16961_v57 }
 0x1df   :  { %857 = vmatprep.subr.bf16.mxu0 %v16966_v58 }
 0x1e2   :  { %858 = vmatpush1.bf16.msra.mxu0 %v16964_v59 }
 0x1e3   :  { %859 = vmatprep.subr.bf16.mxu0 %v16969_v60 }
 0x1e6   :  { %860 = vmatpush1.bf16.msra.mxu0 %v16967_v61 }
 0x1e7   :  { %861 = vmatprep.subr.bf16.mxu0 %v16972_v62 }
 0x1ea   :  { %862 = vmatpush1.bf16.msra.mxu0 %v16970_v63 }
 0x1ed   :  { %864 = vmatmul.mubr.bf16.vlgmr.msra.gmra.mrb[4].mxu0 %v18842_v34 }
 0x280   :  { %v783_v1 = vpop.f32.mrb[0].mxu0  ;;  %v824_v2 = vpop.f32.mrb[0].mxu1 }
 0x281   :  { %879 = vrot.lane.b32.xlu1 %v824_v2, %s18672_s7  ;;  %v785_v3 = vpop.f32.mrb[1].mxu0  ;;  %v826_v4 = vpop.f32.mrb[1].mxu1  ;;  %16633 = vmatpush3.xpose.msk.msra.mxu1 %vm892_vm1, %v824_v2 }
 0x282   :  { %882 = vrot.lane.b32.xlu0 %v826_v4, %s18672_s7  ;;  %v787_v5 = vpop.f32.mrb[2].mxu0  ;;  %v828_v6 = vpop.f32.mrb[2].mxu1  ;;  %16637 = vmatprep.subr.mxu1 %v18670_v0 }
 0x283   :  { %v788_v7 = vpop.f32.mrb[3].mxu0  ;;  %v829_v8 = vpop.f32.mrb[3].mxu1 }
 0x284   :  { %16635 = vmatmul.mubr.msk.f32.vlgmr.msra.gmra.mrb[4].mxu1 %vm892_vm1, %v783_v1 }
 0x285   :  { %873 = vrot.lane.b32.xlu1 %v783_v1, %s18672_s7  ;;  %16639 = vmatprep.mubr.msk.f32.mxu1 %vm18671_vm0, %v18670_v0 }
 0x289   :  { %876 = vrot.lane.b32.xlu1 %v785_v3, %s18672_s7 }
 0x2c0   :  { %v18859_v9 = vpop.f32.mrb[4].mxu0 }
 0x2c1   :  { %v18861_v10 = vpop.f32.mrb[5].mxu0 }
 0x2c2   :  { %v869_v11 = vpop.f32.mrb[6].mxu0 }
 0x2c3   :  { %v870_v12 = vpop.f32.mrb[7].mxu0 }
 0x2f3   :  { %v880_v13 = vpop.permute.xlu1 %879 }
 0x2f4   :  { %16638 = vmatpush3.xpose.msk.msra.mxu1 %vm892_vm1, %v880_v13  ;;  %v883_v16 = vpop.permute.xlu0 %882  ;;  %v16973_v13 = vld [vmem:[#allocation6] ss:$8 sps:$4 sm:$0xff]  }
 0x2f5   :  { %16642 = vmatprep.subr.mxu1 %v18670_v0 }
 0x2f7   :  { %v874_v14 = vpop.permute.xlu1 %873 }
 0x2f8   :  { %16640 = vmatmul.mubr.msk.f32.vlgmr.msra.gmra.mrb[6].mxu1 %vm892_vm1, %v874_v14  ;;  %v16975_v14 = vld [vmem:[#allocation6 + $0x4] ss:$8 sps:$4 sm:$0xff]  }
 0x2f9   :  { %16643 = vmatpush3.xpose.msk.msra.mxu1 %vm892_vm1, %v826_v4  ;;  %16644 = vmatprep.mubr.msk.f32.mxu1 %vm18671_vm0, %v18670_v0 }
 0x2fa   :  { %16647 = vmatprep.subr.mxu1 %v18670_v0 }
 0x2fb   :  { %v877_v17 = vpop.permute.xlu1 %876 }
 0x2fc   :  { %16645 = vmatmul.mubr.msk.f32.vlgmr.msra.gmra.mrb[8].mxu1 %vm892_vm1, %v785_v3 }
 0x2fd   :  { %16648 = vmatpush3.xpose.msk.msra.mxu1 %vm892_vm1, %v883_v16  ;;  %16649 = vmatprep.mubr.msk.f32.mxu1 %vm18671_vm0, %v18670_v0  ;;  %v16978_v16 = vld [vmem:[#allocation6 + $0x14] ss:$8 sps:$4 sm:$0xff]  }
 0x2fe   :  { %16652 = vmatprep.subr.mxu1 %v18670_v0 }
 0x300   :  { %16650 = vmatmul.mubr.msk.f32.vlgmr.msra.gmra.mrb[10].mxu1 %vm892_vm1, %v877_v17 }
 0x301   :  { %16653 = vmatpush3.msra.mxu1 %v18859_v9  ;;  %16654 = vmatprep.mubr.msk.f32.mxu1 %vm18671_vm0, %v18670_v0 }
 0x302   :  { %16657 = vmatprep.subr.mxu1 %v18670_v0 }
 0x357   :  { %v963_v20 = vpop.f32.mrb[4].mxu1 }
 0x358   :  { %v1189_v22 = vmul.f32 0.0625, %v963_v20  ;;  %v16636_v23 = vpop.f32.mrb[5].mxu1  ;;  %v16976_v20 = vld [vmem:[#allocation6 + $0x10] ss:$8 sps:$4 sm:$0xff]  }
 0x359   :  { %v16984_v23 = vld [vmem:[#allocation6 + $0x34] ss:$8 sps:$4 sm:$0xff]  }
 0x35a   :  { %v1193_v24 = vadd.f32 %v1189_v22, %v113_v21  ;;  %v16979_v22 = vld [vmem:[#allocation6 + $0x20] ss:$8 sps:$4 sm:$0xff]  }
 0x35c   :  { %v1198_v25 = vsel %vm1197_vm2, %v1193_v24, -inf }
 0x35d   :  { %1199 = vmax.xlane.f32.xlu1 %v1198_v25  ;;  %v16987_v25 = vld [vmem:[#allocation6 + $0x44] ss:$8 sps:$4 sm:$0xff]  }
 0x3cb   :  { %v1037_v26 = vpop.f32.mrb[6].mxu1 }
 0x3cc   :  { %v1190_v27 = vmul.f32 0.0625, %v1037_v26  ;;  %v16641_v28 = vpop.f32.mrb[7].mxu1  ;;  %v16985_v26 = vld [vmem:[#allocation6 + $0x40] ss:$8 sps:$4 sm:$0xff]  }
 0x3cd   :  { %v16988_v28 = vld [vmem:[#allocation6 + $0x50] ss:$8 sps:$4 sm:$0xff]  }
 0x3ce   :  { %v1194_v29 = vadd.f32 %v1190_v27, %v113_v21  ;;  %v16990_v27 = vld [vmem:[#allocation6 + $0x54] ss:$8 sps:$4 sm:$0xff]  }
 0x3cf   :  { %v1111_v30 = vpop.f32.mrb[8].mxu1 }
 0x3d0   :  { %v1191_v31 = vmul.f32 0.0625, %v1111_v30  ;;  %v16646_v32 = vpop.f32.mrb[9].mxu1  ;;  %v1201_v33 = vsel %vm1197_vm2, %v1194_v29, -inf  ;;  %v16991_v30 = vld [vmem:[#allocation6 + $0x60] ss:$8 sps:$4 sm:$0xff]  }
 0x3d1   :  { %1202 = vmax.xlane.f32.xlu0 %v1201_v33  ;;  %v16994_v32 = vld [vmem:[#allocation6 + $0x70] ss:$8 sps:$4 sm:$0xff]   ;;  %v16999_v33 = vld [vmem:[#allocation6 + $0x84] ss:$8 sps:$4 sm:$0xff]  }
 0x3d2   :  { %v1195_v34 = vadd.f32 %v1191_v31, %v113_v21  ;;  %v16996_v31 = vld [vmem:[#allocation6 + $0x74] ss:$8 sps:$4 sm:$0xff]  }
 0x3d3   :  { %v1185_v35 = vpop.f32.mrb[10].mxu1 }
 0x3d4   :  { %v1192_v36 = vmul.f32 0.0625, %v1185_v35  ;;  %v16651_v37 = vpop.f32.mrb[11].mxu1  ;;  %v1204_v38 = vsel %vm1197_vm2, %v1195_v34, -inf  ;;  %v17002_v35 = vld [vmem:[#allocation6 + $0x94] ss:$8 sps:$4 sm:$0xff]  }
 0x3d5   :  { %1205 = vmax.xlane.f32.xlu1 %v1204_v38  ;;  %v17005_v37 = vld [vmem:[#allocation6 + $0xa4] ss:$8 sps:$4 sm:$0xff]   ;;  %v17003_v38 = vld [vmem:[#allocation6 + $0xa0] ss:$8 sps:$4 sm:$0xff]  }
 0x3d6   :  { %v1196_v39 = vadd.f32 %v1192_v36, %v113_v21  ;;  %v16981_v21 = vld [vmem:[#allocation6 + $0x24] ss:$8 sps:$4 sm:$0xff]   ;;  %v17000_v36 = vld [vmem:[#allocation6 + $0x90] ss:$8 sps:$4 sm:$0xff]  }
 0x3d8   :  { %v1207_v40 = vsel %vm1197_vm2, %v1196_v39, -inf }
 0x3d9   :  { %1208 = vmax.xlane.f32.xlu1 %v1207_v40  ;;  %v17006_v40 = vld [vmem:[#allocation6 + $0xb0] ss:$8 sps:$4 sm:$0xff]  }
 0x3ea   :  { %v1200_v41 = vpop.xlane.xlu1 %1199 }
 0x3eb   :  { %v1210_v42 = vsub.f32 %v1193_v24, %v1200_v41  ;;  %v16982_v24 = vld [vmem:[#allocation6 + $0x30] ss:$8 sps:$4 sm:$0xff]   ;;  %v17011_v41 = vld [vmem:[#allocation6 + $0xc4] ss:$8 sps:$4 sm:$0xff]  }
 0x3ed   :  { %v1214_v43 = vmul.f32 1.442695, %v1210_v42  ;;  %v17009_v42 = vld [vmem:[#allocation6 + $0xc0] ss:$8 sps:$4 sm:$0xff]  }
 0x3ef   :  { %18415 = vpow2.f32 %v1214_v43  ;;  %v17014_v43 = vld [vmem:[#allocation6 + $0xd4] ss:$8 sps:$4 sm:$0xff]  }
 0x3f9   :  { %v18416_v44 = vpop.eup %18415 }
 0x3fa   :  { %v1222_v45 = vsel %vm1197_vm2, %v18416_v44, 0.0 }
 0x3fb   :  { %1223 = vadd.xlane.f32.xlu1 %v1222_v45  ;;  %v17017_v45 = vld [vmem:[#allocation6 + $0xe4] ss:$8 sps:$4 sm:$0xff]  }
 0x45e   :  { %v1203_v46 = vpop.xlane.xlu0 %1202 }
 0x45f   :  { %v1211_v47 = vsub.f32 %v1194_v29, %v1203_v46  ;;  %v16993_v29 = vld [vmem:[#allocation6 + $0x64] ss:$8 sps:$4 sm:$0xff]   ;;  %v17015_v46 = vld [vmem:[#allocation6 + $0xe0] ss:$8 sps:$4 sm:$0xff]  }
 0x461   :  { %v1216_v48 = vmul.f32 1.442695, %v1211_v47  ;;  %v17020_v47 = vld [vmem:[#allocation6 + $0xf4] ss:$8 sps:$4 sm:$0xff]  }
 0x462   :  { %v1206_v49 = vpop.xlane.xlu1 %1205 }
 0x463   :  { %18417 = vpow2.f32 %v1216_v48  ;;  %v1212_v50 = vsub.f32 %v1195_v34, %v1206_v49  ;;  %v16997_v34 = vld [vmem:[#allocation6 + $0x80] ss:$8 sps:$4 sm:$0xff]   ;;  %v17018_v49 = vld [vmem:[#allocation6 + $0xf0] ss:$8 sps:$4 sm:$0xff]  }
 0x465   :  { %v1218_v51 = vmul.f32 1.442695, %v1212_v50 }
 0x466   :  { %v1209_v52 = vpop.xlane.xlu1 %1208 }
 0x467   :  { %18419 = vpow2.f32 %v1218_v51  ;;  %v1213_v53 = vsub.f32 %v1196_v39, %v1209_v52  ;;  %v17008_v39 = vld [vmem:[#allocation6 + $0xb4] ss:$8 sps:$4 sm:$0xff]  }
 0x469   :  { %v1220_v54 = vmul.f32 1.442695, %v1213_v53 }
 0x46b   :  { %18421 = vpow2.f32 %v1220_v54 }
 0x46d   :  { %v18418_v55 = vpop.eup %18417 }
 0x46e   :  { %v1225_v56 = vsel %vm1197_vm2, %v18418_v55, 0.0 }
 0x46f   :  { %1226 = vadd.xlane.f32.xlu1 %v1225_v56 }
 0x471   :  { %v18420_v57 = vpop.eup %18419 }
 0x472   :  { %v1228_v58 = vsel %vm1197_vm2, %v18420_v57, 0.0 }
 0x473   :  { %1229 = vadd.xlane.f32.xlu0 %v1228_v58 }
 0x475   :  { %v18422_v59 = vpop.eup %18421 }
 0x476   :  { %v1231_v60 = vsel %vm1197_vm2, %v18422_v59, 0.0 }
 0x477   :  { %1232 = vadd.xlane.f32.xlu1 %v1231_v60 }
 0x488   :  { %v1224_v61 = vpop.xlane.xlu1 %1223  ;;  %889 = vrot.lane.b32.xlu1 %v18861_v10, %s18672_s7 }
 0x489   :  { %18423 = vrcp.f32 %v1224_v61  ;;  %885 = vrot.lane.b32.xlu0 %v18859_v9, %s18672_s7 }
 0x493   :  { %v18424_v62 = vpop.eup %18423 }
 0x494   :  { %v1238_v63 = vmul.f32 %v18424_v62, %v18416_v44  ;;  %v17012_v44 = vld [vmem:[#allocation6 + $0xd0] ss:$8 sps:$4 sm:$0xff]  }
 0x496   :  { %16655 = vmatmul.mubr.msk.f32.vlgmr.msra.gmra.mrb[12].mxu1 %vm1197_vm2, %v1238_v63  ;;  %v18915_v63 = vsub.s32 4, %v18828_v15 }
 0x497   :  { %16659 = vmatprep.mubr.msk.f32.mxu1 %vm18671_vm0, %v18670_v0 }
 0x4fc   :  { %v1227_v1 = vpop.xlane.xlu1 %1226 }
 0x4fd   :  { %18425 = vrcp.f32 %v1227_v1  ;;  %v18917_v1 = vld [vmem:[#allocation2] sm:$0xff] }
 0x500   :  { %v1230_v2 = vpop.xlane.xlu0 %1229 }
 0x501   :  { %18427 = vrcp.f32 %v1230_v2  ;;  %v1581_v2 = vrot.slane %v18917_v1, %v18915_v63 }
 0x504   :  { %v1233_v3 = vpop.xlane.xlu1 %1232  ;;  %v886_v4 = vpop.permute.xlu0 %885 }
 0x505   :  { %18429 = vrcp.f32 %v1233_v3  ;;  %16658 = vmatpush3.msra.mxu1 %v886_v4  ;;  %v18921_v3 = vld [vmem:[#allocation2 + $0x8] sm:$0xff] }
 0x506   :  { %16662 = vmatprep.subr.mxu1 %v18670_v0  ;;  %v1585_v4 = vrot.slane %v18921_v3, %v18915_v63 }
 0x507   :  { %v18426_v5 = vpop.eup %18425 }
 0x508   :  { %v1239_v6 = vmul.f32 %v18426_v5, %v18418_v55  ;;  %v890_v9 = vpop.permute.xlu1 %889 }
 0x50a   :  { %16660 = vmatmul.mubr.msk.f32.vlgmr.msra.gmra.mrb[14].mxu1 %vm1197_vm2, %v1239_v6 }
 0x50b   :  { %v18428_v7 = vpop.eup %18427  ;;  %16663 = vmatpush3.msra.mxu1 %v18861_v10  ;;  %16664 = vmatprep.mubr.msk.f32.mxu1 %vm18671_vm0, %v18670_v0 }
 0x50c   :  { %v1240_v8 = vmul.f32 %v18428_v7, %v18420_v57  ;;  %16667 = vmatprep.subr.mxu1 %v18670_v0 }
 0x50e   :  { %16665 = vmatmul.mubr.msk.f32.vlgmr.msra.gmra.mrb[16].mxu1 %vm1197_vm2, %v1240_v8 }
 0x50f   :  { %v18430_v11 = vpop.eup %18429  ;;  %16668 = vmatpush3.msra.mxu1 %v890_v9  ;;  %16669 = vmatprep.mubr.msk.f32.mxu1 %vm18671_vm0, %v18670_v0 }
 0x510   :  { %v1241_v12 = vmul.f32 %v18430_v11, %v18422_v59  ;;  %1746 = vmatprep.subr.bf16.mxu1 %v16975_v14  ;;  %v18497_v11 = vld [vmem:[%s19460_s0] sm:$0xff]  ;;  %v18498_v14 = vld [vmem:[%s19460_s0 + $0x8] sm:$0xff] }
 0x512   :  { %16670 = vmatmul.mubr.msk.f32.vlgmr.msra.gmra.mrb[18].mxu1 %vm1197_vm2, %v1241_v12 }
 0x513   :  { %1747 = vmatpush1.bf16.msra.mxu1 %v16973_v13 }
 0x514   :  { %1748 = vmatprep.subr.bf16.mxu1 %v16978_v16 }
 0x517   :  { %1749 = vmatpush1.bf16.msra.mxu1 %v16976_v20  ;;  %v1831_v20 = vld [vmem:[#allocation7 + $0x20] sm:$0xff] }
 0x518   :  { %1750 = vmatprep.subr.bf16.mxu1 %v16981_v21  ;;  %v1828_v21 = vld [vmem:[#allocation7 + $0x8] sm:$0xff] }
 0x51b   :  { %1751 = vmatpush1.bf16.msra.mxu1 %v16979_v22 }
 0x51c   :  { %1752 = vmatprep.subr.bf16.mxu1 %v16984_v23 }
 0x51f   :  { %1753 = vmatpush1.bf16.msra.mxu1 %v16982_v24  ;;  %v1832_v24 = vld [vmem:[#allocation7 + $0x28] sm:$0xff] }
 0x520   :  { %1754 = vmatprep.subr.bf16.mxu1 %v16987_v25  ;;  %v1835_v25 = vld [vmem:[#allocation7 + $0x40] sm:$0xff] }
 0x523   :  { %1755 = vmatpush1.bf16.msra.mxu1 %v16985_v26  ;;  %v1839_v26 = vld [vmem:[#allocation7 + $0x60] sm:$0xff] }
 0x524   :  { %1756 = vmatprep.subr.bf16.mxu1 %v16990_v27  ;;  %v15094_v27 = vcombine.low %v1828_v21, %v1832_v24 }
 0x527   :  { %1757 = vmatpush1.bf16.msra.mxu1 %v16988_v28  ;;  %v15095_v28 = vcombine.high %v1828_v21, %v1832_v24  ;;  %v1888_v21 = vld [vmem:[#allocation7 + $0x1e8] sm:$0xff] }
 0x528   :  { %1758 = vmatprep.subr.bf16.mxu1 %v16993_v29  ;;  %v15101_v29 = vcombine.high %v1835_v25, %v1839_v26 }
 0x52b   :  { %1759 = vmatpush1.bf16.msra.mxu1 %v16991_v30  ;;  %v1836_v30 = vld [vmem:[#allocation7 + $0x48] sm:$0xff] }
 0x52c   :  { %1760 = vmatprep.subr.bf16.mxu1 %v16996_v31  ;;  %v1840_v31 = vld [vmem:[#allocation7 + $0x68] sm:$0xff] }
 0x52f   :  { %1761 = vmatpush1.bf16.msra.mxu1 %v16994_v32  ;;  %v1843_v32 = vld [vmem:[#allocation7 + $0x80] sm:$0xff] }
 0x530   :  { %1762 = vmatprep.subr.bf16.mxu1 %v16999_v33  ;;  %v15103_v33 = vcombine.high %v1836_v30, %v1840_v31 }
 0x533   :  { %1763 = vmatpush1.bf16.msra.mxu1 %v16997_v34  ;;  %v1847_v34 = vld [vmem:[#allocation7 + $0xa0] sm:$0xff] }
 0x534   :  { %1764 = vmatprep.subr.bf16.mxu1 %v17002_v35  ;;  %v1844_v35 = vld [vmem:[#allocation7 + $0x88] sm:$0xff] }
 0x537   :  { %1765 = vmatpush1.bf16.msra.mxu1 %v17000_v36  ;;  %v1848_v36 = vld [vmem:[#allocation7 + $0xa8] sm:$0xff] }
 0x538   :  { %1766 = vmatprep.subr.bf16.mxu1 %v17005_v37  ;;  %v15100_v37 = vcombine.low %v1835_v25, %v1839_v26  ;;  %v1891_v26 = vld [vmem:[#allocation7 + $0x200] sm:$0xff] }
 0x53b   :  { %1767 = vmatpush1.bf16.msra.mxu1 %v17003_v38  ;;  %v15102_v38 = vcombine.low %v1836_v30, %v1840_v31 }
 0x53c   :  { %1768 = vmatprep.subr.bf16.mxu1 %v17008_v39  ;;  %v15109_v39 = vcombine.high %v1843_v32, %v1847_v34 }
 0x53f   :  { %1769 = vmatpush1.bf16.msra.mxu1 %v17006_v40  ;;  %v15111_v40 = vcombine.high %v1844_v35, %v1848_v36 }
 0x540   :  { %1770 = vmatprep.subr.bf16.mxu1 %v17011_v41  ;;  %v1851_v41 = vld [vmem:[#allocation7 + $0xc0] sm:$0xff] }
 0x543   :  { %1771 = vmatpush1.bf16.msra.mxu1 %v17009_v42  ;;  %v1855_v42 = vld [vmem:[#allocation7 + $0xe0] sm:$0xff] }
 0x544   :  { %1772 = vmatprep.subr.bf16.mxu1 %v17014_v43  ;;  %v1852_v43 = vld [vmem:[#allocation7 + $0xc8] sm:$0xff] }
 0x547   :  { %1773 = vmatpush1.bf16.msra.mxu1 %v17012_v44  ;;  %v1856_v44 = vld [vmem:[#allocation7 + $0xe8] sm:$0xff] }
 0x548   :  { %1774 = vmatprep.subr.bf16.mxu1 %v17017_v45  ;;  %v15108_v45 = vcombine.low %v1843_v32, %v1847_v34  ;;  %v1899_v34 = vld [vmem:[#allocation7 + $0x240] sm:$0xff] }
 0x54b   :  { %1775 = vmatpush1.bf16.msra.mxu1 %v17015_v46  ;;  %v15110_v46 = vcombine.low %v1844_v35, %v1848_v36  ;;  %v1903_v35 = vld [vmem:[#allocation7 + $0x260] sm:$0xff]  ;;  %v1900_v36 = vld [vmem:[#allocation7 + $0x248] sm:$0xff] }
 0x54c   :  { %1776 = vmatprep.subr.bf16.mxu1 %v17020_v47  ;;  %v15117_v47 = vcombine.high %v1851_v41, %v1855_v42 }
 0x54f   :  { %1777 = vmatpush1.bf16.msra.mxu1 %v17018_v49  ;;  %v1859_v49 = vld [vmem:[#allocation7 + $0x100] sm:$0xff] }
 0x550   :  { %2668 = vmatprep.subr.bf16.mxu1 %v15095_v28  ;;  %v1892_v28 = vld [vmem:[#allocation7 + $0x208] sm:$0xff] }
 0x569   :  { %v18908_v10 = vpop.f32.mrb[12].mxu1 }
 0x56a   :  { %v16656_v17 = vpop.f32.mrb[13].mxu1 }
 0x56b   :  { %v1827_v17 = vld [vmem:[#allocation7] sm:$0xff] }
 0x56c   :  { %v15092_v22 = vcombine.low %v1827_v17, %v1831_v20  ;;  %v15093_v23 = vcombine.high %v1827_v17, %v1831_v20  ;;  %v1887_v17 = vld [vmem:[#allocation7 + $0x1e0] sm:$0xff]  ;;  %v1884_v20 = vld [vmem:[#allocation7 + $0x1c8] sm:$0xff] }
 0x56d   :  { %v15151_v25 = vcombine.high %v1884_v20, %v1888_v21  ;;  %v15150_v31 = vcombine.low %v1884_v20, %v1888_v21 }
 0x56e   :  { %2627 = vmatprep.subr.bf16.mxu0 %v15093_v23 }
 0x56f   :  { %2628 = vmatpush1.bf16.msra.mxu0 %v15092_v22 }
 0x570   :  { %2629 = vmatprep.subr.bf16.mxu0 %v15101_v29  ;;  %v1896_v29 = vld [vmem:[#allocation7 + $0x228] sm:$0xff] }
 0x573   :  { %2630 = vmatpush1.bf16.msra.mxu0 %v15100_v37  ;;  %v1904_v37 = vld [vmem:[#allocation7 + $0x268] sm:$0xff] }
 0x574   :  { %2631 = vmatprep.subr.bf16.mxu0 %v15109_v39  ;;  %v15158_v39 = vcombine.low %v1892_v28, %v1896_v29 }
 0x577   :  { %2632 = vmatpush1.bf16.msra.mxu0 %v15108_v45  ;;  %v1912_v45 = vld [vmem:[#allocation7 + $0x2a8] sm:$0xff] }
 0x578   :  { %2633 = vmatprep.subr.bf16.mxu0 %v15117_v47  ;;  %v15166_v47 = vcombine.low %v1900_v36, %v1904_v37 }
 0x5dd   :  { %v1384_v48 = vpop.f32.mrb[14].mxu1 }
 0x5de   :  { %v16661_v50 = vpop.f32.mrb[15].mxu1 }
 0x5df   :  { %v1863_v50 = vld [vmem:[#allocation7 + $0x120] sm:$0xff] }
 0x5e1   :  { %v1457_v51 = vpop.f32.mrb[16].mxu1 }
 0x5e2   :  { %v16666_v52 = vpop.f32.mrb[17].mxu1 }
 0x5e3   :  { %v1864_v52 = vld [vmem:[#allocation7 + $0x128] sm:$0xff] }
 0x5e5   :  { %v1530_v53 = vpop.f32.mrb[18].mxu1 }
 0x5e6   :  { %v16809_v54 = vpack.i.bf16 %v1384_v48, %v1530_v53  ;;  %v16671_v55 = vpop.f32.mrb[19].mxu1  ;;  %v15119_v48 = vcombine.high %v1852_v43, %v1856_v44  ;;  %v15116_v53 = vcombine.low %v1851_v41, %v1855_v42  ;;  %v15167_v41 = vcombine.high %v1900_v36, %v1904_v37  ;;  %v1907_v42 = vld [vmem:[#allocation7 + $0x280] sm:$0xff]  ;;  %v1948_v36 = vld [vmem:[#allocation7 + $0x3c8] sm:$0xff] }
 0x5e7   :  { %v15125_v55 = vcombine.high %v1859_v49, %v1863_v50  ;;  %v1952_v37 = vld [vmem:[#allocation7 + $0x3e8] sm:$0xff] }
 0x5e8   :  { %16810 = vrot.lane.b32.xlu1 %v16809_v54, %s18672_s7  ;;  %v15118_v54 = vcombine.low %v1852_v43, %v1856_v44  ;;  %2634 = vmatpush1.bf16.msra.mxu0 %v15116_v53  ;;  %v1911_v43 = vld [vmem:[#allocation7 + $0x2a0] sm:$0xff]  ;;  %v1908_v44 = vld [vmem:[#allocation7 + $0x288] sm:$0xff] }
 0x5e9   :  { %2635 = vmatprep.subr.bf16.mxu0 %v15125_v55 }
 0x65a   :  { %v16811_v56 = vpop.permute.xlu1 %16810 }
 0x65b   :  { %v16813_v57 = vunpack.i.h.bf16 %v16811_v56  ;;  %v16812_v58 = vunpack.i.l.bf16 %v16811_v56 }
 0x65d   :  { %v1542_v59 = vsel %vm892_vm1, %v18908_v10, %v16813_v57  ;;  %v1543_v60 = vsel %vm892_vm1, %v1457_v51, %v16812_v58  ;;  %v1860_v51 = vld [vmem:[#allocation7 + $0x108] sm:$0xff]  ;;  %v1867_v57 = vld [vmem:[#allocation7 + $0x140] sm:$0xff] }
 0x65e   :  { %v1544_v61 = vpack.c.bf16 %v1542_v59, %v1542_v59  ;;  %v1545_v62 = vpack.c.bf16 %v1543_v60, %v1543_v60  ;;  %v15127_v56 = vcombine.high %v1860_v51, %v1864_v52  ;;  %v1871_v58 = vld [vmem:[#allocation7 + $0x160] sm:$0xff]  ;;  %v1868_v59 = vld [vmem:[#allocation7 + $0x148] sm:$0xff] }
 0x65f   :  { %v1872_v60 = vld [vmem:[#allocation7 + $0x168] sm:$0xff] }
 0x660   :  { %1778 = vmatprep.mubr.bf16.mxu1 %v1545_v62  ;;  %v15126_v62 = vcombine.low %v1860_v51, %v1864_v52  ;;  %v15174_v51 = vcombine.low %v1908_v44, %v1912_v45 }
 0x661   :  { %1779 = vmatmul.mubr.bf16.vlgmr.msra.gmra.mrb[20].mxu1 %v1544_v61  ;;  %v15124_v61 = vcombine.low %v1859_v49, %v1863_v50  ;;  %v15175_v49 = vcombine.high %v1908_v44, %v1912_v45  ;;  %v15172_v50 = vcombine.low %v1907_v42, %v1911_v43  ;;  %v1829_v44 = vld [vmem:[#allocation7 + $0x10] sm:$0xff] }
 0x662   :  { %2669 = vmatpush1.bf16.msra.mxu1 %v15094_v27  ;;  %v1895_v27 = vld [vmem:[#allocation7 + $0x220] sm:$0xff]  ;;  %v1833_v45 = vld [vmem:[#allocation7 + $0x30] sm:$0xff] }
 0x663   :  { %2670 = vmatprep.subr.bf16.mxu1 %v15103_v33  ;;  %2636 = vmatpush1.bf16.msra.mxu0 %v15124_v61  ;;  %v15157_v32 = vcombine.high %v1891_v26, %v1895_v27  ;;  %v15159_v33 = vcombine.high %v1892_v28, %v1896_v29  ;;  %v1916_v61 = vld [vmem:[#allocation7 + $0x2c8] sm:$0xff] }
 0x664   :  { %v1940_v28 = vld [vmem:[#allocation7 + $0x388] sm:$0xff] }
 0x665   :  { %v1944_v29 = vld [vmem:[#allocation7 + $0x3a8] sm:$0xff] }
 0x666   :  { %2671 = vmatpush1.bf16.msra.mxu1 %v15102_v38  ;;  %v15156_v38 = vcombine.low %v1891_v26, %v1895_v27  ;;  %v1939_v26 = vld [vmem:[#allocation7 + $0x380] sm:$0xff] }
 0x667   :  { %2672 = vmatprep.subr.bf16.mxu1 %v15111_v40  ;;  %v15165_v40 = vcombine.high %v1899_v34, %v1903_v35  ;;  %v1943_v27 = vld [vmem:[#allocation7 + $0x3a0] sm:$0xff] }
 0x66a   :  { %2673 = vmatpush1.bf16.msra.mxu1 %v15110_v46  ;;  %v15164_v46 = vcombine.low %v1899_v34, %v1903_v35  ;;  %v1947_v34 = vld [vmem:[#allocation7 + $0x3c0] sm:$0xff] }
 0x66b   :  { %2674 = vmatprep.subr.bf16.mxu1 %v15119_v48  ;;  %v15173_v48 = vcombine.high %v1907_v42, %v1911_v43  ;;  %v1951_v35 = vld [vmem:[#allocation7 + $0x3e0] sm:$0xff]  ;;  %v15214_v43 = vcombine.low %v1948_v36, %v1952_v37 }
 0x66c   :  { %v15212_v42 = vcombine.low %v1947_v34, %v1951_v35 }
 0x66e   :  { %2675 = vmatpush1.bf16.msra.mxu1 %v15118_v54 }
 0x66f   :  { %2676 = vmatprep.subr.bf16.mxu1 %v15127_v56 }
 0x672   :  { %2677 = vmatpush1.bf16.msra.mxu1 %v15126_v62 }
 0x734   :  { %v1780_v5 = vpop.f32.mrb[20].mxu1 }
 0x735   :  { %v1781_v6 = vadd.f32 %v1780_v5, %v1581_v2  ;;  %v1782_v7 = vpop.f32.mrb[21].mxu1  ;;  %v15133_v2 = vcombine.high %v1867_v57, %v1871_v58  ;;  %v1875_v5 = vld [vmem:[#allocation7 + $0x180] sm:$0xff] }
 0x736   :  { %v1783_v8 = vadd.f32 %v1782_v7, %v1585_v4  ;;  %v1784_v9 = vpop.f32.mrb[22].mxu1  ;;  %v15135_v4 = vcombine.high %v1868_v59, %v1872_v60  ;;  %v1876_v7 = vld [vmem:[#allocation7 + $0x188] sm:$0xff] }
 0x737   :  { %v18928_v12 = vadd.f32 %v18497_v11, %v1781_v6  ;;  %v1785_v13 = vpop.f32.mrb[23].mxu1  ;;  %v1879_v6 = vld [vmem:[#allocation7 + $0x1a0] sm:$0xff]  ;;  %v15132_v9 = vcombine.low %v1867_v57, %v1871_v58  ;;  %2637 = vmatprep.subr.bf16.mxu0 %v15133_v2  ;;  %v15134_v11 = vcombine.low %v1868_v59, %v1872_v60  ;;  %v1920_v2 = vld [vmem:[#allocation7 + $0x2e8] sm:$0xff] }
 0x738   :  { %v18933_v10 = vadd.f32 %v18498_v14, %v1783_v8  ;;  %v1880_v8 = vld [vmem:[#allocation7 + $0x1a8] sm:$0xff]  ;;  %v15141_v13 = vcombine.high %v1875_v5, %v1879_v6  ;;  %2678 = vmatprep.subr.bf16.mxu1 %v15135_v4  ;;  %v15140_v22 = vcombine.low %v1875_v5, %v1879_v6  ;;  %v1915_v59 = vld [vmem:[#allocation7 + $0x2c0] sm:$0xff]  ;;  %v15182_v5 = vcombine.low %v1916_v61, %v1920_v2 }
 0x739   :  { %v15143_v14 = vcombine.high %v1876_v7, %v1880_v8  ;;  %2638 = vmatpush1.bf16.msra.mxu0 %v15132_v9  ;;  %2679 = vmatpush1.bf16.msra.mxu1 %v15134_v11  ;;  %v15142_v23 = vcombine.low %v1876_v7, %v1880_v8  ;;  %v1919_v60 = vld [vmem:[#allocation7 + $0x2e0] sm:$0xff]  ;;  %v15183_v6 = vcombine.high %v1916_v61, %v1920_v2  ;;  %v1924_v9 = vld [vmem:[#allocation7 + $0x308] sm:$0xff] }
 0x73a   :  { %v1789_v16 = vadd.f32 %v18933_v10, %v18928_v12  ;;  %2639 = vmatprep.subr.bf16.mxu0 %v15141_v13  ;;  %v15181_v62 = vcombine.high %v1915_v59, %v1919_v60  ;;  %v15180_v4 = vcombine.low %v1915_v59, %v1919_v60  ;;  %v1923_v7 = vld [vmem:[#allocation7 + $0x300] sm:$0xff] }
 0x73b   :  { %2680 = vmatprep.subr.bf16.mxu1 %v15143_v14  ;;  %v1927_v8 = vld [vmem:[#allocation7 + $0x320] sm:$0xff]  ;;  %v1928_v14 = vld [vmem:[#allocation7 + $0x328] sm:$0xff] }
 0x73c   :  { %1790 = vadd.xlane.f32.xlu0 %v1789_v16  ;;  %v1883_v16 = vld [vmem:[#allocation7 + $0x1c0] sm:$0xff]  ;;  %v15188_v11 = vcombine.low %v1923_v7, %v1927_v8  ;;  %v15189_v13 = vcombine.high %v1923_v7, %v1927_v8  ;;  %v15190_v20 = vcombine.low %v1924_v9, %v1928_v14  ;;  %v15191_v21 = vcombine.high %v1924_v9, %v1928_v14  ;;  %v1838_v14 = vld [vmem:[#allocation7 + $0x58] sm:$0xff] }
 0x73d   :  { %v15149_v24 = vcombine.high %v1883_v16, %v1887_v17  ;;  %2640 = vmatpush1.bf16.msra.mxu0 %v15140_v22  ;;  %v15148_v30 = vcombine.low %v1883_v16, %v1887_v17  ;;  %2681 = vmatpush1.bf16.msra.mxu1 %v15142_v23  ;;  %v1931_v16 = vld [vmem:[#allocation7 + $0x340] sm:$0xff]  ;;  %v1932_v23 = vld [vmem:[#allocation7 + $0x348] sm:$0xff] }
 0x73e   :  { %2682 = vmatprep.subr.bf16.mxu1 %v15151_v25  ;;  %v1935_v17 = vld [vmem:[#allocation7 + $0x360] sm:$0xff] }
 0x73f   :  { %2641 = vmatprep.subr.bf16.mxu0 %v15149_v24  ;;  %v15197_v22 = vcombine.high %v1931_v16, %v1935_v17  ;;  %v1936_v24 = vld [vmem:[#allocation7 + $0x368] sm:$0xff] }
 0x740   :  { %v15199_v25 = vcombine.high %v1932_v23, %v1936_v24 }
 0x741   :  { %2642 = vmatpush1.bf16.msra.mxu0 %v15148_v30  ;;  %2683 = vmatpush1.bf16.msra.mxu1 %v15150_v31  ;;  %v15196_v30 = vcombine.low %v1931_v16, %v1935_v17  ;;  %v15198_v31 = vcombine.low %v1932_v23, %v1936_v24  ;;  %v1842_v16 = vld [vmem:[#allocation7 + $0x78] sm:$0xff] }
 0x742   :  { %2643 = vmatprep.subr.bf16.mxu0 %v15157_v32  ;;  %2684 = vmatprep.subr.bf16.mxu1 %v15159_v33  ;;  %v15205_v32 = vcombine.high %v1939_v26, %v1943_v27  ;;  %v15207_v33 = vcombine.high %v1940_v28, %v1944_v29  ;;  %v1850_v23 = vld [vmem:[#allocation7 + $0xb8] sm:$0xff]  ;;  %v15106_v24 = vcombine.low %v1838_v14, %v1842_v16 }
 0x745   :  { %2644 = vmatpush1.bf16.msra.mxu0 %v15156_v38  ;;  %2685 = vmatpush1.bf16.msra.mxu1 %v15158_v39  ;;  %v15204_v38 = vcombine.low %v1939_v26, %v1943_v27  ;;  %v15206_v39 = vcombine.low %v1940_v28, %v1944_v29  ;;  %v1853_v27 = vld [vmem:[#allocation7 + $0xd0] sm:$0xff]  ;;  %v1854_v29 = vld [vmem:[#allocation7 + $0xd8] sm:$0xff] }
 0x746   :  { %2645 = vmatprep.subr.bf16.mxu0 %v15165_v40  ;;  %2686 = vmatprep.subr.bf16.mxu1 %v15167_v41  ;;  %v15213_v40 = vcombine.high %v1947_v34, %v1951_v35  ;;  %v15215_v41 = vcombine.high %v1948_v36, %v1952_v37  ;;  %v1857_v28 = vld [vmem:[#allocation7 + $0xf0] sm:$0xff]  ;;  %v1862_v37 = vld [vmem:[#allocation7 + $0x118] sm:$0xff] }
 0x747   :  { %v1861_v35 = vld [vmem:[#allocation7 + $0x110] sm:$0xff] }
 0x748   :  { %v1865_v36 = vld [vmem:[#allocation7 + $0x130] sm:$0xff] }
 0x749   :  { %2646 = vmatpush1.bf16.msra.mxu0 %v15164_v46  ;;  %2687 = vmatpush1.bf16.msra.mxu1 %v15166_v47  ;;  %v1830_v46 = vld [vmem:[#allocation7 + $0x18] sm:$0xff]  ;;  %v15097_v47 = vcombine.high %v1829_v44, %v1833_v45 }
 0x74a   :  { %2647 = vmatprep.subr.bf16.mxu0 %v15173_v48  ;;  %2688 = vmatprep.subr.bf16.mxu1 %v15175_v49  ;;  %v1834_v48 = vld [vmem:[#allocation7 + $0x38] sm:$0xff]  ;;  %v15096_v49 = vcombine.low %v1829_v44, %v1833_v45  ;;  %v1873_v44 = vld [vmem:[#allocation7 + $0x170] sm:$0xff] }
 0x74b   :  { %v1870_v45 = vld [vmem:[#allocation7 + $0x158] sm:$0xff] }
 0x74d   :  { %2648 = vmatpush1.bf16.msra.mxu0 %v15172_v50  ;;  %2689 = vmatpush1.bf16.msra.mxu1 %v15174_v51  ;;  %v15098_v50 = vcombine.low %v1830_v46, %v1834_v48  ;;  %v15099_v51 = vcombine.high %v1830_v46, %v1834_v48  ;;  %v1874_v46 = vld [vmem:[#allocation7 + $0x178] sm:$0xff] }
 0x74e   :  { %2649 = vmatprep.subr.bf16.mxu0 %v15181_v62  ;;  %2690 = vmatprep.subr.bf16.mxu1 %v15183_v6 }
 0x751   :  { %2650 = vmatpush1.bf16.msra.mxu0 %v15180_v4  ;;  %2691 = vmatpush1.bf16.msra.mxu1 %v15182_v5 }
 0x752   :  { %2651 = vmatprep.subr.bf16.mxu0 %v15189_v13  ;;  %2692 = vmatprep.subr.bf16.mxu1 %v15191_v21  ;;  %v1841_v13 = vld [vmem:[#allocation7 + $0x70] sm:$0xff]  ;;  %v15107_v21 = vcombine.high %v1838_v14, %v1842_v16  ;;  %v1894_v16 = vld [vmem:[#allocation7 + $0x218] sm:$0xff] }
 0x753   :  { %v1897_v14 = vld [vmem:[#allocation7 + $0x230] sm:$0xff] }
 0x755   :  { %2652 = vmatpush1.bf16.msra.mxu0 %v15188_v11  ;;  %2693 = vmatpush1.bf16.msra.mxu1 %v15190_v20  ;;  %v1837_v11 = vld [vmem:[#allocation7 + $0x50] sm:$0xff] }
 0x756   :  { %2653 = vmatprep.subr.bf16.mxu0 %v15197_v22  ;;  %2694 = vmatprep.subr.bf16.mxu1 %v15199_v25  ;;  %v1846_v22 = vld [vmem:[#allocation7 + $0x98] sm:$0xff] }
 0x757   :  { %v15115_v26 = vcombine.high %v1846_v22, %v1850_v23 }
 0x759   :  { %2654 = vmatpush1.bf16.msra.mxu0 %v15196_v30  ;;  %2695 = vmatpush1.bf16.msra.mxu1 %v15198_v31  ;;  %v1858_v30 = vld [vmem:[#allocation7 + $0xf8] sm:$0xff] }
 0x75a   :  { %2655 = vmatprep.subr.bf16.mxu0 %v15205_v32  ;;  %2696 = vmatprep.subr.bf16.mxu1 %v15207_v33  ;;  %v15114_v32 = vcombine.low %v1846_v22, %v1850_v23  ;;  %v15121_v33 = vcombine.high %v1853_v27, %v1857_v28  ;;  %v15123_v34 = vcombine.high %v1854_v29, %v1858_v30  ;;  %v1901_v22 = vld [vmem:[#allocation7 + $0x250] sm:$0xff] }
 0x75b   :  { %v1905_v23 = vld [vmem:[#allocation7 + $0x270] sm:$0xff] }
 0x75d   :  { %2656 = vmatpush1.bf16.msra.mxu0 %v15204_v38  ;;  %2697 = vmatpush1.bf16.msra.mxu1 %v15206_v39  ;;  %v1866_v38 = vld [vmem:[#allocation7 + $0x138] sm:$0xff]  ;;  %v15120_v39 = vcombine.low %v1853_v27, %v1857_v28  ;;  %v15169_v27 = vcombine.high %v1901_v22, %v1905_v23 }
 0x75e   :  { %2657 = vmatprep.subr.bf16.mxu0 %v15213_v40  ;;  %2698 = vmatprep.subr.bf16.mxu1 %v15215_v41  ;;  %v15122_v40 = vcombine.low %v1854_v29, %v1858_v30  ;;  %v15129_v41 = vcombine.high %v1861_v35, %v1865_v36  ;;  %v15130_v48 = vcombine.low %v1862_v37, %v1866_v38  ;;  %v1909_v29 = vld [vmem:[#allocation7 + $0x290] sm:$0xff] }
 0x75f   :  { %v1913_v30 = vld [vmem:[#allocation7 + $0x2b0] sm:$0xff] }
 0x761   :  { %2658 = vmatpush1.bf16.msra.mxu0 %v15212_v42  ;;  %2699 = vmatpush1.bf16.msra.mxu1 %v15214_v43  ;;  %v15131_v42 = vcombine.high %v1862_v37, %v1866_v38  ;;  %v1869_v43 = vld [vmem:[#allocation7 + $0x150] sm:$0xff] }
 0x762   :  { %2709 = vmatprep.subr.bf16.mxu0 %v15097_v47  ;;  %2750 = vmatprep.subr.bf16.mxu1 %v15099_v51  ;;  %v15128_v47 = vcombine.low %v1861_v35, %v1865_v36  ;;  %v1877_v51 = vld [vmem:[#allocation7 + $0x190] sm:$0xff]  ;;  %v15177_v35 = vcombine.high %v1909_v29, %v1913_v30 }
 0x763   :  { %v1917_v37 = vld [vmem:[#allocation7 + $0x2d0] sm:$0xff] }
 0x764   :  { %v1921_v38 = vld [vmem:[#allocation7 + $0x2f0] sm:$0xff] }
 0x7c9   :  { %v1791_v52 = vpop.xlane.xlu0 %1790 }
 0x7ca   :  { %v1792_v53 = vmul.f32 0.00390625, %v1791_v52 }
 0x7cc   :  { %v18938_v54 = vsub.f32 %v18928_v12, %v1792_v53  ;;  %v18941_v55 = vsub.f32 %v18933_v10, %v1792_v53 }
 0x7ce   :  { %v1795_v56 = vmul.f32 %v18938_v54, %v18938_v54  ;;  %v1796_v57 = vmul.f32 %v18941_v55, %v18941_v55 }
 0x7d0   :  { %v1797_v58 = vadd.f32 %v1796_v57, %v1795_v56  ;;  %v18948_v57 = vsub.s32 2, %v18828_v15 }
 0x7d2   :  { %1798 = vadd.xlane.f32.xlu1 %v1797_v58  ;;  %v18951_v58 = vsub.s32 3, %v18828_v15  ;;  %v1812_v59 = vrot.slane %v18921_v3, %v18948_v57  ;;  %v1808_v60 = vrot.slane %v18917_v1, %v18948_v57 }
 0x7d4   :  { %v1822_v2 = vrot.slane %v18921_v3, %v18951_v58  ;;  %v1818_v5 = vrot.slane %v18917_v1, %v18951_v58  ;;  %v15105_v3 = vcombine.high %v1837_v11, %v1841_v13  ;;  %v15104_v1 = vcombine.low %v1837_v11, %v1841_v13  ;;  %v1893_v13 = vld [vmem:[#allocation7 + $0x210] sm:$0xff] }
 0x85f   :  { %v1799_v52 = vpop.xlane.xlu1 %1798 }
 0x860   :  { %v1800_v53 = vmul.f32 0.00390625, %v1799_v52  ;;  %v1881_v52 = vld [vmem:[#allocation7 + $0x1b0] sm:$0xff] }
 0x862   :  { %v1801_v56 = vadd.f32 1e-05, %v1800_v53  ;;  %v1878_v53 = vld [vmem:[#allocation7 + $0x198] sm:$0xff] }
 0x864   :  { %18431 = vrsqrt.f32 %v1801_v56  ;;  %v1882_v56 = vld [vmem:[#allocation7 + $0x1b8] sm:$0xff] }
 0x86e   :  { %v18432_v61 = vpop.eup %18431 }
 0x86f   :  { %v1804_v62 = vmul.f32 %v18432_v61, %v18941_v55  ;;  %v1803_v4 = vmul.f32 %v18432_v61, %v18938_v54  ;;  %v1845_v55 = vld [vmem:[#allocation7 + $0x90] sm:$0xff]  ;;  %v15145_v61 = vcombine.high %v1877_v51, %v1881_v52 }
 0x870   :  { %v1849_v54 = vld [vmem:[#allocation7 + $0xb0] sm:$0xff] }
 0x871   :  { %v1814_v6 = vmul.f32 %v1812_v59, %v1804_v62  ;;  %v1813_v7 = vmul.f32 %v1808_v60, %v1803_v4  ;;  %v15113_v25 = vcombine.high %v1845_v55, %v1849_v54  ;;  %v15112_v31 = vcombine.low %v1845_v55, %v1849_v54  ;;  %v1889_v4 = vld [vmem:[#allocation7 + $0x1f0] sm:$0xff] }
 0x872   :  { %v15136_v59 = vcombine.low %v1869_v43, %v1873_v44  ;;  %v15138_v60 = vcombine.low %v1870_v45, %v1874_v46  ;;  %v15147_v62 = vcombine.high %v1878_v53, %v1882_v56 }
 0x873   :  { %v1824_v8 = vadd.f32 %v1822_v2, %v1814_v6  ;;  %v1823_v9 = vadd.f32 %v1818_v5, %v1813_v7  ;;  %v1885_v2 = vld [vmem:[#allocation7 + $0x1d0] sm:$0xff]  ;;  %v1886_v5 = vld [vmem:[#allocation7 + $0x1d8] sm:$0xff]  ;;  %v15144_v7 = vcombine.low %v1877_v51, %v1881_v52 }
 0x874   :  { %v1890_v6 = vld [vmem:[#allocation7 + $0x1f8] sm:$0xff]  ;;  %v15152_v55 = vcombine.low %v1885_v2, %v1889_v4 }
 0x875   :  { %v1826_v17 = vpack.c.bf16 %v1824_v8, %v1824_v8  ;;  %v18963_v20 = vpack.c.bf16 %v1823_v9, %v1823_v9  ;;  %v15146_v8 = vcombine.low %v1878_v53, %v1882_v56  ;;  %v15153_v9 = vcombine.high %v1885_v2, %v1889_v4  ;;  %v1933_v53 = vld [vmem:[#allocation7 + $0x350] sm:$0xff] }
 0x876   :  { %v15155_v11 = vcombine.high %v1886_v5, %v1890_v6  ;;  %v1937_v56 = vld [vmem:[#allocation7 + $0x370] sm:$0xff] }
 0x877   :  { %2659 = vmatprep.mubr.bf16.mxu0 %v1826_v17  ;;  %2700 = vmatprep.mubr.bf16.mxu1 %v1826_v17  ;;  %v15201_v2 = vcombine.high %v1933_v53, %v1937_v56 }
 0x878   :  { %2660 = vmatmul.mubr.bf16.vlgmr.msra.gmra.mrb[8].mxu0 %v18963_v20  ;;  %2701 = vmatmul.mubr.bf16.vlgmr.msra.gmra.mrb[24].mxu1 %v18963_v20 }
 0x879   :  { %2710 = vmatpush1.bf16.msra.mxu0 %v15096_v49  ;;  %2751 = vmatpush1.bf16.msra.mxu1 %v15098_v50  ;;  %v15137_v49 = vcombine.high %v1869_v43, %v1873_v44  ;;  %v15139_v50 = vcombine.high %v1870_v45, %v1874_v46  ;;  %v15185_v43 = vcombine.high %v1917_v37, %v1921_v38  ;;  %v1925_v45 = vld [vmem:[#allocation7 + $0x310] sm:$0xff] }
 0x87a   :  { %2741 = vmatprep.mubr.bf16.mxu0 %v1826_v17  ;;  %2782 = vmatprep.mubr.bf16.mxu1 %v1826_v17  ;;  %v1898_v17 = vld [vmem:[#allocation7 + $0x238] sm:$0xff]  ;;  %v1929_v46 = vld [vmem:[#allocation7 + $0x330] sm:$0xff] }
 0x87b   :  { %2711 = vmatprep.subr.bf16.mxu0 %v15105_v3  ;;  %2752 = vmatprep.subr.bf16.mxu1 %v15107_v21  ;;  %v15154_v3 = vcombine.low %v1886_v5, %v1890_v6  ;;  %v15161_v21 = vcombine.high %v1893_v13, %v1897_v14  ;;  %v15163_v54 = vcombine.high %v1894_v16, %v1898_v17  ;;  %v1941_v5 = vld [vmem:[#allocation7 + $0x390] sm:$0xff] }
 0x87c   :  { %v15193_v51 = vcombine.high %v1925_v45, %v1929_v46  ;;  %v1945_v6 = vld [vmem:[#allocation7 + $0x3b0] sm:$0xff] }
 0x87d   :  { %2712 = vmatpush1.bf16.msra.mxu0 %v15104_v1  ;;  %2753 = vmatpush1.bf16.msra.mxu1 %v15106_v24  ;;  %v1902_v1 = vld [vmem:[#allocation7 + $0x258] sm:$0xff] }
 0x87e   :  { %2713 = vmatprep.subr.bf16.mxu0 %v15113_v25  ;;  %2754 = vmatprep.subr.bf16.mxu1 %v15115_v26  ;;  %v1906_v24 = vld [vmem:[#allocation7 + $0x278] sm:$0xff]  ;;  %v15160_v25 = vcombine.low %v1893_v13, %v1897_v14  ;;  %v15162_v26 = vcombine.low %v1894_v16, %v1898_v17  ;;  %v15209_v13 = vcombine.high %v1941_v5, %v1945_v6  ;;  %v1949_v16 = vld [vmem:[#allocation7 + $0x3d0] sm:$0xff] }
 0x87f   :  { %v15171_v28 = vcombine.high %v1902_v1, %v1906_v24  ;;  %v1953_v17 = vld [vmem:[#allocation7 + $0x3f0] sm:$0xff] }
 0x881   :  { %2714 = vmatpush1.bf16.msra.mxu0 %v15112_v31  ;;  %2755 = vmatpush1.bf16.msra.mxu1 %v15114_v32  ;;  %v1910_v31 = vld [vmem:[#allocation7 + $0x298] sm:$0xff] }
 0x882   :  { %2715 = vmatprep.subr.bf16.mxu0 %v15121_v33  ;;  %2756 = vmatprep.subr.bf16.mxu1 %v15123_v34  ;;  %v1914_v32 = vld [vmem:[#allocation7 + $0x2b8] sm:$0xff]  ;;  %v15168_v33 = vcombine.low %v1901_v22, %v1905_v23  ;;  %v15170_v34 = vcombine.low %v1902_v1, %v1906_v24  ;;  %v15217_v22 = vcombine.high %v1949_v16, %v1953_v17 }
 0x883   :  { %v15179_v36 = vcombine.high %v1910_v31, %v1914_v32  ;;  %v15216_v1 = vcombine.low %v1949_v16, %v1953_v17  ;;  %v17092_v16 = vld [vmem:[#allocation9 + $0x1b4] ss:$8 sps:$4 sm:$0xff]   ;;  %v17087_v17 = vld [vmem:[#allocation9 + $0xb0] ss:$8 sps:$4 sm:$0xff]  }
 0x885   :  { %2716 = vmatpush1.bf16.msra.mxu0 %v15120_v39  ;;  %2757 = vmatpush1.bf16.msra.mxu1 %v15122_v40  ;;  %v1918_v39 = vld [vmem:[#allocation7 + $0x2d8] sm:$0xff] }
 0x886   :  { %2717 = vmatprep.subr.bf16.mxu0 %v15129_v41  ;;  %2758 = vmatprep.subr.bf16.mxu1 %v15131_v42  ;;  %v1922_v40 = vld [vmem:[#allocation7 + $0x2f8] sm:$0xff]  ;;  %v15176_v41 = vcombine.low %v1909_v29, %v1913_v30  ;;  %v15178_v42 = vcombine.low %v1910_v31, %v1914_v32 }
 0x887   :  { %v15187_v44 = vcombine.high %v1918_v39, %v1922_v40  ;;  %v17029_v29 = vld [vmem:[#allocation9 + $0x14] ss:$8 sps:$4 sm:$0xff]   ;;  %v17027_v31 = vld [vmem:[#allocation9 + $0x10] ss:$8 sps:$4 sm:$0xff]  }
 0x888   :  { %v17032_v30 = vld [vmem:[#allocation9 + $0x114] ss:$8 sps:$4 sm:$0xff]   ;;  %v17030_v32 = vld [vmem:[#allocation9 + $0x110] ss:$8 sps:$4 sm:$0xff]  }
 0x889   :  { %2718 = vmatpush1.bf16.msra.mxu0 %v15128_v47  ;;  %2759 = vmatpush1.bf16.msra.mxu1 %v15130_v48  ;;  %v1926_v47 = vld [vmem:[#allocation7 + $0x318] sm:$0xff] }
 0x88a   :  { %2719 = vmatprep.subr.bf16.mxu0 %v15137_v49  ;;  %2760 = vmatprep.subr.bf16.mxu1 %v15139_v50  ;;  %v1930_v48 = vld [vmem:[#allocation7 + $0x338] sm:$0xff]  ;;  %v15184_v49 = vcombine.low %v1917_v37, %v1921_v38  ;;  %v15186_v50 = vcombine.low %v1918_v39, %v1922_v40  ;;  %v17047_v40 = vld [vmem:[#allocation9 + $0x44] ss:$8 sps:$4 sm:$0xff]  }
 0x88b   :  { %v15195_v52 = vcombine.high %v1926_v47, %v1930_v48  ;;  %v17041_v37 = vld [vmem:[#allocation9 + $0x34] ss:$8 sps:$4 sm:$0xff]   ;;  %v17039_v39 = vld [vmem:[#allocation9 + $0x30] ss:$8 sps:$4 sm:$0xff]  }
 0x88c   :  { %v17044_v38 = vld [vmem:[#allocation9 + $0x134] ss:$8 sps:$4 sm:$0xff]  }
 0x88d   :  { %2720 = vmatpush1.bf16.msra.mxu0 %v15136_v59  ;;  %2761 = vmatpush1.bf16.msra.mxu1 %v15138_v60  ;;  %v1934_v59 = vld [vmem:[#allocation7 + $0x358] sm:$0xff] }
 0x88e   :  { %2721 = vmatprep.subr.bf16.mxu0 %v15145_v61  ;;  %2762 = vmatprep.subr.bf16.mxu1 %v15147_v62  ;;  %v1938_v60 = vld [vmem:[#allocation7 + $0x378] sm:$0xff]  ;;  %v15192_v61 = vcombine.low %v1925_v45, %v1929_v46  ;;  %v15194_v62 = vcombine.low %v1926_v47, %v1930_v48  ;;  %v17059_v48 = vld [vmem:[#allocation9 + $0x64] ss:$8 sps:$4 sm:$0xff]  }
 0x88f   :  { %v15203_v4 = vcombine.high %v1934_v59, %v1938_v60  ;;  %v17056_v45 = vld [vmem:[#allocation9 + $0x154] ss:$8 sps:$4 sm:$0xff]   ;;  %v17051_v46 = vld [vmem:[#allocation9 + $0x50] ss:$8 sps:$4 sm:$0xff]  }
 0x890   :  { %v17054_v47 = vld [vmem:[#allocation9 + $0x150] ss:$8 sps:$4 sm:$0xff]  }
 0x891   :  { %2722 = vmatpush1.bf16.msra.mxu0 %v15144_v7  ;;  %2763 = vmatpush1.bf16.msra.mxu1 %v15146_v8  ;;  %v1942_v7 = vld [vmem:[#allocation7 + $0x398] sm:$0xff] }
 0x892   :  { %2723 = vmatprep.subr.bf16.mxu0 %v15153_v9  ;;  %2764 = vmatprep.subr.bf16.mxu1 %v15155_v11  ;;  %v1946_v8 = vld [vmem:[#allocation7 + $0x3b8] sm:$0xff]  ;;  %v15200_v9 = vcombine.low %v1933_v53, %v1937_v56  ;;  %v15202_v11 = vcombine.low %v1934_v59, %v1938_v60  ;;  %v17071_v60 = vld [vmem:[#allocation9 + $0x84] ss:$8 sps:$4 sm:$0xff]  }
 0x893   :  { %v15211_v14 = vcombine.high %v1942_v7, %v1946_v8  ;;  %v17068_v53 = vld [vmem:[#allocation9 + $0x174] ss:$8 sps:$4 sm:$0xff]   ;;  %v17063_v56 = vld [vmem:[#allocation9 + $0x70] ss:$8 sps:$4 sm:$0xff]  }
 0x894   :  { %v17066_v59 = vld [vmem:[#allocation9 + $0x170] ss:$8 sps:$4 sm:$0xff]  }
 0x895   :  { %2724 = vmatpush1.bf16.msra.mxu0 %v15152_v55  ;;  %2765 = vmatpush1.bf16.msra.mxu1 %v15154_v3  ;;  %v1950_v55 = vld [vmem:[#allocation7 + $0x3d8] sm:$0xff] }
 0x896   :  { %2725 = vmatprep.subr.bf16.mxu0 %v15161_v21  ;;  %2766 = vmatprep.subr.bf16.mxu1 %v15163_v54  ;;  %v1954_v3 = vld [vmem:[#allocation7 + $0x3f8] sm:$0xff]  ;;  %v15208_v21 = vcombine.low %v1941_v5, %v1945_v6  ;;  %v15210_v54 = vcombine.low %v1942_v7, %v1946_v8  ;;  %v17083_v8 = vld [vmem:[#allocation9 + $0xa4] ss:$8 sps:$4 sm:$0xff]  }
 0x897   :  { %v15219_v23 = vcombine.high %v1950_v55, %v1954_v3  ;;  %v15218_v24 = vcombine.low %v1950_v55, %v1954_v3  ;;  %v17080_v5 = vld [vmem:[#allocation9 + $0x194] ss:$8 sps:$4 sm:$0xff]   ;;  %v17075_v6 = vld [vmem:[#allocation9 + $0x90] ss:$8 sps:$4 sm:$0xff]   ;;  %v17095_v3 = vld [vmem:[#allocation9 + $0xc4] ss:$8 sps:$4 sm:$0xff]  }
 0x898   :  { %v17078_v7 = vld [vmem:[#allocation9 + $0x190] ss:$8 sps:$4 sm:$0xff]  }
 0x899   :  { %2726 = vmatpush1.bf16.msra.mxu0 %v15160_v25  ;;  %2767 = vmatpush1.bf16.msra.mxu1 %v15162_v26  ;;  %v17023_v25 = vld [vmem:[#allocation9 + $0x4] ss:$8 sps:$4 sm:$0xff]   ;;  %v17090_v55 = vld [vmem:[#allocation9 + $0x1b0] ss:$8 sps:$4 sm:$0xff]  }
 0x89a   :  { %2727 = vmatprep.subr.bf16.mxu0 %v15169_v27  ;;  %2768 = vmatprep.subr.bf16.mxu1 %v15171_v28  ;;  %v17026_v26 = vld [vmem:[#allocation9 + $0x104] ss:$8 sps:$4 sm:$0xff]   ;;  %v17021_v27 = vld [vmem:[#allocation9] ss:$8 sps:$4 sm:$0xff]  }
 0x89b   :  { %v17024_v28 = vld [vmem:[#allocation9 + $0x100] ss:$8 sps:$4 sm:$0xff]  }
 0x89d   :  { %2728 = vmatpush1.bf16.msra.mxu0 %v15168_v33  ;;  %2769 = vmatpush1.bf16.msra.mxu1 %v15170_v34  ;;  %v17035_v33 = vld [vmem:[#allocation9 + $0x24] ss:$8 sps:$4 sm:$0xff]  }
 0x89e   :  { %2729 = vmatprep.subr.bf16.mxu0 %v15177_v35  ;;  %2770 = vmatprep.subr.bf16.mxu1 %v15179_v36  ;;  %v17038_v34 = vld [vmem:[#allocation9 + $0x124] ss:$8 sps:$4 sm:$0xff]   ;;  %v17033_v35 = vld [vmem:[#allocation9 + $0x20] ss:$8 sps:$4 sm:$0xff]  }
 0x89f   :  { %v17036_v36 = vld [vmem:[#allocation9 + $0x120] ss:$8 sps:$4 sm:$0xff]  }
 0x8a1   :  { %2730 = vmatpush1.bf16.msra.mxu0 %v15176_v41  ;;  %2771 = vmatpush1.bf16.msra.mxu1 %v15178_v42  ;;  %v17050_v41 = vld [vmem:[#allocation9 + $0x144] ss:$8 sps:$4 sm:$0xff]   ;;  %v17045_v42 = vld [vmem:[#allocation9 + $0x40] ss:$8 sps:$4 sm:$0xff]  }
 0x8a2   :  { %2731 = vmatprep.subr.bf16.mxu0 %v15185_v43  ;;  %2772 = vmatprep.subr.bf16.mxu1 %v15187_v44  ;;  %v17048_v43 = vld [vmem:[#allocation9 + $0x140] ss:$8 sps:$4 sm:$0xff]   ;;  %v17053_v44 = vld [vmem:[#allocation9 + $0x54] ss:$8 sps:$4 sm:$0xff]  }
 0x8a5   :  { %2732 = vmatpush1.bf16.msra.mxu0 %v15184_v49  ;;  %2773 = vmatpush1.bf16.msra.mxu1 %v15186_v50  ;;  %v17062_v49 = vld [vmem:[#allocation9 + $0x164] ss:$8 sps:$4 sm:$0xff]   ;;  %v17057_v50 = vld [vmem:[#allocation9 + $0x60] ss:$8 sps:$4 sm:$0xff]  }
 0x8a6   :  { %2733 = vmatprep.subr.bf16.mxu0 %v15193_v51  ;;  %2774 = vmatprep.subr.bf16.mxu1 %v15195_v52  ;;  %v17060_v51 = vld [vmem:[#allocation9 + $0x160] ss:$8 sps:$4 sm:$0xff]   ;;  %v17065_v52 = vld [vmem:[#allocation9 + $0x74] ss:$8 sps:$4 sm:$0xff]  }
 0x8a9   :  { %2734 = vmatpush1.bf16.msra.mxu0 %v15192_v61  ;;  %2775 = vmatpush1.bf16.msra.mxu1 %v15194_v62  ;;  %v17074_v61 = vld [vmem:[#allocation9 + $0x184] ss:$8 sps:$4 sm:$0xff]   ;;  %v17069_v62 = vld [vmem:[#allocation9 + $0x80] ss:$8 sps:$4 sm:$0xff]  }
 0x8aa   :  { %2735 = vmatprep.subr.bf16.mxu0 %v15201_v2  ;;  %2776 = vmatprep.subr.bf16.mxu1 %v15203_v4  ;;  %v17072_v2 = vld [vmem:[#allocation9 + $0x180] ss:$8 sps:$4 sm:$0xff]   ;;  %v17077_v4 = vld [vmem:[#allocation9 + $0x94] ss:$8 sps:$4 sm:$0xff]  }
 0x8ad   :  { %2736 = vmatpush1.bf16.msra.mxu0 %v15200_v9  ;;  %2777 = vmatpush1.bf16.msra.mxu1 %v15202_v11  ;;  %v17086_v9 = vld [vmem:[#allocation9 + $0x1a4] ss:$8 sps:$4 sm:$0xff]   ;;  %v17081_v11 = vld [vmem:[#allocation9 + $0xa0] ss:$8 sps:$4 sm:$0xff]  }
 0x8ae   :  { %2737 = vmatprep.subr.bf16.mxu0 %v15209_v13  ;;  %2778 = vmatprep.subr.bf16.mxu1 %v15211_v14  ;;  %v17084_v13 = vld [vmem:[#allocation9 + $0x1a0] ss:$8 sps:$4 sm:$0xff]   ;;  %v17089_v14 = vld [vmem:[#allocation9 + $0xb4] ss:$8 sps:$4 sm:$0xff]  }
 0x8b1   :  { %2738 = vmatpush1.bf16.msra.mxu0 %v15208_v21  ;;  %2779 = vmatpush1.bf16.msra.mxu1 %v15210_v54  ;;  %v17098_v21 = vld [vmem:[#allocation9 + $0x1c4] ss:$8 sps:$4 sm:$0xff]   ;;  %v17093_v54 = vld [vmem:[#allocation9 + $0xc0] ss:$8 sps:$4 sm:$0xff]  }
 0x8b2   :  { %2739 = vmatprep.subr.bf16.mxu0 %v15217_v22  ;;  %2780 = vmatprep.subr.bf16.mxu1 %v15219_v23  ;;  %v17096_v22 = vld [vmem:[#allocation9 + $0x1c0] ss:$8 sps:$4 sm:$0xff]   ;;  %v17101_v23 = vld [vmem:[#allocation9 + $0xd4] ss:$8 sps:$4 sm:$0xff]  }
 0x8b5   :  { %2740 = vmatpush1.bf16.msra.mxu0 %v15216_v1  ;;  %2781 = vmatpush1.bf16.msra.mxu1 %v15218_v24  ;;  %v17104_v1 = vld [vmem:[#allocation9 + $0x1d4] ss:$8 sps:$4 sm:$0xff]   ;;  %v17099_v24 = vld [vmem:[#allocation9 + $0xd0] ss:$8 sps:$4 sm:$0xff]  }
 0x8b6   :  { %3583 = vmatprep.subr.bf16.mxu0 %v17023_v25  ;;  %3624 = vmatprep.subr.bf16.mxu1 %v17026_v26  ;;  %v17102_v25 = vld [vmem:[#allocation9 + $0x1d0] ss:$8 sps:$4 sm:$0xff]   ;;  %v17107_v26 = vld [vmem:[#allocation9 + $0xe4] ss:$8 sps:$4 sm:$0xff]  }
 0x8b8   :  { %2742 = vmatmul.mubr.bf16.vlgmr.msra.gmra.mrb[12].mxu0 %v18963_v20  ;;  %2783 = vmatmul.mubr.bf16.vlgmr.msra.gmra.mrb[28].mxu1 %v18963_v20  ;;  %v17042_v20 = vld [vmem:[#allocation9 + $0x130] ss:$8 sps:$4 sm:$0xff]  }
 0x8b9   :  { %3584 = vmatpush1.bf16.msra.mxu0 %v17021_v27  ;;  %3625 = vmatpush1.bf16.msra.mxu1 %v17024_v28  ;;  %v17110_v27 = vld [vmem:[#allocation9 + $0x1e4] ss:$8 sps:$4 sm:$0xff]   ;;  %v17105_v28 = vld [vmem:[#allocation9 + $0xe0] ss:$8 sps:$4 sm:$0xff]  }
 0x8ba   :  { %3585 = vmatprep.subr.bf16.mxu0 %v17029_v29  ;;  %3626 = vmatprep.subr.bf16.mxu1 %v17032_v30  ;;  %v17108_v29 = vld [vmem:[#allocation9 + $0x1e0] ss:$8 sps:$4 sm:$0xff]   ;;  %v17113_v30 = vld [vmem:[#allocation9 + $0xf4] ss:$8 sps:$4 sm:$0xff]  }
 0x8bd   :  { %3586 = vmatpush1.bf16.msra.mxu0 %v17027_v31  ;;  %3627 = vmatpush1.bf16.msra.mxu1 %v17030_v32  ;;  %v17116_v31 = vld [vmem:[#allocation9 + $0x1f4] ss:$8 sps:$4 sm:$0xff]   ;;  %v17111_v32 = vld [vmem:[#allocation9 + $0xf0] ss:$8 sps:$4 sm:$0xff]  }
 0x8be   :  { %3587 = vmatprep.subr.bf16.mxu0 %v17035_v33  ;;  %3628 = vmatprep.subr.bf16.mxu1 %v17038_v34  ;;  %v17114_v33 = vld [vmem:[#allocation9 + $0x1f0] ss:$8 sps:$4 sm:$0xff]   ;;  %v17119_v34 = vld [vmem:[#allocation9 + $0x204] ss:$8 sps:$4 sm:$0xff]  }
 0x8c1   :  { %3588 = vmatpush1.bf16.msra.mxu0 %v17033_v35  ;;  %3629 = vmatpush1.bf16.msra.mxu1 %v17036_v36  ;;  %v17122_v35 = vld [vmem:[#allocation9 + $0x304] ss:$8 sps:$4 sm:$0xff]   ;;  %v18970_v36 = vsub.s32 6, %v18828_v15 }
 0x8c2   :  { %3589 = vmatprep.subr.bf16.mxu0 %v17041_v37  ;;  %3630 = vmatprep.subr.bf16.mxu1 %v17044_v38  ;;  %v18972_v37 = vld [vmem:[#allocation2] sm:$0xff] }
 0x8c3   :  { %v120_v38 = vrot.slane %v18972_v37, 1 }
 0x8c5   :  { %3590 = vmatpush1.bf16.msra.mxu0 %v17039_v39  ;;  %3631 = vmatpush1.bf16.msra.mxu1 %v17042_v20  ;;  %v18975_v39 = vld [vmem:[#allocation2 + $0x8] sm:$0xff] }
 0x8c6   :  { %3591 = vmatprep.subr.bf16.mxu0 %v17047_v40  ;;  %3632 = vmatprep.subr.bf16.mxu1 %v17050_v41  ;;  %v121_v20 = vrot.slane %v18975_v39, 1  ;;  %v1958_v40 = vrot.slane %v18972_v37, %v18970_v36  ;;  %v1966_v41 = vrot.slane %v120_v38, %v18970_v36  ;;  %v17161_v38 = vld [vmem:[#allocation9 + $0x274] ss:$8 sps:$4 sm:$0xff]  }
 0x8c9   :  { %3592 = vmatpush1.bf16.msra.mxu0 %v17045_v42  ;;  %3633 = vmatpush1.bf16.msra.mxu1 %v17048_v43  ;;  %v1962_v42 = vrot.slane %v18975_v39, %v18970_v36  ;;  %v1970_v43 = vrot.slane %v121_v20, %v18970_v36  ;;  %v17164_v20 = vld [vmem:[#allocation9 + $0x374] ss:$8 sps:$4 sm:$0xff]  }
 0x8ca   :  { %3593 = vmatprep.subr.bf16.mxu0 %v17053_v44  ;;  %3634 = vmatprep.subr.bf16.mxu1 %v17056_v45 }
 0x8cd   :  { %3594 = vmatpush1.bf16.msra.mxu0 %v17051_v46  ;;  %3635 = vmatpush1.bf16.msra.mxu1 %v17054_v47 }
 0x8ce   :  { %3595 = vmatprep.subr.bf16.mxu0 %v17059_v48  ;;  %3636 = vmatprep.subr.bf16.mxu1 %v17062_v49 }
 0x8d1   :  { %3596 = vmatpush1.bf16.msra.mxu0 %v17057_v50  ;;  %3637 = vmatpush1.bf16.msra.mxu1 %v17060_v51 }
 0x8d2   :  { %3597 = vmatprep.subr.bf16.mxu0 %v17065_v52  ;;  %3638 = vmatprep.subr.bf16.mxu1 %v17068_v53 }
 0x8d5   :  { %3598 = vmatpush1.bf16.msra.mxu0 %v17063_v56  ;;  %3639 = vmatpush1.bf16.msra.mxu1 %v17066_v59 }
 0x8d6   :  { %3599 = vmatprep.subr.bf16.mxu0 %v17071_v60  ;;  %3640 = vmatprep.subr.bf16.mxu1 %v17074_v61 }
 0x8d9   :  { %3600 = vmatpush1.bf16.msra.mxu0 %v17069_v62  ;;  %3641 = vmatpush1.bf16.msra.mxu1 %v17072_v2 }
 0x8da   :  { %3601 = vmatprep.subr.bf16.mxu0 %v17077_v4  ;;  %3642 = vmatprep.subr.bf16.mxu1 %v17080_v5 }
 0x8dd   :  { %3602 = vmatpush1.bf16.msra.mxu0 %v17075_v6  ;;  %3643 = vmatpush1.bf16.msra.mxu1 %v17078_v7  ;;  %v17117_v6 = vld [vmem:[#allocation9 + $0x200] ss:$8 sps:$4 sm:$0xff]  }
 0x8de   :  { %3603 = vmatprep.subr.bf16.mxu0 %v17083_v8  ;;  %3644 = vmatprep.subr.bf16.mxu1 %v17086_v9  ;;  %v17120_v7 = vld [vmem:[#allocation9 + $0x300] ss:$8 sps:$4 sm:$0xff]  }
 0x8e1   :  { %3604 = vmatpush1.bf16.msra.mxu0 %v17081_v11  ;;  %3645 = vmatpush1.bf16.msra.mxu1 %v17084_v13  ;;  %v17125_v11 = vld [vmem:[#allocation9 + $0x214] ss:$8 sps:$4 sm:$0xff]  }
 0x8e2   :  { %3605 = vmatprep.subr.bf16.mxu0 %v17089_v14  ;;  %3646 = vmatprep.subr.bf16.mxu1 %v17092_v16  ;;  %v17128_v13 = vld [vmem:[#allocation9 + $0x314] ss:$8 sps:$4 sm:$0xff]   ;;  %v17123_v14 = vld [vmem:[#allocation9 + $0x210] ss:$8 sps:$4 sm:$0xff]  }
 0x8e3   :  { %v17126_v16 = vld [vmem:[#allocation9 + $0x310] ss:$8 sps:$4 sm:$0xff]  }
 0x8e5   :  { %3606 = vmatpush1.bf16.msra.mxu0 %v17087_v17  ;;  %3647 = vmatpush1.bf16.msra.mxu1 %v17090_v55  ;;  %v17131_v17 = vld [vmem:[#allocation9 + $0x224] ss:$8 sps:$4 sm:$0xff]  }
 0x8e6   :  { %3607 = vmatprep.subr.bf16.mxu0 %v17095_v3  ;;  %3648 = vmatprep.subr.bf16.mxu1 %v17098_v21  ;;  %v17134_v55 = vld [vmem:[#allocation9 + $0x324] ss:$8 sps:$4 sm:$0xff]   ;;  %v17129_v3 = vld [vmem:[#allocation9 + $0x220] ss:$8 sps:$4 sm:$0xff]  }
 0x8e7   :  { %v17132_v21 = vld [vmem:[#allocation9 + $0x320] ss:$8 sps:$4 sm:$0xff]  }
 0x8e9   :  { %3608 = vmatpush1.bf16.msra.mxu0 %v17093_v54  ;;  %3649 = vmatpush1.bf16.msra.mxu1 %v17096_v22  ;;  %v17137_v54 = vld [vmem:[#allocation9 + $0x234] ss:$8 sps:$4 sm:$0xff]  }
 0x8ea   :  { %3609 = vmatprep.subr.bf16.mxu0 %v17101_v23  ;;  %3650 = vmatprep.subr.bf16.mxu1 %v17104_v1  ;;  %v17140_v22 = vld [vmem:[#allocation9 + $0x334] ss:$8 sps:$4 sm:$0xff]   ;;  %v17135_v23 = vld [vmem:[#allocation9 + $0x230] ss:$8 sps:$4 sm:$0xff]  }
 0x8eb   :  { %v17138_v1 = vld [vmem:[#allocation9 + $0x330] ss:$8 sps:$4 sm:$0xff]  }
 0x8ed   :  { %3610 = vmatpush1.bf16.msra.mxu0 %v17099_v24  ;;  %3651 = vmatpush1.bf16.msra.mxu1 %v17102_v25  ;;  %v17143_v24 = vld [vmem:[#allocation9 + $0x244] ss:$8 sps:$4 sm:$0xff]  }
 0x8ee   :  { %3611 = vmatprep.subr.bf16.mxu0 %v17107_v26  ;;  %3652 = vmatprep.subr.bf16.mxu1 %v17110_v27  ;;  %v17146_v25 = vld [vmem:[#allocation9 + $0x344] ss:$8 sps:$4 sm:$0xff]   ;;  %v17141_v26 = vld [vmem:[#allocation9 + $0x240] ss:$8 sps:$4 sm:$0xff]  }
 0x8ef   :  { %v17144_v27 = vld [vmem:[#allocation9 + $0x340] ss:$8 sps:$4 sm:$0xff]  }
 0x8f1   :  { %3612 = vmatpush1.bf16.msra.mxu0 %v17105_v28  ;;  %3653 = vmatpush1.bf16.msra.mxu1 %v17108_v29  ;;  %v17149_v28 = vld [vmem:[#allocation9 + $0x254] ss:$8 sps:$4 sm:$0xff]  }
 0x8f2   :  { %3613 = vmatprep.subr.bf16.mxu0 %v17113_v30  ;;  %3654 = vmatprep.subr.bf16.mxu1 %v17116_v31  ;;  %v17152_v29 = vld [vmem:[#allocation9 + $0x354] ss:$8 sps:$4 sm:$0xff]   ;;  %v17147_v30 = vld [vmem:[#allocation9 + $0x250] ss:$8 sps:$4 sm:$0xff]  }
 0x8f3   :  { %v17150_v31 = vld [vmem:[#allocation9 + $0x350] ss:$8 sps:$4 sm:$0xff]  }
 0x8f5   :  { %3614 = vmatpush1.bf16.msra.mxu0 %v17111_v32  ;;  %3655 = vmatpush1.bf16.msra.mxu1 %v17114_v33  ;;  %v17155_v32 = vld [vmem:[#allocation9 + $0x264] ss:$8 sps:$4 sm:$0xff]  }
 0x8f6   :  { %3665 = vmatprep.subr.bf16.mxu0 %v17119_v34  ;;  %3706 = vmatprep.subr.bf16.mxu1 %v17122_v35  ;;  %v17158_v33 = vld [vmem:[#allocation9 + $0x364] ss:$8 sps:$4 sm:$0xff]   ;;  %v17153_v34 = vld [vmem:[#allocation9 + $0x260] ss:$8 sps:$4 sm:$0xff]  }
 0x8f7   :  { %v17156_v35 = vld [vmem:[#allocation9 + $0x360] ss:$8 sps:$4 sm:$0xff]  }
 0x94b   :  { %v2661_v44 = vpop.f32.mrb[8].mxu0  ;;  %v2702_v45 = vpop.f32.mrb[24].mxu1 }
 0x94c   :  { %v2662_v46 = vadd.f32 %v2661_v44, %v1958_v40  ;;  %v2703_v47 = vadd.f32 %v2702_v45, %v1966_v41  ;;  %v2663_v48 = vpop.f32.mrb[9].mxu0  ;;  %v2704_v49 = vpop.f32.mrb[25].mxu1  ;;  %v17159_v40 = vld [vmem:[#allocation9 + $0x270] ss:$8 sps:$4 sm:$0xff]   ;;  %v17165_v44 = vld [vmem:[#allocation9 + $0x280] ss:$8 sps:$4 sm:$0xff]  }
 0x94d   :  { %v2664_v50 = vadd.f32 %v2663_v48, %v1962_v42  ;;  %v2705_v51 = vadd.f32 %v2704_v49, %v1970_v43  ;;  %v2665_v52 = vpop.f32.mrb[10].mxu0  ;;  %v2706_v53 = vpop.f32.mrb[26].mxu1  ;;  %v17162_v41 = vld [vmem:[#allocation9 + $0x370] ss:$8 sps:$4 sm:$0xff]   ;;  %v17167_v42 = vld [vmem:[#allocation9 + $0x284] ss:$8 sps:$4 sm:$0xff]  }
 0x94e   :  { %v2791_v56 = vmax.f32 %v2662_v46, 0.0  ;;  %v2793_v59 = vmax.f32 %v2703_v47, 0.0  ;;  %v2666_v60 = vpop.f32.mrb[11].mxu0  ;;  %v2707_v61 = vpop.f32.mrb[27].mxu1  ;;  %v17170_v43 = vld [vmem:[#allocation9 + $0x384] ss:$8 sps:$4 sm:$0xff]  }
 0x94f   :  { %v2792_v62 = vmax.f32 %v2664_v50, 0.0  ;;  %v2794_v2 = vmax.f32 %v2705_v51, 0.0  ;;  %v17168_v45 = vld [vmem:[#allocation9 + $0x380] ss:$8 sps:$4 sm:$0xff]   ;;  %v17173_v46 = vld [vmem:[#allocation9 + $0x294] ss:$8 sps:$4 sm:$0xff]  }
 0x950   :  { %v2799_v8 = vpack.c.bf16 %v2791_v56, %v2791_v56  ;;  %v2801_v9 = vpack.c.bf16 %v2793_v59, %v2793_v59  ;;  %v17176_v47 = vld [vmem:[#allocation9 + $0x394] ss:$8 sps:$4 sm:$0xff]   ;;  %v17171_v48 = vld [vmem:[#allocation9 + $0x290] ss:$8 sps:$4 sm:$0xff]   ;;  %v17179_v50 = vld [vmem:[#allocation9 + $0x2a4] ss:$8 sps:$4 sm:$0xff]  }
 0x951   :  { %v2800_v4 = vpack.c.bf16 %v2792_v62, %v2792_v62  ;;  %v2802_v5 = vpack.c.bf16 %v2794_v2, %v2794_v2  ;;  %v17174_v49 = vld [vmem:[#allocation9 + $0x390] ss:$8 sps:$4 sm:$0xff]   ;;  %v17182_v51 = vld [vmem:[#allocation9 + $0x3a4] ss:$8 sps:$4 sm:$0xff]   ;;  %v17177_v52 = vld [vmem:[#allocation9 + $0x2a0] ss:$8 sps:$4 sm:$0xff]  }
 0x952   :  { %v17180_v53 = vld [vmem:[#allocation9 + $0x3a0] ss:$8 sps:$4 sm:$0xff]   ;;  %v17185_v56 = vld [vmem:[#allocation9 + $0x2b4] ss:$8 sps:$4 sm:$0xff]   ;;  %v17183_v60 = vld [vmem:[#allocation9 + $0x2b0] ss:$8 sps:$4 sm:$0xff]  }
 0x953   :  { %3615 = vmatprep.mubr.bf16.mxu0 %v2800_v4  ;;  %3656 = vmatprep.mubr.bf16.mxu1 %v2802_v5  ;;  %v17188_v59 = vld [vmem:[#allocation9 + $0x3b4] ss:$8 sps:$4 sm:$0xff]   ;;  %v17186_v61 = vld [vmem:[#allocation9 + $0x3b0] ss:$8 sps:$4 sm:$0xff]   ;;  %v17191_v62 = vld [vmem:[#allocation9 + $0x2c4] ss:$8 sps:$4 sm:$0xff]  }
 0x954   :  { %3616 = vmatmul.mubr.bf16.vlgmr.msra.gmra.mrb[16].mxu0 %v2799_v8  ;;  %3657 = vmatmul.mubr.bf16.vlgmr.msra.gmra.mrb[32].mxu1 %v2801_v9  ;;  %v17194_v2 = vld [vmem:[#allocation9 + $0x3c4] ss:$8 sps:$4 sm:$0xff]   ;;  %v17189_v4 = vld [vmem:[#allocation9 + $0x2c0] ss:$8 sps:$4 sm:$0xff]   ;;  %v17200_v8 = vld [vmem:[#allocation9 + $0x3d4] ss:$8 sps:$4 sm:$0xff]  }
 0x955   :  { %3666 = vmatpush1.bf16.msra.mxu0 %v17117_v6  ;;  %3707 = vmatpush1.bf16.msra.mxu1 %v17120_v7  ;;  %v17192_v5 = vld [vmem:[#allocation9 + $0x3c0] ss:$8 sps:$4 sm:$0xff]   ;;  %v116_v6 = vld [vmem:[#allocation2 + $0x10] sm:$0xf]  ;;  %v17197_v7 = vld [vmem:[#allocation9 + $0x2d4] ss:$8 sps:$4 sm:$0xff]  }
 0x956   :  { %3667 = vmatprep.subr.bf16.mxu0 %v17125_v11  ;;  %3708 = vmatprep.subr.bf16.mxu1 %v17128_v13  ;;  %v117_v9 = vld [vmem:[#allocation2 + $0x18] sm:$0xf]  ;;  %v126_v11 = vrot.slane %v116_v6, 2  ;;  %v130_v13 = vrot.slane %v116_v6, 3 }
 0x959   :  { %3668 = vmatpush1.bf16.msra.mxu0 %v17123_v14  ;;  %3709 = vmatpush1.bf16.msra.mxu1 %v17126_v16  ;;  %v17195_v14 = vld [vmem:[#allocation9 + $0x2d0] ss:$8 sps:$4 sm:$0xff]  }
 0x95a   :  { %3669 = vmatprep.subr.bf16.mxu0 %v17131_v17  ;;  %3710 = vmatprep.subr.bf16.mxu1 %v17134_v55  ;;  %v17198_v16 = vld [vmem:[#allocation9 + $0x3d0] ss:$8 sps:$4 sm:$0xff]   ;;  %v127_v17 = vrot.slane %v117_v9, 2  ;;  %v131_v55 = vrot.slane %v117_v9, 3 }
 0x95d   :  { %3670 = vmatpush1.bf16.msra.mxu0 %v17129_v3  ;;  %3711 = vmatpush1.bf16.msra.mxu1 %v17132_v21  ;;  %v17203_v3 = vld [vmem:[#allocation9 + $0x2e4] ss:$8 sps:$4 sm:$0xff]  }
 0x95e   :  { %3671 = vmatprep.subr.bf16.mxu0 %v17137_v54  ;;  %3712 = vmatprep.subr.bf16.mxu1 %v17140_v22  ;;  %v17206_v21 = vld [vmem:[#allocation9 + $0x3e4] ss:$8 sps:$4 sm:$0xff]   ;;  %v1974_v54 = vrot.slane %v126_v11, %v18970_v36  ;;  %v1982_v22 = vrot.slane %v130_v13, %v18970_v36 }
 0x961   :  { %3672 = vmatpush1.bf16.msra.mxu0 %v17135_v23  ;;  %3713 = vmatpush1.bf16.msra.mxu1 %v17138_v1  ;;  %v1978_v23 = vrot.slane %v127_v17, %v18970_v36  ;;  %v1986_v1 = vrot.slane %v131_v55, %v18970_v36 }
 0x962   :  { %3673 = vmatprep.subr.bf16.mxu0 %v17143_v24  ;;  %3714 = vmatprep.subr.bf16.mxu1 %v17146_v25  ;;  %v17201_v24 = vld [vmem:[#allocation9 + $0x2e0] ss:$8 sps:$4 sm:$0xff]  }
 0x963   :  { %v17204_v25 = vld [vmem:[#allocation9 + $0x3e0] ss:$8 sps:$4 sm:$0xff]  }
 0x965   :  { %3674 = vmatpush1.bf16.msra.mxu0 %v17141_v26  ;;  %3715 = vmatpush1.bf16.msra.mxu1 %v17144_v27  ;;  %v17209_v26 = vld [vmem:[#allocation9 + $0x2f4] ss:$8 sps:$4 sm:$0xff]  }
 0x966   :  { %3675 = vmatprep.subr.bf16.mxu0 %v17149_v28  ;;  %3716 = vmatprep.subr.bf16.mxu1 %v17152_v29  ;;  %v17212_v27 = vld [vmem:[#allocation9 + $0x3f4] ss:$8 sps:$4 sm:$0xff]  }
 0x969   :  { %3676 = vmatpush1.bf16.msra.mxu0 %v17147_v30  ;;  %3717 = vmatpush1.bf16.msra.mxu1 %v17150_v31 }
 0x96a   :  { %3677 = vmatprep.subr.bf16.mxu0 %v17155_v32  ;;  %3718 = vmatprep.subr.bf16.mxu1 %v17158_v33 }
 0x96d   :  { %3678 = vmatpush1.bf16.msra.mxu0 %v17153_v34  ;;  %3719 = vmatpush1.bf16.msra.mxu1 %v17156_v35 }
 0x96e   :  { %3679 = vmatprep.subr.bf16.mxu0 %v17161_v38  ;;  %3720 = vmatprep.subr.bf16.mxu1 %v17164_v20 }
 0x971   :  { %3680 = vmatpush1.bf16.msra.mxu0 %v17159_v40  ;;  %3721 = vmatpush1.bf16.msra.mxu1 %v17162_v41  ;;  %v17207_v40 = vld [vmem:[#allocation9 + $0x2f0] ss:$8 sps:$4 sm:$0xff]  }
 0x972   :  { %3681 = vmatprep.subr.bf16.mxu0 %v17167_v42  ;;  %3722 = vmatprep.subr.bf16.mxu1 %v17170_v43  ;;  %v17210_v41 = vld [vmem:[#allocation9 + $0x3f0] ss:$8 sps:$4 sm:$0xff]  }
 0x975   :  { %3682 = vmatpush1.bf16.msra.mxu0 %v17165_v44  ;;  %3723 = vmatpush1.bf16.msra.mxu1 %v17168_v45 }
 0x976   :  { %3683 = vmatprep.subr.bf16.mxu0 %v17173_v46  ;;  %3724 = vmatprep.subr.bf16.mxu1 %v17176_v47 }
 0x979   :  { %3684 = vmatpush1.bf16.msra.mxu0 %v17171_v48  ;;  %3725 = vmatpush1.bf16.msra.mxu1 %v17174_v49 }
 0x97a   :  { %3685 = vmatprep.subr.bf16.mxu0 %v17179_v50  ;;  %3726 = vmatprep.subr.bf16.mxu1 %v17182_v51 }
 0x97d   :  { %3686 = vmatpush1.bf16.msra.mxu0 %v17177_v52  ;;  %3727 = vmatpush1.bf16.msra.mxu1 %v17180_v53  ;;  %v18989_v52 = vsub.s32 5, %v18828_v15 }
 0x97e   :  { %3687 = vmatprep.subr.bf16.mxu0 %v17185_v56  ;;  %3728 = vmatprep.subr.bf16.mxu1 %v17188_v59 }
 0x97f   :  { %v2938_v53 = vrot.slane %v18972_v37, %v18989_v52  ;;  %v2942_v56 = vrot.slane %v18975_v39, %v18989_v52 }
 0x981   :  { %3688 = vmatpush1.bf16.msra.mxu0 %v17183_v60  ;;  %3729 = vmatpush1.bf16.msra.mxu1 %v17186_v61 }
 0x982   :  { %3689 = vmatprep.subr.bf16.mxu0 %v17191_v62  ;;  %3730 = vmatprep.subr.bf16.mxu1 %v17194_v2 }
 0x985   :  { %3690 = vmatpush1.bf16.msra.mxu0 %v17189_v4  ;;  %3731 = vmatpush1.bf16.msra.mxu1 %v17192_v5 }
 0x986   :  { %3691 = vmatprep.subr.bf16.mxu0 %v17197_v7  ;;  %3732 = vmatprep.subr.bf16.mxu1 %v17200_v8 }
 0x989   :  { %3692 = vmatpush1.bf16.msra.mxu0 %v17195_v14  ;;  %3733 = vmatpush1.bf16.msra.mxu1 %v17198_v16 }
 0x98a   :  { %3693 = vmatprep.subr.bf16.mxu0 %v17203_v3  ;;  %3734 = vmatprep.subr.bf16.mxu1 %v17206_v21 }
 0x98b   :  { %v2743_v28 = vpop.f32.mrb[12].mxu0  ;;  %v2784_v29 = vpop.f32.mrb[28].mxu1 }
 0x98c   :  { %v2744_v30 = vadd.f32 %v2743_v28, %v1974_v54  ;;  %v2785_v31 = vadd.f32 %v2784_v29, %v1982_v22  ;;  %v2745_v32 = vpop.f32.mrb[13].mxu0  ;;  %v2786_v33 = vpop.f32.mrb[29].mxu1  ;;  %v17218_v28 = vld [vmem:[#allocation4 + $0x30c] ss:$24 sps:$4 sm:$0xff]  }
 0x98d   :  { %v2746_v34 = vadd.f32 %v2745_v32, %v1978_v23  ;;  %v2787_v35 = vadd.f32 %v2786_v33, %v1986_v1  ;;  %v2747_v38 = vpop.f32.mrb[14].mxu0  ;;  %v2788_v20 = vpop.f32.mrb[30].mxu1  ;;  %3694 = vmatpush1.bf16.msra.mxu0 %v17201_v24  ;;  %3735 = vmatpush1.bf16.msra.mxu1 %v17204_v25  ;;  %v17213_v25 = vld [vmem:[#allocation4 + $0x300] ss:$24 sps:$4 sm:$0xff]   ;;  %v17221_v29 = vld [vmem:[#allocation4 + $0x334] ss:$24 sps:$4 sm:$0xff]  }
 0x98e   :  { %v2795_v42 = vmax.f32 %v2744_v30, 0.0  ;;  %v2797_v43 = vmax.f32 %v2785_v31, 0.0  ;;  %v2748_v44 = vpop.f32.mrb[15].mxu0  ;;  %v2789_v45 = vpop.f32.mrb[31].mxu1  ;;  %3695 = vmatprep.subr.bf16.mxu0 %v17209_v26  ;;  %3736 = vmatprep.subr.bf16.mxu1 %v17212_v27  ;;  %v17215_v26 = vld [vmem:[#allocation4 + $0x304] ss:$24 sps:$4 sm:$0xff]  }
 0x98f   :  { %v2796_v46 = vmax.f32 %v2746_v34, 0.0  ;;  %v2798_v47 = vmax.f32 %v2787_v35, 0.0  ;;  %v17216_v27 = vld [vmem:[#allocation4 + $0x308] ss:$24 sps:$4 sm:$0xff]   ;;  %v17224_v30 = vld [vmem:[#allocation4 + $0x33c] ss:$24 sps:$4 sm:$0xff]  }
 0x990   :  { %v2803_v50 = vpack.c.bf16 %v2795_v42, %v2795_v42  ;;  %v2805_v51 = vpack.c.bf16 %v2797_v43, %v2797_v43  ;;  %v17219_v31 = vld [vmem:[#allocation4 + $0x330] ss:$24 sps:$4 sm:$0xff]   ;;  %v17227_v32 = vld [vmem:[#allocation4 + $0x364] ss:$24 sps:$4 sm:$0xff]   ;;  %v17225_v33 = vld [vmem:[#allocation4 + $0x360] ss:$24 sps:$4 sm:$0xff]  }
 0x991   :  { %v2804_v48 = vpack.c.bf16 %v2796_v46, %v2796_v46  ;;  %v2806_v49 = vpack.c.bf16 %v2798_v47, %v2798_v47  ;;  %3696 = vmatpush1.bf16.msra.mxu0 %v17207_v40  ;;  %3737 = vmatpush1.bf16.msra.mxu1 %v17210_v41  ;;  %v17228_v34 = vld [vmem:[#allocation4 + $0x368] ss:$24 sps:$4 sm:$0xff]   ;;  %v17233_v35 = vld [vmem:[#allocation4 + $0x394] ss:$24 sps:$4 sm:$0xff]   ;;  %v17234_v40 = vld [vmem:[#allocation4 + $0x398] ss:$24 sps:$4 sm:$0xff]  }
 0x992   :  { %4385 = vmatprep.subr.bf16.mxu0 %v17215_v26  ;;  %4426 = vmatprep.subr.bf16.mxu1 %v17218_v28  ;;  %v17236_v38 = vld [vmem:[#allocation4 + $0x39c] ss:$24 sps:$4 sm:$0xff]   ;;  %v17231_v20 = vld [vmem:[#allocation4 + $0x390] ss:$24 sps:$4 sm:$0xff]   ;;  %v17242_v42 = vld [vmem:[#allocation4 + $0x3cc] ss:$24 sps:$4 sm:$0xff]  }
 0x993   :  { %3697 = vmatprep.mubr.bf16.mxu0 %v2804_v48  ;;  %3738 = vmatprep.mubr.bf16.mxu1 %v2806_v49  ;;  %v17239_v41 = vld [vmem:[#allocation4 + $0x3c4] ss:$24 sps:$4 sm:$0xff]   ;;  %v17237_v43 = vld [vmem:[#allocation4 + $0x3c0] ss:$24 sps:$4 sm:$0xff]   ;;  %v17245_v45 = vld [vmem:[#allocation4 + $0x3f4] ss:$24 sps:$4 sm:$0xff]  }
 0x994   :  { %3698 = vmatmul.mubr.bf16.vlgmr.msra.gmra.mrb[20].mxu0 %v2803_v50  ;;  %3739 = vmatmul.mubr.bf16.vlgmr.msra.gmra.mrb[36].mxu1 %v2805_v51  ;;  %v17240_v44 = vld [vmem:[#allocation4 + $0x3c8] ss:$24 sps:$4 sm:$0xff]   ;;  %v17248_v46 = vld [vmem:[#allocation4 + $0x3fc] ss:$24 sps:$4 sm:$0xff]   ;;  %v17246_v48 = vld [vmem:[#allocation4 + $0x3f8] ss:$24 sps:$4 sm:$0xff]  }
 0x995   :  { %4386 = vmatpush1.bf16.msra.mxu0 %v17213_v25  ;;  %4427 = vmatpush1.bf16.msra.mxu1 %v17216_v27  ;;  %v17243_v47 = vld [vmem:[#allocation4 + $0x3f0] ss:$24 sps:$4 sm:$0xff]   ;;  %v17251_v49 = vld [vmem:[#allocation4 + $0x424] ss:$24 sps:$4 sm:$0xff]   ;;  %v17249_v51 = vld [vmem:[#allocation4 + $0x420] ss:$24 sps:$4 sm:$0xff]  }
 0x996   :  { %4387 = vmatprep.subr.bf16.mxu0 %v17221_v29  ;;  %4428 = vmatprep.subr.bf16.mxu1 %v17224_v30  ;;  %v17254_v50 = vld [vmem:[#allocation4 + $0x42c] ss:$24 sps:$4 sm:$0xff]   ;;  %v17282_v25 = vld [vmem:[#allocation4 + $0x518] ss:$24 sps:$4 sm:$0xff]   ;;  %v17288_v28 = vld [vmem:[#allocation4 + $0x548] ss:$24 sps:$4 sm:$0xff]  }
 0x997   :  { %v17285_v26 = vld [vmem:[#allocation4 + $0x540] ss:$24 sps:$4 sm:$0xff]   ;;  %v17287_v27 = vld [vmem:[#allocation4 + $0x544] ss:$24 sps:$4 sm:$0xff]   ;;  %v17293_v30 = vld [vmem:[#allocation4 + $0x574] ss:$24 sps:$4 sm:$0xff]  }
 0x998   :  { %v17290_v29 = vld [vmem:[#allocation4 + $0x54c] ss:$24 sps:$4 sm:$0xff]  }
 0x999   :  { %4388 = vmatpush1.bf16.msra.mxu0 %v17219_v31  ;;  %v17296_v31 = vld [vmem:[#allocation4 + $0x57c] ss:$24 sps:$4 sm:$0xff]  }
 0x99a   :  { %4389 = vmatprep.subr.bf16.mxu0 %v17227_v32  ;;  %v17294_v32 = vld [vmem:[#allocation4 + $0x578] ss:$24 sps:$4 sm:$0xff]  }
 0x99d   :  { %4390 = vmatpush1.bf16.msra.mxu0 %v17225_v33  ;;  %v17302_v33 = vld [vmem:[#allocation4 + $0x5ac] ss:$24 sps:$4 sm:$0xff]  }
 0x99e   :  { %4391 = vmatprep.subr.bf16.mxu0 %v17233_v35  ;;  %v17300_v35 = vld [vmem:[#allocation4 + $0x5a8] ss:$24 sps:$4 sm:$0xff]  }
 0x9a1   :  { %4392 = vmatpush1.bf16.msra.mxu0 %v17231_v20  ;;  %v17308_v20 = vld [vmem:[#allocation4 + $0x5dc] ss:$24 sps:$4 sm:$0xff]  }
 0x9a2   :  { %4393 = vmatprep.subr.bf16.mxu0 %v17239_v41  ;;  %v17306_v41 = vld [vmem:[#allocation4 + $0x5d8] ss:$24 sps:$4 sm:$0xff]  }
 0x9a5   :  { %4394 = vmatpush1.bf16.msra.mxu0 %v17237_v43 }
 0x9a6   :  { %4395 = vmatprep.subr.bf16.mxu0 %v17245_v45 }
 0x9a9   :  { %4396 = vmatpush1.bf16.msra.mxu0 %v17243_v47  ;;  %v19012_v47 = vld [vmem:[#allocation2 + $0x20] sm:$0xff] }
 0x9aa   :  { %4397 = vmatprep.subr.bf16.mxu0 %v17251_v49  ;;  %v3789_v49 = vrot.slane %v19012_v47, %v18831_v18 }
 0x9ad   :  { %4398 = vmatpush1.bf16.msra.mxu0 %v17249_v51 }
 0xa27   :  { %v3617_v59 = vpop.f32.mrb[16].mxu0  ;;  %v3658_v60 = vpop.f32.mrb[32].mxu1 }
 0xa28   :  { %v3618_v61 = vadd.f32 %v3617_v59, %v2938_v53  ;;  %v3619_v62 = vpop.f32.mrb[17].mxu0  ;;  %v3660_v2 = vpop.f32.mrb[33].mxu1  ;;  %v17252_v53 = vld [vmem:[#allocation4 + $0x428] ss:$24 sps:$4 sm:$0xff]   ;;  %v17260_v59 = vld [vmem:[#allocation4 + $0x45c] ss:$24 sps:$4 sm:$0xff]  }
 0xa29   :  { %v3620_v4 = vadd.f32 %v3619_v62, %v2942_v56  ;;  %v3621_v5 = vpop.f32.mrb[18].mxu0  ;;  %v3662_v6 = vpop.f32.mrb[34].mxu1  ;;  %v17257_v56 = vld [vmem:[#allocation4 + $0x454] ss:$24 sps:$4 sm:$0xff]   ;;  %v17263_v62 = vld [vmem:[#allocation4 + $0x484] ss:$24 sps:$4 sm:$0xff]  }
 0xa2a   :  { %v3659_v7 = vadd.f32 %v3658_v60, %v3618_v61  ;;  %v3622_v8 = vpop.f32.mrb[19].mxu0  ;;  %v3663_v9 = vpop.f32.mrb[35].mxu1  ;;  %v17255_v60 = vld [vmem:[#allocation4 + $0x450] ss:$24 sps:$4 sm:$0xff]   ;;  %4399 = vmatprep.subr.bf16.mxu0 %v17257_v56  ;;  %v17269_v6 = vld [vmem:[#allocation4 + $0x4b4] ss:$24 sps:$4 sm:$0xff]  }
 0xa2b   :  { %v3661_v11 = vadd.f32 %v3660_v2, %v3620_v4  ;;  %v17258_v61 = vld [vmem:[#allocation4 + $0x458] ss:$24 sps:$4 sm:$0xff]   ;;  %v17266_v2 = vld [vmem:[#allocation4 + $0x48c] ss:$24 sps:$4 sm:$0xff]   ;;  %4400 = vmatpush1.bf16.msra.mxu0 %v17255_v60  ;;  %v17264_v5 = vld [vmem:[#allocation4 + $0x488] ss:$24 sps:$4 sm:$0xff]  }
 0xa2c   :  { %v17261_v4 = vld [vmem:[#allocation4 + $0x480] ss:$24 sps:$4 sm:$0xff]   ;;  %4401 = vmatprep.subr.bf16.mxu0 %v17263_v62  ;;  %v17267_v8 = vld [vmem:[#allocation4 + $0x4b0] ss:$24 sps:$4 sm:$0xff]  }
 0xa2d   :  { %v17270_v9 = vld [vmem:[#allocation4 + $0x4b8] ss:$24 sps:$4 sm:$0xff]  }
 0xa2f   :  { %4402 = vmatpush1.bf16.msra.mxu0 %v17261_v4 }
 0xa30   :  { %4403 = vmatprep.subr.bf16.mxu0 %v17269_v6 }
 0xa33   :  { %4404 = vmatpush1.bf16.msra.mxu0 %v17267_v8  ;;  %v17312_v8 = vld [vmem:[#allocation4 + $0x340] ss:$24 sps:$4 sm:$0xff]  }
 0xa67   :  { %v3699_v15 = vpop.f32.mrb[20].mxu0  ;;  %v3740_v13 = vpop.f32.mrb[36].mxu1 }
 0xa68   :  { %v3700_v14 = vadd.f32 %v3699_v15, %v3659_v7  ;;  %v3701_v16 = vpop.f32.mrb[21].mxu0  ;;  %v3742_v37 = vpop.f32.mrb[37].mxu1  ;;  %v17272_v7 = vld [vmem:[#allocation4 + $0x4bc] ss:$24 sps:$4 sm:$0xff]   ;;  %v17273_v15 = vld [vmem:[#allocation4 + $0x4e0] ss:$24 sps:$4 sm:$0xff]  }
 0xa69   :  { %v3702_v17 = vadd.f32 %v3701_v16, %v3661_v11  ;;  %v3703_v55 = vpop.f32.mrb[22].mxu0  ;;  %v3744_v39 = vpop.f32.mrb[38].mxu1  ;;  %v17275_v11 = vld [vmem:[#allocation4 + $0x4e4] ss:$24 sps:$4 sm:$0xff]  }
 0xa6a   :  { %v3741_v3 = vadd.f32 %v3740_v13, %v3700_v14  ;;  %v3704_v21 = vpop.f32.mrb[23].mxu0  ;;  %v3745_v54 = vpop.f32.mrb[39].mxu1  ;;  %4405 = vmatprep.subr.bf16.mxu0 %v17275_v11  ;;  %v17315_v11 = vld [vmem:[#allocation4 + $0x370] ss:$24 sps:$4 sm:$0xff]  }
 0xa6b   :  { %v3743_v22 = vadd.f32 %v3742_v37, %v3702_v17  ;;  %4406 = vmatpush1.bf16.msra.mxu0 %v17273_v15  ;;  %v17276_v21 = vld [vmem:[#allocation4 + $0x4e8] ss:$24 sps:$4 sm:$0xff]   ;;  %v17281_v54 = vld [vmem:[#allocation4 + $0x514] ss:$24 sps:$4 sm:$0xff]   ;;  %v17320_v15 = vld [vmem:[#allocation4 + $0x3a4] ss:$24 sps:$4 sm:$0xff]  }
 0xa6c   :  { %v18996_v23 = vadd.f32 %v3741_v3, %v18928_v12  ;;  %v17222_v12 = vld [vmem:[#allocation4 + $0x338] ss:$24 sps:$4 sm:$0xff]   ;;  %v17278_v3 = vld [vmem:[#allocation4 + $0x4ec] ss:$24 sps:$4 sm:$0xff]   ;;  %4407 = vmatprep.subr.bf16.mxu0 %v17281_v54 }
 0xa6d   :  { %v18999_v1 = vadd.f32 %v3743_v22, %v18933_v10  ;;  %v17230_v10 = vld [vmem:[#allocation4 + $0x36c] ss:$24 sps:$4 sm:$0xff]   ;;  %4429 = vmatpush1.bf16.msra.mxu1 %v17222_v12  ;;  %v17279_v22 = vld [vmem:[#allocation4 + $0x510] ss:$24 sps:$4 sm:$0xff]  }
 0xa6e   :  { %4430 = vmatprep.subr.bf16.mxu1 %v17230_v10  ;;  %v17291_v12 = vld [vmem:[#allocation4 + $0x570] ss:$24 sps:$4 sm:$0xff]   ;;  %v17299_v10 = vld [vmem:[#allocation4 + $0x5a4] ss:$24 sps:$4 sm:$0xff]   ;;  %v17335_v54 = vld [vmem:[#allocation4 + $0x494] ss:$24 sps:$4 sm:$0xff]  }
 0xa6f   :  { %v3770_v24 = vadd.f32 %v18999_v1, %v18996_v23  ;;  %4408 = vmatpush1.bf16.msra.mxu0 %v17279_v22  ;;  %v17333_v22 = vld [vmem:[#allocation4 + $0x490] ss:$24 sps:$4 sm:$0xff]  }
 0xa70   :  { %4409 = vmatprep.subr.bf16.mxu0 %v17287_v27  ;;  %v17339_v27 = vld [vmem:[#allocation4 + $0x4f0] ss:$24 sps:$4 sm:$0xff]  }
 0xa71   :  { %3771 = vadd.xlane.f32.xlu0 %v3770_v24  ;;  %4431 = vmatpush1.bf16.msra.mxu1 %v17228_v34  ;;  %v17284_v24 = vld [vmem:[#allocation4 + $0x51c] ss:$24 sps:$4 sm:$0xff]   ;;  %v17297_v34 = vld [vmem:[#allocation4 + $0x5a0] ss:$24 sps:$4 sm:$0xff]  }
 0xa72   :  { %4432 = vmatprep.subr.bf16.mxu1 %v17236_v38  ;;  %v17305_v38 = vld [vmem:[#allocation4 + $0x5d4] ss:$24 sps:$4 sm:$0xff]  }
 0xa73   :  { %4410 = vmatpush1.bf16.msra.mxu0 %v17285_v26  ;;  %v17341_v26 = vld [vmem:[#allocation4 + $0x4f4] ss:$24 sps:$4 sm:$0xff]  }
 0xa74   :  { %4411 = vmatprep.subr.bf16.mxu0 %v17293_v30  ;;  %v17347_v30 = vld [vmem:[#allocation4 + $0x554] ss:$24 sps:$4 sm:$0xff]  }
 0xa75   :  { %4433 = vmatpush1.bf16.msra.mxu1 %v17234_v40  ;;  %v17303_v40 = vld [vmem:[#allocation4 + $0x5d0] ss:$24 sps:$4 sm:$0xff]  }
 0xa76   :  { %4434 = vmatprep.subr.bf16.mxu1 %v17242_v42  ;;  %v17311_v42 = vld [vmem:[#allocation4 + $0x314] ss:$24 sps:$4 sm:$0xff]  }
 0xa77   :  { %4412 = vmatpush1.bf16.msra.mxu0 %v17291_v12  ;;  %v17350_v12 = vld [vmem:[#allocation4 + $0x584] ss:$24 sps:$4 sm:$0xff]  }
 0xa78   :  { %4413 = vmatprep.subr.bf16.mxu0 %v17299_v10  ;;  %v17353_v10 = vld [vmem:[#allocation4 + $0x5b4] ss:$24 sps:$4 sm:$0xff]  }
 0xa79   :  { %4435 = vmatpush1.bf16.msra.mxu1 %v17240_v44 }
 0xa7a   :  { %4436 = vmatprep.subr.bf16.mxu1 %v17248_v46  ;;  %v19010_v46 = vld [vmem:[#allocation2 + $0x28] sm:$0xff] }
 0xa7b   :  { %4414 = vmatpush1.bf16.msra.mxu0 %v17297_v34  ;;  %v17356_v34 = vld [vmem:[#allocation4 + $0x5e4] ss:$24 sps:$4 sm:$0xff]  }
 0xa7c   :  { %4415 = vmatprep.subr.bf16.mxu0 %v17305_v38 }
 0xa7d   :  { %4437 = vmatpush1.bf16.msra.mxu1 %v17246_v48  ;;  %v3793_v48 = vrot.slane %v19010_v46, %v18831_v18 }
 0xa7e   :  { %4438 = vmatprep.subr.bf16.mxu1 %v17254_v50 }
 0xa7f   :  { %4416 = vmatpush1.bf16.msra.mxu0 %v17303_v40 }
 0xa80   :  { %4467 = vmatprep.subr.bf16.mxu0 %v17311_v42 }
 0xa81   :  { %4439 = vmatpush1.bf16.msra.mxu1 %v17252_v53  ;;  %v3803_v53 = vrot.slane %v19010_v46, %v18834_v19 }
 0xa82   :  { %4440 = vmatprep.subr.bf16.mxu1 %v17260_v59  ;;  %v3799_v59 = vrot.slane %v19012_v47, %v18834_v19 }
 0xa85   :  { %4441 = vmatpush1.bf16.msra.mxu1 %v17258_v61 }
 0xa86   :  { %4442 = vmatprep.subr.bf16.mxu1 %v17266_v2 }
 0xa89   :  { %4443 = vmatpush1.bf16.msra.mxu1 %v17264_v5  ;;  %v17309_v5 = vld [vmem:[#allocation4 + $0x310] ss:$24 sps:$4 sm:$0xff]  }
 0xa8a   :  { %4444 = vmatprep.subr.bf16.mxu1 %v17272_v7  ;;  %v17314_v7 = vld [vmem:[#allocation4 + $0x344] ss:$24 sps:$4 sm:$0xff]  }
 0xa8d   :  { %4445 = vmatpush1.bf16.msra.mxu1 %v17270_v9  ;;  %v17317_v9 = vld [vmem:[#allocation4 + $0x374] ss:$24 sps:$4 sm:$0xff]  }
 0xa8e   :  { %4446 = vmatprep.subr.bf16.mxu1 %v17278_v3  ;;  %v17332_v3 = vld [vmem:[#allocation4 + $0x464] ss:$24 sps:$4 sm:$0xff]  }
 0xa91   :  { %4447 = vmatpush1.bf16.msra.mxu1 %v17276_v21  ;;  %v17330_v21 = vld [vmem:[#allocation4 + $0x460] ss:$24 sps:$4 sm:$0xff]  }
 0xa92   :  { %4448 = vmatprep.subr.bf16.mxu1 %v17284_v24  ;;  %v17338_v24 = vld [vmem:[#allocation4 + $0x4c4] ss:$24 sps:$4 sm:$0xff]  }
 0xa95   :  { %4449 = vmatpush1.bf16.msra.mxu1 %v17282_v25  ;;  %v17336_v25 = vld [vmem:[#allocation4 + $0x4c0] ss:$24 sps:$4 sm:$0xff]  }
 0xa96   :  { %4450 = vmatprep.subr.bf16.mxu1 %v17290_v29  ;;  %v17342_v29 = vld [vmem:[#allocation4 + $0x520] ss:$24 sps:$4 sm:$0xff]  }
 0xa99   :  { %4451 = vmatpush1.bf16.msra.mxu1 %v17288_v28  ;;  %v17344_v28 = vld [vmem:[#allocation4 + $0x524] ss:$24 sps:$4 sm:$0xff]  }
 0xa9a   :  { %4452 = vmatprep.subr.bf16.mxu1 %v17296_v31  ;;  %v17345_v31 = vld [vmem:[#allocation4 + $0x550] ss:$24 sps:$4 sm:$0xff]  }
 0xa9d   :  { %4453 = vmatpush1.bf16.msra.mxu1 %v17294_v32  ;;  %v17348_v32 = vld [vmem:[#allocation4 + $0x580] ss:$24 sps:$4 sm:$0xff]  }
 0xa9e   :  { %4454 = vmatprep.subr.bf16.mxu1 %v17302_v33  ;;  %v17351_v33 = vld [vmem:[#allocation4 + $0x5b0] ss:$24 sps:$4 sm:$0xff]  }
 0xaa1   :  { %4455 = vmatpush1.bf16.msra.mxu1 %v17300_v35  ;;  %v17354_v35 = vld [vmem:[#allocation4 + $0x5e0] ss:$24 sps:$4 sm:$0xff]  }
 0xaa2   :  { %4456 = vmatprep.subr.bf16.mxu1 %v17308_v20 }
 0xaa5   :  { %4457 = vmatpush1.bf16.msra.mxu1 %v17306_v41 }
 0xaa6   :  { %16672 = vmatprep.subr.mxu1 %v18670_v0 }
 0xafe   :  { %v3772_v13 = vpop.xlane.xlu0 %3771 }
 0xaff   :  { %v3773_v14 = vmul.f32 0.00390625, %v3772_v13  ;;  %v17318_v13 = vld [vmem:[#allocation4 + $0x3a0] ss:$24 sps:$4 sm:$0xff]  }
 0xb01   :  { %v19004_v16 = vsub.f32 %v18996_v23, %v3773_v14  ;;  %v3775_v37 = vsub.f32 %v18999_v1, %v3773_v14  ;;  %v17323_v14 = vld [vmem:[#allocation4 + $0x3d4] ss:$24 sps:$4 sm:$0xff]  }
 0xb03   :  { %v3776_v17 = vmul.f32 %v19004_v16, %v19004_v16  ;;  %v3777_v55 = vmul.f32 %v3775_v37, %v3775_v37 }
 0xb05   :  { %v3778_v39 = vadd.f32 %v3777_v55, %v3776_v17  ;;  %v17324_v17 = vld [vmem:[#allocation4 + $0x400] ss:$24 sps:$4 sm:$0xff]   ;;  %v17329_v55 = vld [vmem:[#allocation4 + $0x434] ss:$24 sps:$4 sm:$0xff]  }
 0xb07   :  { %3779 = vadd.xlane.f32.xlu0 %v3778_v39  ;;  %v17327_v39 = vld [vmem:[#allocation4 + $0x430] ss:$24 sps:$4 sm:$0xff]  }
 0xb94   :  { %v3780_v43 = vpop.xlane.xlu0 %3779 }
 0xb95   :  { %v3781_v44 = vmul.f32 0.00390625, %v3780_v43 }
 0xb97   :  { %v3782_v45 = vadd.f32 1e-05, %v3781_v44 }
 0xb99   :  { %18433 = vrsqrt.f32 %v3782_v45 }
 0xba3   :  { %v18434_v50 = vpop.eup %18433 }
 0xba4   :  { %v3785_v51 = vmul.f32 %v18434_v50, %v3775_v37  ;;  %v3784_v56 = vmul.f32 %v18434_v50, %v19004_v16  ;;  %v17321_v16 = vld [vmem:[#allocation4 + $0x3d0] ss:$24 sps:$4 sm:$0xff]   ;;  %v17326_v37 = vld [vmem:[#allocation4 + $0x404] ss:$24 sps:$4 sm:$0xff]  }
 0xba6   :  { %v3795_v60 = vmul.f32 %v3793_v48, %v3785_v51  ;;  %v3794_v61 = vmul.f32 %v3789_v49, %v3784_v56 }
 0xba8   :  { %v3805_v62 = vadd.f32 %v3803_v53, %v3795_v60  ;;  %v3804_v2 = vadd.f32 %v3799_v59, %v3794_v61 }
 0xbaa   :  { %v3807_v4 = vpack.c.bf16 %v3805_v62, %v3805_v62  ;;  %v19023_v6 = vpack.c.bf16 %v3804_v2, %v3804_v2 }
 0xbac   :  { %4417 = vmatprep.mubr.bf16.mxu0 %v3807_v4  ;;  %4458 = vmatprep.mubr.bf16.mxu1 %v3807_v4 }
 0xbad   :  { %4418 = vmatmul.mubr.bf16.vlgmr.msra.gmra.mrb[24].mxu0 %v19023_v6  ;;  %4459 = vmatmul.mubr.bf16.vlgmr.msra.gmra.mrb[40].mxu1 %v19023_v6 }
 0xbae   :  { %4468 = vmatpush1.bf16.msra.mxu0 %v17309_v5  ;;  %4499 = vmatprep.mubr.bf16.mxu0 %v3807_v4  ;;  %v18501_v4 = vld [vmem:[%s19461_s1] sm:$0xff] }
 0xbaf   :  { %4469 = vmatprep.subr.bf16.mxu0 %v17314_v7  ;;  %16674 = vmatprep.mubr.msk.f32.mxu1 %vm18671_vm0, %v18670_v0 }
 0xbb2   :  { %4470 = vmatpush1.bf16.msra.mxu0 %v17312_v8 }
 0xbb3   :  { %4471 = vmatprep.subr.bf16.mxu0 %v17317_v9 }
 0xbb6   :  { %4472 = vmatpush1.bf16.msra.mxu0 %v17315_v11 }
 0xbb7   :  { %4473 = vmatprep.subr.bf16.mxu0 %v17320_v15 }
 0xbba   :  { %4474 = vmatpush1.bf16.msra.mxu0 %v17318_v13 }
 0xbbb   :  { %4475 = vmatprep.subr.bf16.mxu0 %v17323_v14 }
 0xbbe   :  { %4476 = vmatpush1.bf16.msra.mxu0 %v17321_v16 }
 0xbbf   :  { %4477 = vmatprep.subr.bf16.mxu0 %v17326_v37 }
 0xbc2   :  { %4478 = vmatpush1.bf16.msra.mxu0 %v17324_v17 }
 0xbc3   :  { %4479 = vmatprep.subr.bf16.mxu0 %v17329_v55 }
 0xbc6   :  { %4480 = vmatpush1.bf16.msra.mxu0 %v17327_v39 }
 0xbc7   :  { %4481 = vmatprep.subr.bf16.mxu0 %v17332_v3 }
 0xbca   :  { %4482 = vmatpush1.bf16.msra.mxu0 %v17330_v21 }
 0xbcb   :  { %4483 = vmatprep.subr.bf16.mxu0 %v17335_v54 }
 0xbce   :  { %4484 = vmatpush1.bf16.msra.mxu0 %v17333_v22 }
 0xbcf   :  { %4485 = vmatprep.subr.bf16.mxu0 %v17338_v24 }
 0xbd2   :  { %4486 = vmatpush1.bf16.msra.mxu0 %v17336_v25 }
 0xbd3   :  { %4487 = vmatprep.subr.bf16.mxu0 %v17341_v26 }
 0xbd6   :  { %4488 = vmatpush1.bf16.msra.mxu0 %v17339_v27 }
 0xbd7   :  { %4489 = vmatprep.subr.bf16.mxu0 %v17344_v28 }
 0xbda   :  { %4490 = vmatpush1.bf16.msra.mxu0 %v17342_v29 }
 0xbdb   :  { %4491 = vmatprep.subr.bf16.mxu0 %v17347_v30 }
 0xbde   :  { %4492 = vmatpush1.bf16.msra.mxu0 %v17345_v31 }
 0xbdf   :  { %4493 = vmatprep.subr.bf16.mxu0 %v17350_v12 }
 0xbe2   :  { %4494 = vmatpush1.bf16.msra.mxu0 %v17348_v32 }
 0xbe3   :  { %4495 = vmatprep.subr.bf16.mxu0 %v17353_v10 }
 0xbe6   :  { %4496 = vmatpush1.bf16.msra.mxu0 %v17351_v33 }
 0xbe7   :  { %4497 = vmatprep.subr.bf16.mxu0 %v17356_v34 }
 0xbea   :  { %4498 = vmatpush1.bf16.msra.mxu0 %v17354_v35 }
 0xbeb   :  { %16707 = vmatprep.subr.mxu0 %v18670_v0 }
 0xbed   :  { %4500 = vmatmul.mubr.bf16.vlgmr.msra.gmra.mrb[28].mxu0 %v19023_v6 }
 0xbee   :  { %16709 = vmatprep.mubr.msk.f32.mxu0 %vm18671_vm0, %v18670_v0 }
 0xc80   :  { %v4419_v38 = vpop.f32.mrb[24].mxu0  ;;  %v4460_v20 = vpop.f32.mrb[40].mxu1 }
 0xc81   :  { %4515 = vrot.lane.b32.xlu1 %v4460_v20, %s18672_s7  ;;  %v4462_v40 = vpop.f32.mrb[41].mxu1  ;;  %16673 = vmatpush3.xpose.msk.msra.mxu1 %vm892_vm1, %v4460_v20  ;;  %v4421_v41 = vpop.f32.mrb[25].mxu0 }
 0xc82   :  { %4509 = vrot.lane.b32.xlu0 %v4419_v38, %s18672_s7  ;;  %v4423_v42 = vpop.f32.mrb[26].mxu0  ;;  %v4464_v43 = vpop.f32.mrb[42].mxu1  ;;  %16677 = vmatprep.subr.mxu1 %v18670_v0 }
 0xc83   :  { %v4424_v44 = vpop.f32.mrb[27].mxu0  ;;  %v4465_v45 = vpop.f32.mrb[43].mxu1 }
 0xc84   :  { %16675 = vmatmul.mubr.msk.f32.vlgmr.msra.gmra.mrb[44].mxu1 %vm892_vm1, %v4419_v38 }
 0xc85   :  { %4518 = vrot.lane.b32.xlu1 %v4462_v40, %s18672_s7  ;;  %16679 = vmatprep.mubr.msk.f32.mxu1 %vm18671_vm0, %v18670_v0 }
 0xc89   :  { %4512 = vrot.lane.b32.xlu1 %v4421_v41, %s18672_s7 }
 0xcc0   :  { %v19042_v48 = vpop.f32.mrb[28].mxu0 }
 0xcc1   :  { %v19044_v49 = vpop.f32.mrb[29].mxu0 }
 0xcc2   :  { %v4505_v50 = vpop.f32.mrb[30].mxu0 }
 0xcc3   :  { %v4506_v51 = vpop.f32.mrb[31].mxu0 }
 0xcf3   :  { %v4516_v53 = vpop.permute.xlu1 %4515 }
 0xcf4   :  { %16678 = vmatpush3.xpose.msk.msra.mxu1 %vm892_vm1, %v4516_v53  ;;  %v4510_v56 = vpop.permute.xlu0 %4509 }
 0xcf5   :  { %16682 = vmatprep.subr.mxu1 %v18670_v0 }
 0xcf7   :  { %16680 = vmatmul.mubr.msk.f32.vlgmr.msra.gmra.mrb[46].mxu1 %vm892_vm1, %v4510_v56  ;;  %v4519_v59 = vpop.permute.xlu1 %4518 }
 0xcf8   :  { %16683 = vmatpush3.xpose.msk.msra.mxu1 %vm892_vm1, %v4462_v40  ;;  %16684 = vmatprep.mubr.msk.f32.mxu1 %vm18671_vm0, %v18670_v0 }
 0xcf9   :  { %16687 = vmatprep.subr.mxu1 %v18670_v0 }
 0xcfb   :  { %16685 = vmatmul.mubr.msk.f32.vlgmr.msra.gmra.mrb[48].mxu1 %vm892_vm1, %v4421_v41  ;;  %v4513_v60 = vpop.permute.xlu1 %4512 }
 0xcfc   :  { %16688 = vmatpush3.xpose.msk.msra.mxu1 %vm892_vm1, %v4519_v59  ;;  %16689 = vmatprep.mubr.msk.f32.mxu1 %vm18671_vm0, %v18670_v0 }
 0xcfd   :  { %16692 = vmatprep.subr.mxu1 %v18670_v0 }
 0xcff   :  { %16690 = vmatmul.mubr.msk.f32.vlgmr.msra.gmra.mrb[50].mxu1 %vm892_vm1, %v4513_v60 }
 0xd00   :  { %16693 = vmatpush3.msra.mxu1 %v19042_v48  ;;  %16694 = vmatprep.mubr.msk.f32.mxu1 %vm18671_vm0, %v18670_v0 }
 0xd01   :  { %16697 = vmatprep.subr.mxu1 %v18670_v0 }
 0xd57   :  { %v4598_v61 = vpop.f32.mrb[44].mxu1 }
 0xd58   :  { %v4824_v62 = vmul.f32 0.0625, %v4598_v61  ;;  %v16676_v2 = vpop.f32.mrb[45].mxu1 }
 0xd5a   :  { %v4828_v5 = vadd.f32 %v18501_v4, %v4824_v62 }
 0xd5c   :  { %v4832_v6 = vsel %vm1197_vm2, %v4828_v5, -inf }
 0xd5d   :  { %4833 = vmax.xlane.f32.xlu0 %v4832_v6 }
 0xdca   :  { %v4672_v7 = vpop.f32.mrb[46].mxu1 }
 0xdcb   :  { %v4825_v8 = vmul.f32 0.0625, %v4672_v7  ;;  %v16681_v9 = vpop.f32.mrb[47].mxu1  ;;  %v17357_v7 = vld [vmem:[#allocation6 + $0x100] ss:$8 sps:$4 sm:$0xff]  }
 0xdcc   :  { %v17362_v9 = vld [vmem:[#allocation6 + $0x114] ss:$8 sps:$4 sm:$0xff]  }
 0xdcd   :  { %v4829_v11 = vadd.f32 %v18501_v4, %v4825_v8  ;;  %v17359_v8 = vld [vmem:[#allocation6 + $0x104] ss:$8 sps:$4 sm:$0xff]  }
 0xdce   :  { %v4746_v15 = vpop.f32.mrb[48].mxu1 }
 0xdcf   :  { %v4826_v13 = vmul.f32 0.0625, %v4746_v15  ;;  %v16686_v14 = vpop.f32.mrb[49].mxu1  ;;  %v4835_v16 = vsel %vm1197_vm2, %v4829_v11, -inf  ;;  %v17363_v15 = vld [vmem:[#allocation6 + $0x120] ss:$8 sps:$4 sm:$0xff]  }
 0xdd0   :  { %4836 = vmax.xlane.f32.xlu0 %v4835_v16  ;;  %v17366_v14 = vld [vmem:[#allocation6 + $0x130] ss:$8 sps:$4 sm:$0xff]   ;;  %v17371_v16 = vld [vmem:[#allocation6 + $0x144] ss:$8 sps:$4 sm:$0xff]  }
 0xdd1   :  { %v4830_v37 = vadd.f32 %v18501_v4, %v4826_v13  ;;  %v17368_v13 = vld [vmem:[#allocation6 + $0x134] ss:$8 sps:$4 sm:$0xff]  }
 0xdd2   :  { %v4820_v17 = vpop.f32.mrb[50].mxu1 }
 0xdd3   :  { %v4827_v55 = vmul.f32 0.0625, %v4820_v17  ;;  %v16691_v39 = vpop.f32.mrb[51].mxu1  ;;  %v4838_v3 = vsel %vm1197_vm2, %v4830_v37, -inf  ;;  %v17374_v17 = vld [vmem:[#allocation6 + $0x154] ss:$8 sps:$4 sm:$0xff]  }
 0xdd4   :  { %4839 = vmax.xlane.f32.xlu0 %v4838_v3  ;;  %v17377_v39 = vld [vmem:[#allocation6 + $0x164] ss:$8 sps:$4 sm:$0xff]   ;;  %v17375_v3 = vld [vmem:[#allocation6 + $0x160] ss:$8 sps:$4 sm:$0xff]  }
 0xdd5   :  { %v4831_v21 = vadd.f32 %v18501_v4, %v4827_v55  ;;  %v17372_v55 = vld [vmem:[#allocation6 + $0x150] ss:$8 sps:$4 sm:$0xff]  }
 0xdd7   :  { %v4841_v54 = vsel %vm1197_vm2, %v4831_v21, -inf }
 0xdd8   :  { %4842 = vmax.xlane.f32.xlu1 %v4841_v54  ;;  %v17378_v54 = vld [vmem:[#allocation6 + $0x170] ss:$8 sps:$4 sm:$0xff]  }
 0xdea   :  { %v4834_v22 = vpop.xlane.xlu0 %4833 }
 0xdeb   :  { %v4844_v24 = vsub.f32 %v4828_v5, %v4834_v22  ;;  %v17383_v22 = vld [vmem:[#allocation6 + $0x184] ss:$8 sps:$4 sm:$0xff]  }
 0xded   :  { %v4848_v25 = vmul.f32 1.442695, %v4844_v24  ;;  %v17381_v24 = vld [vmem:[#allocation6 + $0x180] ss:$8 sps:$4 sm:$0xff]  }
 0xdef   :  { %18435 = vpow2.f32 %v4848_v25  ;;  %v17386_v25 = vld [vmem:[#allocation6 + $0x194] ss:$8 sps:$4 sm:$0xff]  }
 0xdf9   :  { %v18436_v26 = vpop.eup %18435 }
 0xdfa   :  { %v4856_v27 = vsel %vm1197_vm2, %v18436_v26, 0.0 }
 0xdfb   :  { %4857 = vadd.xlane.f32.xlu1 %v4856_v27  ;;  %v17389_v27 = vld [vmem:[#allocation6 + $0x1a4] ss:$8 sps:$4 sm:$0xff]  }
 0xe5d   :  { %v4837_v28 = vpop.xlane.xlu0 %4836 }
 0xe5e   :  { %v4845_v29 = vsub.f32 %v4829_v11, %v4837_v28  ;;  %v17365_v11 = vld [vmem:[#allocation6 + $0x124] ss:$8 sps:$4 sm:$0xff]   ;;  %v17387_v28 = vld [vmem:[#allocation6 + $0x1a0] ss:$8 sps:$4 sm:$0xff]  }
 0xe60   :  { %v4850_v30 = vmul.f32 1.442695, %v4845_v29  ;;  %v17392_v29 = vld [vmem:[#allocation6 + $0x1b4] ss:$8 sps:$4 sm:$0xff]  }
 0xe61   :  { %v4840_v20 = vpop.xlane.xlu0 %4839 }
 0xe62   :  { %18437 = vpow2.f32 %v4850_v30  ;;  %v4846_v40 = vsub.f32 %v4830_v37, %v4840_v20  ;;  %v17369_v37 = vld [vmem:[#allocation6 + $0x140] ss:$8 sps:$4 sm:$0xff]   ;;  %v17390_v30 = vld [vmem:[#allocation6 + $0x1b0] ss:$8 sps:$4 sm:$0xff]  }
 0xe63   :  { %v17402_v20 = vld [vmem:[#allocation6 + $0x1f0] ss:$8 sps:$4 sm:$0xff]  }
 0xe64   :  { %v4852_v41 = vmul.f32 1.442695, %v4846_v40 }
 0xe65   :  { %v4843_v31 = vpop.xlane.xlu1 %4842 }
 0xe66   :  { %v4847_v12 = vsub.f32 %v4831_v21, %v4843_v31  ;;  %v17380_v21 = vld [vmem:[#allocation6 + $0x174] ss:$8 sps:$4 sm:$0xff]   ;;  %v17395_v31 = vld [vmem:[#allocation6 + $0x1c4] ss:$8 sps:$4 sm:$0xff]  }
 0xe68   :  { %v4854_v32 = vmul.f32 1.442695, %v4847_v12  ;;  %v17393_v12 = vld [vmem:[#allocation6 + $0x1c0] ss:$8 sps:$4 sm:$0xff]  }
 0xe6a   :  { %18439 = vpow2.f32 %v4854_v32  ;;  %v17398_v32 = vld [vmem:[#allocation6 + $0x1d4] ss:$8 sps:$4 sm:$0xff]  }
 0xe6c   :  { %v18438_v10 = vpop.eup %18437 }
 0xe6d   :  { %v4859_v33 = vsel %vm1197_vm2, %v18438_v10, 0.0 }
 0xe6e   :  { %4860 = vadd.xlane.f32.xlu1 %v4859_v33  ;;  %v17401_v33 = vld [vmem:[#allocation6 + $0x1e4] ss:$8 sps:$4 sm:$0xff]  }
 0xe74   :  { %v18440_v34 = vpop.eup %18439 }
 0xe75   :  { %v4865_v35 = vsel %vm1197_vm2, %v18440_v34, 0.0 }
 0xe76   :  { %4866 = vadd.xlane.f32.xlu0 %v4865_v35  ;;  %v17404_v35 = vld [vmem:[#allocation6 + $0x1f4] ss:$8 sps:$4 sm:$0xff]  }
 0xe7f   :  { %4521 = vrot.lane.b32.xlu1 %v19042_v48, %s18672_s7 }
 0xe88   :  { %v4858_v38 = vpop.xlane.xlu1 %4857 }
 0xe89   :  { %18441 = vrcp.f32 %v4858_v38 }
 0xe8a   :  { %18443 = vpow2.f32 %v4852_v41 }
 0xe8c   :  { %4525 = vrot.lane.b32.xlu0 %v19044_v49, %s18672_s7 }
 0xe93   :  { %v18442_v42 = vpop.eup %18441 }
 0xe94   :  { %v4872_v43 = vmul.f32 %v18442_v42, %v18436_v26  ;;  %v18444_v44 = vpop.eup %18443  ;;  %v17384_v26 = vld [vmem:[#allocation6 + $0x190] ss:$8 sps:$4 sm:$0xff]  }
 0xe95   :  { %v4862_v45 = vsel %vm1197_vm2, %v18444_v44, 0.0 }
 0xe96   :  { %16695 = vmatmul.mubr.msk.f32.vlgmr.msra.gmra.mrb[52].mxu1 %vm1197_vm2, %v4872_v43 }
 0xe97   :  { %16699 = vmatprep.mubr.msk.f32.mxu1 %vm18671_vm0, %v18670_v0 }
 0xea3   :  { %4863 = vadd.xlane.f32.xlu1 %v4862_v45 }
 0xefb   :  { %v4861_v48 = vpop.xlane.xlu1 %4860 }
 0xefc   :  { %18445 = vrcp.f32 %v4861_v48 }
 0xeff   :  { %v4522_v50 = vpop.permute.xlu1 %4521 }
 0xf00   :  { %16698 = vmatpush3.msra.mxu1 %v4522_v50 }
 0xf01   :  { %16702 = vmatprep.subr.mxu1 %v18670_v0 }
 0xf03   :  { %v4867_v51 = vpop.xlane.xlu0 %4866 }
 0xf04   :  { %18447 = vrcp.f32 %v4867_v51 }
 0xf06   :  { %v18446_v53 = vpop.eup %18445 }
 0xf07   :  { %v4873_v56 = vmul.f32 %v18446_v53, %v18438_v10  ;;  %v4526_v59 = vpop.permute.xlu0 %4525  ;;  %v17396_v10 = vld [vmem:[#allocation6 + $0x1d0] ss:$8 sps:$4 sm:$0xff]  }
 0xf08   :  { %16708 = vmatpush3.msra.mxu0 %v4526_v59 }
 0xf09   :  { %16700 = vmatmul.mubr.msk.f32.vlgmr.msra.gmra.mrb[54].mxu1 %vm1197_vm2, %v4873_v56 }
 0xf0a   :  { %16703 = vmatpush3.msra.mxu1 %v19044_v49  ;;  %16704 = vmatprep.mubr.msk.f32.mxu1 %vm18671_vm0, %v18670_v0  ;;  %v17360_v49 = vld [vmem:[#allocation6 + $0x110] ss:$8 sps:$4 sm:$0xff]  }
 0xf0b   :  { %5381 = vmatprep.subr.bf16.mxu1 %v17359_v8 }
 0xf0e   :  { %v18448_v60 = vpop.eup %18447 }
 0xf0f   :  { %v4875_v61 = vmul.f32 %v18448_v60, %v18440_v34  ;;  %v17399_v34 = vld [vmem:[#allocation6 + $0x1e0] ss:$8 sps:$4 sm:$0xff]  }
 0xf11   :  { %16710 = vmatmul.mubr.msk.f32.vlgmr.msra.gmra.mrb[32].mxu0 %vm1197_vm2, %v4875_v61  ;;  %v5216_v61 = vrot.slane %v19012_v47, %v18915_v63  ;;  %v5463_v47 = vld [vmem:[#allocation7 + $0x400] sm:$0xff] }
 0xf30   :  { %v4864_v62 = vpop.xlane.xlu1 %4863 }
 0xf31   :  { %18449 = vrcp.f32 %v4864_v62  ;;  %v5220_v62 = vrot.slane %v19010_v46, %v18915_v63 }
 0xf3b   :  { %v18450_v2 = vpop.eup %18449 }
 0xf3c   :  { %v4874_v4 = vmul.f32 %v18450_v2, %v18444_v44 }
 0xf3e   :  { %16705 = vmatmul.mubr.msk.f32.vlgmr.msra.gmra.mrb[56].mxu1 %vm1197_vm2, %v4874_v4 }
 0xf3f   :  { %5382 = vmatpush1.bf16.msra.mxu1 %v17357_v7 }
 0xf40   :  { %5383 = vmatprep.subr.bf16.mxu1 %v17362_v9 }
 0xf43   :  { %5384 = vmatpush1.bf16.msra.mxu1 %v17360_v49 }
 0xf44   :  { %5385 = vmatprep.subr.bf16.mxu1 %v17365_v11 }
 0xf47   :  { %5386 = vmatpush1.bf16.msra.mxu1 %v17363_v15  ;;  %v5467_v15 = vld [vmem:[#allocation7 + $0x420] sm:$0xff] }
 0xf48   :  { %5387 = vmatprep.subr.bf16.mxu1 %v17368_v13  ;;  %v5464_v13 = vld [vmem:[#allocation7 + $0x408] sm:$0xff]  ;;  %v15488_v46 = vcombine.low %v5463_v47, %v5467_v15 }
 0xf4b   :  { %5388 = vmatpush1.bf16.msra.mxu1 %v17366_v14  ;;  %v15489_v14 = vcombine.high %v5463_v47, %v5467_v15  ;;  %v5519_v47 = vld [vmem:[#allocation7 + $0x5c0] sm:$0xff] }
 0xf4c   :  { %5389 = vmatprep.subr.bf16.mxu1 %v17371_v16  ;;  %v5468_v16 = vld [vmem:[#allocation7 + $0x428] sm:$0xff]  ;;  %v5523_v15 = vld [vmem:[#allocation7 + $0x5e0] sm:$0xff] }
 0xf4d   :  { %6263 = vmatprep.subr.bf16.mxu0 %v15489_v14 }
 0xf4e   :  { %6264 = vmatpush1.bf16.msra.mxu0 %v15488_v46  ;;  %v5524_v46 = vld [vmem:[#allocation7 + $0x5e8] sm:$0xff] }
 0xf4f   :  { %5390 = vmatpush1.bf16.msra.mxu1 %v17369_v37  ;;  %v5471_v37 = vld [vmem:[#allocation7 + $0x440] sm:$0xff] }
 0xf50   :  { %5391 = vmatprep.subr.bf16.mxu1 %v17374_v17  ;;  %v5475_v17 = vld [vmem:[#allocation7 + $0x460] sm:$0xff] }
 0xf53   :  { %5392 = vmatpush1.bf16.msra.mxu1 %v17372_v55  ;;  %v15490_v55 = vcombine.low %v5464_v13, %v5468_v16 }
 0xf54   :  { %5393 = vmatprep.subr.bf16.mxu1 %v17377_v39  ;;  %v15491_v39 = vcombine.high %v5464_v13, %v5468_v16  ;;  %v5520_v13 = vld [vmem:[#allocation7 + $0x5c8] sm:$0xff] }
 0xf57   :  { %5394 = vmatpush1.bf16.msra.mxu1 %v17375_v3  ;;  %v5472_v3 = vld [vmem:[#allocation7 + $0x448] sm:$0xff] }
 0xf58   :  { %5395 = vmatprep.subr.bf16.mxu1 %v17380_v21  ;;  %v5476_v21 = vld [vmem:[#allocation7 + $0x468] sm:$0xff] }
 0xf5b   :  { %5396 = vmatpush1.bf16.msra.mxu1 %v17378_v54  ;;  %v5479_v54 = vld [vmem:[#allocation7 + $0x480] sm:$0xff] }
 0xf5c   :  { %5397 = vmatprep.subr.bf16.mxu1 %v17383_v22  ;;  %v5483_v22 = vld [vmem:[#allocation7 + $0x4a0] sm:$0xff] }
 0xf5f   :  { %5398 = vmatpush1.bf16.msra.mxu1 %v17381_v24  ;;  %v5480_v24 = vld [vmem:[#allocation7 + $0x488] sm:$0xff] }
 0xf60   :  { %5399 = vmatprep.subr.bf16.mxu1 %v17386_v25  ;;  %v5484_v25 = vld [vmem:[#allocation7 + $0x4a8] sm:$0xff] }
 0xf63   :  { %5400 = vmatpush1.bf16.msra.mxu1 %v17384_v26  ;;  %v15496_v26 = vcombine.low %v5471_v37, %v5475_v17 }
 0xf64   :  { %5401 = vmatprep.subr.bf16.mxu1 %v17389_v27  ;;  %v15498_v27 = vcombine.low %v5472_v3, %v5476_v21 }
 0xf67   :  { %5402 = vmatpush1.bf16.msra.mxu1 %v17387_v28  ;;  %v15505_v28 = vcombine.high %v5479_v54, %v5483_v22 }
 0xf68   :  { %5403 = vmatprep.subr.bf16.mxu1 %v17392_v29  ;;  %v15507_v29 = vcombine.high %v5480_v24, %v5484_v25 }
 0xf69   :  { %v19088_v5 = vpop.f32.mrb[52].mxu1 }
 0xf6a   :  { %v16696_v6 = vpop.f32.mrb[53].mxu1 }
 0xf6b   :  { %5404 = vmatpush1.bf16.msra.mxu1 %v17390_v30  ;;  %v5487_v30 = vld [vmem:[#allocation7 + $0x4c0] sm:$0xff] }
 0xf6c   :  { %5405 = vmatprep.subr.bf16.mxu1 %v17395_v31  ;;  %v5491_v31 = vld [vmem:[#allocation7 + $0x4e0] sm:$0xff] }
 0xf6f   :  { %5406 = vmatpush1.bf16.msra.mxu1 %v17393_v12  ;;  %v5488_v12 = vld [vmem:[#allocation7 + $0x4c8] sm:$0xff] }
 0xf70   :  { %5407 = vmatprep.subr.bf16.mxu1 %v17398_v32  ;;  %v5492_v32 = vld [vmem:[#allocation7 + $0x4e8] sm:$0xff] }
 0xf73   :  { %5408 = vmatpush1.bf16.msra.mxu1 %v17396_v10  ;;  %v15504_v10 = vcombine.low %v5479_v54, %v5483_v22  ;;  %v15546_v54 = vcombine.low %v5520_v13, %v5524_v46 }
 0xf74   :  { %5409 = vmatprep.subr.bf16.mxu1 %v17401_v33  ;;  %v15506_v33 = vcombine.low %v5480_v24, %v5484_v25  ;;  %v5535_v24 = vld [vmem:[#allocation7 + $0x640] sm:$0xff] }
 0xf75   :  { %v5539_v25 = vld [vmem:[#allocation7 + $0x660] sm:$0xff] }
 0xf77   :  { %5410 = vmatpush1.bf16.msra.mxu1 %v17399_v34  ;;  %v15513_v34 = vcombine.high %v5487_v30, %v5491_v31 }
 0xf78   :  { %5411 = vmatprep.subr.bf16.mxu1 %v17404_v35  ;;  %v15515_v35 = vcombine.high %v5488_v12, %v5492_v32 }
 0xf7b   :  { %5412 = vmatpush1.bf16.msra.mxu1 %v17402_v20  ;;  %v5499_v20 = vld [vmem:[#allocation7 + $0x520] sm:$0xff] }
 0xf7c   :  { %6304 = vmatprep.subr.bf16.mxu1 %v15491_v39  ;;  %v5531_v39 = vld [vmem:[#allocation7 + $0x620] sm:$0xff] }
 0xfdc   :  { %v5018_v38 = vpop.f32.mrb[54].mxu1 }
 0xfdd   :  { %v16701_v40 = vpop.f32.mrb[55].mxu1 }
 0xfde   :  { %v5496_v40 = vld [vmem:[#allocation7 + $0x508] sm:$0xff] }
 0xfe4   :  { %v5164_v41 = vpop.f32.mrb[32].mxu0 }
 0xfe5   :  { %v16814_v42 = vpack.i.bf16 %v5018_v38, %v5164_v41  ;;  %v16711_v43 = vpop.f32.mrb[33].mxu0  ;;  %v5495_v38 = vld [vmem:[#allocation7 + $0x500] sm:$0xff]  ;;  %v5500_v41 = vld [vmem:[#allocation7 + $0x528] sm:$0xff] }
 0xfe6   :  { %v15514_v43 = vcombine.low %v5488_v12, %v5492_v32  ;;  %v5543_v12 = vld [vmem:[#allocation7 + $0x680] sm:$0xff] }
 0xfe7   :  { %16815 = vrot.lane.b32.xlu0 %v16814_v42, %s18672_s7  ;;  %v15512_v42 = vcombine.low %v5487_v30, %v5491_v31  ;;  %v15561_v30 = vcombine.high %v5535_v24, %v5539_v25  ;;  %v5547_v32 = vld [vmem:[#allocation7 + $0x6a0] sm:$0xff] }
0x1011   :  { %v5091_v44 = vpop.f32.mrb[56].mxu1 }
0x1012   :  { %v16706_v45 = vpop.f32.mrb[57].mxu1 }
0x1013   :  { %v15523_v45 = vcombine.high %v5496_v40, %v5500_v41 }
0x1059   :  { %v16816_v48 = vpop.permute.xlu0 %16815 }
0x105a   :  { %v16818_v50 = vunpack.i.h.bf16 %v16816_v48  ;;  %v16817_v51 = vunpack.i.l.bf16 %v16816_v48  ;;  %v5503_v48 = vld [vmem:[#allocation7 + $0x540] sm:$0xff] }
0x105c   :  { %v5176_v53 = vsel %vm892_vm1, %v19088_v5, %v16818_v50  ;;  %v5177_v56 = vsel %vm892_vm1, %v5091_v44, %v16817_v51  ;;  %v15521_v44 = vcombine.high %v5495_v38, %v5499_v20  ;;  %v5507_v50 = vld [vmem:[#allocation7 + $0x560] sm:$0xff]  ;;  %v5504_v51 = vld [vmem:[#allocation7 + $0x548] sm:$0xff] }
0x105d   :  { %v5178_v59 = vpack.c.bf16 %v5176_v53, %v5176_v53  ;;  %v5179_v60 = vpack.c.bf16 %v5177_v56, %v5177_v56  ;;  %v5508_v53 = vld [vmem:[#allocation7 + $0x568] sm:$0xff]  ;;  %v15520_v56 = vcombine.low %v5495_v38, %v5499_v20  ;;  %v15569_v38 = vcombine.high %v5543_v12, %v5547_v32 }
0x105f   :  { %5413 = vmatprep.mubr.bf16.mxu1 %v5179_v60  ;;  %v15529_v60 = vcombine.high %v5503_v48, %v5507_v50 }
0x1060   :  { %5414 = vmatmul.mubr.bf16.vlgmr.msra.gmra.mrb[60].mxu1 %v5178_v59  ;;  %v15522_v59 = vcombine.low %v5496_v40, %v5500_v41  ;;  %v15568_v40 = vcombine.low %v5543_v12, %v5547_v32 }
0x1061   :  { %6305 = vmatpush1.bf16.msra.mxu1 %v15490_v55  ;;  %v5527_v55 = vld [vmem:[#allocation7 + $0x600] sm:$0xff] }
0x1133   :  { %v5415_v2 = vpop.f32.mrb[60].mxu1 }
0x1134   :  { %v5416_v4 = vadd.f32 %v5415_v2, %v5216_v61  ;;  %v5417_v6 = vpop.f32.mrb[61].mxu1  ;;  %v15531_v61 = vcombine.high %v5504_v51, %v5508_v53  ;;  %v5515_v2 = vld [vmem:[#allocation7 + $0x5a0] sm:$0xff] }
0x1135   :  { %v5418_v7 = vadd.f32 %v5417_v6, %v5220_v62  ;;  %v5419_v8 = vpop.f32.mrb[62].mxu1  ;;  %v5511_v62 = vld [vmem:[#allocation7 + $0x580] sm:$0xff]  ;;  %v5516_v6 = vld [vmem:[#allocation7 + $0x5a8] sm:$0xff] }
0x1136   :  { %v19099_v9 = vadd.f32 %v5416_v4, %v18996_v23  ;;  %v5420_v5 = vpop.f32.mrb[63].mxu1  ;;  %v15497_v23 = vcombine.high %v5471_v37, %v5475_v17  ;;  %v5512_v4 = vld [vmem:[#allocation7 + $0x588] sm:$0xff]  ;;  %v15530_v8 = vcombine.low %v5504_v51, %v5508_v53  ;;  %v15536_v14 = vcombine.low %v5511_v62, %v5515_v2  ;;  %v5551_v53 = vld [vmem:[#allocation7 + $0x6c0] sm:$0xff] }
0x1137   :  { %v19102_v49 = vadd.f32 %v5418_v7, %v18999_v1  ;;  %v15499_v1 = vcombine.high %v5472_v3, %v5476_v21  ;;  %v15528_v7 = vcombine.low %v5503_v48, %v5507_v50  ;;  %v15537_v5 = vcombine.high %v5511_v62, %v5515_v2  ;;  %v5532_v3 = vld [vmem:[#allocation7 + $0x628] sm:$0xff] }
0x1138   :  { %6265 = vmatprep.subr.bf16.mxu0 %v15497_v23  ;;  %v15538_v16 = vcombine.low %v5512_v4, %v5516_v6  ;;  %v15545_v37 = vcombine.high %v5519_v47, %v5523_v15  ;;  %v15547_v17 = vcombine.high %v5520_v13, %v5524_v46  ;;  %v5528_v23 = vld [vmem:[#allocation7 + $0x608] sm:$0xff]  ;;  %v15544_v21 = vcombine.low %v5519_v47, %v5523_v15  ;;  %v5567_v15 = vld [vmem:[#allocation7 + $0x740] sm:$0xff] }
0x1139   :  { %v5424_v11 = vadd.f32 %v19102_v49, %v19099_v9  ;;  %6306 = vmatprep.subr.bf16.mxu1 %v15499_v1  ;;  %6266 = vmatpush1.bf16.msra.mxu0 %v15496_v26  ;;  %v15553_v1 = vcombine.high %v5527_v55, %v5531_v39  ;;  %v15555_v22 = vcombine.high %v5528_v23, %v5532_v3  ;;  %v5536_v26 = vld [vmem:[#allocation7 + $0x648] sm:$0xff]  ;;  %v5571_v13 = vld [vmem:[#allocation7 + $0x760] sm:$0xff] }
0x113a   :  { %6307 = vmatpush1.bf16.msra.mxu1 %v15498_v27  ;;  %6267 = vmatprep.subr.bf16.mxu0 %v15505_v28  ;;  %v5540_v27 = vld [vmem:[#allocation7 + $0x668] sm:$0xff]  ;;  %v15552_v28 = vcombine.low %v5527_v55, %v5531_v39  ;;  %v5575_v39 = vld [vmem:[#allocation7 + $0x780] sm:$0xff] }
0x113b   :  { %5425 = vadd.xlane.f32.xlu0 %v5424_v11  ;;  %6308 = vmatprep.subr.bf16.mxu1 %v15507_v29  ;;  %v15539_v11 = vcombine.high %v5512_v4, %v5516_v6  ;;  %v15554_v29 = vcombine.low %v5528_v23, %v5532_v3  ;;  %v15563_v31 = vcombine.high %v5536_v26, %v5540_v27  ;;  %v5559_v6 = vld [vmem:[#allocation7 + $0x700] sm:$0xff]  ;;  %v5564_v47 = vld [vmem:[#allocation7 + $0x728] sm:$0xff] }
0x113c   :  { %v5579_v23 = vld [vmem:[#allocation7 + $0x7a0] sm:$0xff]  ;;  %v5576_v3 = vld [vmem:[#allocation7 + $0x788] sm:$0xff] }
0x113d   :  { %6268 = vmatpush1.bf16.msra.mxu0 %v15504_v10  ;;  %v5544_v10 = vld [vmem:[#allocation7 + $0x688] sm:$0xff] }
0x113e   :  { %6309 = vmatpush1.bf16.msra.mxu1 %v15506_v33  ;;  %6269 = vmatprep.subr.bf16.mxu0 %v15513_v34  ;;  %v5548_v33 = vld [vmem:[#allocation7 + $0x6a8] sm:$0xff]  ;;  %v15560_v34 = vcombine.low %v5535_v24, %v5539_v25  ;;  %v5583_v25 = vld [vmem:[#allocation7 + $0x7c0] sm:$0xff] }
0x113f   :  { %6310 = vmatprep.subr.bf16.mxu1 %v15515_v35  ;;  %v15562_v35 = vcombine.low %v5536_v26, %v5540_v27  ;;  %v15571_v20 = vcombine.high %v5544_v10, %v5548_v33  ;;  %v15570_v41 = vcombine.low %v5544_v10, %v5548_v33  ;;  %v5587_v26 = vld [vmem:[#allocation7 + $0x7e0] sm:$0xff]  ;;  %v5584_v27 = vld [vmem:[#allocation7 + $0x7c8] sm:$0xff]  ;;  %v5465_v33 = vld [vmem:[#allocation7 + $0x410] sm:$0xff] }
0x1140   :  { %v15608_v32 = vcombine.low %v5583_v25, %v5587_v26 }
0x1141   :  { %6270 = vmatpush1.bf16.msra.mxu0 %v15512_v42 }
0x1142   :  { %6311 = vmatpush1.bf16.msra.mxu1 %v15514_v43  ;;  %6271 = vmatprep.subr.bf16.mxu0 %v15521_v44 }
0x1143   :  { %6312 = vmatprep.subr.bf16.mxu1 %v15523_v45 }
0x1145   :  { %6272 = vmatpush1.bf16.msra.mxu0 %v15520_v56  ;;  %v5555_v56 = vld [vmem:[#allocation7 + $0x6e0] sm:$0xff] }
0x1146   :  { %6313 = vmatpush1.bf16.msra.mxu1 %v15522_v59  ;;  %6273 = vmatprep.subr.bf16.mxu0 %v15529_v60  ;;  %v5552_v59 = vld [vmem:[#allocation7 + $0x6c8] sm:$0xff]  ;;  %v15577_v60 = vcombine.high %v5551_v53, %v5555_v56  ;;  %v15576_v62 = vcombine.low %v5551_v53, %v5555_v56  ;;  %v19120_v56 = vld [vmem:[#allocation2 + $0x20] sm:$0xff] }
0x1147   :  { %6314 = vmatprep.subr.bf16.mxu1 %v15531_v61  ;;  %v5556_v61 = vld [vmem:[#allocation7 + $0x6e8] sm:$0xff] }
0x1148   :  { %v15578_v2 = vcombine.low %v5552_v59, %v5556_v61  ;;  %v15579_v4 = vcombine.high %v5552_v59, %v5556_v61  ;;  %v5443_v59 = vrot.slane %v19120_v56, %v18948_v57 }
0x1149   :  { %6274 = vmatpush1.bf16.msra.mxu0 %v15528_v7  ;;  %v5563_v7 = vld [vmem:[#allocation7 + $0x720] sm:$0xff] }
0x114a   :  { %6315 = vmatpush1.bf16.msra.mxu1 %v15530_v8  ;;  %6275 = vmatprep.subr.bf16.mxu0 %v15537_v5  ;;  %v5560_v8 = vld [vmem:[#allocation7 + $0x708] sm:$0xff]  ;;  %v15584_v5 = vcombine.low %v5559_v6, %v5563_v7 }
0x114b   :  { %6316 = vmatprep.subr.bf16.mxu1 %v15539_v11  ;;  %v15585_v11 = vcombine.high %v5559_v6, %v5563_v7  ;;  %v15586_v46 = vcombine.low %v5560_v8, %v5564_v47 }
0x114d   :  { %6276 = vmatpush1.bf16.msra.mxu0 %v15536_v14  ;;  %v15587_v14 = vcombine.high %v5560_v8, %v5564_v47  ;;  %v5477_v47 = vld [vmem:[#allocation7 + $0x470] sm:$0xff] }
0x114e   :  { %6317 = vmatpush1.bf16.msra.mxu1 %v15538_v16  ;;  %6277 = vmatprep.subr.bf16.mxu0 %v15545_v37  ;;  %v15593_v16 = vcombine.high %v5567_v15, %v5571_v13  ;;  %v5568_v37 = vld [vmem:[#allocation7 + $0x748] sm:$0xff] }
0x114f   :  { %6318 = vmatprep.subr.bf16.mxu1 %v15547_v17  ;;  %v5572_v17 = vld [vmem:[#allocation7 + $0x768] sm:$0xff] }
0x1150   :  { %v15595_v55 = vcombine.high %v5568_v37, %v5572_v17 }
0x1151   :  { %6278 = vmatpush1.bf16.msra.mxu0 %v15544_v21  ;;  %v5580_v21 = vld [vmem:[#allocation7 + $0x7a8] sm:$0xff] }
0x1152   :  { %6319 = vmatpush1.bf16.msra.mxu1 %v15546_v54  ;;  %6279 = vmatprep.subr.bf16.mxu0 %v15553_v1  ;;  %v15592_v54 = vcombine.low %v5567_v15, %v5571_v13  ;;  %v15594_v1 = vcombine.low %v5568_v37, %v5572_v17  ;;  %v15603_v24 = vcombine.high %v5576_v3, %v5580_v21  ;;  %v5474_v15 = vld [vmem:[#allocation7 + $0x458] sm:$0xff] }
0x1153   :  { %6320 = vmatprep.subr.bf16.mxu1 %v15555_v22  ;;  %v15601_v22 = vcombine.high %v5575_v39, %v5579_v23  ;;  %v5478_v13 = vld [vmem:[#allocation7 + $0x478] sm:$0xff] }
0x1154   :  { %v15503_v37 = vcombine.high %v5474_v15, %v5478_v13  ;;  %v5482_v17 = vld [vmem:[#allocation7 + $0x498] sm:$0xff] }
0x1155   :  { %6280 = vmatpush1.bf16.msra.mxu0 %v15552_v28  ;;  %v5588_v28 = vld [vmem:[#allocation7 + $0x7e8] sm:$0xff] }
0x1156   :  { %6321 = vmatpush1.bf16.msra.mxu1 %v15554_v29  ;;  %6281 = vmatprep.subr.bf16.mxu0 %v15561_v30  ;;  %v15600_v29 = vcombine.low %v5575_v39, %v5579_v23  ;;  %v15602_v30 = vcombine.low %v5576_v3, %v5580_v21  ;;  %v15611_v12 = vcombine.high %v5584_v27, %v5588_v28 }
0x1157   :  { %6322 = vmatprep.subr.bf16.mxu1 %v15563_v31  ;;  %v15609_v31 = vcombine.high %v5583_v25, %v5587_v26  ;;  %v15610_v10 = vcombine.low %v5584_v27, %v5588_v28  ;;  %v15502_v23 = vcombine.low %v5474_v15, %v5478_v13 }
0x1159   :  { %6282 = vmatpush1.bf16.msra.mxu0 %v15560_v34  ;;  %v5469_v34 = vld [vmem:[#allocation7 + $0x430] sm:$0xff] }
0x115a   :  { %6323 = vmatpush1.bf16.msra.mxu1 %v15562_v35  ;;  %6283 = vmatprep.subr.bf16.mxu0 %v15569_v38  ;;  %v5466_v35 = vld [vmem:[#allocation7 + $0x418] sm:$0xff]  ;;  %v15493_v38 = vcombine.high %v5465_v33, %v5469_v34 }
0x115b   :  { %6324 = vmatprep.subr.bf16.mxu1 %v15571_v20  ;;  %v5470_v20 = vld [vmem:[#allocation7 + $0x438] sm:$0xff] }
0x115d   :  { %6284 = vmatpush1.bf16.msra.mxu0 %v15568_v40  ;;  %v15492_v40 = vcombine.low %v5465_v33, %v5469_v34 }
0x115e   :  { %6325 = vmatpush1.bf16.msra.mxu1 %v15570_v41  ;;  %6285 = vmatprep.subr.bf16.mxu0 %v15577_v60  ;;  %v15494_v41 = vcombine.low %v5466_v35, %v5470_v20 }
0x115f   :  { %6326 = vmatprep.subr.bf16.mxu1 %v15579_v4  ;;  %v5453_v4 = vrot.slane %v19120_v56, %v18951_v58 }
0x1161   :  { %6286 = vmatpush1.bf16.msra.mxu0 %v15576_v62 }
0x1162   :  { %6327 = vmatpush1.bf16.msra.mxu1 %v15578_v2  ;;  %6287 = vmatprep.subr.bf16.mxu0 %v15585_v11  ;;  %v5473_v11 = vld [vmem:[#allocation7 + $0x450] sm:$0xff] }
0x1163   :  { %6328 = vmatprep.subr.bf16.mxu1 %v15587_v14  ;;  %v15500_v39 = vcombine.low %v5473_v11, %v5477_v47 }
0x1165   :  { %6288 = vmatpush1.bf16.msra.mxu0 %v15584_v5 }
0x1166   :  { %6329 = vmatpush1.bf16.msra.mxu1 %v15586_v46  ;;  %6289 = vmatprep.subr.bf16.mxu0 %v15593_v16  ;;  %v15501_v16 = vcombine.high %v5473_v11, %v5477_v47 }
0x1167   :  { %6330 = vmatprep.subr.bf16.mxu1 %v15595_v55  ;;  %v5486_v55 = vld [vmem:[#allocation7 + $0x4b8] sm:$0xff] }
0x1168   :  { %v15511_v21 = vcombine.high %v5482_v17, %v5486_v55  ;;  %v15510_v26 = vcombine.low %v5482_v17, %v5486_v55 }
0x1169   :  { %6290 = vmatpush1.bf16.msra.mxu0 %v15592_v54  ;;  %v5489_v54 = vld [vmem:[#allocation7 + $0x4d0] sm:$0xff] }
0x116a   :  { %6331 = vmatpush1.bf16.msra.mxu1 %v15594_v1  ;;  %6291 = vmatprep.subr.bf16.mxu0 %v15601_v22  ;;  %v5493_v1 = vld [vmem:[#allocation7 + $0x4f0] sm:$0xff]  ;;  %v5490_v22 = vld [vmem:[#allocation7 + $0x4d8] sm:$0xff] }
0x116b   :  { %6332 = vmatprep.subr.bf16.mxu1 %v15603_v24  ;;  %v5494_v24 = vld [vmem:[#allocation7 + $0x4f8] sm:$0xff]  ;;  %v15517_v27 = vcombine.high %v5489_v54, %v5493_v1 }
0x116c   :  { %v15519_v28 = vcombine.high %v5490_v22, %v5494_v24 }
0x116d   :  { %6292 = vmatpush1.bf16.msra.mxu0 %v15600_v29  ;;  %v5497_v29 = vld [vmem:[#allocation7 + $0x510] sm:$0xff] }
0x116e   :  { %6333 = vmatpush1.bf16.msra.mxu1 %v15602_v30  ;;  %6293 = vmatprep.subr.bf16.mxu0 %v15609_v31  ;;  %v5501_v30 = vld [vmem:[#allocation7 + $0x530] sm:$0xff]  ;;  %v5498_v31 = vld [vmem:[#allocation7 + $0x518] sm:$0xff] }
0x116f   :  { %6334 = vmatprep.subr.bf16.mxu1 %v15611_v12  ;;  %v5502_v12 = vld [vmem:[#allocation7 + $0x538] sm:$0xff]  ;;  %v15525_v33 = vcombine.high %v5497_v29, %v5501_v30 }
0x1170   :  { %v15527_v34 = vcombine.high %v5498_v31, %v5502_v12 }
0x1171   :  { %6294 = vmatpush1.bf16.msra.mxu0 %v15608_v32  ;;  %v15516_v32 = vcombine.low %v5489_v54, %v5493_v1  ;;  %v5542_v54 = vld [vmem:[#allocation7 + $0x678] sm:$0xff] }
0x1172   :  { %6335 = vmatpush1.bf16.msra.mxu1 %v15610_v10  ;;  %6345 = vmatprep.subr.bf16.mxu0 %v15493_v38  ;;  %v15518_v10 = vcombine.low %v5490_v22, %v5494_v24  ;;  %v5509_v38 = vld [vmem:[#allocation7 + $0x570] sm:$0xff] }
0x11c8   :  { %v5426_v42 = vpop.xlane.xlu0 %5425 }
0x11c9   :  { %v5427_v43 = vmul.f32 0.00390625, %v5426_v42  ;;  %v15495_v42 = vcombine.high %v5466_v35, %v5470_v20  ;;  %v5505_v35 = vld [vmem:[#allocation7 + $0x550] sm:$0xff]  ;;  %v5506_v20 = vld [vmem:[#allocation7 + $0x558] sm:$0xff] }
0x11cb   :  { %v19107_v44 = vsub.f32 %v19099_v9, %v5427_v43  ;;  %v19110_v45 = vsub.f32 %v19102_v49, %v5427_v43  ;;  %6386 = vmatprep.subr.bf16.mxu1 %v15495_v42  ;;  %v15526_v42 = vcombine.low %v5498_v31, %v5502_v12 }
0x11cd   :  { %v5430_v48 = vmul.f32 %v19107_v44, %v19107_v44  ;;  %v5431_v50 = vmul.f32 %v19110_v45, %v19110_v45 }
0x11cf   :  { %v5432_v51 = vadd.f32 %v5431_v50, %v5430_v48 }
0x11d1   :  { %5433 = vadd.xlane.f32.xlu1 %v5432_v51  ;;  %v19116_v51 = vld [vmem:[#allocation2 + $0x28] sm:$0xff] }
0x11d2   :  { %v5447_v53 = vrot.slane %v19116_v51, %v18948_v57  ;;  %v5457_v62 = vrot.slane %v19116_v51, %v18951_v58 }
0x125e   :  { %v5434_v43 = vpop.xlane.xlu1 %5433 }
0x125f   :  { %v5435_v48 = vmul.f32 0.00390625, %v5434_v43  ;;  %v15533_v43 = vcombine.high %v5505_v35, %v5509_v38 }
0x1261   :  { %v5436_v50 = vadd.f32 1e-05, %v5435_v48 }
0x1263   :  { %18451 = vrsqrt.f32 %v5436_v50  ;;  %v5513_v50 = vld [vmem:[#allocation7 + $0x590] sm:$0xff] }
0x126d   :  { %v18452_v60 = vpop.eup %18451 }
0x126e   :  { %v5439_v61 = vmul.f32 %v18452_v60, %v19110_v45  ;;  %v5438_v2 = vmul.f32 %v18452_v60, %v19107_v44  ;;  %v5481_v45 = vld [vmem:[#allocation7 + $0x490] sm:$0xff]  ;;  %v5518_v60 = vld [vmem:[#allocation7 + $0x5b8] sm:$0xff] }
0x126f   :  { %v5485_v44 = vld [vmem:[#allocation7 + $0x4b0] sm:$0xff] }
0x1270   :  { %v5449_v6 = vmul.f32 %v5447_v53, %v5439_v61  ;;  %v5448_v7 = vmul.f32 %v5443_v59, %v5438_v2  ;;  %v15509_v3 = vcombine.high %v5481_v45, %v5485_v44  ;;  %v15508_v25 = vcombine.low %v5481_v45, %v5485_v44  ;;  %v5517_v53 = vld [vmem:[#allocation7 + $0x5b0] sm:$0xff]  ;;  %v5514_v59 = vld [vmem:[#allocation7 + $0x598] sm:$0xff] }
0x1271   :  { %v15532_v61 = vcombine.low %v5505_v35, %v5509_v38  ;;  %v15541_v2 = vcombine.high %v5513_v50, %v5517_v53  ;;  %v15540_v11 = vcombine.low %v5513_v50, %v5517_v53  ;;  %v15542_v47 = vcombine.low %v5514_v59, %v5518_v60  ;;  %v5533_v45 = vld [vmem:[#allocation7 + $0x630] sm:$0xff]  ;;  %v5558_v35 = vld [vmem:[#allocation7 + $0x6f8] sm:$0xff] }
0x1272   :  { %v5459_v8 = vadd.f32 %v5457_v62, %v5449_v6  ;;  %v5458_v5 = vadd.f32 %v5453_v4, %v5448_v7  ;;  %v15543_v4 = vcombine.high %v5514_v59, %v5518_v60  ;;  %v5521_v6 = vld [vmem:[#allocation7 + $0x5d0] sm:$0xff]  ;;  %v5566_v50 = vld [vmem:[#allocation7 + $0x738] sm:$0xff] }
0x1273   :  { %v5525_v7 = vld [vmem:[#allocation7 + $0x5f0] sm:$0xff] }
0x1274   :  { %v5461_v46 = vpack.c.bf16 %v5459_v8, %v5459_v8  ;;  %v19130_v14 = vpack.c.bf16 %v5458_v5, %v5458_v5  ;;  %v5522_v8 = vld [vmem:[#allocation7 + $0x5d8] sm:$0xff]  ;;  %v15549_v15 = vcombine.high %v5521_v6, %v5525_v7  ;;  %v15548_v44 = vcombine.low %v5521_v6, %v5525_v7 }
0x1275   :  { %v5526_v5 = vld [vmem:[#allocation7 + $0x5f8] sm:$0xff] }
0x1276   :  { %6295 = vmatprep.mubr.bf16.mxu0 %v5461_v46  ;;  %6336 = vmatprep.mubr.bf16.mxu1 %v5461_v46  ;;  %v15551_v13 = vcombine.high %v5522_v8, %v5526_v5  ;;  %v15550_v17 = vcombine.low %v5522_v8, %v5526_v5  ;;  %v5574_v6 = vld [vmem:[#allocation7 + $0x778] sm:$0xff] }
0x1277   :  { %6296 = vmatmul.mubr.bf16.vlgmr.msra.gmra.mrb[36].mxu0 %v19130_v14  ;;  %6337 = vmatmul.mubr.bf16.vlgmr.msra.gmra.mrb[64].mxu1 %v19130_v14 }
0x1278   :  { %6346 = vmatpush1.bf16.msra.mxu0 %v15492_v40  ;;  %6387 = vmatpush1.bf16.msra.mxu1 %v15494_v41  ;;  %v5510_v40 = vld [vmem:[#allocation7 + $0x578] sm:$0xff]  ;;  %v15524_v41 = vcombine.low %v5497_v29, %v5501_v30 }
0x1279   :  { %6377 = vmatprep.mubr.bf16.mxu0 %v5461_v46  ;;  %6418 = vmatprep.mubr.bf16.mxu1 %v5461_v46  ;;  %v15535_v48 = vcombine.high %v5506_v20, %v5510_v40  ;;  %v15534_v62 = vcombine.low %v5506_v20, %v5510_v40  ;;  %v5529_v46 = vld [vmem:[#allocation7 + $0x610] sm:$0xff]  ;;  %v5550_v29 = vld [vmem:[#allocation7 + $0x6b8] sm:$0xff] }
0x127a   :  { %6347 = vmatprep.subr.bf16.mxu0 %v15501_v16  ;;  %6388 = vmatprep.subr.bf16.mxu1 %v15503_v37  ;;  %v5530_v16 = vld [vmem:[#allocation7 + $0x618] sm:$0xff]  ;;  %v15557_v55 = vcombine.high %v5529_v46, %v5533_v45  ;;  %v15556_v1 = vcombine.low %v5529_v46, %v5533_v45 }
0x127b   :  { %v5534_v37 = vld [vmem:[#allocation7 + $0x638] sm:$0xff] }
0x127c   :  { %6348 = vmatpush1.bf16.msra.mxu0 %v15500_v39  ;;  %6389 = vmatpush1.bf16.msra.mxu1 %v15502_v23  ;;  %v15559_v39 = vcombine.high %v5530_v16, %v5534_v37  ;;  %v5537_v23 = vld [vmem:[#allocation7 + $0x650] sm:$0xff]  ;;  %v15558_v22 = vcombine.low %v5530_v16, %v5534_v37  ;;  %v5582_v46 = vld [vmem:[#allocation7 + $0x7b8] sm:$0xff] }
0x127d   :  { %6349 = vmatprep.subr.bf16.mxu0 %v15509_v3  ;;  %6390 = vmatprep.subr.bf16.mxu1 %v15511_v21  ;;  %v5541_v3 = vld [vmem:[#allocation7 + $0x670] sm:$0xff]  ;;  %v5538_v21 = vld [vmem:[#allocation7 + $0x658] sm:$0xff] }
0x127e   :  { %v15565_v24 = vcombine.high %v5537_v23, %v5541_v3  ;;  %v15564_v30 = vcombine.low %v5537_v23, %v5541_v3  ;;  %v15566_v31 = vcombine.low %v5538_v21, %v5542_v54  ;;  %v5590_v23 = vld [vmem:[#allocation7 + $0x7f8] sm:$0xff] }
0x1280   :  { %6350 = vmatpush1.bf16.msra.mxu0 %v15508_v25  ;;  %6391 = vmatpush1.bf16.msra.mxu1 %v15510_v26  ;;  %v15567_v25 = vcombine.high %v5538_v21, %v5542_v54  ;;  %v5545_v26 = vld [vmem:[#allocation7 + $0x690] sm:$0xff] }
0x1281   :  { %6351 = vmatprep.subr.bf16.mxu0 %v15517_v27  ;;  %6392 = vmatprep.subr.bf16.mxu1 %v15519_v28  ;;  %v5549_v27 = vld [vmem:[#allocation7 + $0x6b0] sm:$0xff]  ;;  %v5546_v28 = vld [vmem:[#allocation7 + $0x698] sm:$0xff] }
0x1282   :  { %v15573_v12 = vcombine.high %v5545_v26, %v5549_v27  ;;  %v15572_v38 = vcombine.low %v5545_v26, %v5549_v27  ;;  %v15574_v20 = vcombine.low %v5546_v28, %v5550_v29  ;;  %v17410_v26 = vld [vmem:[#allocation9 + $0x504] ss:$8 sps:$4 sm:$0xff]   ;;  %v17405_v27 = vld [vmem:[#allocation9 + $0x400] ss:$8 sps:$4 sm:$0xff]  }
0x1284   :  { %6352 = vmatpush1.bf16.msra.mxu0 %v15516_v32  ;;  %6393 = vmatpush1.bf16.msra.mxu1 %v15518_v10  ;;  %v15575_v32 = vcombine.high %v5546_v28, %v5550_v29  ;;  %v5553_v10 = vld [vmem:[#allocation7 + $0x6d0] sm:$0xff]  ;;  %v17408_v28 = vld [vmem:[#allocation9 + $0x500] ss:$8 sps:$4 sm:$0xff]  }
0x1285   :  { %6353 = vmatprep.subr.bf16.mxu0 %v15525_v33  ;;  %6394 = vmatprep.subr.bf16.mxu1 %v15527_v34  ;;  %v5557_v33 = vld [vmem:[#allocation7 + $0x6f0] sm:$0xff]  ;;  %v5554_v34 = vld [vmem:[#allocation7 + $0x6d8] sm:$0xff] }
0x1286   :  { %v15581_v40 = vcombine.high %v5553_v10, %v5557_v33  ;;  %v15580_v53 = vcombine.low %v5553_v10, %v5557_v33  ;;  %v15582_v59 = vcombine.low %v5554_v34, %v5558_v35  ;;  %v17413_v29 = vld [vmem:[#allocation9 + $0x414] ss:$8 sps:$4 sm:$0xff]   ;;  %v17422_v10 = vld [vmem:[#allocation9 + $0x524] ss:$8 sps:$4 sm:$0xff]   ;;  %v17417_v33 = vld [vmem:[#allocation9 + $0x420] ss:$8 sps:$4 sm:$0xff]  }
0x1288   :  { %6354 = vmatpush1.bf16.msra.mxu0 %v15524_v41  ;;  %6395 = vmatpush1.bf16.msra.mxu1 %v15526_v42  ;;  %v15583_v41 = vcombine.high %v5554_v34, %v5558_v35  ;;  %v5561_v42 = vld [vmem:[#allocation7 + $0x710] sm:$0xff]  ;;  %v17420_v34 = vld [vmem:[#allocation9 + $0x520] ss:$8 sps:$4 sm:$0xff]  }
0x1289   :  { %6355 = vmatprep.subr.bf16.mxu0 %v15533_v43  ;;  %6396 = vmatprep.subr.bf16.mxu1 %v15535_v48  ;;  %v5565_v43 = vld [vmem:[#allocation7 + $0x730] sm:$0xff]  ;;  %v5562_v48 = vld [vmem:[#allocation7 + $0x718] sm:$0xff] }
0x128a   :  { %v15589_v60 = vcombine.high %v5561_v42, %v5565_v43  ;;  %v15588_v7 = vcombine.low %v5561_v42, %v5565_v43  ;;  %v15590_v8 = vcombine.low %v5562_v48, %v5566_v50  ;;  %v17425_v35 = vld [vmem:[#allocation9 + $0x434] ss:$8 sps:$4 sm:$0xff]   ;;  %v17429_v42 = vld [vmem:[#allocation9 + $0x440] ss:$8 sps:$4 sm:$0xff]  }
0x128b   :  { %v17432_v43 = vld [vmem:[#allocation9 + $0x540] ss:$8 sps:$4 sm:$0xff]  }
0x128c   :  { %6356 = vmatpush1.bf16.msra.mxu0 %v15532_v61  ;;  %6397 = vmatpush1.bf16.msra.mxu1 %v15534_v62  ;;  %v15591_v61 = vcombine.high %v5562_v48, %v5566_v50  ;;  %v5569_v62 = vld [vmem:[#allocation7 + $0x750] sm:$0xff] }
0x128d   :  { %6357 = vmatprep.subr.bf16.mxu0 %v15541_v2  ;;  %6398 = vmatprep.subr.bf16.mxu1 %v15543_v4  ;;  %v5573_v2 = vld [vmem:[#allocation7 + $0x770] sm:$0xff]  ;;  %v5570_v4 = vld [vmem:[#allocation7 + $0x758] sm:$0xff] }
0x128e   :  { %v15597_v5 = vcombine.high %v5569_v62, %v5573_v2  ;;  %v15596_v45 = vcombine.low %v5569_v62, %v5573_v2  ;;  %v15598_v16 = vcombine.low %v5570_v4, %v5574_v6  ;;  %v17437_v48 = vld [vmem:[#allocation9 + $0x454] ss:$8 sps:$4 sm:$0xff]   ;;  %v17441_v62 = vld [vmem:[#allocation9 + $0x460] ss:$8 sps:$4 sm:$0xff]  }
0x128f   :  { %v17440_v50 = vld [vmem:[#allocation9 + $0x554] ss:$8 sps:$4 sm:$0xff]   ;;  %v17444_v2 = vld [vmem:[#allocation9 + $0x560] ss:$8 sps:$4 sm:$0xff]  }
0x1290   :  { %6358 = vmatpush1.bf16.msra.mxu0 %v15540_v11  ;;  %6399 = vmatpush1.bf16.msra.mxu1 %v15542_v47  ;;  %v15599_v11 = vcombine.high %v5570_v4, %v5574_v6  ;;  %v5577_v47 = vld [vmem:[#allocation7 + $0x790] sm:$0xff] }
0x1291   :  { %6359 = vmatprep.subr.bf16.mxu0 %v15549_v15  ;;  %6400 = vmatprep.subr.bf16.mxu1 %v15551_v13  ;;  %v5581_v15 = vld [vmem:[#allocation7 + $0x7b0] sm:$0xff]  ;;  %v5578_v13 = vld [vmem:[#allocation7 + $0x798] sm:$0xff] }
0x1292   :  { %v15605_v37 = vcombine.high %v5577_v47, %v5581_v15  ;;  %v15604_v3 = vcombine.low %v5577_v47, %v5581_v15  ;;  %v15606_v21 = vcombine.low %v5578_v13, %v5582_v46  ;;  %v17449_v4 = vld [vmem:[#allocation9 + $0x474] ss:$8 sps:$4 sm:$0xff]   ;;  %v17453_v47 = vld [vmem:[#allocation9 + $0x480] ss:$8 sps:$4 sm:$0xff]  }
0x1293   :  { %v17452_v6 = vld [vmem:[#allocation9 + $0x574] ss:$8 sps:$4 sm:$0xff]   ;;  %v17456_v15 = vld [vmem:[#allocation9 + $0x580] ss:$8 sps:$4 sm:$0xff]  }
0x1294   :  { %6360 = vmatpush1.bf16.msra.mxu0 %v15548_v44  ;;  %6401 = vmatpush1.bf16.msra.mxu1 %v15550_v17  ;;  %v15607_v44 = vcombine.high %v5578_v13, %v5582_v46  ;;  %v5585_v17 = vld [vmem:[#allocation7 + $0x7d0] sm:$0xff] }
0x1295   :  { %6361 = vmatprep.subr.bf16.mxu0 %v15557_v55  ;;  %6402 = vmatprep.subr.bf16.mxu1 %v15559_v39  ;;  %v5589_v55 = vld [vmem:[#allocation7 + $0x7f0] sm:$0xff]  ;;  %v5586_v39 = vld [vmem:[#allocation7 + $0x7d8] sm:$0xff] }
0x1296   :  { %v15613_v54 = vcombine.high %v5585_v17, %v5589_v55  ;;  %v17461_v13 = vld [vmem:[#allocation9 + $0x494] ss:$8 sps:$4 sm:$0xff]  }
0x1297   :  { %v17464_v46 = vld [vmem:[#allocation9 + $0x594] ss:$8 sps:$4 sm:$0xff]  }
0x1298   :  { %6362 = vmatpush1.bf16.msra.mxu0 %v15556_v1  ;;  %6403 = vmatpush1.bf16.msra.mxu1 %v15558_v22  ;;  %v15615_v1 = vcombine.high %v5586_v39, %v5590_v23  ;;  %v15612_v22 = vcombine.low %v5585_v17, %v5589_v55  ;;  %v17465_v17 = vld [vmem:[#allocation9 + $0x4a0] ss:$8 sps:$4 sm:$0xff]  }
0x1299   :  { %6363 = vmatprep.subr.bf16.mxu0 %v15565_v24  ;;  %6404 = vmatprep.subr.bf16.mxu1 %v15567_v25  ;;  %v15614_v24 = vcombine.low %v5586_v39, %v5590_v23  ;;  %v17407_v25 = vld [vmem:[#allocation9 + $0x404] ss:$8 sps:$4 sm:$0xff]   ;;  %v17468_v55 = vld [vmem:[#allocation9 + $0x5a0] ss:$8 sps:$4 sm:$0xff]   ;;  %v17473_v39 = vld [vmem:[#allocation9 + $0x4b4] ss:$8 sps:$4 sm:$0xff]  }
0x129a   :  { %v17476_v23 = vld [vmem:[#allocation9 + $0x5b4] ss:$8 sps:$4 sm:$0xff]  }
0x129c   :  { %6364 = vmatpush1.bf16.msra.mxu0 %v15564_v30  ;;  %6405 = vmatpush1.bf16.msra.mxu1 %v15566_v31  ;;  %v17416_v30 = vld [vmem:[#allocation9 + $0x514] ss:$8 sps:$4 sm:$0xff]   ;;  %v17411_v31 = vld [vmem:[#allocation9 + $0x410] ss:$8 sps:$4 sm:$0xff]  }
0x129d   :  { %6365 = vmatprep.subr.bf16.mxu0 %v15573_v12  ;;  %6406 = vmatprep.subr.bf16.mxu1 %v15575_v32  ;;  %v17414_v12 = vld [vmem:[#allocation9 + $0x510] ss:$8 sps:$4 sm:$0xff]   ;;  %v17419_v32 = vld [vmem:[#allocation9 + $0x424] ss:$8 sps:$4 sm:$0xff]  }
0x12a0   :  { %6366 = vmatpush1.bf16.msra.mxu0 %v15572_v38  ;;  %6407 = vmatpush1.bf16.msra.mxu1 %v15574_v20  ;;  %v17428_v38 = vld [vmem:[#allocation9 + $0x534] ss:$8 sps:$4 sm:$0xff]   ;;  %v17423_v20 = vld [vmem:[#allocation9 + $0x430] ss:$8 sps:$4 sm:$0xff]  }
0x12a1   :  { %6367 = vmatprep.subr.bf16.mxu0 %v15581_v40  ;;  %6408 = vmatprep.subr.bf16.mxu1 %v15583_v41  ;;  %v17431_v40 = vld [vmem:[#allocation9 + $0x444] ss:$8 sps:$4 sm:$0xff]  }
0x12a2   :  { %v17434_v41 = vld [vmem:[#allocation9 + $0x544] ss:$8 sps:$4 sm:$0xff]  }
0x12a4   :  { %6368 = vmatpush1.bf16.msra.mxu0 %v15580_v53  ;;  %6409 = vmatpush1.bf16.msra.mxu1 %v15582_v59  ;;  %v17435_v53 = vld [vmem:[#allocation9 + $0x450] ss:$8 sps:$4 sm:$0xff]  }
0x12a5   :  { %6369 = vmatprep.subr.bf16.mxu0 %v15589_v60  ;;  %6410 = vmatprep.subr.bf16.mxu1 %v15591_v61  ;;  %v17438_v59 = vld [vmem:[#allocation9 + $0x550] ss:$8 sps:$4 sm:$0xff]   ;;  %v17443_v60 = vld [vmem:[#allocation9 + $0x464] ss:$8 sps:$4 sm:$0xff]  }
0x12a6   :  { %v17446_v61 = vld [vmem:[#allocation9 + $0x564] ss:$8 sps:$4 sm:$0xff]  }
0x12a8   :  { %6370 = vmatpush1.bf16.msra.mxu0 %v15588_v7  ;;  %6411 = vmatpush1.bf16.msra.mxu1 %v15590_v8  ;;  %v17447_v7 = vld [vmem:[#allocation9 + $0x470] ss:$8 sps:$4 sm:$0xff]  }
0x12a9   :  { %6371 = vmatprep.subr.bf16.mxu0 %v15597_v5  ;;  %6412 = vmatprep.subr.bf16.mxu1 %v15599_v11  ;;  %v17450_v8 = vld [vmem:[#allocation9 + $0x570] ss:$8 sps:$4 sm:$0xff]   ;;  %v17455_v5 = vld [vmem:[#allocation9 + $0x484] ss:$8 sps:$4 sm:$0xff]  }
0x12aa   :  { %v17458_v11 = vld [vmem:[#allocation9 + $0x584] ss:$8 sps:$4 sm:$0xff]  }
0x12ac   :  { %6372 = vmatpush1.bf16.msra.mxu0 %v15596_v45  ;;  %6413 = vmatpush1.bf16.msra.mxu1 %v15598_v16  ;;  %v17459_v45 = vld [vmem:[#allocation9 + $0x490] ss:$8 sps:$4 sm:$0xff]  }
0x12ad   :  { %6373 = vmatprep.subr.bf16.mxu0 %v15605_v37  ;;  %6414 = vmatprep.subr.bf16.mxu1 %v15607_v44  ;;  %v17462_v16 = vld [vmem:[#allocation9 + $0x590] ss:$8 sps:$4 sm:$0xff]   ;;  %v17467_v37 = vld [vmem:[#allocation9 + $0x4a4] ss:$8 sps:$4 sm:$0xff]  }
0x12ae   :  { %v17470_v44 = vld [vmem:[#allocation9 + $0x5a4] ss:$8 sps:$4 sm:$0xff]  }
0x12b0   :  { %6374 = vmatpush1.bf16.msra.mxu0 %v15604_v3  ;;  %6415 = vmatpush1.bf16.msra.mxu1 %v15606_v21  ;;  %v17471_v3 = vld [vmem:[#allocation9 + $0x4b0] ss:$8 sps:$4 sm:$0xff]  }
0x12b1   :  { %6375 = vmatprep.subr.bf16.mxu0 %v15613_v54  ;;  %6416 = vmatprep.subr.bf16.mxu1 %v15615_v1  ;;  %v17474_v21 = vld [vmem:[#allocation9 + $0x5b0] ss:$8 sps:$4 sm:$0xff]   ;;  %v17479_v54 = vld [vmem:[#allocation9 + $0x4c4] ss:$8 sps:$4 sm:$0xff]  }
0x12b2   :  { %v17482_v1 = vld [vmem:[#allocation9 + $0x5c4] ss:$8 sps:$4 sm:$0xff]  }
0x12b4   :  { %6376 = vmatpush1.bf16.msra.mxu0 %v15612_v22  ;;  %6417 = vmatpush1.bf16.msra.mxu1 %v15614_v24  ;;  %v17477_v22 = vld [vmem:[#allocation9 + $0x4c0] ss:$8 sps:$4 sm:$0xff]  }
0x12b5   :  { %7220 = vmatprep.subr.bf16.mxu0 %v17407_v25  ;;  %7261 = vmatprep.subr.bf16.mxu1 %v17410_v26  ;;  %v17480_v24 = vld [vmem:[#allocation9 + $0x5c0] ss:$8 sps:$4 sm:$0xff]   ;;  %v17485_v25 = vld [vmem:[#allocation9 + $0x4d4] ss:$8 sps:$4 sm:$0xff]  }
0x12b6   :  { %v17488_v26 = vld [vmem:[#allocation9 + $0x5d4] ss:$8 sps:$4 sm:$0xff]  }
0x12b7   :  { %6378 = vmatmul.mubr.bf16.vlgmr.msra.gmra.mrb[40].mxu0 %v19130_v14  ;;  %6419 = vmatmul.mubr.bf16.vlgmr.msra.gmra.mrb[68].mxu1 %v19130_v14  ;;  %v17426_v14 = vld [vmem:[#allocation9 + $0x530] ss:$8 sps:$4 sm:$0xff]  }
0x12b8   :  { %7221 = vmatpush1.bf16.msra.mxu0 %v17405_v27  ;;  %7262 = vmatpush1.bf16.msra.mxu1 %v17408_v28  ;;  %v17483_v27 = vld [vmem:[#allocation9 + $0x4d0] ss:$8 sps:$4 sm:$0xff]  }
0x12b9   :  { %7222 = vmatprep.subr.bf16.mxu0 %v17413_v29  ;;  %7263 = vmatprep.subr.bf16.mxu1 %v17416_v30  ;;  %v17486_v28 = vld [vmem:[#allocation9 + $0x5d0] ss:$8 sps:$4 sm:$0xff]   ;;  %v17491_v29 = vld [vmem:[#allocation9 + $0x4e4] ss:$8 sps:$4 sm:$0xff]  }
0x12ba   :  { %v17494_v30 = vld [vmem:[#allocation9 + $0x5e4] ss:$8 sps:$4 sm:$0xff]  }
0x12bc   :  { %7223 = vmatpush1.bf16.msra.mxu0 %v17411_v31  ;;  %7264 = vmatpush1.bf16.msra.mxu1 %v17414_v12  ;;  %v17489_v31 = vld [vmem:[#allocation9 + $0x4e0] ss:$8 sps:$4 sm:$0xff]  }
0x12bd   :  { %7224 = vmatprep.subr.bf16.mxu0 %v17419_v32  ;;  %7265 = vmatprep.subr.bf16.mxu1 %v17422_v10  ;;  %v17492_v12 = vld [vmem:[#allocation9 + $0x5e0] ss:$8 sps:$4 sm:$0xff]   ;;  %v17497_v32 = vld [vmem:[#allocation9 + $0x4f4] ss:$8 sps:$4 sm:$0xff]  }
0x12be   :  { %v17500_v10 = vld [vmem:[#allocation9 + $0x5f4] ss:$8 sps:$4 sm:$0xff]  }
0x12c0   :  { %7225 = vmatpush1.bf16.msra.mxu0 %v17417_v33  ;;  %7266 = vmatpush1.bf16.msra.mxu1 %v17420_v34  ;;  %v17495_v33 = vld [vmem:[#allocation9 + $0x4f0] ss:$8 sps:$4 sm:$0xff]  }
0x12c1   :  { %7226 = vmatprep.subr.bf16.mxu0 %v17425_v35  ;;  %7267 = vmatprep.subr.bf16.mxu1 %v17428_v38  ;;  %v17498_v34 = vld [vmem:[#allocation9 + $0x5f0] ss:$8 sps:$4 sm:$0xff]   ;;  %v17503_v35 = vld [vmem:[#allocation9 + $0x604] ss:$8 sps:$4 sm:$0xff]  }
0x12c2   :  { %v17506_v38 = vld [vmem:[#allocation9 + $0x704] ss:$8 sps:$4 sm:$0xff]  }
0x12c4   :  { %7227 = vmatpush1.bf16.msra.mxu0 %v17423_v20  ;;  %7268 = vmatpush1.bf16.msra.mxu1 %v17426_v14  ;;  %v3756_v20 = vrot.slane %v19120_v56, 1  ;;  %v3757_v14 = vrot.slane %v19116_v51, 1 }
0x12c5   :  { %7228 = vmatprep.subr.bf16.mxu0 %v17431_v40  ;;  %7269 = vmatprep.subr.bf16.mxu1 %v17434_v41  ;;  %v5594_v40 = vrot.slane %v19120_v56, %v18970_v36 }
0x12c6   :  { %v5602_v41 = vrot.slane %v3756_v20, %v18970_v36  ;;  %v17543_v20 = vld [vmem:[#allocation9 + $0x670] ss:$8 sps:$4 sm:$0xff]  }
0x12c8   :  { %7229 = vmatpush1.bf16.msra.mxu0 %v17429_v42  ;;  %7270 = vmatpush1.bf16.msra.mxu1 %v17432_v43  ;;  %v5598_v42 = vrot.slane %v19116_v51, %v18970_v36  ;;  %v5606_v43 = vrot.slane %v3757_v14, %v18970_v36  ;;  %v17546_v14 = vld [vmem:[#allocation9 + $0x770] ss:$8 sps:$4 sm:$0xff]  }
0x12c9   :  { %7230 = vmatprep.subr.bf16.mxu0 %v17437_v48  ;;  %7271 = vmatprep.subr.bf16.mxu1 %v17440_v50 }
0x12cc   :  { %7231 = vmatpush1.bf16.msra.mxu0 %v17435_v53  ;;  %7272 = vmatpush1.bf16.msra.mxu1 %v17438_v59 }
0x12cd   :  { %7232 = vmatprep.subr.bf16.mxu0 %v17443_v60  ;;  %7273 = vmatprep.subr.bf16.mxu1 %v17446_v61 }
0x12d0   :  { %7233 = vmatpush1.bf16.msra.mxu0 %v17441_v62  ;;  %7274 = vmatpush1.bf16.msra.mxu1 %v17444_v2 }
0x12d1   :  { %7234 = vmatprep.subr.bf16.mxu0 %v17449_v4  ;;  %7275 = vmatprep.subr.bf16.mxu1 %v17452_v6 }
0x12d4   :  { %7235 = vmatpush1.bf16.msra.mxu0 %v17447_v7  ;;  %7276 = vmatpush1.bf16.msra.mxu1 %v17450_v8 }
0x12d5   :  { %7236 = vmatprep.subr.bf16.mxu0 %v17455_v5  ;;  %7277 = vmatprep.subr.bf16.mxu1 %v17458_v11 }
0x12d8   :  { %7237 = vmatpush1.bf16.msra.mxu0 %v17453_v47  ;;  %7278 = vmatpush1.bf16.msra.mxu1 %v17456_v15 }
0x12d9   :  { %7238 = vmatprep.subr.bf16.mxu0 %v17461_v13  ;;  %7279 = vmatprep.subr.bf16.mxu1 %v17464_v46  ;;  %v17501_v13 = vld [vmem:[#allocation9 + $0x600] ss:$8 sps:$4 sm:$0xff]  }
0x12da   :  { %v17504_v46 = vld [vmem:[#allocation9 + $0x700] ss:$8 sps:$4 sm:$0xff]  }
0x12dc   :  { %7239 = vmatpush1.bf16.msra.mxu0 %v17459_v45  ;;  %7280 = vmatpush1.bf16.msra.mxu1 %v17462_v16 }
0x12dd   :  { %7240 = vmatprep.subr.bf16.mxu0 %v17467_v37  ;;  %7281 = vmatprep.subr.bf16.mxu1 %v17470_v44  ;;  %v17509_v37 = vld [vmem:[#allocation9 + $0x614] ss:$8 sps:$4 sm:$0xff]  }
0x12de   :  { %v17512_v44 = vld [vmem:[#allocation9 + $0x714] ss:$8 sps:$4 sm:$0xff]  }
0x12e0   :  { %7241 = vmatpush1.bf16.msra.mxu0 %v17465_v17  ;;  %7282 = vmatpush1.bf16.msra.mxu1 %v17468_v55  ;;  %v17507_v17 = vld [vmem:[#allocation9 + $0x610] ss:$8 sps:$4 sm:$0xff]  }
0x12e1   :  { %7242 = vmatprep.subr.bf16.mxu0 %v17473_v39  ;;  %7283 = vmatprep.subr.bf16.mxu1 %v17476_v23  ;;  %v17510_v55 = vld [vmem:[#allocation9 + $0x710] ss:$8 sps:$4 sm:$0xff]   ;;  %v17515_v39 = vld [vmem:[#allocation9 + $0x624] ss:$8 sps:$4 sm:$0xff]  }
0x12e2   :  { %v17518_v23 = vld [vmem:[#allocation9 + $0x724] ss:$8 sps:$4 sm:$0xff]  }
0x12e4   :  { %7243 = vmatpush1.bf16.msra.mxu0 %v17471_v3  ;;  %7284 = vmatpush1.bf16.msra.mxu1 %v17474_v21  ;;  %v17513_v3 = vld [vmem:[#allocation9 + $0x620] ss:$8 sps:$4 sm:$0xff]  }
0x12e5   :  { %7244 = vmatprep.subr.bf16.mxu0 %v17479_v54  ;;  %7285 = vmatprep.subr.bf16.mxu1 %v17482_v1  ;;  %v17516_v21 = vld [vmem:[#allocation9 + $0x720] ss:$8 sps:$4 sm:$0xff]   ;;  %v17521_v54 = vld [vmem:[#allocation9 + $0x634] ss:$8 sps:$4 sm:$0xff]  }
0x12e6   :  { %v17524_v1 = vld [vmem:[#allocation9 + $0x734] ss:$8 sps:$4 sm:$0xff]  }
0x12e8   :  { %7245 = vmatpush1.bf16.msra.mxu0 %v17477_v22  ;;  %7286 = vmatpush1.bf16.msra.mxu1 %v17480_v24  ;;  %v17519_v22 = vld [vmem:[#allocation9 + $0x630] ss:$8 sps:$4 sm:$0xff]  }
0x12e9   :  { %7246 = vmatprep.subr.bf16.mxu0 %v17485_v25  ;;  %7287 = vmatprep.subr.bf16.mxu1 %v17488_v26  ;;  %v17522_v24 = vld [vmem:[#allocation9 + $0x730] ss:$8 sps:$4 sm:$0xff]   ;;  %v17527_v25 = vld [vmem:[#allocation9 + $0x644] ss:$8 sps:$4 sm:$0xff]  }
0x12ea   :  { %v17530_v26 = vld [vmem:[#allocation9 + $0x744] ss:$8 sps:$4 sm:$0xff]  }
0x12ec   :  { %7247 = vmatpush1.bf16.msra.mxu0 %v17483_v27  ;;  %7288 = vmatpush1.bf16.msra.mxu1 %v17486_v28  ;;  %v17525_v27 = vld [vmem:[#allocation9 + $0x640] ss:$8 sps:$4 sm:$0xff]  }
0x12ed   :  { %7248 = vmatprep.subr.bf16.mxu0 %v17491_v29  ;;  %7289 = vmatprep.subr.bf16.mxu1 %v17494_v30  ;;  %v17528_v28 = vld [vmem:[#allocation9 + $0x740] ss:$8 sps:$4 sm:$0xff]   ;;  %v17533_v29 = vld [vmem:[#allocation9 + $0x654] ss:$8 sps:$4 sm:$0xff]  }
0x12ee   :  { %v17536_v30 = vld [vmem:[#allocation9 + $0x754] ss:$8 sps:$4 sm:$0xff]  }
0x12f0   :  { %7249 = vmatpush1.bf16.msra.mxu0 %v17489_v31  ;;  %7290 = vmatpush1.bf16.msra.mxu1 %v17492_v12  ;;  %v17531_v31 = vld [vmem:[#allocation9 + $0x650] ss:$8 sps:$4 sm:$0xff]  }
0x12f1   :  { %7250 = vmatprep.subr.bf16.mxu0 %v17497_v32  ;;  %7291 = vmatprep.subr.bf16.mxu1 %v17500_v10  ;;  %v17534_v12 = vld [vmem:[#allocation9 + $0x750] ss:$8 sps:$4 sm:$0xff]   ;;  %v17539_v32 = vld [vmem:[#allocation9 + $0x664] ss:$8 sps:$4 sm:$0xff]  }
0x12f2   :  { %v17542_v10 = vld [vmem:[#allocation9 + $0x764] ss:$8 sps:$4 sm:$0xff]  }
0x12f4   :  { %7251 = vmatpush1.bf16.msra.mxu0 %v17495_v33  ;;  %7292 = vmatpush1.bf16.msra.mxu1 %v17498_v34  ;;  %v17537_v33 = vld [vmem:[#allocation9 + $0x660] ss:$8 sps:$4 sm:$0xff]  }
0x12f5   :  { %7302 = vmatprep.subr.bf16.mxu0 %v17503_v35  ;;  %7343 = vmatprep.subr.bf16.mxu1 %v17506_v38  ;;  %v17540_v34 = vld [vmem:[#allocation9 + $0x760] ss:$8 sps:$4 sm:$0xff]   ;;  %v17545_v35 = vld [vmem:[#allocation9 + $0x674] ss:$8 sps:$4 sm:$0xff]  }
0x12f6   :  { %v17548_v38 = vld [vmem:[#allocation9 + $0x774] ss:$8 sps:$4 sm:$0xff]  }
0x134a   :  { %v6297_v48 = vpop.f32.mrb[36].mxu0  ;;  %v6338_v50 = vpop.f32.mrb[64].mxu1 }
0x134b   :  { %v6298_v53 = vadd.f32 %v6297_v48, %v5594_v40  ;;  %v6339_v59 = vadd.f32 %v6338_v50, %v5602_v41  ;;  %v6299_v60 = vpop.f32.mrb[37].mxu0  ;;  %v6340_v61 = vpop.f32.mrb[65].mxu1  ;;  %v17551_v40 = vld [vmem:[#allocation9 + $0x684] ss:$8 sps:$4 sm:$0xff]   ;;  %v17557_v48 = vld [vmem:[#allocation9 + $0x694] ss:$8 sps:$4 sm:$0xff]  }
0x134c   :  { %v6300_v62 = vadd.f32 %v6299_v60, %v5598_v42  ;;  %v6341_v2 = vadd.f32 %v6340_v61, %v5606_v43  ;;  %v6301_v4 = vpop.f32.mrb[38].mxu0  ;;  %v6342_v6 = vpop.f32.mrb[66].mxu1  ;;  %v17554_v41 = vld [vmem:[#allocation9 + $0x784] ss:$8 sps:$4 sm:$0xff]   ;;  %v17549_v42 = vld [vmem:[#allocation9 + $0x680] ss:$8 sps:$4 sm:$0xff]  }
0x134d   :  { %v6427_v7 = vmax.f32 %v6298_v53, 0.0  ;;  %v6429_v8 = vmax.f32 %v6339_v59, 0.0  ;;  %v6302_v56 = vpop.f32.mrb[39].mxu0  ;;  %v6343_v5 = vpop.f32.mrb[67].mxu1  ;;  %v17552_v43 = vld [vmem:[#allocation9 + $0x780] ss:$8 sps:$4 sm:$0xff]  }
0x134e   :  { %v6428_v11 = vmax.f32 %v6300_v62, 0.0  ;;  %v6430_v47 = vmax.f32 %v6341_v2, 0.0  ;;  %v17560_v50 = vld [vmem:[#allocation9 + $0x794] ss:$8 sps:$4 sm:$0xff]   ;;  %v17555_v53 = vld [vmem:[#allocation9 + $0x690] ss:$8 sps:$4 sm:$0xff]  }
0x134f   :  { %v6435_v45 = vpack.c.bf16 %v6427_v7, %v6427_v7  ;;  %v6437_v16 = vpack.c.bf16 %v6429_v8, %v6429_v8  ;;  %v17558_v59 = vld [vmem:[#allocation9 + $0x790] ss:$8 sps:$4 sm:$0xff]   ;;  %v17563_v60 = vld [vmem:[#allocation9 + $0x6a4] ss:$8 sps:$4 sm:$0xff]   ;;  %v17561_v62 = vld [vmem:[#allocation9 + $0x6a0] ss:$8 sps:$4 sm:$0xff]  }
0x1350   :  { %v6436_v15 = vpack.c.bf16 %v6428_v11, %v6428_v11  ;;  %v6438_v51 = vpack.c.bf16 %v6430_v47, %v6430_v47  ;;  %v17566_v61 = vld [vmem:[#allocation9 + $0x7a4] ss:$8 sps:$4 sm:$0xff]   ;;  %v17564_v2 = vld [vmem:[#allocation9 + $0x7a0] ss:$8 sps:$4 sm:$0xff]   ;;  %v17569_v4 = vld [vmem:[#allocation9 + $0x6b4] ss:$8 sps:$4 sm:$0xff]  }
0x1351   :  { %v17572_v6 = vld [vmem:[#allocation9 + $0x7b4] ss:$8 sps:$4 sm:$0xff]   ;;  %v17567_v7 = vld [vmem:[#allocation9 + $0x6b0] ss:$8 sps:$4 sm:$0xff]   ;;  %v17575_v56 = vld [vmem:[#allocation9 + $0x6c4] ss:$8 sps:$4 sm:$0xff]  }
0x1352   :  { %7252 = vmatprep.mubr.bf16.mxu0 %v6436_v15  ;;  %7293 = vmatprep.mubr.bf16.mxu1 %v6438_v51  ;;  %v17570_v8 = vld [vmem:[#allocation9 + $0x7b0] ss:$8 sps:$4 sm:$0xff]   ;;  %v17578_v5 = vld [vmem:[#allocation9 + $0x7c4] ss:$8 sps:$4 sm:$0xff]   ;;  %v17573_v11 = vld [vmem:[#allocation9 + $0x6c0] ss:$8 sps:$4 sm:$0xff]  }
0x1353   :  { %7253 = vmatmul.mubr.bf16.vlgmr.msra.gmra.mrb[44].mxu0 %v6435_v45  ;;  %7294 = vmatmul.mubr.bf16.vlgmr.msra.gmra.mrb[72].mxu1 %v6437_v16  ;;  %v17576_v47 = vld [vmem:[#allocation9 + $0x7c0] ss:$8 sps:$4 sm:$0xff]   ;;  %v3752_v15 = vld [vmem:[#allocation2 + $0x30] sm:$0xf]  ;;  %v17581_v51 = vld [vmem:[#allocation9 + $0x6d4] ss:$8 sps:$4 sm:$0xff]  }
0x1354   :  { %7303 = vmatpush1.bf16.msra.mxu0 %v17501_v13  ;;  %7344 = vmatpush1.bf16.msra.mxu1 %v17504_v46  ;;  %v17584_v13 = vld [vmem:[#allocation9 + $0x7d4] ss:$8 sps:$4 sm:$0xff]   ;;  %v3753_v46 = vld [vmem:[#allocation2 + $0x38] sm:$0xf]  ;;  %v3762_v45 = vrot.slane %v3752_v15, 2  ;;  %v3766_v16 = vrot.slane %v3752_v15, 3 }
0x1355   :  { %7304 = vmatprep.subr.bf16.mxu0 %v17509_v37  ;;  %7345 = vmatprep.subr.bf16.mxu1 %v17512_v44  ;;  %v17579_v37 = vld [vmem:[#allocation9 + $0x6d0] ss:$8 sps:$4 sm:$0xff]  }
0x1356   :  { %v17582_v44 = vld [vmem:[#allocation9 + $0x7d0] ss:$8 sps:$4 sm:$0xff]  }
0x1358   :  { %7305 = vmatpush1.bf16.msra.mxu0 %v17507_v17  ;;  %7346 = vmatpush1.bf16.msra.mxu1 %v17510_v55  ;;  %v3763_v17 = vrot.slane %v3753_v46, 2  ;;  %v3767_v55 = vrot.slane %v3753_v46, 3 }
0x1359   :  { %7306 = vmatprep.subr.bf16.mxu0 %v17515_v39  ;;  %7347 = vmatprep.subr.bf16.mxu1 %v17518_v23  ;;  %v17587_v39 = vld [vmem:[#allocation9 + $0x6e4] ss:$8 sps:$4 sm:$0xff]  }
0x135a   :  { %v17590_v23 = vld [vmem:[#allocation9 + $0x7e4] ss:$8 sps:$4 sm:$0xff]  }
0x135c   :  { %7307 = vmatpush1.bf16.msra.mxu0 %v17513_v3  ;;  %7348 = vmatpush1.bf16.msra.mxu1 %v17516_v21  ;;  %v5610_v3 = vrot.slane %v3762_v45, %v18970_v36  ;;  %v5618_v21 = vrot.slane %v3766_v16, %v18970_v36 }
0x135d   :  { %7308 = vmatprep.subr.bf16.mxu0 %v17521_v54  ;;  %7349 = vmatprep.subr.bf16.mxu1 %v17524_v1  ;;  %v5614_v54 = vrot.slane %v3763_v17, %v18970_v36  ;;  %v5622_v1 = vrot.slane %v3767_v55, %v18970_v36 }
0x1360   :  { %7309 = vmatpush1.bf16.msra.mxu0 %v17519_v22  ;;  %7350 = vmatpush1.bf16.msra.mxu1 %v17522_v24  ;;  %v17585_v22 = vld [vmem:[#allocation9 + $0x6e0] ss:$8 sps:$4 sm:$0xff]  }
0x1361   :  { %7310 = vmatprep.subr.bf16.mxu0 %v17527_v25  ;;  %7351 = vmatprep.subr.bf16.mxu1 %v17530_v26  ;;  %v17588_v24 = vld [vmem:[#allocation9 + $0x7e0] ss:$8 sps:$4 sm:$0xff]   ;;  %v17593_v25 = vld [vmem:[#allocation9 + $0x6f4] ss:$8 sps:$4 sm:$0xff]  }
0x1362   :  { %v17596_v26 = vld [vmem:[#allocation9 + $0x7f4] ss:$8 sps:$4 sm:$0xff]  }
0x1364   :  { %7311 = vmatpush1.bf16.msra.mxu0 %v17525_v27  ;;  %7352 = vmatpush1.bf16.msra.mxu1 %v17528_v28 }
0x1365   :  { %7312 = vmatprep.subr.bf16.mxu0 %v17533_v29  ;;  %7353 = vmatprep.subr.bf16.mxu1 %v17536_v30 }
0x1368   :  { %7313 = vmatpush1.bf16.msra.mxu0 %v17531_v31  ;;  %7354 = vmatpush1.bf16.msra.mxu1 %v17534_v12 }
0x1369   :  { %7314 = vmatprep.subr.bf16.mxu0 %v17539_v32  ;;  %7355 = vmatprep.subr.bf16.mxu1 %v17542_v10 }
0x136c   :  { %7315 = vmatpush1.bf16.msra.mxu0 %v17537_v33  ;;  %7356 = vmatpush1.bf16.msra.mxu1 %v17540_v34 }
0x136d   :  { %7316 = vmatprep.subr.bf16.mxu0 %v17545_v35  ;;  %7357 = vmatprep.subr.bf16.mxu1 %v17548_v38  ;;  %v17591_v35 = vld [vmem:[#allocation9 + $0x6f0] ss:$8 sps:$4 sm:$0xff]  }
0x136e   :  { %v17594_v38 = vld [vmem:[#allocation9 + $0x7f0] ss:$8 sps:$4 sm:$0xff]  }
0x1370   :  { %7317 = vmatpush1.bf16.msra.mxu0 %v17543_v20  ;;  %7358 = vmatpush1.bf16.msra.mxu1 %v17546_v14 }
0x1371   :  { %7318 = vmatprep.subr.bf16.mxu0 %v17551_v40  ;;  %7359 = vmatprep.subr.bf16.mxu1 %v17554_v41 }
0x1374   :  { %7319 = vmatpush1.bf16.msra.mxu0 %v17549_v42  ;;  %7360 = vmatpush1.bf16.msra.mxu1 %v17552_v43 }
0x1375   :  { %7320 = vmatprep.subr.bf16.mxu0 %v17557_v48  ;;  %7361 = vmatprep.subr.bf16.mxu1 %v17560_v50 }
0x1378   :  { %7321 = vmatpush1.bf16.msra.mxu0 %v17555_v53  ;;  %7362 = vmatpush1.bf16.msra.mxu1 %v17558_v59 }
0x1379   :  { %7322 = vmatprep.subr.bf16.mxu0 %v17563_v60  ;;  %7363 = vmatprep.subr.bf16.mxu1 %v17566_v61  ;;  %v18504_v60 = vld [vmem:[#allocation2 + $0x20] sm:$0xff] }
0x137a   :  { %v6575_v61 = vrot.slane %v18504_v60, %v18989_v52  ;;  %v17638_v60 = vld [vmem:[#allocation4 + $0x72c] ss:$24 sps:$4 sm:$0xff]  }
0x137c   :  { %7323 = vmatpush1.bf16.msra.mxu0 %v17561_v62  ;;  %7364 = vmatpush1.bf16.msra.mxu1 %v17564_v2  ;;  %v18505_v62 = vld [vmem:[#allocation2 + $0x28] sm:$0xff] }
0x137d   :  { %7324 = vmatprep.subr.bf16.mxu0 %v17569_v4  ;;  %7365 = vmatprep.subr.bf16.mxu1 %v17572_v6  ;;  %v6579_v2 = vrot.slane %v18505_v62, %v18989_v52  ;;  %v17636_v62 = vld [vmem:[#allocation4 + $0x728] ss:$24 sps:$4 sm:$0xff]  }
0x1380   :  { %7325 = vmatpush1.bf16.msra.mxu0 %v17567_v7  ;;  %7366 = vmatpush1.bf16.msra.mxu1 %v17570_v8 }
0x1381   :  { %7326 = vmatprep.subr.bf16.mxu0 %v17575_v56  ;;  %7367 = vmatprep.subr.bf16.mxu1 %v17578_v5 }
0x1384   :  { %7327 = vmatpush1.bf16.msra.mxu0 %v17573_v11  ;;  %7368 = vmatpush1.bf16.msra.mxu1 %v17576_v47 }
0x1385   :  { %7328 = vmatprep.subr.bf16.mxu0 %v17581_v51  ;;  %7369 = vmatprep.subr.bf16.mxu1 %v17584_v13 }
0x1388   :  { %7329 = vmatpush1.bf16.msra.mxu0 %v17579_v37  ;;  %7370 = vmatpush1.bf16.msra.mxu1 %v17582_v44 }
0x1389   :  { %7330 = vmatprep.subr.bf16.mxu0 %v17587_v39  ;;  %7371 = vmatprep.subr.bf16.mxu1 %v17590_v23 }
0x138a   :  { %v6379_v27 = vpop.f32.mrb[40].mxu0  ;;  %v6420_v28 = vpop.f32.mrb[68].mxu1 }
0x138b   :  { %v6380_v29 = vadd.f32 %v6379_v27, %v5610_v3  ;;  %v6421_v30 = vadd.f32 %v6420_v28, %v5618_v21  ;;  %v6381_v31 = vpop.f32.mrb[41].mxu0  ;;  %v6422_v12 = vpop.f32.mrb[69].mxu1  ;;  %v17599_v27 = vld [vmem:[#allocation4 + $0x604] ss:$24 sps:$4 sm:$0xff]   ;;  %v17600_v28 = vld [vmem:[#allocation4 + $0x608] ss:$24 sps:$4 sm:$0xff]  }
0x138c   :  { %v6382_v32 = vadd.f32 %v6381_v31, %v5614_v54  ;;  %v6423_v10 = vadd.f32 %v6422_v12, %v5622_v1  ;;  %v6383_v33 = vpop.f32.mrb[42].mxu0  ;;  %v6424_v34 = vpop.f32.mrb[70].mxu1  ;;  %7331 = vmatpush1.bf16.msra.mxu0 %v17585_v22  ;;  %7372 = vmatpush1.bf16.msra.mxu1 %v17588_v24  ;;  %v17608_v31 = vld [vmem:[#allocation4 + $0x63c] ss:$24 sps:$4 sm:$0xff]   ;;  %v17603_v12 = vld [vmem:[#allocation4 + $0x630] ss:$24 sps:$4 sm:$0xff]  }
0x138d   :  { %v6431_v20 = vmax.f32 %v6380_v29, 0.0  ;;  %v6433_v14 = vmax.f32 %v6421_v30, 0.0  ;;  %v6384_v40 = vpop.f32.mrb[43].mxu0  ;;  %v6425_v41 = vpop.f32.mrb[71].mxu1  ;;  %7332 = vmatprep.subr.bf16.mxu0 %v17593_v25  ;;  %7373 = vmatprep.subr.bf16.mxu1 %v17596_v26  ;;  %v17597_v26 = vld [vmem:[#allocation4 + $0x600] ss:$24 sps:$4 sm:$0xff]  }
0x138e   :  { %v6432_v42 = vmax.f32 %v6382_v32, 0.0  ;;  %v6434_v43 = vmax.f32 %v6423_v10, 0.0  ;;  %v17602_v29 = vld [vmem:[#allocation4 + $0x60c] ss:$24 sps:$4 sm:$0xff]   ;;  %v17609_v10 = vld [vmem:[#allocation4 + $0x660] ss:$24 sps:$4 sm:$0xff]  }
0x138f   :  { %v6439_v53 = vpack.c.bf16 %v6431_v20, %v6431_v20  ;;  %v6441_v59 = vpack.c.bf16 %v6433_v14, %v6433_v14  ;;  %v17605_v30 = vld [vmem:[#allocation4 + $0x634] ss:$24 sps:$4 sm:$0xff]   ;;  %v17611_v32 = vld [vmem:[#allocation4 + $0x664] ss:$24 sps:$4 sm:$0xff]   ;;  %v17612_v33 = vld [vmem:[#allocation4 + $0x668] ss:$24 sps:$4 sm:$0xff]  }
0x1390   :  { %v6440_v48 = vpack.c.bf16 %v6432_v42, %v6432_v42  ;;  %v6442_v50 = vpack.c.bf16 %v6434_v43, %v6434_v43  ;;  %7333 = vmatpush1.bf16.msra.mxu0 %v17591_v35  ;;  %7374 = vmatpush1.bf16.msra.mxu1 %v17594_v38  ;;  %v17617_v34 = vld [vmem:[#allocation4 + $0x694] ss:$24 sps:$4 sm:$0xff]   ;;  %v17615_v38 = vld [vmem:[#allocation4 + $0x690] ss:$24 sps:$4 sm:$0xff]   ;;  %v17623_v14 = vld [vmem:[#allocation4 + $0x6c4] ss:$24 sps:$4 sm:$0xff]  }
0x1391   :  { %8022 = vmatprep.subr.bf16.mxu0 %v17599_v27  ;;  %8063 = vmatprep.subr.bf16.mxu1 %v17602_v29  ;;  %v17620_v35 = vld [vmem:[#allocation4 + $0x69c] ss:$24 sps:$4 sm:$0xff]   ;;  %v17618_v20 = vld [vmem:[#allocation4 + $0x698] ss:$24 sps:$4 sm:$0xff]   ;;  %v17626_v40 = vld [vmem:[#allocation4 + $0x6cc] ss:$24 sps:$4 sm:$0xff]  }
0x1392   :  { %7334 = vmatprep.mubr.bf16.mxu0 %v6440_v48  ;;  %7375 = vmatprep.mubr.bf16.mxu1 %v6442_v50  ;;  %v17621_v41 = vld [vmem:[#allocation4 + $0x6c0] ss:$24 sps:$4 sm:$0xff]   ;;  %v17629_v43 = vld [vmem:[#allocation4 + $0x6f4] ss:$24 sps:$4 sm:$0xff]   ;;  %v17627_v50 = vld [vmem:[#allocation4 + $0x6f0] ss:$24 sps:$4 sm:$0xff]  }
0x1393   :  { %7335 = vmatmul.mubr.bf16.vlgmr.msra.gmra.mrb[48].mxu0 %v6439_v53  ;;  %7376 = vmatmul.mubr.bf16.vlgmr.msra.gmra.mrb[76].mxu1 %v6441_v59  ;;  %v17624_v42 = vld [vmem:[#allocation4 + $0x6c8] ss:$24 sps:$4 sm:$0xff]   ;;  %v17632_v48 = vld [vmem:[#allocation4 + $0x6fc] ss:$24 sps:$4 sm:$0xff]   ;;  %v17630_v53 = vld [vmem:[#allocation4 + $0x6f8] ss:$24 sps:$4 sm:$0xff]  }
0x1394   :  { %8023 = vmatpush1.bf16.msra.mxu0 %v17597_v26  ;;  %8064 = vmatpush1.bf16.msra.mxu1 %v17600_v28  ;;  %v17635_v59 = vld [vmem:[#allocation4 + $0x724] ss:$24 sps:$4 sm:$0xff]   ;;  %v17666_v26 = vld [vmem:[#allocation4 + $0x818] ss:$24 sps:$4 sm:$0xff]   ;;  %v17672_v29 = vld [vmem:[#allocation4 + $0x848] ss:$24 sps:$4 sm:$0xff]  }
0x1395   :  { %8024 = vmatprep.subr.bf16.mxu0 %v17605_v30  ;;  %8065 = vmatprep.subr.bf16.mxu1 %v17608_v31  ;;  %v17669_v27 = vld [vmem:[#allocation4 + $0x840] ss:$24 sps:$4 sm:$0xff]   ;;  %v17671_v28 = vld [vmem:[#allocation4 + $0x844] ss:$24 sps:$4 sm:$0xff]   ;;  %v17677_v31 = vld [vmem:[#allocation4 + $0x874] ss:$24 sps:$4 sm:$0xff]  }
0x1396   :  { %v17674_v30 = vld [vmem:[#allocation4 + $0x84c] ss:$24 sps:$4 sm:$0xff]  }
0x1398   :  { %8025 = vmatpush1.bf16.msra.mxu0 %v17603_v12  ;;  %v17680_v12 = vld [vmem:[#allocation4 + $0x87c] ss:$24 sps:$4 sm:$0xff]  }
0x1399   :  { %8026 = vmatprep.subr.bf16.mxu0 %v17611_v32  ;;  %v17678_v32 = vld [vmem:[#allocation4 + $0x878] ss:$24 sps:$4 sm:$0xff]  }
0x139c   :  { %8027 = vmatpush1.bf16.msra.mxu0 %v17609_v10  ;;  %v17686_v10 = vld [vmem:[#allocation4 + $0x8ac] ss:$24 sps:$4 sm:$0xff]  }
0x139d   :  { %8028 = vmatprep.subr.bf16.mxu0 %v17617_v34  ;;  %v17684_v34 = vld [vmem:[#allocation4 + $0x8a8] ss:$24 sps:$4 sm:$0xff]  }
0x13a0   :  { %8029 = vmatpush1.bf16.msra.mxu0 %v17615_v38  ;;  %v17692_v38 = vld [vmem:[#allocation4 + $0x8dc] ss:$24 sps:$4 sm:$0xff]  }
0x13a1   :  { %8030 = vmatprep.subr.bf16.mxu0 %v17623_v14  ;;  %v17690_v14 = vld [vmem:[#allocation4 + $0x8d8] ss:$24 sps:$4 sm:$0xff]  }
0x13a4   :  { %8031 = vmatpush1.bf16.msra.mxu0 %v17621_v41 }
0x13a5   :  { %8032 = vmatprep.subr.bf16.mxu0 %v17629_v43 }
0x13a8   :  { %8033 = vmatpush1.bf16.msra.mxu0 %v17627_v50  ;;  %v19167_v50 = vld [vmem:[#allocation2 + $0x40] sm:$0xff] }
0x13a9   :  { %8034 = vmatprep.subr.bf16.mxu0 %v17635_v59  ;;  %v7426_v59 = vrot.slane %v19167_v50, %v18831_v18 }
0x1426   :  { %v7254_v4 = vpop.f32.mrb[44].mxu0  ;;  %v7295_v6 = vpop.f32.mrb[72].mxu1 }
0x1427   :  { %v7255_v7 = vadd.f32 %v7254_v4, %v6575_v61  ;;  %v7256_v8 = vpop.f32.mrb[45].mxu0  ;;  %v7297_v56 = vpop.f32.mrb[73].mxu1  ;;  %v17633_v61 = vld [vmem:[#allocation4 + $0x720] ss:$24 sps:$4 sm:$0xff]   ;;  %v17644_v4 = vld [vmem:[#allocation4 + $0x75c] ss:$24 sps:$4 sm:$0xff]  }
0x1428   :  { %v7257_v5 = vadd.f32 %v7256_v8, %v6579_v2  ;;  %v7258_v11 = vpop.f32.mrb[46].mxu0  ;;  %v7299_v47 = vpop.f32.mrb[74].mxu1  ;;  %v17641_v2 = vld [vmem:[#allocation4 + $0x754] ss:$24 sps:$4 sm:$0xff]   ;;  %8035 = vmatpush1.bf16.msra.mxu0 %v17633_v61  ;;  %v17647_v8 = vld [vmem:[#allocation4 + $0x784] ss:$24 sps:$4 sm:$0xff]  }
0x1429   :  { %v7296_v15 = vadd.f32 %v7295_v6, %v7255_v7  ;;  %v7259_v51 = vpop.f32.mrb[47].mxu0  ;;  %v7300_v13 = vpop.f32.mrb[75].mxu1  ;;  %v17639_v6 = vld [vmem:[#allocation4 + $0x750] ss:$24 sps:$4 sm:$0xff]   ;;  %8036 = vmatprep.subr.bf16.mxu0 %v17641_v2  ;;  %v17653_v47 = vld [vmem:[#allocation4 + $0x7b4] ss:$24 sps:$4 sm:$0xff]  }
0x142a   :  { %v7298_v46 = vadd.f32 %v7297_v56, %v7257_v5  ;;  %v17642_v7 = vld [vmem:[#allocation4 + $0x758] ss:$24 sps:$4 sm:$0xff]   ;;  %v17650_v56 = vld [vmem:[#allocation4 + $0x78c] ss:$24 sps:$4 sm:$0xff]   ;;  %v17648_v11 = vld [vmem:[#allocation4 + $0x788] ss:$24 sps:$4 sm:$0xff]  }
0x142b   :  { %v17645_v5 = vld [vmem:[#allocation4 + $0x780] ss:$24 sps:$4 sm:$0xff]   ;;  %v17651_v51 = vld [vmem:[#allocation4 + $0x7b0] ss:$24 sps:$4 sm:$0xff]  }
0x142c   :  { %8037 = vmatpush1.bf16.msra.mxu0 %v17639_v6  ;;  %v17654_v13 = vld [vmem:[#allocation4 + $0x7b8] ss:$24 sps:$4 sm:$0xff]  }
0x142d   :  { %8038 = vmatprep.subr.bf16.mxu0 %v17647_v8 }
0x1430   :  { %8039 = vmatpush1.bf16.msra.mxu0 %v17645_v5 }
0x1431   :  { %8040 = vmatprep.subr.bf16.mxu0 %v17653_v47 }
0x1434   :  { %8041 = vmatpush1.bf16.msra.mxu0 %v17651_v51  ;;  %v17696_v51 = vld [vmem:[#allocation4 + $0x640] ss:$24 sps:$4 sm:$0xff]  }
0x1466   :  { %v7336_v45 = vpop.f32.mrb[48].mxu0  ;;  %v7377_v16 = vpop.f32.mrb[76].mxu1 }
0x1467   :  { %v7337_v37 = vadd.f32 %v7336_v45, %v7296_v15  ;;  %v7338_v44 = vpop.f32.mrb[49].mxu0  ;;  %v7379_v17 = vpop.f32.mrb[77].mxu1  ;;  %v17656_v15 = vld [vmem:[#allocation4 + $0x7bc] ss:$24 sps:$4 sm:$0xff]   ;;  %v17657_v45 = vld [vmem:[#allocation4 + $0x7e0] ss:$24 sps:$4 sm:$0xff]  }
0x1468   :  { %v7339_v55 = vadd.f32 %v7338_v44, %v7298_v46  ;;  %v7340_v39 = vpop.f32.mrb[50].mxu0  ;;  %v7381_v23 = vpop.f32.mrb[78].mxu1  ;;  %v17659_v46 = vld [vmem:[#allocation4 + $0x7e4] ss:$24 sps:$4 sm:$0xff]  }
0x1469   :  { %v7378_v3 = vadd.f32 %v7377_v16, %v7337_v37  ;;  %v7341_v21 = vpop.f32.mrb[51].mxu0  ;;  %v7382_v54 = vpop.f32.mrb[79].mxu1  ;;  %8042 = vmatprep.subr.bf16.mxu0 %v17659_v46  ;;  %v17699_v46 = vld [vmem:[#allocation4 + $0x670] ss:$24 sps:$4 sm:$0xff]  }
0x146a   :  { %v7380_v1 = vadd.f32 %v7379_v17, %v7339_v55  ;;  %8043 = vmatpush1.bf16.msra.mxu0 %v17657_v45  ;;  %v17660_v21 = vld [vmem:[#allocation4 + $0x7e8] ss:$24 sps:$4 sm:$0xff]   ;;  %v17665_v54 = vld [vmem:[#allocation4 + $0x814] ss:$24 sps:$4 sm:$0xff]   ;;  %v17704_v45 = vld [vmem:[#allocation4 + $0x6a4] ss:$24 sps:$4 sm:$0xff]  }
0x146b   :  { %v19151_v22 = vadd.f32 %v7378_v3, %v19099_v9  ;;  %v17606_v9 = vld [vmem:[#allocation4 + $0x638] ss:$24 sps:$4 sm:$0xff]   ;;  %v17662_v3 = vld [vmem:[#allocation4 + $0x7ec] ss:$24 sps:$4 sm:$0xff]   ;;  %8044 = vmatprep.subr.bf16.mxu0 %v17665_v54 }
0x146c   :  { %v19154_v24 = vadd.f32 %v7380_v1, %v19102_v49  ;;  %v17614_v49 = vld [vmem:[#allocation4 + $0x66c] ss:$24 sps:$4 sm:$0xff]   ;;  %8066 = vmatpush1.bf16.msra.mxu1 %v17606_v9  ;;  %v17663_v1 = vld [vmem:[#allocation4 + $0x810] ss:$24 sps:$4 sm:$0xff]  }
0x146d   :  { %8067 = vmatprep.subr.bf16.mxu1 %v17614_v49  ;;  %v17675_v9 = vld [vmem:[#allocation4 + $0x870] ss:$24 sps:$4 sm:$0xff]   ;;  %v17683_v49 = vld [vmem:[#allocation4 + $0x8a4] ss:$24 sps:$4 sm:$0xff]   ;;  %v17719_v54 = vld [vmem:[#allocation4 + $0x794] ss:$24 sps:$4 sm:$0xff]  }
0x146e   :  { %v7407_v25 = vadd.f32 %v19154_v24, %v19151_v22  ;;  %8045 = vmatpush1.bf16.msra.mxu0 %v17663_v1  ;;  %v17717_v1 = vld [vmem:[#allocation4 + $0x790] ss:$24 sps:$4 sm:$0xff]  }
0x146f   :  { %8046 = vmatprep.subr.bf16.mxu0 %v17671_v28  ;;  %v17723_v28 = vld [vmem:[#allocation4 + $0x7f0] ss:$24 sps:$4 sm:$0xff]  }
0x1470   :  { %7408 = vadd.xlane.f32.xlu0 %v7407_v25  ;;  %8068 = vmatpush1.bf16.msra.mxu1 %v17612_v33  ;;  %v17668_v25 = vld [vmem:[#allocation4 + $0x81c] ss:$24 sps:$4 sm:$0xff]   ;;  %v17681_v33 = vld [vmem:[#allocation4 + $0x8a0] ss:$24 sps:$4 sm:$0xff]  }
0x1471   :  { %8069 = vmatprep.subr.bf16.mxu1 %v17620_v35  ;;  %v17689_v35 = vld [vmem:[#allocation4 + $0x8d4] ss:$24 sps:$4 sm:$0xff]  }
0x1472   :  { %8047 = vmatpush1.bf16.msra.mxu0 %v17669_v27  ;;  %v17725_v27 = vld [vmem:[#allocation4 + $0x7f4] ss:$24 sps:$4 sm:$0xff]  }
0x1473   :  { %8048 = vmatprep.subr.bf16.mxu0 %v17677_v31  ;;  %v17731_v31 = vld [vmem:[#allocation4 + $0x854] ss:$24 sps:$4 sm:$0xff]  }
0x1474   :  { %8070 = vmatpush1.bf16.msra.mxu1 %v17618_v20  ;;  %v17687_v20 = vld [vmem:[#allocation4 + $0x8d0] ss:$24 sps:$4 sm:$0xff]  }
0x1475   :  { %8071 = vmatprep.subr.bf16.mxu1 %v17626_v40  ;;  %v17695_v40 = vld [vmem:[#allocation4 + $0x614] ss:$24 sps:$4 sm:$0xff]  }
0x1476   :  { %8049 = vmatpush1.bf16.msra.mxu0 %v17675_v9  ;;  %v17734_v9 = vld [vmem:[#allocation4 + $0x884] ss:$24 sps:$4 sm:$0xff]  }
0x1477   :  { %8050 = vmatprep.subr.bf16.mxu0 %v17683_v49  ;;  %v17737_v49 = vld [vmem:[#allocation4 + $0x8b4] ss:$24 sps:$4 sm:$0xff]  }
0x1478   :  { %8072 = vmatpush1.bf16.msra.mxu1 %v17624_v42 }
0x1479   :  { %8073 = vmatprep.subr.bf16.mxu1 %v17632_v48  ;;  %v19165_v48 = vld [vmem:[#allocation2 + $0x48] sm:$0xff] }
0x147a   :  { %8051 = vmatpush1.bf16.msra.mxu0 %v17681_v33  ;;  %v17740_v33 = vld [vmem:[#allocation4 + $0x8e4] ss:$24 sps:$4 sm:$0xff]  }
0x147b   :  { %8052 = vmatprep.subr.bf16.mxu0 %v17689_v35 }
0x147c   :  { %8074 = vmatpush1.bf16.msra.mxu1 %v17630_v53  ;;  %v7430_v53 = vrot.slane %v19165_v48, %v18831_v18 }
0x147d   :  { %8075 = vmatprep.subr.bf16.mxu1 %v17638_v60 }
0x147e   :  { %8053 = vmatpush1.bf16.msra.mxu0 %v17687_v20 }
0x147f   :  { %8104 = vmatprep.subr.bf16.mxu0 %v17695_v40 }
0x1480   :  { %8076 = vmatpush1.bf16.msra.mxu1 %v17636_v62  ;;  %v7440_v62 = vrot.slane %v19165_v48, %v18834_v19 }
0x1481   :  { %8077 = vmatprep.subr.bf16.mxu1 %v17644_v4  ;;  %v7436_v4 = vrot.slane %v19167_v50, %v18834_v19 }
0x1484   :  { %8078 = vmatpush1.bf16.msra.mxu1 %v17642_v7 }
0x1485   :  { %8079 = vmatprep.subr.bf16.mxu1 %v17650_v56 }
0x1488   :  { %8080 = vmatpush1.bf16.msra.mxu1 %v17648_v11  ;;  %v17693_v11 = vld [vmem:[#allocation4 + $0x610] ss:$24 sps:$4 sm:$0xff]  }
0x1489   :  { %8081 = vmatprep.subr.bf16.mxu1 %v17656_v15  ;;  %v17698_v15 = vld [vmem:[#allocation4 + $0x644] ss:$24 sps:$4 sm:$0xff]  }
0x148c   :  { %8082 = vmatpush1.bf16.msra.mxu1 %v17654_v13  ;;  %v17701_v13 = vld [vmem:[#allocation4 + $0x674] ss:$24 sps:$4 sm:$0xff]  }
0x148d   :  { %8083 = vmatprep.subr.bf16.mxu1 %v17662_v3  ;;  %v17716_v3 = vld [vmem:[#allocation4 + $0x764] ss:$24 sps:$4 sm:$0xff]  }
0x1490   :  { %8084 = vmatpush1.bf16.msra.mxu1 %v17660_v21  ;;  %v17714_v21 = vld [vmem:[#allocation4 + $0x760] ss:$24 sps:$4 sm:$0xff]  }
0x1491   :  { %8085 = vmatprep.subr.bf16.mxu1 %v17668_v25  ;;  %v17722_v25 = vld [vmem:[#allocation4 + $0x7c4] ss:$24 sps:$4 sm:$0xff]  }
0x1494   :  { %8086 = vmatpush1.bf16.msra.mxu1 %v17666_v26  ;;  %v17720_v26 = vld [vmem:[#allocation4 + $0x7c0] ss:$24 sps:$4 sm:$0xff]  }
0x1495   :  { %8087 = vmatprep.subr.bf16.mxu1 %v17674_v30  ;;  %v17726_v30 = vld [vmem:[#allocation4 + $0x820] ss:$24 sps:$4 sm:$0xff]  }
0x1498   :  { %8088 = vmatpush1.bf16.msra.mxu1 %v17672_v29  ;;  %v17728_v29 = vld [vmem:[#allocation4 + $0x824] ss:$24 sps:$4 sm:$0xff]  }
0x1499   :  { %8089 = vmatprep.subr.bf16.mxu1 %v17680_v12  ;;  %v17729_v12 = vld [vmem:[#allocation4 + $0x850] ss:$24 sps:$4 sm:$0xff]  }
0x149c   :  { %8090 = vmatpush1.bf16.msra.mxu1 %v17678_v32  ;;  %v17732_v32 = vld [vmem:[#allocation4 + $0x880] ss:$24 sps:$4 sm:$0xff]  }
0x149d   :  { %8091 = vmatprep.subr.bf16.mxu1 %v17686_v10  ;;  %v17735_v10 = vld [vmem:[#allocation4 + $0x8b0] ss:$24 sps:$4 sm:$0xff]  }
0x14a0   :  { %8092 = vmatpush1.bf16.msra.mxu1 %v17684_v34  ;;  %v17738_v34 = vld [vmem:[#allocation4 + $0x8e0] ss:$24 sps:$4 sm:$0xff]  }
0x14a1   :  { %8093 = vmatprep.subr.bf16.mxu1 %v17692_v38 }
0x14a4   :  { %8094 = vmatpush1.bf16.msra.mxu1 %v17690_v14 }
0x14a5   :  { %16712 = vmatprep.subr.mxu1 %v18670_v0 }
0x14fd   :  { %v7409_v16 = vpop.xlane.xlu0 %7408 }
0x14fe   :  { %v7410_v37 = vmul.f32 0.00390625, %v7409_v16  ;;  %v17702_v16 = vld [vmem:[#allocation4 + $0x6a0] ss:$24 sps:$4 sm:$0xff]  }
0x1500   :  { %v19159_v44 = vsub.f32 %v19151_v22, %v7410_v37  ;;  %v7412_v17 = vsub.f32 %v19154_v24, %v7410_v37  ;;  %v17707_v37 = vld [vmem:[#allocation4 + $0x6d4] ss:$24 sps:$4 sm:$0xff]  }
0x1502   :  { %v7413_v55 = vmul.f32 %v19159_v44, %v19159_v44  ;;  %v7414_v39 = vmul.f32 %v7412_v17, %v7412_v17 }
0x1504   :  { %v7415_v23 = vadd.f32 %v7414_v39, %v7413_v55  ;;  %v17708_v55 = vld [vmem:[#allocation4 + $0x700] ss:$24 sps:$4 sm:$0xff]   ;;  %v17713_v39 = vld [vmem:[#allocation4 + $0x734] ss:$24 sps:$4 sm:$0xff]  }
0x1506   :  { %7416 = vadd.xlane.f32.xlu1 %v7415_v23  ;;  %v17711_v23 = vld [vmem:[#allocation4 + $0x730] ss:$24 sps:$4 sm:$0xff]  }
0x1593   :  { %v7417_v41 = vpop.xlane.xlu1 %7416 }
0x1594   :  { %v7418_v42 = vmul.f32 0.00390625, %v7417_v41 }
0x1596   :  { %v7419_v43 = vadd.f32 1e-05, %v7418_v42 }
0x1598   :  { %18453 = vrsqrt.f32 %v7419_v43 }
0x15a2   :  { %v18454_v60 = vpop.eup %18453 }
0x15a3   :  { %v7422_v61 = vmul.f32 %v18454_v60, %v7412_v17  ;;  %v7421_v2 = vmul.f32 %v18454_v60, %v19159_v44  ;;  %v17705_v44 = vld [vmem:[#allocation4 + $0x6d0] ss:$24 sps:$4 sm:$0xff]   ;;  %v17710_v17 = vld [vmem:[#allocation4 + $0x704] ss:$24 sps:$4 sm:$0xff]  }
0x15a5   :  { %v7432_v6 = vmul.f32 %v7430_v53, %v7422_v61  ;;  %v7431_v7 = vmul.f32 %v7426_v59, %v7421_v2 }
0x15a7   :  { %v7442_v8 = vadd.f32 %v7440_v62, %v7432_v6  ;;  %v7441_v56 = vadd.f32 %v7436_v4, %v7431_v7 }
0x15a9   :  { %v7444_v5 = vpack.c.bf16 %v7442_v8, %v7442_v8  ;;  %v19178_v47 = vpack.c.bf16 %v7441_v56, %v7441_v56 }
0x15ab   :  { %8054 = vmatprep.mubr.bf16.mxu0 %v7444_v5  ;;  %8095 = vmatprep.mubr.bf16.mxu1 %v7444_v5 }
0x15ac   :  { %8055 = vmatmul.mubr.bf16.vlgmr.msra.gmra.mrb[52].mxu0 %v19178_v47  ;;  %8096 = vmatmul.mubr.bf16.vlgmr.msra.gmra.mrb[80].mxu1 %v19178_v47 }
0x15ad   :  { %8105 = vmatpush1.bf16.msra.mxu0 %v17693_v11  ;;  %8136 = vmatprep.mubr.bf16.mxu0 %v7444_v5 }
0x15ae   :  { %8106 = vmatprep.subr.bf16.mxu0 %v17698_v15  ;;  %16714 = vmatprep.mubr.msk.f32.mxu1 %vm18671_vm0, %v18670_v0 }
0x15b1   :  { %8107 = vmatpush1.bf16.msra.mxu0 %v17696_v51 }
0x15b2   :  { %8108 = vmatprep.subr.bf16.mxu0 %v17701_v13  ;;  %v18506_v13 = vld [vmem:[%s19461_s1] sm:$0xff] }
0x15b5   :  { %8109 = vmatpush1.bf16.msra.mxu0 %v17699_v46 }
0x15b6   :  { %8110 = vmatprep.subr.bf16.mxu0 %v17704_v45 }
0x15b9   :  { %8111 = vmatpush1.bf16.msra.mxu0 %v17702_v16 }
0x15ba   :  { %8112 = vmatprep.subr.bf16.mxu0 %v17707_v37 }
0x15bd   :  { %8113 = vmatpush1.bf16.msra.mxu0 %v17705_v44 }
0x15be   :  { %8114 = vmatprep.subr.bf16.mxu0 %v17710_v17 }
0x15c1   :  { %8115 = vmatpush1.bf16.msra.mxu0 %v17708_v55 }
0x15c2   :  { %8116 = vmatprep.subr.bf16.mxu0 %v17713_v39 }
0x15c5   :  { %8117 = vmatpush1.bf16.msra.mxu0 %v17711_v23 }
0x15c6   :  { %8118 = vmatprep.subr.bf16.mxu0 %v17716_v3 }
0x15c9   :  { %8119 = vmatpush1.bf16.msra.mxu0 %v17714_v21 }
0x15ca   :  { %8120 = vmatprep.subr.bf16.mxu0 %v17719_v54 }
0x15cd   :  { %8121 = vmatpush1.bf16.msra.mxu0 %v17717_v1 }
0x15ce   :  { %8122 = vmatprep.subr.bf16.mxu0 %v17722_v25 }
0x15d1   :  { %8123 = vmatpush1.bf16.msra.mxu0 %v17720_v26 }
0x15d2   :  { %8124 = vmatprep.subr.bf16.mxu0 %v17725_v27 }
0x15d5   :  { %8125 = vmatpush1.bf16.msra.mxu0 %v17723_v28 }
0x15d6   :  { %8126 = vmatprep.subr.bf16.mxu0 %v17728_v29 }
0x15d9   :  { %8127 = vmatpush1.bf16.msra.mxu0 %v17726_v30 }
0x15da   :  { %8128 = vmatprep.subr.bf16.mxu0 %v17731_v31 }
0x15dd   :  { %8129 = vmatpush1.bf16.msra.mxu0 %v17729_v12 }
0x15de   :  { %8130 = vmatprep.subr.bf16.mxu0 %v17734_v9 }
0x15e1   :  { %8131 = vmatpush1.bf16.msra.mxu0 %v17732_v32 }
0x15e2   :  { %8132 = vmatprep.subr.bf16.mxu0 %v17737_v49 }
0x15e5   :  { %8133 = vmatpush1.bf16.msra.mxu0 %v17735_v10 }
0x15e6   :  { %8134 = vmatprep.subr.bf16.mxu0 %v17740_v33 }
0x15e9   :  { %8135 = vmatpush1.bf16.msra.mxu0 %v17738_v34 }
0x15ea   :  { %16717 = vmatprep.subr.mxu0 %v18670_v0 }
0x15ec   :  { %8137 = vmatmul.mubr.bf16.vlgmr.msra.gmra.mrb[56].mxu0 %v19178_v47 }
0x15ed   :  { %16719 = vmatprep.mubr.msk.f32.mxu0 %vm18671_vm0, %v18670_v0 }
0x167f   :  { %v8056_v35 = vpop.f32.mrb[52].mxu0  ;;  %v8097_v38 = vpop.f32.mrb[80].mxu1 }
0x1680   :  { %8152 = vrot.lane.b32.xlu0 %v8097_v38, %s18672_s7  ;;  %v8099_v20 = vpop.f32.mrb[81].mxu1  ;;  %16713 = vmatpush3.xpose.msk.msra.mxu1 %vm892_vm1, %v8097_v38  ;;  %v8058_v14 = vpop.f32.mrb[53].mxu0 }
0x1681   :  { %8146 = vrot.lane.b32.xlu1 %v8056_v35, %s18672_s7  ;;  %v8060_v40 = vpop.f32.mrb[54].mxu0  ;;  %v8101_v41 = vpop.f32.mrb[82].mxu1  ;;  %16722 = vmatprep.subr.mxu1 %v18670_v0 }
0x1682   :  { %v8061_v42 = vpop.f32.mrb[55].mxu0  ;;  %v8102_v43 = vpop.f32.mrb[83].mxu1 }
0x1683   :  { %16715 = vmatmul.mubr.msk.f32.vlgmr.msra.gmra.mrb[58].mxu1 %vm892_vm1, %v8056_v35 }
0x1684   :  { %16723 = vmatpush3.xpose.msk.msra.mxu1 %vm892_vm1, %v8099_v20  ;;  %8149 = vrot.lane.b32.xlu0 %v8058_v14, %s18672_s7 }
0x1685   :  { %8155 = vrot.lane.b32.xlu1 %v8099_v20, %s18672_s7  ;;  %16724 = vmatprep.mubr.msk.f32.mxu1 %vm18671_vm0, %v18670_v0 }
0x1686   :  { %16732 = vmatprep.subr.mxu1 %v18670_v0 }
0x1687   :  { %16725 = vmatmul.mubr.msk.f32.vlgmr.msra.gmra.mrb[84].mxu1 %vm892_vm1, %v8058_v14 }
0x1688   :  { %16734 = vmatprep.mubr.msk.f32.mxu1 %vm18671_vm0, %v18670_v0 }
0x16bf   :  { %v8138_v53 = vpop.f32.mrb[56].mxu0 }
0x16c0   :  { %v19202_v59 = vpop.f32.mrb[57].mxu0  ;;  %16733 = vmatpush3.msra.mxu1 %v8138_v53 }
0x16c1   :  { %v8142_v60 = vpop.f32.mrb[58].mxu0  ;;  %16742 = vmatprep.subr.mxu1 %v18670_v0 }
0x16c2   :  { %v8143_v61 = vpop.f32.mrb[59].mxu0 }
0x16f2   :  { %v8153_v62 = vpop.permute.xlu0 %8152 }
0x16f3   :  { %v8147_v2 = vpop.permute.xlu1 %8146  ;;  %16718 = vmatpush3.xpose.msk.msra.mxu0 %vm892_vm1, %v8153_v62 }
0x16f4   :  { %16727 = vmatprep.subr.mxu0 %v18670_v0 }
0x16f6   :  { %16720 = vmatmul.mubr.msk.f32.vlgmr.msra.gmra.mrb[34].mxu0 %vm892_vm1, %v8147_v2  ;;  %v8150_v6 = vpop.permute.xlu0 %8149 }
0x16f7   :  { %v8156_v4 = vpop.permute.xlu1 %8155  ;;  %16729 = vmatprep.mubr.msk.f32.mxu0 %vm18671_vm0, %v18670_v0 }
0x16f8   :  { %16728 = vmatpush3.xpose.msk.msra.mxu0 %vm892_vm1, %v8156_v4 }
0x16f9   :  { %16737 = vmatprep.subr.mxu0 %v18670_v0 }
0x16fb   :  { %16730 = vmatmul.mubr.msk.f32.vlgmr.msra.gmra.mrb[60].mxu0 %vm892_vm1, %v8150_v6 }
0x16fc   :  { %16739 = vmatprep.mubr.msk.f32.mxu0 %vm18671_vm0, %v18670_v0 }
0x1756   :  { %v8235_v7 = vpop.f32.mrb[58].mxu1 }
0x1757   :  { %v16716_v8 = vpop.f32.mrb[59].mxu1  ;;  %v8461_v44 = vmul.f32 0.0625, %v8235_v7 }
0x1759   :  { %v8465_v21 = vadd.f32 %v18506_v13, %v8461_v44  ;;  %v17758_v44 = vld [vmem:[#allocation6 + $0x254] ss:$8 sps:$4 sm:$0xff]  }
0x175a   :  { %v8383_v56 = vpop.f32.mrb[84].mxu1 }
0x175b   :  { %v16726_v5 = vpop.f32.mrb[85].mxu1  ;;  %v8463_v47 = vmul.f32 0.0625, %v8383_v56  ;;  %v8469_v54 = vsel %vm1197_vm2, %v8465_v21, -inf }
0x175d   :  { %v8467_v37 = vadd.f32 %v18506_v13, %v8463_v47  ;;  %v17743_v47 = vld [vmem:[#allocation6 + $0x204] ss:$8 sps:$4 sm:$0xff]  }
0x175f   :  { %v8475_v23 = vsel %vm1197_vm2, %v8467_v37, -inf }
0x17c9   :  { %v8309_v11 = vpop.f32.mrb[34].mxu0 }
0x17ca   :  { %v8462_v15 = vmul.f32 0.0625, %v8309_v11  ;;  %v16721_v51 = vpop.f32.mrb[35].mxu0  ;;  %v17741_v11 = vld [vmem:[#allocation6 + $0x200] ss:$8 sps:$4 sm:$0xff]  }
0x17cb   :  { %v17744_v51 = vld [vmem:[#allocation6 + $0x210] ss:$8 sps:$4 sm:$0xff]  }
0x17cc   :  { %v8466_v46 = vadd.f32 %v18506_v13, %v8462_v15  ;;  %v17746_v15 = vld [vmem:[#allocation6 + $0x214] ss:$8 sps:$4 sm:$0xff]  }
0x17ce   :  { %v8457_v45 = vpop.f32.mrb[60].mxu0  ;;  %v8472_v16 = vsel %vm1197_vm2, %v8466_v46, -inf }
0x17cf   :  { %v8464_v17 = vmul.f32 0.0625, %v8457_v45  ;;  %v16731_v55 = vpop.f32.mrb[61].mxu0  ;;  %8473 = vmax.xlane.f32.xlu1 %v8472_v16  ;;  %v17752_v45 = vld [vmem:[#allocation6 + $0x234] ss:$8 sps:$4 sm:$0xff]   ;;  %v17755_v16 = vld [vmem:[#allocation6 + $0x244] ss:$8 sps:$4 sm:$0xff]  }
0x17d0   :  { %v17761_v55 = vld [vmem:[#allocation6 + $0x264] ss:$8 sps:$4 sm:$0xff]  }
0x17d1   :  { %v8468_v39 = vadd.f32 %v18506_v13, %v8464_v17  ;;  %v17749_v13 = vld [vmem:[#allocation6 + $0x224] ss:$8 sps:$4 sm:$0xff]   ;;  %v17756_v17 = vld [vmem:[#allocation6 + $0x250] ss:$8 sps:$4 sm:$0xff]  }
0x17d3   :  { %8476 = vmax.xlane.f32.xlu1 %v8475_v23  ;;  %v8478_v3 = vsel %vm1197_vm2, %v8468_v39, -inf  ;;  %v17764_v23 = vld [vmem:[#allocation6 + $0x274] ss:$8 sps:$4 sm:$0xff]  }
0x17d4   :  { %8479 = vmax.xlane.f32.xlu0 %v8478_v3  ;;  %v17762_v3 = vld [vmem:[#allocation6 + $0x270] ss:$8 sps:$4 sm:$0xff]  }
0x17d8   :  { %8470 = vmax.xlane.f32.xlu0 %v8469_v54  ;;  %v17765_v54 = vld [vmem:[#allocation6 + $0x280] ss:$8 sps:$4 sm:$0xff]  }
0x185c   :  { %v8474_v1 = vpop.xlane.xlu1 %8473 }
0x185d   :  { %v8482_v25 = vsub.f32 %v8466_v46, %v8474_v1  ;;  %v17747_v46 = vld [vmem:[#allocation6 + $0x220] ss:$8 sps:$4 sm:$0xff]   ;;  %v17770_v1 = vld [vmem:[#allocation6 + $0x294] ss:$8 sps:$4 sm:$0xff]  }
0x185f   :  { %v8487_v26 = vmul.f32 1.442695, %v8482_v25  ;;  %v17768_v25 = vld [vmem:[#allocation6 + $0x290] ss:$8 sps:$4 sm:$0xff]  }
0x1860   :  { %v8477_v32 = vpop.xlane.xlu1 %8476 }
0x1861   :  { %18455 = vpow2.f32 %v8487_v26  ;;  %v8480_v27 = vpop.xlane.xlu0 %8479  ;;  %v8483_v49 = vsub.f32 %v8467_v37, %v8477_v32  ;;  %v17753_v37 = vld [vmem:[#allocation6 + $0x240] ss:$8 sps:$4 sm:$0xff]   ;;  %v17773_v26 = vld [vmem:[#allocation6 + $0x2a4] ss:$8 sps:$4 sm:$0xff]  }
0x1862   :  { %v8484_v28 = vsub.f32 %v8468_v39, %v8480_v27  ;;  %v17759_v39 = vld [vmem:[#allocation6 + $0x260] ss:$8 sps:$4 sm:$0xff]   ;;  %v17785_v32 = vld [vmem:[#allocation6 + $0x2e4] ss:$8 sps:$4 sm:$0xff]  }
0x1863   :  { %v8489_v33 = vmul.f32 1.442695, %v8483_v49  ;;  %v17771_v27 = vld [vmem:[#allocation6 + $0x2a0] ss:$8 sps:$4 sm:$0xff]  }
0x1864   :  { %v8491_v29 = vmul.f32 1.442695, %v8484_v28  ;;  %v17776_v28 = vld [vmem:[#allocation6 + $0x2b4] ss:$8 sps:$4 sm:$0xff]   ;;  %v17783_v49 = vld [vmem:[#allocation6 + $0x2e0] ss:$8 sps:$4 sm:$0xff]  }
0x1865   :  { %v8471_v10 = vpop.xlane.xlu0 %8470 }
0x1866   :  { %18457 = vpow2.f32 %v8491_v29  ;;  %v8481_v34 = vsub.f32 %v8465_v21, %v8471_v10  ;;  %v17767_v21 = vld [vmem:[#allocation6 + $0x284] ss:$8 sps:$4 sm:$0xff]   ;;  %v17774_v29 = vld [vmem:[#allocation6 + $0x2b0] ss:$8 sps:$4 sm:$0xff]   ;;  %v17788_v10 = vld [vmem:[#allocation6 + $0x2f4] ss:$8 sps:$4 sm:$0xff]  }
0x1867   :  { %18459 = vpow2.f32 %v8489_v33  ;;  %v17786_v33 = vld [vmem:[#allocation6 + $0x2f0] ss:$8 sps:$4 sm:$0xff]  }
0x1868   :  { %v8485_v35 = vmul.f32 1.442695, %v8481_v34 }
0x186a   :  { %18461 = vpow2.f32 %v8485_v35 }
0x186b   :  { %v18456_v30 = vpop.eup %18455 }
0x186c   :  { %v8496_v31 = vsel %vm1197_vm2, %v18456_v30, 0.0 }
0x186d   :  { %8497 = vadd.xlane.f32.xlu0 %v8496_v31  ;;  %v17777_v31 = vld [vmem:[#allocation6 + $0x2c0] ss:$8 sps:$4 sm:$0xff]  }
0x1870   :  { %v18458_v12 = vpop.eup %18457 }
0x1871   :  { %v8502_v9 = vsel %vm1197_vm2, %v18458_v12, 0.0  ;;  %v18460_v38 = vpop.eup %18459 }
0x1872   :  { %8503 = vadd.xlane.f32.xlu1 %v8502_v9  ;;  %v8499_v20 = vsel %vm1197_vm2, %v18460_v38, 0.0  ;;  %v17780_v9 = vld [vmem:[#allocation6 + $0x2d0] ss:$8 sps:$4 sm:$0xff]  }
0x1874   :  { %v18462_v14 = vpop.eup %18461 }
0x1875   :  { %v8493_v40 = vsel %vm1197_vm2, %v18462_v14, 0.0 }
0x1883   :  { %8162 = vrot.lane.b32.xlu1 %v19202_v59, %s18672_s7  ;;  %8158 = vrot.lane.b32.xlu0 %v8138_v53, %s18672_s7 }
0x18a2   :  { %8500 = vadd.xlane.f32.xlu0 %v8499_v20 }
0x18a7   :  { %8494 = vadd.xlane.f32.xlu1 %v8493_v40 }
0x18fa   :  { %v8498_v41 = vpop.xlane.xlu0 %8497 }
0x18fb   :  { %18463 = vrcp.f32 %v8498_v41 }
0x18fe   :  { %v8159_v42 = vpop.permute.xlu0 %8158 }
0x18ff   :  { %v8504_v43 = vpop.xlane.xlu1 %8503  ;;  %16738 = vmatpush3.msra.mxu0 %v8159_v42 }
0x1900   :  { %18465 = vrcp.f32 %v8504_v43  ;;  %16747 = vmatprep.subr.mxu0 %v18670_v0 }
0x1903   :  { %v8163_v61 = vpop.permute.xlu1 %8162 }
0x1905   :  { %v18464_v53 = vpop.eup %18463 }
0x1906   :  { %v8510_v60 = vmul.f32 %v18464_v53, %v18456_v30  ;;  %v17779_v30 = vld [vmem:[#allocation6 + $0x2c4] ss:$8 sps:$4 sm:$0xff]  }
0x1908   :  { %16740 = vmatmul.mubr.msk.f32.vlgmr.msra.gmra.mrb[62].mxu0 %vm1197_vm2, %v8510_v60 }
0x1909   :  { %16748 = vmatpush3.msra.mxu0 %v8163_v61  ;;  %16749 = vmatprep.mubr.msk.f32.mxu0 %vm18671_vm0, %v18670_v0 }
0x190a   :  { %v18466_v62 = vpop.eup %18465 }
0x190b   :  { %v8512_v2 = vmul.f32 %v18466_v62, %v18458_v12  ;;  %v17782_v12 = vld [vmem:[#allocation6 + $0x2d4] ss:$8 sps:$4 sm:$0xff]  }
0x190d   :  { %16750 = vmatmul.mubr.msk.f32.vlgmr.msra.gmra.mrb[64].mxu0 %vm1197_vm2, %v8512_v2 }
0x192f   :  { %v8501_v4 = vpop.xlane.xlu0 %8500 }
0x1934   :  { %v8495_v6 = vpop.xlane.xlu1 %8494 }
0x1935   :  { %18467 = vrcp.f32 %v8495_v6 }
0x1936   :  { %18469 = vrcp.f32 %v8501_v4 }
0x193f   :  { %v18468_v7 = vpop.eup %18467 }
0x1940   :  { %v8509_v8 = vmul.f32 %v18468_v7, %v18462_v14  ;;  %v18470_v56 = vpop.eup %18469  ;;  %v8853_v7 = vrot.slane %v19167_v50, %v18915_v63  ;;  %v9100_v50 = vld [vmem:[#allocation7 + $0x800] sm:$0xff] }
0x1941   :  { %v8511_v5 = vmul.f32 %v18470_v56, %v18460_v38 }
0x1942   :  { %16735 = vmatmul.mubr.msk.f32.vlgmr.msra.gmra.mrb[86].mxu1 %vm1197_vm2, %v8509_v8  ;;  %v8857_v8 = vrot.slane %v19165_v48, %v18915_v63 }
0x1943   :  { %16743 = vmatpush3.msra.mxu1 %v19202_v59  ;;  %16744 = vmatprep.mubr.msk.f32.mxu1 %vm18671_vm0, %v18670_v0  ;;  %v17750_v59 = vld [vmem:[#allocation6 + $0x230] ss:$8 sps:$4 sm:$0xff]  }
0x1944   :  { %9018 = vmatprep.subr.bf16.mxu1 %v17743_v47 }
0x1946   :  { %16745 = vmatmul.mubr.msk.f32.vlgmr.msra.gmra.mrb[88].mxu1 %vm1197_vm2, %v8511_v5 }
0x1947   :  { %9019 = vmatpush1.bf16.msra.mxu1 %v17741_v11 }
0x1948   :  { %9020 = vmatprep.subr.bf16.mxu1 %v17746_v15 }
0x194b   :  { %9021 = vmatpush1.bf16.msra.mxu1 %v17744_v51 }
0x194c   :  { %9022 = vmatprep.subr.bf16.mxu1 %v17749_v13 }
0x194f   :  { %9023 = vmatpush1.bf16.msra.mxu1 %v17747_v46 }
0x1950   :  { %9024 = vmatprep.subr.bf16.mxu1 %v17752_v45 }
0x1953   :  { %9025 = vmatpush1.bf16.msra.mxu1 %v17750_v59  ;;  %v9104_v59 = vld [vmem:[#allocation7 + $0x820] sm:$0xff] }
0x1954   :  { %9026 = vmatprep.subr.bf16.mxu1 %v17755_v16  ;;  %v9101_v16 = vld [vmem:[#allocation7 + $0x808] sm:$0xff]  ;;  %v15884_v48 = vcombine.low %v9100_v50, %v9104_v59 }
0x1957   :  { %9027 = vmatpush1.bf16.msra.mxu1 %v17753_v37  ;;  %v15885_v37 = vcombine.high %v9100_v50, %v9104_v59  ;;  %v9156_v50 = vld [vmem:[#allocation7 + $0x9c0] sm:$0xff] }
0x1958   :  { %9028 = vmatprep.subr.bf16.mxu1 %v17758_v44  ;;  %v9105_v44 = vld [vmem:[#allocation7 + $0x828] sm:$0xff]  ;;  %v9160_v59 = vld [vmem:[#allocation7 + $0x9e0] sm:$0xff] }
0x1959   :  { %9900 = vmatprep.subr.bf16.mxu0 %v15885_v37 }
0x195a   :  { %9901 = vmatpush1.bf16.msra.mxu0 %v15884_v48  ;;  %v9161_v48 = vld [vmem:[#allocation7 + $0x9e8] sm:$0xff] }
0x195b   :  { %9029 = vmatpush1.bf16.msra.mxu1 %v17756_v17  ;;  %v9108_v17 = vld [vmem:[#allocation7 + $0x840] sm:$0xff] }
0x195c   :  { %9030 = vmatprep.subr.bf16.mxu1 %v17761_v55  ;;  %v9112_v55 = vld [vmem:[#allocation7 + $0x860] sm:$0xff] }
0x195f   :  { %9031 = vmatpush1.bf16.msra.mxu1 %v17759_v39  ;;  %v15886_v39 = vcombine.low %v9101_v16, %v9105_v44 }
0x1960   :  { %9032 = vmatprep.subr.bf16.mxu1 %v17764_v23  ;;  %v15887_v23 = vcombine.high %v9101_v16, %v9105_v44  ;;  %v9157_v16 = vld [vmem:[#allocation7 + $0x9c8] sm:$0xff] }
0x1963   :  { %9033 = vmatpush1.bf16.msra.mxu1 %v17762_v3  ;;  %v9109_v3 = vld [vmem:[#allocation7 + $0x848] sm:$0xff] }
0x1964   :  { %9034 = vmatprep.subr.bf16.mxu1 %v17767_v21  ;;  %v9113_v21 = vld [vmem:[#allocation7 + $0x868] sm:$0xff] }
0x1967   :  { %9035 = vmatpush1.bf16.msra.mxu1 %v17765_v54  ;;  %v9116_v54 = vld [vmem:[#allocation7 + $0x880] sm:$0xff] }
0x1968   :  { %9036 = vmatprep.subr.bf16.mxu1 %v17770_v1  ;;  %v9120_v1 = vld [vmem:[#allocation7 + $0x8a0] sm:$0xff] }
0x196b   :  { %9037 = vmatpush1.bf16.msra.mxu1 %v17768_v25  ;;  %v9117_v25 = vld [vmem:[#allocation7 + $0x888] sm:$0xff] }
0x196c   :  { %9038 = vmatprep.subr.bf16.mxu1 %v17773_v26  ;;  %v9121_v26 = vld [vmem:[#allocation7 + $0x8a8] sm:$0xff] }
0x196f   :  { %9039 = vmatpush1.bf16.msra.mxu1 %v17771_v27  ;;  %v15892_v27 = vcombine.low %v9108_v17, %v9112_v55 }
0x1970   :  { %9040 = vmatprep.subr.bf16.mxu1 %v17776_v28  ;;  %v15894_v28 = vcombine.low %v9109_v3, %v9113_v21 }
0x1973   :  { %9041 = vmatpush1.bf16.msra.mxu1 %v17774_v29  ;;  %v15901_v29 = vcombine.high %v9116_v54, %v9120_v1 }
0x1974   :  { %9042 = vmatprep.subr.bf16.mxu1 %v17779_v30  ;;  %v15903_v30 = vcombine.high %v9117_v25, %v9121_v26 }
0x1977   :  { %9043 = vmatpush1.bf16.msra.mxu1 %v17777_v31  ;;  %v9124_v31 = vld [vmem:[#allocation7 + $0x8c0] sm:$0xff] }
0x1978   :  { %9044 = vmatprep.subr.bf16.mxu1 %v17782_v12  ;;  %v9128_v12 = vld [vmem:[#allocation7 + $0x8e0] sm:$0xff] }
0x197b   :  { %9045 = vmatpush1.bf16.msra.mxu1 %v17780_v9  ;;  %v9125_v9 = vld [vmem:[#allocation7 + $0x8c8] sm:$0xff] }
0x197c   :  { %9046 = vmatprep.subr.bf16.mxu1 %v17785_v32  ;;  %v9129_v32 = vld [vmem:[#allocation7 + $0x8e8] sm:$0xff] }
0x197f   :  { %9047 = vmatpush1.bf16.msra.mxu1 %v17783_v49  ;;  %v15900_v49 = vcombine.low %v9116_v54, %v9120_v1  ;;  %v15942_v54 = vcombine.low %v9157_v16, %v9161_v48 }
0x1980   :  { %9048 = vmatprep.subr.bf16.mxu1 %v17788_v10  ;;  %v15902_v10 = vcombine.low %v9117_v25, %v9121_v26  ;;  %v9172_v25 = vld [vmem:[#allocation7 + $0xa40] sm:$0xff] }
0x1981   :  { %v9176_v26 = vld [vmem:[#allocation7 + $0xa60] sm:$0xff] }
0x1983   :  { %9049 = vmatpush1.bf16.msra.mxu1 %v17786_v33  ;;  %v15909_v33 = vcombine.high %v9124_v31, %v9128_v12 }
0x1984   :  { %9941 = vmatprep.subr.bf16.mxu1 %v15887_v23  ;;  %v9168_v23 = vld [vmem:[#allocation7 + $0xa20] sm:$0xff] }
0x19db   :  { %v8655_v34 = vpop.f32.mrb[62].mxu0 }
0x19dc   :  { %v16741_v35 = vpop.f32.mrb[63].mxu0 }
0x19dd   :  { %v9132_v35 = vld [vmem:[#allocation7 + $0x900] sm:$0xff] }
0x19e0   :  { %v8801_v38 = vpop.f32.mrb[64].mxu0 }
0x19e1   :  { %v16819_v20 = vpack.i.bf16 %v8655_v34, %v8801_v38  ;;  %v16751_v14 = vpop.f32.mrb[65].mxu0  ;;  %v15911_v34 = vcombine.high %v9125_v9, %v9129_v32  ;;  %v9136_v38 = vld [vmem:[#allocation7 + $0x920] sm:$0xff] }
0x19e2   :  { %v9137_v14 = vld [vmem:[#allocation7 + $0x928] sm:$0xff] }
0x19e3   :  { %16820 = vrot.lane.b32.xlu0 %v16819_v20, %s18672_s7  ;;  %v9133_v20 = vld [vmem:[#allocation7 + $0x908] sm:$0xff] }
0x1a15   :  { %v8582_v40 = vpop.f32.mrb[86].mxu1 }
0x1a16   :  { %v16736_v41 = vpop.f32.mrb[87].mxu1 }
0x1a17   :  { %v15910_v41 = vcombine.low %v9125_v9, %v9129_v32  ;;  %v9180_v9 = vld [vmem:[#allocation7 + $0xa80] sm:$0xff] }
0x1a18   :  { %v9184_v32 = vld [vmem:[#allocation7 + $0xaa0] sm:$0xff] }
0x1a19   :  { %v8728_v42 = vpop.f32.mrb[88].mxu1 }
0x1a1a   :  { %v16746_v43 = vpop.f32.mrb[89].mxu1 }
0x1a1b   :  { %v15919_v43 = vcombine.high %v9133_v20, %v9137_v14 }
0x1a55   :  { %v16821_v53 = vpop.permute.xlu0 %16820 }
0x1a56   :  { %v16823_v60 = vunpack.i.h.bf16 %v16821_v53  ;;  %v16822_v61 = vunpack.i.l.bf16 %v16821_v53  ;;  %v9140_v53 = vld [vmem:[#allocation7 + $0x940] sm:$0xff] }
0x1a58   :  { %v8813_v62 = vsel %vm892_vm1, %v8582_v40, %v16823_v60  ;;  %v8814_v2 = vsel %vm892_vm1, %v8728_v42, %v16822_v61  ;;  %v15908_v40 = vcombine.low %v9124_v31, %v9128_v12  ;;  %v15917_v42 = vcombine.high %v9132_v35, %v9136_v38  ;;  %v9144_v60 = vld [vmem:[#allocation7 + $0x960] sm:$0xff]  ;;  %v9141_v61 = vld [vmem:[#allocation7 + $0x948] sm:$0xff] }
0x1a59   :  { %v8815_v4 = vpack.c.bf16 %v8813_v62, %v8813_v62  ;;  %v8816_v6 = vpack.c.bf16 %v8814_v2, %v8814_v2  ;;  %v9145_v62 = vld [vmem:[#allocation7 + $0x968] sm:$0xff]  ;;  %v15916_v2 = vcombine.low %v9132_v35, %v9136_v38  ;;  %v15957_v31 = vcombine.high %v9172_v25, %v9176_v26 }
0x1a5a   :  { %v15965_v35 = vcombine.high %v9180_v9, %v9184_v32 }
0x1a5b   :  { %9050 = vmatprep.mubr.bf16.mxu1 %v8816_v6  ;;  %v15925_v6 = vcombine.high %v9140_v53, %v9144_v60 }
0x1a5c   :  { %9051 = vmatmul.mubr.bf16.vlgmr.msra.gmra.mrb[92].mxu1 %v8815_v4  ;;  %v15918_v4 = vcombine.low %v9133_v20, %v9137_v14  ;;  %v15964_v20 = vcombine.low %v9180_v9, %v9184_v32 }
0x1a5d   :  { %9942 = vmatpush1.bf16.msra.mxu1 %v15886_v39  ;;  %v9164_v39 = vld [vmem:[#allocation7 + $0xa00] sm:$0xff] }
0x1b2f   :  { %v9052_v56 = vpop.f32.mrb[92].mxu1 }
0x1b30   :  { %v9053_v5 = vadd.f32 %v9052_v56, %v8853_v7  ;;  %v9054_v11 = vpop.f32.mrb[93].mxu1  ;;  %v15927_v7 = vcombine.high %v9141_v61, %v9145_v62  ;;  %v9152_v56 = vld [vmem:[#allocation7 + $0x9a0] sm:$0xff] }
0x1b31   :  { %v9055_v47 = vadd.f32 %v9054_v11, %v8857_v8  ;;  %v9056_v15 = vpop.f32.mrb[94].mxu1  ;;  %v9148_v8 = vld [vmem:[#allocation7 + $0x980] sm:$0xff]  ;;  %v9153_v11 = vld [vmem:[#allocation7 + $0x9a8] sm:$0xff] }
0x1b32   :  { %v19247_v51 = vadd.f32 %v9053_v5, %v19151_v22  ;;  %v9057_v13 = vpop.f32.mrb[95].mxu1  ;;  %v15893_v22 = vcombine.high %v9108_v17, %v9112_v55  ;;  %v9149_v5 = vld [vmem:[#allocation7 + $0x988] sm:$0xff]  ;;  %v15926_v15 = vcombine.low %v9141_v61, %v9145_v62  ;;  %v15932_v37 = vcombine.low %v9148_v8, %v9152_v56  ;;  %v9188_v62 = vld [vmem:[#allocation7 + $0xac0] sm:$0xff] }
0x1b33   :  { %v19250_v46 = vadd.f32 %v9055_v47, %v19154_v24  ;;  %v15895_v24 = vcombine.high %v9109_v3, %v9113_v21  ;;  %v15924_v47 = vcombine.low %v9140_v53, %v9144_v60  ;;  %v15933_v13 = vcombine.high %v9148_v8, %v9152_v56  ;;  %v9169_v3 = vld [vmem:[#allocation7 + $0xa28] sm:$0xff] }
0x1b34   :  { %9902 = vmatprep.subr.bf16.mxu0 %v15893_v22  ;;  %v15934_v44 = vcombine.low %v9149_v5, %v9153_v11  ;;  %v15941_v17 = vcombine.high %v9156_v50, %v9160_v59  ;;  %v15943_v55 = vcombine.high %v9157_v16, %v9161_v48  ;;  %v9165_v22 = vld [vmem:[#allocation7 + $0xa08] sm:$0xff]  ;;  %v15940_v21 = vcombine.low %v9156_v50, %v9160_v59  ;;  %v9204_v59 = vld [vmem:[#allocation7 + $0xb40] sm:$0xff] }
0x1b35   :  { %v9061_v45 = vadd.f32 %v19250_v46, %v19247_v51  ;;  %9943 = vmatprep.subr.bf16.mxu1 %v15895_v24  ;;  %9903 = vmatpush1.bf16.msra.mxu0 %v15892_v27  ;;  %v15949_v24 = vcombine.high %v9164_v39, %v9168_v23  ;;  %v15951_v1 = vcombine.high %v9165_v22, %v9169_v3  ;;  %v9173_v27 = vld [vmem:[#allocation7 + $0xa48] sm:$0xff]  ;;  %v9208_v16 = vld [vmem:[#allocation7 + $0xb60] sm:$0xff] }
0x1b36   :  { %9944 = vmatpush1.bf16.msra.mxu1 %v15894_v28  ;;  %9904 = vmatprep.subr.bf16.mxu0 %v15901_v29  ;;  %v9177_v28 = vld [vmem:[#allocation7 + $0xa68] sm:$0xff]  ;;  %v15948_v29 = vcombine.low %v9164_v39, %v9168_v23  ;;  %v9212_v23 = vld [vmem:[#allocation7 + $0xb80] sm:$0xff] }
0x1b37   :  { %9062 = vadd.xlane.f32.xlu1 %v9061_v45  ;;  %9945 = vmatprep.subr.bf16.mxu1 %v15903_v30  ;;  %v15935_v45 = vcombine.high %v9149_v5, %v9153_v11  ;;  %v15950_v30 = vcombine.low %v9165_v22, %v9169_v3  ;;  %v15959_v12 = vcombine.high %v9173_v27, %v9177_v28  ;;  %v9196_v11 = vld [vmem:[#allocation7 + $0xb00] sm:$0xff]  ;;  %v9201_v50 = vld [vmem:[#allocation7 + $0xb28] sm:$0xff] }
0x1b38   :  { %v9216_v22 = vld [vmem:[#allocation7 + $0xba0] sm:$0xff]  ;;  %v9213_v3 = vld [vmem:[#allocation7 + $0xb88] sm:$0xff] }
0x1b39   :  { %9905 = vmatpush1.bf16.msra.mxu0 %v15900_v49  ;;  %v9181_v49 = vld [vmem:[#allocation7 + $0xa88] sm:$0xff] }
0x1b3a   :  { %9946 = vmatpush1.bf16.msra.mxu1 %v15902_v10  ;;  %9906 = vmatprep.subr.bf16.mxu0 %v15909_v33  ;;  %v9185_v10 = vld [vmem:[#allocation7 + $0xaa8] sm:$0xff]  ;;  %v15956_v33 = vcombine.low %v9172_v25, %v9176_v26  ;;  %v9220_v26 = vld [vmem:[#allocation7 + $0xbc0] sm:$0xff] }
0x1b3b   :  { %9947 = vmatprep.subr.bf16.mxu1 %v15911_v34  ;;  %v15958_v34 = vcombine.low %v9173_v27, %v9177_v28  ;;  %v15967_v38 = vcombine.high %v9181_v49, %v9185_v10  ;;  %v15966_v14 = vcombine.low %v9181_v49, %v9185_v10  ;;  %v9224_v27 = vld [vmem:[#allocation7 + $0xbe0] sm:$0xff]  ;;  %v9221_v28 = vld [vmem:[#allocation7 + $0xbc8] sm:$0xff]  ;;  %v9102_v10 = vld [vmem:[#allocation7 + $0x810] sm:$0xff] }
0x1b3c   :  { %v16004_v32 = vcombine.low %v9220_v26, %v9224_v27 }
0x1b3d   :  { %9907 = vmatpush1.bf16.msra.mxu0 %v15908_v40 }
0x1b3e   :  { %9948 = vmatpush1.bf16.msra.mxu1 %v15910_v41  ;;  %9908 = vmatprep.subr.bf16.mxu0 %v15917_v42 }
0x1b3f   :  { %9949 = vmatprep.subr.bf16.mxu1 %v15919_v43 }
0x1b41   :  { %9909 = vmatpush1.bf16.msra.mxu0 %v15916_v2  ;;  %v9192_v2 = vld [vmem:[#allocation7 + $0xae0] sm:$0xff] }
0x1b42   :  { %9950 = vmatpush1.bf16.msra.mxu1 %v15918_v4  ;;  %9910 = vmatprep.subr.bf16.mxu0 %v15925_v6  ;;  %v9189_v4 = vld [vmem:[#allocation7 + $0xac8] sm:$0xff]  ;;  %v15973_v6 = vcombine.high %v9188_v62, %v9192_v2  ;;  %v15972_v8 = vcombine.low %v9188_v62, %v9192_v2  ;;  %v19268_v2 = vld [vmem:[#allocation2 + $0x40] sm:$0xff] }
0x1b43   :  { %9951 = vmatprep.subr.bf16.mxu1 %v15927_v7  ;;  %v9193_v7 = vld [vmem:[#allocation7 + $0xae8] sm:$0xff] }
0x1b44   :  { %v15974_v56 = vcombine.low %v9189_v4, %v9193_v7  ;;  %v15975_v5 = vcombine.high %v9189_v4, %v9193_v7  ;;  %v9080_v4 = vrot.slane %v19268_v2, %v18948_v57 }
0x1b45   :  { %9911 = vmatpush1.bf16.msra.mxu0 %v15924_v47  ;;  %v9200_v47 = vld [vmem:[#allocation7 + $0xb20] sm:$0xff] }
0x1b46   :  { %9952 = vmatpush1.bf16.msra.mxu1 %v15926_v15  ;;  %9912 = vmatprep.subr.bf16.mxu0 %v15933_v13  ;;  %v9197_v15 = vld [vmem:[#allocation7 + $0xb08] sm:$0xff]  ;;  %v15980_v13 = vcombine.low %v9196_v11, %v9200_v47 }
0x1b47   :  { %9953 = vmatprep.subr.bf16.mxu1 %v15935_v45  ;;  %v15981_v45 = vcombine.high %v9196_v11, %v9200_v47  ;;  %v15982_v48 = vcombine.low %v9197_v15, %v9201_v50 }
0x1b49   :  { %9913 = vmatpush1.bf16.msra.mxu0 %v15932_v37  ;;  %v15983_v37 = vcombine.high %v9197_v15, %v9201_v50  ;;  %v9114_v50 = vld [vmem:[#allocation7 + $0x870] sm:$0xff] }
0x1b4a   :  { %9954 = vmatpush1.bf16.msra.mxu1 %v15934_v44  ;;  %9914 = vmatprep.subr.bf16.mxu0 %v15941_v17  ;;  %v15989_v44 = vcombine.high %v9204_v59, %v9208_v16  ;;  %v9205_v17 = vld [vmem:[#allocation7 + $0xb48] sm:$0xff] }
0x1b4b   :  { %9955 = vmatprep.subr.bf16.mxu1 %v15943_v55  ;;  %v9209_v55 = vld [vmem:[#allocation7 + $0xb68] sm:$0xff] }
0x1b4c   :  { %v15991_v39 = vcombine.high %v9205_v17, %v9209_v55 }
0x1b4d   :  { %9915 = vmatpush1.bf16.msra.mxu0 %v15940_v21  ;;  %v9217_v21 = vld [vmem:[#allocation7 + $0xba8] sm:$0xff] }
0x1b4e   :  { %9956 = vmatpush1.bf16.msra.mxu1 %v15942_v54  ;;  %9916 = vmatprep.subr.bf16.mxu0 %v15949_v24  ;;  %v15988_v54 = vcombine.low %v9204_v59, %v9208_v16  ;;  %v15990_v24 = vcombine.low %v9205_v17, %v9209_v55  ;;  %v15999_v25 = vcombine.high %v9213_v3, %v9217_v21  ;;  %v9111_v59 = vld [vmem:[#allocation7 + $0x858] sm:$0xff] }
0x1b4f   :  { %9957 = vmatprep.subr.bf16.mxu1 %v15951_v1  ;;  %v15997_v1 = vcombine.high %v9212_v23, %v9216_v22  ;;  %v9115_v16 = vld [vmem:[#allocation7 + $0x878] sm:$0xff] }
0x1b50   :  { %v15899_v17 = vcombine.high %v9111_v59, %v9115_v16  ;;  %v9119_v55 = vld [vmem:[#allocation7 + $0x898] sm:$0xff] }
0x1b51   :  { %9917 = vmatpush1.bf16.msra.mxu0 %v15948_v29  ;;  %v9225_v29 = vld [vmem:[#allocation7 + $0xbe8] sm:$0xff] }
0x1b52   :  { %9958 = vmatpush1.bf16.msra.mxu1 %v15950_v30  ;;  %9918 = vmatprep.subr.bf16.mxu0 %v15957_v31  ;;  %v15996_v30 = vcombine.low %v9212_v23, %v9216_v22  ;;  %v15998_v31 = vcombine.low %v9213_v3, %v9217_v21  ;;  %v16007_v9 = vcombine.high %v9221_v28, %v9225_v29 }
0x1b53   :  { %9959 = vmatprep.subr.bf16.mxu1 %v15959_v12  ;;  %v16005_v12 = vcombine.high %v9220_v26, %v9224_v27  ;;  %v16006_v49 = vcombine.low %v9221_v28, %v9225_v29  ;;  %v15898_v22 = vcombine.low %v9111_v59, %v9115_v16 }
0x1b55   :  { %9919 = vmatpush1.bf16.msra.mxu0 %v15956_v33  ;;  %v9106_v33 = vld [vmem:[#allocation7 + $0x830] sm:$0xff] }
0x1b56   :  { %9960 = vmatpush1.bf16.msra.mxu1 %v15958_v34  ;;  %9920 = vmatprep.subr.bf16.mxu0 %v15965_v35  ;;  %v9103_v34 = vld [vmem:[#allocation7 + $0x818] sm:$0xff]  ;;  %v15889_v35 = vcombine.high %v9102_v10, %v9106_v33 }
0x1b57   :  { %9961 = vmatprep.subr.bf16.mxu1 %v15967_v38  ;;  %v9107_v38 = vld [vmem:[#allocation7 + $0x838] sm:$0xff] }
0x1b59   :  { %9921 = vmatpush1.bf16.msra.mxu0 %v15964_v20  ;;  %v15888_v20 = vcombine.low %v9102_v10, %v9106_v33 }
0x1b5a   :  { %9962 = vmatpush1.bf16.msra.mxu1 %v15966_v14  ;;  %9922 = vmatprep.subr.bf16.mxu0 %v15973_v6  ;;  %v15890_v14 = vcombine.low %v9103_v34, %v9107_v38 }
0x1b5b   :  { %9963 = vmatprep.subr.bf16.mxu1 %v15975_v5  ;;  %v9090_v5 = vrot.slane %v19268_v2, %v18951_v58 }
0x1b5d   :  { %9923 = vmatpush1.bf16.msra.mxu0 %v15972_v8 }
0x1b5e   :  { %9964 = vmatpush1.bf16.msra.mxu1 %v15974_v56  ;;  %9924 = vmatprep.subr.bf16.mxu0 %v15981_v45  ;;  %v9110_v45 = vld [vmem:[#allocation7 + $0x850] sm:$0xff] }
0x1b5f   :  { %9965 = vmatprep.subr.bf16.mxu1 %v15983_v37  ;;  %v15896_v23 = vcombine.low %v9110_v45, %v9114_v50 }
0x1b61   :  { %9925 = vmatpush1.bf16.msra.mxu0 %v15980_v13 }
0x1b62   :  { %9966 = vmatpush1.bf16.msra.mxu1 %v15982_v48  ;;  %9926 = vmatprep.subr.bf16.mxu0 %v15989_v44  ;;  %v15897_v44 = vcombine.high %v9110_v45, %v9114_v50 }
0x1b63   :  { %9967 = vmatprep.subr.bf16.mxu1 %v15991_v39  ;;  %v9123_v39 = vld [vmem:[#allocation7 + $0x8b8] sm:$0xff] }
0x1b64   :  { %v15907_v21 = vcombine.high %v9119_v55, %v9123_v39  ;;  %v15906_v27 = vcombine.low %v9119_v55, %v9123_v39 }
0x1b65   :  { %9927 = vmatpush1.bf16.msra.mxu0 %v15988_v54  ;;  %v9126_v54 = vld [vmem:[#allocation7 + $0x8d0] sm:$0xff] }
0x1b66   :  { %9968 = vmatpush1.bf16.msra.mxu1 %v15990_v24  ;;  %9928 = vmatprep.subr.bf16.mxu0 %v15997_v1  ;;  %v9130_v24 = vld [vmem:[#allocation7 + $0x8f0] sm:$0xff]  ;;  %v9127_v1 = vld [vmem:[#allocation7 + $0x8d8] sm:$0xff] }
0x1b67   :  { %9969 = vmatprep.subr.bf16.mxu1 %v15999_v25  ;;  %v9131_v25 = vld [vmem:[#allocation7 + $0x8f8] sm:$0xff]  ;;  %v15913_v28 = vcombine.high %v9126_v54, %v9130_v24 }
0x1b68   :  { %v15915_v29 = vcombine.high %v9127_v1, %v9131_v25 }
0x1b69   :  { %9929 = vmatpush1.bf16.msra.mxu0 %v15996_v30  ;;  %v9134_v30 = vld [vmem:[#allocation7 + $0x910] sm:$0xff] }
0x1b6a   :  { %9970 = vmatpush1.bf16.msra.mxu1 %v15998_v31  ;;  %9930 = vmatprep.subr.bf16.mxu0 %v16005_v12  ;;  %v9138_v31 = vld [vmem:[#allocation7 + $0x930] sm:$0xff]  ;;  %v9135_v12 = vld [vmem:[#allocation7 + $0x918] sm:$0xff] }
0x1b6b   :  { %9971 = vmatprep.subr.bf16.mxu1 %v16007_v9  ;;  %v9139_v9 = vld [vmem:[#allocation7 + $0x938] sm:$0xff]  ;;  %v15921_v10 = vcombine.high %v9134_v30, %v9138_v31 }
0x1b6c   :  { %v15923_v33 = vcombine.high %v9135_v12, %v9139_v9 }
0x1b6d   :  { %9931 = vmatpush1.bf16.msra.mxu0 %v16004_v32  ;;  %v15912_v32 = vcombine.low %v9126_v54, %v9130_v24  ;;  %v9179_v54 = vld [vmem:[#allocation7 + $0xa78] sm:$0xff] }
0x1b6e   :  { %9972 = vmatpush1.bf16.msra.mxu1 %v16006_v49  ;;  %9982 = vmatprep.subr.bf16.mxu0 %v15889_v35  ;;  %v15914_v49 = vcombine.low %v9127_v1, %v9131_v25  ;;  %v9146_v35 = vld [vmem:[#allocation7 + $0x970] sm:$0xff] }
0x1bc4   :  { %v9063_v40 = vpop.xlane.xlu1 %9062 }
0x1bc5   :  { %v9064_v41 = vmul.f32 0.00390625, %v9063_v40  ;;  %v15891_v40 = vcombine.high %v9103_v34, %v9107_v38  ;;  %v9142_v34 = vld [vmem:[#allocation7 + $0x950] sm:$0xff]  ;;  %v9143_v38 = vld [vmem:[#allocation7 + $0x958] sm:$0xff] }
0x1bc7   :  { %v19255_v42 = vsub.f32 %v19247_v51, %v9064_v41  ;;  %v19258_v43 = vsub.f32 %v19250_v46, %v9064_v41  ;;  %10023 = vmatprep.subr.bf16.mxu1 %v15891_v40  ;;  %v15922_v40 = vcombine.low %v9135_v12, %v9139_v9 }
0x1bc9   :  { %v9067_v53 = vmul.f32 %v19255_v42, %v19255_v42  ;;  %v9068_v60 = vmul.f32 %v19258_v43, %v19258_v43 }
0x1bcb   :  { %v9069_v61 = vadd.f32 %v9068_v60, %v9067_v53 }
0x1bcd   :  { %9070 = vadd.xlane.f32.xlu1 %v9069_v61  ;;  %v19264_v61 = vld [vmem:[#allocation2 + $0x48] sm:$0xff] }
0x1bce   :  { %v9084_v62 = vrot.slane %v19264_v61, %v18948_v57  ;;  %v9094_v8 = vrot.slane %v19264_v61, %v18951_v58 }
0x1c5a   :  { %v9071_v41 = vpop.xlane.xlu1 %9070 }
0x1c5b   :  { %v9072_v53 = vmul.f32 0.00390625, %v9071_v41  ;;  %v15929_v41 = vcombine.high %v9142_v34, %v9146_v35 }
0x1c5d   :  { %v9073_v60 = vadd.f32 1e-05, %v9072_v53 }
0x1c5f   :  { %18471 = vrsqrt.f32 %v9073_v60  ;;  %v9150_v60 = vld [vmem:[#allocation7 + $0x990] sm:$0xff] }
0x1c69   :  { %v18472_v6 = vpop.eup %18471 }
0x1c6a   :  { %v9076_v7 = vmul.f32 %v18472_v6, %v19258_v43  ;;  %v9075_v56 = vmul.f32 %v18472_v6, %v19255_v42  ;;  %v9118_v43 = vld [vmem:[#allocation7 + $0x890] sm:$0xff]  ;;  %v9155_v6 = vld [vmem:[#allocation7 + $0x9b8] sm:$0xff] }
0x1c6b   :  { %v9122_v42 = vld [vmem:[#allocation7 + $0x8b0] sm:$0xff] }
0x1c6c   :  { %v9086_v11 = vmul.f32 %v9084_v62, %v9076_v7  ;;  %v9085_v47 = vmul.f32 %v9080_v4, %v9075_v56  ;;  %v15905_v3 = vcombine.high %v9118_v43, %v9122_v42  ;;  %v15904_v26 = vcombine.low %v9118_v43, %v9122_v42  ;;  %v9154_v62 = vld [vmem:[#allocation7 + $0x9b0] sm:$0xff]  ;;  %v9151_v4 = vld [vmem:[#allocation7 + $0x998] sm:$0xff] }
0x1c6d   :  { %v15928_v7 = vcombine.low %v9142_v34, %v9146_v35  ;;  %v15937_v56 = vcombine.high %v9150_v60, %v9154_v62  ;;  %v15936_v45 = vcombine.low %v9150_v60, %v9154_v62  ;;  %v15938_v50 = vcombine.low %v9151_v4, %v9155_v6  ;;  %v9170_v43 = vld [vmem:[#allocation7 + $0xa30] sm:$0xff]  ;;  %v9195_v34 = vld [vmem:[#allocation7 + $0xaf8] sm:$0xff] }
0x1c6e   :  { %v9096_v15 = vadd.f32 %v9094_v8, %v9086_v11  ;;  %v9095_v13 = vadd.f32 %v9090_v5, %v9085_v47  ;;  %v15939_v5 = vcombine.high %v9151_v4, %v9155_v6  ;;  %v9158_v11 = vld [vmem:[#allocation7 + $0x9d0] sm:$0xff]  ;;  %v9203_v60 = vld [vmem:[#allocation7 + $0xb38] sm:$0xff] }
0x1c6f   :  { %v9162_v47 = vld [vmem:[#allocation7 + $0x9f0] sm:$0xff] }
0x1c70   :  { %v9098_v48 = vpack.c.bf16 %v9096_v15, %v9096_v15  ;;  %v19278_v37 = vpack.c.bf16 %v9095_v13, %v9095_v13  ;;  %v9159_v15 = vld [vmem:[#allocation7 + $0x9d8] sm:$0xff]  ;;  %v15945_v59 = vcombine.high %v9158_v11, %v9162_v47  ;;  %v15944_v42 = vcombine.low %v9158_v11, %v9162_v47 }
0x1c71   :  { %v9163_v13 = vld [vmem:[#allocation7 + $0x9f8] sm:$0xff] }
0x1c72   :  { %9932 = vmatprep.mubr.bf16.mxu0 %v9098_v48  ;;  %9973 = vmatprep.mubr.bf16.mxu1 %v9098_v48  ;;  %v15947_v16 = vcombine.high %v9159_v15, %v9163_v13  ;;  %v15946_v55 = vcombine.low %v9159_v15, %v9163_v13  ;;  %v9211_v11 = vld [vmem:[#allocation7 + $0xb78] sm:$0xff] }
0x1c73   :  { %9933 = vmatmul.mubr.bf16.vlgmr.msra.gmra.mrb[68].mxu0 %v19278_v37  ;;  %9974 = vmatmul.mubr.bf16.vlgmr.msra.gmra.mrb[96].mxu1 %v19278_v37 }
0x1c74   :  { %9983 = vmatpush1.bf16.msra.mxu0 %v15888_v20  ;;  %10024 = vmatpush1.bf16.msra.mxu1 %v15890_v14  ;;  %v9147_v20 = vld [vmem:[#allocation7 + $0x978] sm:$0xff]  ;;  %v15920_v14 = vcombine.low %v9134_v30, %v9138_v31 }
0x1c75   :  { %10014 = vmatprep.mubr.bf16.mxu0 %v9098_v48  ;;  %10055 = vmatprep.mubr.bf16.mxu1 %v9098_v48  ;;  %v15931_v53 = vcombine.high %v9143_v38, %v9147_v20  ;;  %v15930_v8 = vcombine.low %v9143_v38, %v9147_v20  ;;  %v9166_v48 = vld [vmem:[#allocation7 + $0xa10] sm:$0xff]  ;;  %v9187_v30 = vld [vmem:[#allocation7 + $0xab8] sm:$0xff] }
0x1c76   :  { %9984 = vmatprep.subr.bf16.mxu0 %v15897_v44  ;;  %10025 = vmatprep.subr.bf16.mxu1 %v15899_v17  ;;  %v9167_v44 = vld [vmem:[#allocation7 + $0xa18] sm:$0xff]  ;;  %v15953_v39 = vcombine.high %v9166_v48, %v9170_v43  ;;  %v15952_v24 = vcombine.low %v9166_v48, %v9170_v43 }
0x1c77   :  { %v9171_v17 = vld [vmem:[#allocation7 + $0xa38] sm:$0xff] }
0x1c78   :  { %9985 = vmatpush1.bf16.msra.mxu0 %v15896_v23  ;;  %10026 = vmatpush1.bf16.msra.mxu1 %v15898_v22  ;;  %v15955_v23 = vcombine.high %v9167_v44, %v9171_v17  ;;  %v9174_v22 = vld [vmem:[#allocation7 + $0xa50] sm:$0xff]  ;;  %v15954_v1 = vcombine.low %v9167_v44, %v9171_v17  ;;  %v9219_v48 = vld [vmem:[#allocation7 + $0xbb8] sm:$0xff] }
0x1c79   :  { %9986 = vmatprep.subr.bf16.mxu0 %v15905_v3  ;;  %10027 = vmatprep.subr.bf16.mxu1 %v15907_v21  ;;  %v9178_v3 = vld [vmem:[#allocation7 + $0xa70] sm:$0xff]  ;;  %v9175_v21 = vld [vmem:[#allocation7 + $0xa58] sm:$0xff] }
0x1c7a   :  { %v15961_v25 = vcombine.high %v9174_v22, %v9178_v3  ;;  %v15960_v31 = vcombine.low %v9174_v22, %v9178_v3  ;;  %v15962_v12 = vcombine.low %v9175_v21, %v9179_v54  ;;  %v9227_v22 = vld [vmem:[#allocation7 + $0xbf8] sm:$0xff] }
0x1c7c   :  { %9987 = vmatpush1.bf16.msra.mxu0 %v15904_v26  ;;  %10028 = vmatpush1.bf16.msra.mxu1 %v15906_v27  ;;  %v15963_v26 = vcombine.high %v9175_v21, %v9179_v54  ;;  %v9182_v27 = vld [vmem:[#allocation7 + $0xa90] sm:$0xff] }
0x1c7d   :  { %9988 = vmatprep.subr.bf16.mxu0 %v15913_v28  ;;  %10029 = vmatprep.subr.bf16.mxu1 %v15915_v29  ;;  %v9186_v28 = vld [vmem:[#allocation7 + $0xab0] sm:$0xff]  ;;  %v9183_v29 = vld [vmem:[#allocation7 + $0xa98] sm:$0xff] }
0x1c7e   :  { %v15969_v9 = vcombine.high %v9182_v27, %v9186_v28  ;;  %v15968_v35 = vcombine.low %v9182_v27, %v9186_v28  ;;  %v15970_v38 = vcombine.low %v9183_v29, %v9187_v30  ;;  %v17794_v27 = vld [vmem:[#allocation9 + $0x904] ss:$8 sps:$4 sm:$0xff]   ;;  %v17789_v28 = vld [vmem:[#allocation9 + $0x800] ss:$8 sps:$4 sm:$0xff]  }
0x1c80   :  { %9989 = vmatpush1.bf16.msra.mxu0 %v15912_v32  ;;  %10030 = vmatpush1.bf16.msra.mxu1 %v15914_v49  ;;  %v15971_v32 = vcombine.high %v9183_v29, %v9187_v30  ;;  %v9190_v49 = vld [vmem:[#allocation7 + $0xad0] sm:$0xff]  ;;  %v17792_v29 = vld [vmem:[#allocation9 + $0x900] ss:$8 sps:$4 sm:$0xff]  }
0x1c81   :  { %9990 = vmatprep.subr.bf16.mxu0 %v15921_v10  ;;  %10031 = vmatprep.subr.bf16.mxu1 %v15923_v33  ;;  %v9194_v10 = vld [vmem:[#allocation7 + $0xaf0] sm:$0xff]  ;;  %v9191_v33 = vld [vmem:[#allocation7 + $0xad8] sm:$0xff] }
0x1c82   :  { %v15977_v20 = vcombine.high %v9190_v49, %v9194_v10  ;;  %v15976_v62 = vcombine.low %v9190_v49, %v9194_v10  ;;  %v15978_v4 = vcombine.low %v9191_v33, %v9195_v34  ;;  %v17797_v30 = vld [vmem:[#allocation9 + $0x814] ss:$8 sps:$4 sm:$0xff]   ;;  %v17806_v49 = vld [vmem:[#allocation9 + $0x924] ss:$8 sps:$4 sm:$0xff]   ;;  %v17801_v10 = vld [vmem:[#allocation9 + $0x820] ss:$8 sps:$4 sm:$0xff]  }
0x1c84   :  { %9991 = vmatpush1.bf16.msra.mxu0 %v15920_v14  ;;  %10032 = vmatpush1.bf16.msra.mxu1 %v15922_v40  ;;  %v15979_v14 = vcombine.high %v9191_v33, %v9195_v34  ;;  %v9198_v40 = vld [vmem:[#allocation7 + $0xb10] sm:$0xff]  ;;  %v17804_v33 = vld [vmem:[#allocation9 + $0x920] ss:$8 sps:$4 sm:$0xff]  }
0x1c85   :  { %9992 = vmatprep.subr.bf16.mxu0 %v15929_v41  ;;  %10033 = vmatprep.subr.bf16.mxu1 %v15931_v53  ;;  %v9202_v41 = vld [vmem:[#allocation7 + $0xb30] sm:$0xff]  ;;  %v9199_v53 = vld [vmem:[#allocation7 + $0xb18] sm:$0xff] }
0x1c86   :  { %v15985_v6 = vcombine.high %v9198_v40, %v9202_v41  ;;  %v15984_v47 = vcombine.low %v9198_v40, %v9202_v41  ;;  %v15986_v15 = vcombine.low %v9199_v53, %v9203_v60  ;;  %v17809_v34 = vld [vmem:[#allocation9 + $0x834] ss:$8 sps:$4 sm:$0xff]   ;;  %v17813_v40 = vld [vmem:[#allocation9 + $0x840] ss:$8 sps:$4 sm:$0xff]  }
0x1c87   :  { %v17816_v41 = vld [vmem:[#allocation9 + $0x940] ss:$8 sps:$4 sm:$0xff]  }
0x1c88   :  { %9993 = vmatpush1.bf16.msra.mxu0 %v15928_v7  ;;  %10034 = vmatpush1.bf16.msra.mxu1 %v15930_v8  ;;  %v15987_v7 = vcombine.high %v9199_v53, %v9203_v60  ;;  %v9206_v8 = vld [vmem:[#allocation7 + $0xb50] sm:$0xff] }
0x1c89   :  { %9994 = vmatprep.subr.bf16.mxu0 %v15937_v56  ;;  %10035 = vmatprep.subr.bf16.mxu1 %v15939_v5  ;;  %v9210_v56 = vld [vmem:[#allocation7 + $0xb70] sm:$0xff]  ;;  %v9207_v5 = vld [vmem:[#allocation7 + $0xb58] sm:$0xff] }
0x1c8a   :  { %v15993_v13 = vcombine.high %v9206_v8, %v9210_v56  ;;  %v15992_v43 = vcombine.low %v9206_v8, %v9210_v56  ;;  %v15994_v44 = vcombine.low %v9207_v5, %v9211_v11  ;;  %v17821_v53 = vld [vmem:[#allocation9 + $0x854] ss:$8 sps:$4 sm:$0xff]   ;;  %v17825_v8 = vld [vmem:[#allocation9 + $0x860] ss:$8 sps:$4 sm:$0xff]  }
0x1c8b   :  { %v17824_v60 = vld [vmem:[#allocation9 + $0x954] ss:$8 sps:$4 sm:$0xff]   ;;  %v17828_v56 = vld [vmem:[#allocation9 + $0x960] ss:$8 sps:$4 sm:$0xff]  }
0x1c8c   :  { %9995 = vmatpush1.bf16.msra.mxu0 %v15936_v45  ;;  %10036 = vmatpush1.bf16.msra.mxu1 %v15938_v50  ;;  %v15995_v45 = vcombine.high %v9207_v5, %v9211_v11  ;;  %v9214_v50 = vld [vmem:[#allocation7 + $0xb90] sm:$0xff] }
0x1c8d   :  { %9996 = vmatprep.subr.bf16.mxu0 %v15945_v59  ;;  %10037 = vmatprep.subr.bf16.mxu1 %v15947_v16  ;;  %v9218_v59 = vld [vmem:[#allocation7 + $0xbb0] sm:$0xff]  ;;  %v9215_v16 = vld [vmem:[#allocation7 + $0xb98] sm:$0xff] }
0x1c8e   :  { %v16001_v17 = vcombine.high %v9214_v50, %v9218_v59  ;;  %v16000_v3 = vcombine.low %v9214_v50, %v9218_v59  ;;  %v16002_v21 = vcombine.low %v9215_v16, %v9219_v48  ;;  %v17833_v5 = vld [vmem:[#allocation9 + $0x874] ss:$8 sps:$4 sm:$0xff]   ;;  %v17837_v50 = vld [vmem:[#allocation9 + $0x880] ss:$8 sps:$4 sm:$0xff]  }
0x1c8f   :  { %v17836_v11 = vld [vmem:[#allocation9 + $0x974] ss:$8 sps:$4 sm:$0xff]   ;;  %v17840_v59 = vld [vmem:[#allocation9 + $0x980] ss:$8 sps:$4 sm:$0xff]  }
0x1c90   :  { %9997 = vmatpush1.bf16.msra.mxu0 %v15944_v42  ;;  %10038 = vmatpush1.bf16.msra.mxu1 %v15946_v55  ;;  %v16003_v42 = vcombine.high %v9215_v16, %v9219_v48  ;;  %v9222_v55 = vld [vmem:[#allocation7 + $0xbd0] sm:$0xff] }
0x1c91   :  { %9998 = vmatprep.subr.bf16.mxu0 %v15953_v39  ;;  %10039 = vmatprep.subr.bf16.mxu1 %v15955_v23  ;;  %v9226_v39 = vld [vmem:[#allocation7 + $0xbf0] sm:$0xff]  ;;  %v9223_v23 = vld [vmem:[#allocation7 + $0xbd8] sm:$0xff] }
0x1c92   :  { %v16009_v54 = vcombine.high %v9222_v55, %v9226_v39  ;;  %v17845_v16 = vld [vmem:[#allocation9 + $0x894] ss:$8 sps:$4 sm:$0xff]  }
0x1c93   :  { %v17848_v48 = vld [vmem:[#allocation9 + $0x994] ss:$8 sps:$4 sm:$0xff]  }
0x1c94   :  { %9999 = vmatpush1.bf16.msra.mxu0 %v15952_v24  ;;  %10040 = vmatpush1.bf16.msra.mxu1 %v15954_v1  ;;  %v16011_v24 = vcombine.high %v9223_v23, %v9227_v22  ;;  %v16008_v1 = vcombine.low %v9222_v55, %v9226_v39  ;;  %v17849_v55 = vld [vmem:[#allocation9 + $0x8a0] ss:$8 sps:$4 sm:$0xff]  }
0x1c95   :  { %10000 = vmatprep.subr.bf16.mxu0 %v15961_v25  ;;  %10041 = vmatprep.subr.bf16.mxu1 %v15963_v26  ;;  %v16010_v25 = vcombine.low %v9223_v23, %v9227_v22  ;;  %v17791_v26 = vld [vmem:[#allocation9 + $0x804] ss:$8 sps:$4 sm:$0xff]   ;;  %v17852_v39 = vld [vmem:[#allocation9 + $0x9a0] ss:$8 sps:$4 sm:$0xff]   ;;  %v17857_v23 = vld [vmem:[#allocation9 + $0x8b4] ss:$8 sps:$4 sm:$0xff]  }
0x1c96   :  { %v17860_v22 = vld [vmem:[#allocation9 + $0x9b4] ss:$8 sps:$4 sm:$0xff]  }
0x1c98   :  { %10001 = vmatpush1.bf16.msra.mxu0 %v15960_v31  ;;  %10042 = vmatpush1.bf16.msra.mxu1 %v15962_v12  ;;  %v17800_v31 = vld [vmem:[#allocation9 + $0x914] ss:$8 sps:$4 sm:$0xff]   ;;  %v17795_v12 = vld [vmem:[#allocation9 + $0x810] ss:$8 sps:$4 sm:$0xff]  }
0x1c99   :  { %10002 = vmatprep.subr.bf16.mxu0 %v15969_v9  ;;  %10043 = vmatprep.subr.bf16.mxu1 %v15971_v32  ;;  %v17798_v9 = vld [vmem:[#allocation9 + $0x910] ss:$8 sps:$4 sm:$0xff]   ;;  %v17803_v32 = vld [vmem:[#allocation9 + $0x824] ss:$8 sps:$4 sm:$0xff]  }
0x1c9c   :  { %10003 = vmatpush1.bf16.msra.mxu0 %v15968_v35  ;;  %10044 = vmatpush1.bf16.msra.mxu1 %v15970_v38  ;;  %v17812_v35 = vld [vmem:[#allocation9 + $0x934] ss:$8 sps:$4 sm:$0xff]   ;;  %v17807_v38 = vld [vmem:[#allocation9 + $0x830] ss:$8 sps:$4 sm:$0xff]  }
0x1c9d   :  { %10004 = vmatprep.subr.bf16.mxu0 %v15977_v20  ;;  %10045 = vmatprep.subr.bf16.mxu1 %v15979_v14  ;;  %v17815_v20 = vld [vmem:[#allocation9 + $0x844] ss:$8 sps:$4 sm:$0xff]  }
0x1c9e   :  { %v17818_v14 = vld [vmem:[#allocation9 + $0x944] ss:$8 sps:$4 sm:$0xff]  }
0x1ca0   :  { %10005 = vmatpush1.bf16.msra.mxu0 %v15976_v62  ;;  %10046 = vmatpush1.bf16.msra.mxu1 %v15978_v4  ;;  %v17819_v62 = vld [vmem:[#allocation9 + $0x850] ss:$8 sps:$4 sm:$0xff]  }
0x1ca1   :  { %10006 = vmatprep.subr.bf16.mxu0 %v15985_v6  ;;  %10047 = vmatprep.subr.bf16.mxu1 %v15987_v7  ;;  %v17822_v4 = vld [vmem:[#allocation9 + $0x950] ss:$8 sps:$4 sm:$0xff]   ;;  %v17827_v6 = vld [vmem:[#allocation9 + $0x864] ss:$8 sps:$4 sm:$0xff]  }
0x1ca2   :  { %v17830_v7 = vld [vmem:[#allocation9 + $0x964] ss:$8 sps:$4 sm:$0xff]  }
0x1ca4   :  { %10007 = vmatpush1.bf16.msra.mxu0 %v15984_v47  ;;  %10048 = vmatpush1.bf16.msra.mxu1 %v15986_v15  ;;  %v17831_v47 = vld [vmem:[#allocation9 + $0x870] ss:$8 sps:$4 sm:$0xff]  }
0x1ca5   :  { %10008 = vmatprep.subr.bf16.mxu0 %v15993_v13  ;;  %10049 = vmatprep.subr.bf16.mxu1 %v15995_v45  ;;  %v17834_v15 = vld [vmem:[#allocation9 + $0x970] ss:$8 sps:$4 sm:$0xff]   ;;  %v17839_v13 = vld [vmem:[#allocation9 + $0x884] ss:$8 sps:$4 sm:$0xff]  }
0x1ca6   :  { %v17842_v45 = vld [vmem:[#allocation9 + $0x984] ss:$8 sps:$4 sm:$0xff]  }
0x1ca8   :  { %10009 = vmatpush1.bf16.msra.mxu0 %v15992_v43  ;;  %10050 = vmatpush1.bf16.msra.mxu1 %v15994_v44  ;;  %v17843_v43 = vld [vmem:[#allocation9 + $0x890] ss:$8 sps:$4 sm:$0xff]  }
0x1ca9   :  { %10010 = vmatprep.subr.bf16.mxu0 %v16001_v17  ;;  %10051 = vmatprep.subr.bf16.mxu1 %v16003_v42  ;;  %v17846_v44 = vld [vmem:[#allocation9 + $0x990] ss:$8 sps:$4 sm:$0xff]   ;;  %v17851_v17 = vld [vmem:[#allocation9 + $0x8a4] ss:$8 sps:$4 sm:$0xff]  }
0x1caa   :  { %v17854_v42 = vld [vmem:[#allocation9 + $0x9a4] ss:$8 sps:$4 sm:$0xff]  }
0x1cac   :  { %10011 = vmatpush1.bf16.msra.mxu0 %v16000_v3  ;;  %10052 = vmatpush1.bf16.msra.mxu1 %v16002_v21  ;;  %v17855_v3 = vld [vmem:[#allocation9 + $0x8b0] ss:$8 sps:$4 sm:$0xff]  }
0x1cad   :  { %10012 = vmatprep.subr.bf16.mxu0 %v16009_v54  ;;  %10053 = vmatprep.subr.bf16.mxu1 %v16011_v24  ;;  %v17858_v21 = vld [vmem:[#allocation9 + $0x9b0] ss:$8 sps:$4 sm:$0xff]   ;;  %v17863_v54 = vld [vmem:[#allocation9 + $0x8c4] ss:$8 sps:$4 sm:$0xff]  }
0x1cae   :  { %v17866_v24 = vld [vmem:[#allocation9 + $0x9c4] ss:$8 sps:$4 sm:$0xff]  }
0x1cb0   :  { %10013 = vmatpush1.bf16.msra.mxu0 %v16008_v1  ;;  %10054 = vmatpush1.bf16.msra.mxu1 %v16010_v25  ;;  %v17861_v1 = vld [vmem:[#allocation9 + $0x8c0] ss:$8 sps:$4 sm:$0xff]  }
0x1cb1   :  { %10857 = vmatprep.subr.bf16.mxu0 %v17791_v26  ;;  %10898 = vmatprep.subr.bf16.mxu1 %v17794_v27  ;;  %v17864_v25 = vld [vmem:[#allocation9 + $0x9c0] ss:$8 sps:$4 sm:$0xff]   ;;  %v17869_v26 = vld [vmem:[#allocation9 + $0x8d4] ss:$8 sps:$4 sm:$0xff]  }
0x1cb2   :  { %v17872_v27 = vld [vmem:[#allocation9 + $0x9d4] ss:$8 sps:$4 sm:$0xff]  }
0x1cb3   :  { %10015 = vmatmul.mubr.bf16.vlgmr.msra.gmra.mrb[72].mxu0 %v19278_v37  ;;  %10056 = vmatmul.mubr.bf16.vlgmr.msra.gmra.mrb[100].mxu1 %v19278_v37  ;;  %v17810_v37 = vld [vmem:[#allocation9 + $0x930] ss:$8 sps:$4 sm:$0xff]  }
0x1cb4   :  { %10858 = vmatpush1.bf16.msra.mxu0 %v17789_v28  ;;  %10899 = vmatpush1.bf16.msra.mxu1 %v17792_v29  ;;  %v17867_v28 = vld [vmem:[#allocation9 + $0x8d0] ss:$8 sps:$4 sm:$0xff]  }
0x1cb5   :  { %10859 = vmatprep.subr.bf16.mxu0 %v17797_v30  ;;  %10900 = vmatprep.subr.bf16.mxu1 %v17800_v31  ;;  %v17870_v29 = vld [vmem:[#allocation9 + $0x9d0] ss:$8 sps:$4 sm:$0xff]   ;;  %v17875_v30 = vld [vmem:[#allocation9 + $0x8e4] ss:$8 sps:$4 sm:$0xff]  }
0x1cb6   :  { %v17878_v31 = vld [vmem:[#allocation9 + $0x9e4] ss:$8 sps:$4 sm:$0xff]  }
0x1cb8   :  { %10860 = vmatpush1.bf16.msra.mxu0 %v17795_v12  ;;  %10901 = vmatpush1.bf16.msra.mxu1 %v17798_v9  ;;  %v17873_v12 = vld [vmem:[#allocation9 + $0x8e0] ss:$8 sps:$4 sm:$0xff]  }
0x1cb9   :  { %10861 = vmatprep.subr.bf16.mxu0 %v17803_v32  ;;  %10902 = vmatprep.subr.bf16.mxu1 %v17806_v49  ;;  %v17876_v9 = vld [vmem:[#allocation9 + $0x9e0] ss:$8 sps:$4 sm:$0xff]   ;;  %v17881_v32 = vld [vmem:[#allocation9 + $0x8f4] ss:$8 sps:$4 sm:$0xff]  }
0x1cba   :  { %v17884_v49 = vld [vmem:[#allocation9 + $0x9f4] ss:$8 sps:$4 sm:$0xff]  }
0x1cbc   :  { %10862 = vmatpush1.bf16.msra.mxu0 %v17801_v10  ;;  %10903 = vmatpush1.bf16.msra.mxu1 %v17804_v33  ;;  %v17879_v10 = vld [vmem:[#allocation9 + $0x8f0] ss:$8 sps:$4 sm:$0xff]  }
0x1cbd   :  { %10863 = vmatprep.subr.bf16.mxu0 %v17809_v34  ;;  %10904 = vmatprep.subr.bf16.mxu1 %v17812_v35  ;;  %v17882_v33 = vld [vmem:[#allocation9 + $0x9f0] ss:$8 sps:$4 sm:$0xff]   ;;  %v17887_v34 = vld [vmem:[#allocation9 + $0xa04] ss:$8 sps:$4 sm:$0xff]  }
0x1cbe   :  { %v17890_v35 = vld [vmem:[#allocation9 + $0xb04] ss:$8 sps:$4 sm:$0xff]  }
0x1cc0   :  { %10864 = vmatpush1.bf16.msra.mxu0 %v17807_v38  ;;  %10905 = vmatpush1.bf16.msra.mxu1 %v17810_v37  ;;  %v7393_v38 = vrot.slane %v19268_v2, 1  ;;  %v7394_v37 = vrot.slane %v19264_v61, 1 }
0x1cc1   :  { %10865 = vmatprep.subr.bf16.mxu0 %v17815_v20  ;;  %10906 = vmatprep.subr.bf16.mxu1 %v17818_v14  ;;  %v9231_v20 = vrot.slane %v19268_v2, %v18970_v36 }
0x1cc2   :  { %v9239_v14 = vrot.slane %v7393_v38, %v18970_v36  ;;  %v17927_v38 = vld [vmem:[#allocation9 + $0xa70] ss:$8 sps:$4 sm:$0xff]  }
0x1cc4   :  { %10866 = vmatpush1.bf16.msra.mxu0 %v17813_v40  ;;  %10907 = vmatpush1.bf16.msra.mxu1 %v17816_v41  ;;  %v9235_v40 = vrot.slane %v19264_v61, %v18970_v36  ;;  %v9243_v41 = vrot.slane %v7394_v37, %v18970_v36  ;;  %v17930_v37 = vld [vmem:[#allocation9 + $0xb70] ss:$8 sps:$4 sm:$0xff]  }
0x1cc5   :  { %10867 = vmatprep.subr.bf16.mxu0 %v17821_v53  ;;  %10908 = vmatprep.subr.bf16.mxu1 %v17824_v60 }
0x1cc8   :  { %10868 = vmatpush1.bf16.msra.mxu0 %v17819_v62  ;;  %10909 = vmatpush1.bf16.msra.mxu1 %v17822_v4 }
0x1cc9   :  { %10869 = vmatprep.subr.bf16.mxu0 %v17827_v6  ;;  %10910 = vmatprep.subr.bf16.mxu1 %v17830_v7 }
0x1ccc   :  { %10870 = vmatpush1.bf16.msra.mxu0 %v17825_v8  ;;  %10911 = vmatpush1.bf16.msra.mxu1 %v17828_v56 }
0x1ccd   :  { %10871 = vmatprep.subr.bf16.mxu0 %v17833_v5  ;;  %10912 = vmatprep.subr.bf16.mxu1 %v17836_v11 }
0x1cd0   :  { %10872 = vmatpush1.bf16.msra.mxu0 %v17831_v47  ;;  %10913 = vmatpush1.bf16.msra.mxu1 %v17834_v15 }
0x1cd1   :  { %10873 = vmatprep.subr.bf16.mxu0 %v17839_v13  ;;  %10914 = vmatprep.subr.bf16.mxu1 %v17842_v45 }
0x1cd4   :  { %10874 = vmatpush1.bf16.msra.mxu0 %v17837_v50  ;;  %10915 = vmatpush1.bf16.msra.mxu1 %v17840_v59 }
0x1cd5   :  { %10875 = vmatprep.subr.bf16.mxu0 %v17845_v16  ;;  %10916 = vmatprep.subr.bf16.mxu1 %v17848_v48  ;;  %v17885_v16 = vld [vmem:[#allocation9 + $0xa00] ss:$8 sps:$4 sm:$0xff]  }
0x1cd6   :  { %v17888_v48 = vld [vmem:[#allocation9 + $0xb00] ss:$8 sps:$4 sm:$0xff]  }
0x1cd8   :  { %10876 = vmatpush1.bf16.msra.mxu0 %v17843_v43  ;;  %10917 = vmatpush1.bf16.msra.mxu1 %v17846_v44 }
0x1cd9   :  { %10877 = vmatprep.subr.bf16.mxu0 %v17851_v17  ;;  %10918 = vmatprep.subr.bf16.mxu1 %v17854_v42  ;;  %v17893_v17 = vld [vmem:[#allocation9 + $0xa14] ss:$8 sps:$4 sm:$0xff]  }
0x1cda   :  { %v17896_v42 = vld [vmem:[#allocation9 + $0xb14] ss:$8 sps:$4 sm:$0xff]  }
0x1cdc   :  { %10878 = vmatpush1.bf16.msra.mxu0 %v17849_v55  ;;  %10919 = vmatpush1.bf16.msra.mxu1 %v17852_v39  ;;  %v17891_v55 = vld [vmem:[#allocation9 + $0xa10] ss:$8 sps:$4 sm:$0xff]  }
0x1cdd   :  { %10879 = vmatprep.subr.bf16.mxu0 %v17857_v23  ;;  %10920 = vmatprep.subr.bf16.mxu1 %v17860_v22  ;;  %v17894_v39 = vld [vmem:[#allocation9 + $0xb10] ss:$8 sps:$4 sm:$0xff]   ;;  %v17899_v23 = vld [vmem:[#allocation9 + $0xa24] ss:$8 sps:$4 sm:$0xff]  }
0x1cde   :  { %v17902_v22 = vld [vmem:[#allocation9 + $0xb24] ss:$8 sps:$4 sm:$0xff]  }
0x1ce0   :  { %10880 = vmatpush1.bf16.msra.mxu0 %v17855_v3  ;;  %10921 = vmatpush1.bf16.msra.mxu1 %v17858_v21  ;;  %v17897_v3 = vld [vmem:[#allocation9 + $0xa20] ss:$8 sps:$4 sm:$0xff]  }
0x1ce1   :  { %10881 = vmatprep.subr.bf16.mxu0 %v17863_v54  ;;  %10922 = vmatprep.subr.bf16.mxu1 %v17866_v24  ;;  %v17900_v21 = vld [vmem:[#allocation9 + $0xb20] ss:$8 sps:$4 sm:$0xff]   ;;  %v17905_v54 = vld [vmem:[#allocation9 + $0xa34] ss:$8 sps:$4 sm:$0xff]  }
0x1ce2   :  { %v17908_v24 = vld [vmem:[#allocation9 + $0xb34] ss:$8 sps:$4 sm:$0xff]  }
0x1ce4   :  { %10882 = vmatpush1.bf16.msra.mxu0 %v17861_v1  ;;  %10923 = vmatpush1.bf16.msra.mxu1 %v17864_v25  ;;  %v17903_v1 = vld [vmem:[#allocation9 + $0xa30] ss:$8 sps:$4 sm:$0xff]  }
0x1ce5   :  { %10883 = vmatprep.subr.bf16.mxu0 %v17869_v26  ;;  %10924 = vmatprep.subr.bf16.mxu1 %v17872_v27  ;;  %v17906_v25 = vld [vmem:[#allocation9 + $0xb30] ss:$8 sps:$4 sm:$0xff]   ;;  %v17911_v26 = vld [vmem:[#allocation9 + $0xa44] ss:$8 sps:$4 sm:$0xff]  }
0x1ce6   :  { %v17914_v27 = vld [vmem:[#allocation9 + $0xb44] ss:$8 sps:$4 sm:$0xff]  }
0x1ce8   :  { %10884 = vmatpush1.bf16.msra.mxu0 %v17867_v28  ;;  %10925 = vmatpush1.bf16.msra.mxu1 %v17870_v29  ;;  %v17909_v28 = vld [vmem:[#allocation9 + $0xa40] ss:$8 sps:$4 sm:$0xff]  }
0x1ce9   :  { %10885 = vmatprep.subr.bf16.mxu0 %v17875_v30  ;;  %10926 = vmatprep.subr.bf16.mxu1 %v17878_v31  ;;  %v17912_v29 = vld [vmem:[#allocation9 + $0xb40] ss:$8 sps:$4 sm:$0xff]   ;;  %v17917_v30 = vld [vmem:[#allocation9 + $0xa54] ss:$8 sps:$4 sm:$0xff]  }
0x1cea   :  { %v17920_v31 = vld [vmem:[#allocation9 + $0xb54] ss:$8 sps:$4 sm:$0xff]  }
0x1cec   :  { %10886 = vmatpush1.bf16.msra.mxu0 %v17873_v12  ;;  %10927 = vmatpush1.bf16.msra.mxu1 %v17876_v9  ;;  %v17915_v12 = vld [vmem:[#allocation9 + $0xa50] ss:$8 sps:$4 sm:$0xff]  }
0x1ced   :  { %10887 = vmatprep.subr.bf16.mxu0 %v17881_v32  ;;  %10928 = vmatprep.subr.bf16.mxu1 %v17884_v49  ;;  %v17918_v9 = vld [vmem:[#allocation9 + $0xb50] ss:$8 sps:$4 sm:$0xff]   ;;  %v17923_v32 = vld [vmem:[#allocation9 + $0xa64] ss:$8 sps:$4 sm:$0xff]  }
0x1cee   :  { %v17926_v49 = vld [vmem:[#allocation9 + $0xb64] ss:$8 sps:$4 sm:$0xff]  }
0x1cf0   :  { %10888 = vmatpush1.bf16.msra.mxu0 %v17879_v10  ;;  %10929 = vmatpush1.bf16.msra.mxu1 %v17882_v33  ;;  %v17921_v10 = vld [vmem:[#allocation9 + $0xa60] ss:$8 sps:$4 sm:$0xff]  }
0x1cf1   :  { %10939 = vmatprep.subr.bf16.mxu0 %v17887_v34  ;;  %10980 = vmatprep.subr.bf16.mxu1 %v17890_v35  ;;  %v17924_v33 = vld [vmem:[#allocation9 + $0xb60] ss:$8 sps:$4 sm:$0xff]   ;;  %v17929_v34 = vld [vmem:[#allocation9 + $0xa74] ss:$8 sps:$4 sm:$0xff]  }
0x1cf2   :  { %v17932_v35 = vld [vmem:[#allocation9 + $0xb74] ss:$8 sps:$4 sm:$0xff]  }
0x1d46   :  { %v9934_v53 = vpop.f32.mrb[68].mxu0  ;;  %v9975_v60 = vpop.f32.mrb[96].mxu1 }
0x1d47   :  { %v9935_v62 = vadd.f32 %v9934_v53, %v9231_v20  ;;  %v9976_v4 = vadd.f32 %v9975_v60, %v9239_v14  ;;  %v9936_v6 = vpop.f32.mrb[69].mxu0  ;;  %v9977_v7 = vpop.f32.mrb[97].mxu1  ;;  %v17935_v20 = vld [vmem:[#allocation9 + $0xa84] ss:$8 sps:$4 sm:$0xff]   ;;  %v17941_v53 = vld [vmem:[#allocation9 + $0xa94] ss:$8 sps:$4 sm:$0xff]  }
0x1d48   :  { %v9937_v8 = vadd.f32 %v9936_v6, %v9235_v40  ;;  %v9978_v56 = vadd.f32 %v9977_v7, %v9243_v41  ;;  %v9938_v5 = vpop.f32.mrb[70].mxu0  ;;  %v9979_v11 = vpop.f32.mrb[98].mxu1  ;;  %v17938_v14 = vld [vmem:[#allocation9 + $0xb84] ss:$8 sps:$4 sm:$0xff]   ;;  %v17933_v40 = vld [vmem:[#allocation9 + $0xa80] ss:$8 sps:$4 sm:$0xff]  }
0x1d49   :  { %v10064_v47 = vmax.f32 %v9935_v62, 0.0  ;;  %v10066_v15 = vmax.f32 %v9976_v4, 0.0  ;;  %v9939_v2 = vpop.f32.mrb[71].mxu0  ;;  %v9980_v13 = vpop.f32.mrb[99].mxu1  ;;  %v17936_v41 = vld [vmem:[#allocation9 + $0xb80] ss:$8 sps:$4 sm:$0xff]  }
0x1d4a   :  { %v10065_v45 = vmax.f32 %v9937_v8, 0.0  ;;  %v10067_v50 = vmax.f32 %v9978_v56, 0.0  ;;  %v17944_v60 = vld [vmem:[#allocation9 + $0xb94] ss:$8 sps:$4 sm:$0xff]   ;;  %v17939_v62 = vld [vmem:[#allocation9 + $0xa90] ss:$8 sps:$4 sm:$0xff]  }
0x1d4b   :  { %v10072_v43 = vpack.c.bf16 %v10064_v47, %v10064_v47  ;;  %v10074_v44 = vpack.c.bf16 %v10066_v15, %v10066_v15  ;;  %v17942_v4 = vld [vmem:[#allocation9 + $0xb90] ss:$8 sps:$4 sm:$0xff]   ;;  %v17947_v6 = vld [vmem:[#allocation9 + $0xaa4] ss:$8 sps:$4 sm:$0xff]   ;;  %v17945_v8 = vld [vmem:[#allocation9 + $0xaa0] ss:$8 sps:$4 sm:$0xff]  }
0x1d4c   :  { %v10073_v59 = vpack.c.bf16 %v10065_v45, %v10065_v45  ;;  %v10075_v61 = vpack.c.bf16 %v10067_v50, %v10067_v50  ;;  %v17950_v7 = vld [vmem:[#allocation9 + $0xba4] ss:$8 sps:$4 sm:$0xff]   ;;  %v17948_v56 = vld [vmem:[#allocation9 + $0xba0] ss:$8 sps:$4 sm:$0xff]   ;;  %v17953_v5 = vld [vmem:[#allocation9 + $0xab4] ss:$8 sps:$4 sm:$0xff]  }
0x1d4d   :  { %v17956_v11 = vld [vmem:[#allocation9 + $0xbb4] ss:$8 sps:$4 sm:$0xff]   ;;  %v17951_v47 = vld [vmem:[#allocation9 + $0xab0] ss:$8 sps:$4 sm:$0xff]   ;;  %v17959_v2 = vld [vmem:[#allocation9 + $0xac4] ss:$8 sps:$4 sm:$0xff]  }
0x1d4e   :  { %10889 = vmatprep.mubr.bf16.mxu0 %v10073_v59  ;;  %10930 = vmatprep.mubr.bf16.mxu1 %v10075_v61  ;;  %v17954_v15 = vld [vmem:[#allocation9 + $0xbb0] ss:$8 sps:$4 sm:$0xff]   ;;  %v17962_v13 = vld [vmem:[#allocation9 + $0xbc4] ss:$8 sps:$4 sm:$0xff]   ;;  %v17957_v45 = vld [vmem:[#allocation9 + $0xac0] ss:$8 sps:$4 sm:$0xff]  }
0x1d4f   :  { %10890 = vmatmul.mubr.bf16.vlgmr.msra.gmra.mrb[76].mxu0 %v10072_v43  ;;  %10931 = vmatmul.mubr.bf16.vlgmr.msra.gmra.mrb[104].mxu1 %v10074_v44  ;;  %v17960_v50 = vld [vmem:[#allocation9 + $0xbc0] ss:$8 sps:$4 sm:$0xff]   ;;  %v7389_v59 = vld [vmem:[#allocation2 + $0x50] sm:$0xf]  ;;  %v17965_v61 = vld [vmem:[#allocation9 + $0xad4] ss:$8 sps:$4 sm:$0xff]  }
0x1d50   :  { %10940 = vmatpush1.bf16.msra.mxu0 %v17885_v16  ;;  %10981 = vmatpush1.bf16.msra.mxu1 %v17888_v48  ;;  %v17968_v16 = vld [vmem:[#allocation9 + $0xbd4] ss:$8 sps:$4 sm:$0xff]   ;;  %v7390_v48 = vld [vmem:[#allocation2 + $0x58] sm:$0xf]  ;;  %v7399_v43 = vrot.slane %v7389_v59, 2  ;;  %v7403_v44 = vrot.slane %v7389_v59, 3 }
0x1d51   :  { %10941 = vmatprep.subr.bf16.mxu0 %v17893_v17  ;;  %10982 = vmatprep.subr.bf16.mxu1 %v17896_v42  ;;  %v17963_v17 = vld [vmem:[#allocation9 + $0xad0] ss:$8 sps:$4 sm:$0xff]  }
0x1d52   :  { %v17966_v42 = vld [vmem:[#allocation9 + $0xbd0] ss:$8 sps:$4 sm:$0xff]  }
0x1d54   :  { %10942 = vmatpush1.bf16.msra.mxu0 %v17891_v55  ;;  %10983 = vmatpush1.bf16.msra.mxu1 %v17894_v39  ;;  %v7400_v55 = vrot.slane %v7390_v48, 2  ;;  %v7404_v39 = vrot.slane %v7390_v48, 3 }
0x1d55   :  { %10943 = vmatprep.subr.bf16.mxu0 %v17899_v23  ;;  %10984 = vmatprep.subr.bf16.mxu1 %v17902_v22  ;;  %v17971_v23 = vld [vmem:[#allocation9 + $0xae4] ss:$8 sps:$4 sm:$0xff]  }
0x1d56   :  { %v17974_v22 = vld [vmem:[#allocation9 + $0xbe4] ss:$8 sps:$4 sm:$0xff]  }
0x1d58   :  { %10944 = vmatpush1.bf16.msra.mxu0 %v17897_v3  ;;  %10985 = vmatpush1.bf16.msra.mxu1 %v17900_v21  ;;  %v9247_v3 = vrot.slane %v7399_v43, %v18970_v36  ;;  %v9255_v21 = vrot.slane %v7403_v44, %v18970_v36 }
0x1d59   :  { %10945 = vmatprep.subr.bf16.mxu0 %v17905_v54  ;;  %10986 = vmatprep.subr.bf16.mxu1 %v17908_v24  ;;  %v9251_v54 = vrot.slane %v7400_v55, %v18970_v36  ;;  %v9259_v24 = vrot.slane %v7404_v39, %v18970_v36 }
0x1d5c   :  { %10946 = vmatpush1.bf16.msra.mxu0 %v17903_v1  ;;  %10987 = vmatpush1.bf16.msra.mxu1 %v17906_v25  ;;  %v17969_v1 = vld [vmem:[#allocation9 + $0xae0] ss:$8 sps:$4 sm:$0xff]  }
0x1d5d   :  { %10947 = vmatprep.subr.bf16.mxu0 %v17911_v26  ;;  %10988 = vmatprep.subr.bf16.mxu1 %v17914_v27  ;;  %v17972_v25 = vld [vmem:[#allocation9 + $0xbe0] ss:$8 sps:$4 sm:$0xff]   ;;  %v17977_v26 = vld [vmem:[#allocation9 + $0xaf4] ss:$8 sps:$4 sm:$0xff]  }
0x1d5e   :  { %v17980_v27 = vld [vmem:[#allocation9 + $0xbf4] ss:$8 sps:$4 sm:$0xff]  }
0x1d60   :  { %10948 = vmatpush1.bf16.msra.mxu0 %v17909_v28  ;;  %10989 = vmatpush1.bf16.msra.mxu1 %v17912_v29 }
0x1d61   :  { %10949 = vmatprep.subr.bf16.mxu0 %v17917_v30  ;;  %10990 = vmatprep.subr.bf16.mxu1 %v17920_v31 }
0x1d64   :  { %10950 = vmatpush1.bf16.msra.mxu0 %v17915_v12  ;;  %10991 = vmatpush1.bf16.msra.mxu1 %v17918_v9 }
0x1d65   :  { %10951 = vmatprep.subr.bf16.mxu0 %v17923_v32  ;;  %10992 = vmatprep.subr.bf16.mxu1 %v17926_v49 }
0x1d68   :  { %10952 = vmatpush1.bf16.msra.mxu0 %v17921_v10  ;;  %10993 = vmatpush1.bf16.msra.mxu1 %v17924_v33 }
0x1d69   :  { %10953 = vmatprep.subr.bf16.mxu0 %v17929_v34  ;;  %10994 = vmatprep.subr.bf16.mxu1 %v17932_v35  ;;  %v17975_v34 = vld [vmem:[#allocation9 + $0xaf0] ss:$8 sps:$4 sm:$0xff]  }
0x1d6a   :  { %v17978_v35 = vld [vmem:[#allocation9 + $0xbf0] ss:$8 sps:$4 sm:$0xff]  }
0x1d6c   :  { %10954 = vmatpush1.bf16.msra.mxu0 %v17927_v38  ;;  %10995 = vmatpush1.bf16.msra.mxu1 %v17930_v37 }
0x1d6d   :  { %10955 = vmatprep.subr.bf16.mxu0 %v17935_v20  ;;  %10996 = vmatprep.subr.bf16.mxu1 %v17938_v14 }
0x1d70   :  { %10956 = vmatpush1.bf16.msra.mxu0 %v17933_v40  ;;  %10997 = vmatpush1.bf16.msra.mxu1 %v17936_v41 }
0x1d71   :  { %10957 = vmatprep.subr.bf16.mxu0 %v17941_v53  ;;  %10998 = vmatprep.subr.bf16.mxu1 %v17944_v60 }
0x1d74   :  { %10958 = vmatpush1.bf16.msra.mxu0 %v17939_v62  ;;  %10999 = vmatpush1.bf16.msra.mxu1 %v17942_v4 }
0x1d75   :  { %10959 = vmatprep.subr.bf16.mxu0 %v17947_v6  ;;  %11000 = vmatprep.subr.bf16.mxu1 %v17950_v7  ;;  %v18509_v6 = vld [vmem:[#allocation2 + $0x40] sm:$0xff] }
0x1d76   :  { %v10212_v7 = vrot.slane %v18509_v6, %v18989_v52  ;;  %v18022_v6 = vld [vmem:[#allocation4 + $0xa2c] ss:$24 sps:$4 sm:$0xff]  }
0x1d78   :  { %10960 = vmatpush1.bf16.msra.mxu0 %v17945_v8  ;;  %11001 = vmatpush1.bf16.msra.mxu1 %v17948_v56  ;;  %v18510_v8 = vld [vmem:[#allocation2 + $0x48] sm:$0xff] }
0x1d79   :  { %10961 = vmatprep.subr.bf16.mxu0 %v17953_v5  ;;  %11002 = vmatprep.subr.bf16.mxu1 %v17956_v11  ;;  %v10216_v56 = vrot.slane %v18510_v8, %v18989_v52  ;;  %v18020_v8 = vld [vmem:[#allocation4 + $0xa28] ss:$24 sps:$4 sm:$0xff]  }
0x1d7c   :  { %10962 = vmatpush1.bf16.msra.mxu0 %v17951_v47  ;;  %11003 = vmatpush1.bf16.msra.mxu1 %v17954_v15 }
0x1d7d   :  { %10963 = vmatprep.subr.bf16.mxu0 %v17959_v2  ;;  %11004 = vmatprep.subr.bf16.mxu1 %v17962_v13 }
0x1d80   :  { %10964 = vmatpush1.bf16.msra.mxu0 %v17957_v45  ;;  %11005 = vmatpush1.bf16.msra.mxu1 %v17960_v50 }
0x1d81   :  { %10965 = vmatprep.subr.bf16.mxu0 %v17965_v61  ;;  %11006 = vmatprep.subr.bf16.mxu1 %v17968_v16 }
0x1d84   :  { %10966 = vmatpush1.bf16.msra.mxu0 %v17963_v17  ;;  %11007 = vmatpush1.bf16.msra.mxu1 %v17966_v42 }
0x1d85   :  { %10967 = vmatprep.subr.bf16.mxu0 %v17971_v23  ;;  %11008 = vmatprep.subr.bf16.mxu1 %v17974_v22 }
0x1d86   :  { %v10016_v28 = vpop.f32.mrb[72].mxu0  ;;  %v10057_v29 = vpop.f32.mrb[100].mxu1 }
0x1d87   :  { %v10017_v30 = vadd.f32 %v10016_v28, %v9247_v3  ;;  %v10058_v31 = vadd.f32 %v10057_v29, %v9255_v21  ;;  %v10018_v12 = vpop.f32.mrb[73].mxu0  ;;  %v10059_v9 = vpop.f32.mrb[101].mxu1  ;;  %v17983_v28 = vld [vmem:[#allocation4 + $0x904] ss:$24 sps:$4 sm:$0xff]   ;;  %v17984_v29 = vld [vmem:[#allocation4 + $0x908] ss:$24 sps:$4 sm:$0xff]  }
0x1d88   :  { %v10019_v32 = vadd.f32 %v10018_v12, %v9251_v54  ;;  %v10060_v49 = vadd.f32 %v10059_v9, %v9259_v24  ;;  %v10020_v10 = vpop.f32.mrb[74].mxu0  ;;  %v10061_v33 = vpop.f32.mrb[102].mxu1  ;;  %10968 = vmatpush1.bf16.msra.mxu0 %v17969_v1  ;;  %11009 = vmatpush1.bf16.msra.mxu1 %v17972_v25  ;;  %v17992_v12 = vld [vmem:[#allocation4 + $0x93c] ss:$24 sps:$4 sm:$0xff]   ;;  %v17987_v9 = vld [vmem:[#allocation4 + $0x930] ss:$24 sps:$4 sm:$0xff]  }
0x1d89   :  { %v10068_v38 = vmax.f32 %v10017_v30, 0.0  ;;  %v10070_v37 = vmax.f32 %v10058_v31, 0.0  ;;  %v10021_v20 = vpop.f32.mrb[75].mxu0  ;;  %v10062_v14 = vpop.f32.mrb[103].mxu1  ;;  %10969 = vmatprep.subr.bf16.mxu0 %v17977_v26  ;;  %11010 = vmatprep.subr.bf16.mxu1 %v17980_v27  ;;  %v17981_v27 = vld [vmem:[#allocation4 + $0x900] ss:$24 sps:$4 sm:$0xff]  }
0x1d8a   :  { %v10069_v40 = vmax.f32 %v10019_v32, 0.0  ;;  %v10071_v41 = vmax.f32 %v10060_v49, 0.0  ;;  %v17986_v30 = vld [vmem:[#allocation4 + $0x90c] ss:$24 sps:$4 sm:$0xff]   ;;  %v17993_v49 = vld [vmem:[#allocation4 + $0x960] ss:$24 sps:$4 sm:$0xff]  }
0x1d8b   :  { %v10076_v62 = vpack.c.bf16 %v10068_v38, %v10068_v38  ;;  %v10078_v4 = vpack.c.bf16 %v10070_v37, %v10070_v37  ;;  %v17989_v31 = vld [vmem:[#allocation4 + $0x934] ss:$24 sps:$4 sm:$0xff]   ;;  %v17995_v32 = vld [vmem:[#allocation4 + $0x964] ss:$24 sps:$4 sm:$0xff]   ;;  %v17996_v10 = vld [vmem:[#allocation4 + $0x968] ss:$24 sps:$4 sm:$0xff]  }
0x1d8c   :  { %v10077_v53 = vpack.c.bf16 %v10069_v40, %v10069_v40  ;;  %v10079_v60 = vpack.c.bf16 %v10071_v41, %v10071_v41  ;;  %10970 = vmatpush1.bf16.msra.mxu0 %v17975_v34  ;;  %11011 = vmatpush1.bf16.msra.mxu1 %v17978_v35  ;;  %v18001_v33 = vld [vmem:[#allocation4 + $0x994] ss:$24 sps:$4 sm:$0xff]   ;;  %v17999_v35 = vld [vmem:[#allocation4 + $0x990] ss:$24 sps:$4 sm:$0xff]   ;;  %v18007_v37 = vld [vmem:[#allocation4 + $0x9c4] ss:$24 sps:$4 sm:$0xff]  }
0x1d8d   :  { %11659 = vmatprep.subr.bf16.mxu0 %v17983_v28  ;;  %11700 = vmatprep.subr.bf16.mxu1 %v17986_v30  ;;  %v18004_v34 = vld [vmem:[#allocation4 + $0x99c] ss:$24 sps:$4 sm:$0xff]   ;;  %v18002_v38 = vld [vmem:[#allocation4 + $0x998] ss:$24 sps:$4 sm:$0xff]   ;;  %v18010_v20 = vld [vmem:[#allocation4 + $0x9cc] ss:$24 sps:$4 sm:$0xff]  }
0x1d8e   :  { %10971 = vmatprep.mubr.bf16.mxu0 %v10077_v53  ;;  %11012 = vmatprep.mubr.bf16.mxu1 %v10079_v60  ;;  %v18005_v14 = vld [vmem:[#allocation4 + $0x9c0] ss:$24 sps:$4 sm:$0xff]   ;;  %v18013_v41 = vld [vmem:[#allocation4 + $0x9f4] ss:$24 sps:$4 sm:$0xff]   ;;  %v18011_v60 = vld [vmem:[#allocation4 + $0x9f0] ss:$24 sps:$4 sm:$0xff]  }
0x1d8f   :  { %10972 = vmatmul.mubr.bf16.vlgmr.msra.gmra.mrb[80].mxu0 %v10076_v62  ;;  %11013 = vmatmul.mubr.bf16.vlgmr.msra.gmra.mrb[108].mxu1 %v10078_v4  ;;  %v18008_v40 = vld [vmem:[#allocation4 + $0x9c8] ss:$24 sps:$4 sm:$0xff]   ;;  %v18016_v53 = vld [vmem:[#allocation4 + $0x9fc] ss:$24 sps:$4 sm:$0xff]   ;;  %v18014_v62 = vld [vmem:[#allocation4 + $0x9f8] ss:$24 sps:$4 sm:$0xff]  }
0x1d90   :  { %11660 = vmatpush1.bf16.msra.mxu0 %v17981_v27  ;;  %11701 = vmatpush1.bf16.msra.mxu1 %v17984_v29  ;;  %v18019_v4 = vld [vmem:[#allocation4 + $0xa24] ss:$24 sps:$4 sm:$0xff]   ;;  %v18050_v27 = vld [vmem:[#allocation4 + $0xb18] ss:$24 sps:$4 sm:$0xff]   ;;  %v18056_v30 = vld [vmem:[#allocation4 + $0xb48] ss:$24 sps:$4 sm:$0xff]  }
0x1d91   :  { %11661 = vmatprep.subr.bf16.mxu0 %v17989_v31  ;;  %11702 = vmatprep.subr.bf16.mxu1 %v17992_v12  ;;  %v18053_v28 = vld [vmem:[#allocation4 + $0xb40] ss:$24 sps:$4 sm:$0xff]   ;;  %v18055_v29 = vld [vmem:[#allocation4 + $0xb44] ss:$24 sps:$4 sm:$0xff]   ;;  %v18061_v12 = vld [vmem:[#allocation4 + $0xb74] ss:$24 sps:$4 sm:$0xff]  }
0x1d92   :  { %v18058_v31 = vld [vmem:[#allocation4 + $0xb4c] ss:$24 sps:$4 sm:$0xff]  }
0x1d94   :  { %11662 = vmatpush1.bf16.msra.mxu0 %v17987_v9  ;;  %v18064_v9 = vld [vmem:[#allocation4 + $0xb7c] ss:$24 sps:$4 sm:$0xff]  }
0x1d95   :  { %11663 = vmatprep.subr.bf16.mxu0 %v17995_v32  ;;  %v18062_v32 = vld [vmem:[#allocation4 + $0xb78] ss:$24 sps:$4 sm:$0xff]  }
0x1d98   :  { %11664 = vmatpush1.bf16.msra.mxu0 %v17993_v49  ;;  %v18070_v49 = vld [vmem:[#allocation4 + $0xbac] ss:$24 sps:$4 sm:$0xff]  }
0x1d99   :  { %11665 = vmatprep.subr.bf16.mxu0 %v18001_v33  ;;  %v18068_v33 = vld [vmem:[#allocation4 + $0xba8] ss:$24 sps:$4 sm:$0xff]  }
0x1d9c   :  { %11666 = vmatpush1.bf16.msra.mxu0 %v17999_v35  ;;  %v18076_v35 = vld [vmem:[#allocation4 + $0xbdc] ss:$24 sps:$4 sm:$0xff]  }
0x1d9d   :  { %11667 = vmatprep.subr.bf16.mxu0 %v18007_v37  ;;  %v18074_v37 = vld [vmem:[#allocation4 + $0xbd8] ss:$24 sps:$4 sm:$0xff]  }
0x1da0   :  { %11668 = vmatpush1.bf16.msra.mxu0 %v18005_v14 }
0x1da1   :  { %11669 = vmatprep.subr.bf16.mxu0 %v18013_v41 }
0x1da4   :  { %11670 = vmatpush1.bf16.msra.mxu0 %v18011_v60  ;;  %v19315_v60 = vld [vmem:[#allocation2 + $0x60] sm:$0xff] }
0x1da5   :  { %11671 = vmatprep.subr.bf16.mxu0 %v18019_v4  ;;  %v11063_v4 = vrot.slane %v19315_v60, %v18831_v18 }
0x1e22   :  { %v10891_v5 = vpop.f32.mrb[76].mxu0  ;;  %v10932_v11 = vpop.f32.mrb[104].mxu1 }
0x1e23   :  { %v10892_v47 = vadd.f32 %v10891_v5, %v10212_v7  ;;  %v10893_v15 = vpop.f32.mrb[77].mxu0  ;;  %v10934_v2 = vpop.f32.mrb[105].mxu1  ;;  %v18017_v7 = vld [vmem:[#allocation4 + $0xa20] ss:$24 sps:$4 sm:$0xff]   ;;  %v18028_v5 = vld [vmem:[#allocation4 + $0xa5c] ss:$24 sps:$4 sm:$0xff]  }
0x1e24   :  { %v10894_v13 = vadd.f32 %v10893_v15, %v10216_v56  ;;  %v10895_v45 = vpop.f32.mrb[78].mxu0  ;;  %v10936_v50 = vpop.f32.mrb[106].mxu1  ;;  %v18025_v56 = vld [vmem:[#allocation4 + $0xa54] ss:$24 sps:$4 sm:$0xff]   ;;  %11672 = vmatpush1.bf16.msra.mxu0 %v18017_v7  ;;  %v18031_v15 = vld [vmem:[#allocation4 + $0xa84] ss:$24 sps:$4 sm:$0xff]  }
0x1e25   :  { %v10933_v59 = vadd.f32 %v10932_v11, %v10892_v47  ;;  %v10896_v61 = vpop.f32.mrb[79].mxu0  ;;  %v10937_v16 = vpop.f32.mrb[107].mxu1  ;;  %v18023_v11 = vld [vmem:[#allocation4 + $0xa50] ss:$24 sps:$4 sm:$0xff]   ;;  %11673 = vmatprep.subr.bf16.mxu0 %v18025_v56  ;;  %v18037_v50 = vld [vmem:[#allocation4 + $0xab4] ss:$24 sps:$4 sm:$0xff]  }
0x1e26   :  { %v10935_v48 = vadd.f32 %v10934_v2, %v10894_v13  ;;  %v18026_v47 = vld [vmem:[#allocation4 + $0xa58] ss:$24 sps:$4 sm:$0xff]   ;;  %v18034_v2 = vld [vmem:[#allocation4 + $0xa8c] ss:$24 sps:$4 sm:$0xff]   ;;  %v18032_v45 = vld [vmem:[#allocation4 + $0xa88] ss:$24 sps:$4 sm:$0xff]  }
0x1e27   :  { %v18029_v13 = vld [vmem:[#allocation4 + $0xa80] ss:$24 sps:$4 sm:$0xff]   ;;  %v18035_v61 = vld [vmem:[#allocation4 + $0xab0] ss:$24 sps:$4 sm:$0xff]  }
0x1e28   :  { %11674 = vmatpush1.bf16.msra.mxu0 %v18023_v11  ;;  %v18038_v16 = vld [vmem:[#allocation4 + $0xab8] ss:$24 sps:$4 sm:$0xff]  }
0x1e29   :  { %11675 = vmatprep.subr.bf16.mxu0 %v18031_v15 }
0x1e2c   :  { %11676 = vmatpush1.bf16.msra.mxu0 %v18029_v13 }
0x1e2d   :  { %11677 = vmatprep.subr.bf16.mxu0 %v18037_v50 }
0x1e30   :  { %11678 = vmatpush1.bf16.msra.mxu0 %v18035_v61  ;;  %v18080_v61 = vld [vmem:[#allocation4 + $0x940] ss:$24 sps:$4 sm:$0xff]  }
0x1e62   :  { %v10973_v43 = vpop.f32.mrb[80].mxu0  ;;  %v11014_v44 = vpop.f32.mrb[108].mxu1 }
0x1e63   :  { %v10974_v17 = vadd.f32 %v10973_v43, %v10933_v59  ;;  %v10975_v42 = vpop.f32.mrb[81].mxu0  ;;  %v11016_v55 = vpop.f32.mrb[109].mxu1  ;;  %v18040_v59 = vld [vmem:[#allocation4 + $0xabc] ss:$24 sps:$4 sm:$0xff]   ;;  %v18041_v43 = vld [vmem:[#allocation4 + $0xae0] ss:$24 sps:$4 sm:$0xff]  }
0x1e64   :  { %v10976_v39 = vadd.f32 %v10975_v42, %v10935_v48  ;;  %v10977_v23 = vpop.f32.mrb[82].mxu0  ;;  %v11018_v22 = vpop.f32.mrb[110].mxu1  ;;  %v18043_v48 = vld [vmem:[#allocation4 + $0xae4] ss:$24 sps:$4 sm:$0xff]  }
0x1e65   :  { %v11015_v3 = vadd.f32 %v11014_v44, %v10974_v17  ;;  %v10978_v21 = vpop.f32.mrb[83].mxu0  ;;  %v11019_v54 = vpop.f32.mrb[111].mxu1  ;;  %11679 = vmatprep.subr.bf16.mxu0 %v18043_v48  ;;  %v18083_v48 = vld [vmem:[#allocation4 + $0x970] ss:$24 sps:$4 sm:$0xff]  }
0x1e66   :  { %v11017_v24 = vadd.f32 %v11016_v55, %v10976_v39  ;;  %11680 = vmatpush1.bf16.msra.mxu0 %v18041_v43  ;;  %v18044_v21 = vld [vmem:[#allocation4 + $0xae8] ss:$24 sps:$4 sm:$0xff]   ;;  %v18049_v54 = vld [vmem:[#allocation4 + $0xb14] ss:$24 sps:$4 sm:$0xff]   ;;  %v18088_v43 = vld [vmem:[#allocation4 + $0x9a4] ss:$24 sps:$4 sm:$0xff]  }
0x1e67   :  { %v19299_v1 = vadd.f32 %v11015_v3, %v19247_v51  ;;  %v17990_v51 = vld [vmem:[#allocation4 + $0x938] ss:$24 sps:$4 sm:$0xff]   ;;  %v18046_v3 = vld [vmem:[#allocation4 + $0xaec] ss:$24 sps:$4 sm:$0xff]   ;;  %11681 = vmatprep.subr.bf16.mxu0 %v18049_v54 }
0x1e68   :  { %v19302_v25 = vadd.f32 %v11017_v24, %v19250_v46  ;;  %v17998_v46 = vld [vmem:[#allocation4 + $0x96c] ss:$24 sps:$4 sm:$0xff]   ;;  %11703 = vmatpush1.bf16.msra.mxu1 %v17990_v51  ;;  %v18047_v24 = vld [vmem:[#allocation4 + $0xb10] ss:$24 sps:$4 sm:$0xff]  }
0x1e69   :  { %11704 = vmatprep.subr.bf16.mxu1 %v17998_v46  ;;  %v18059_v51 = vld [vmem:[#allocation4 + $0xb70] ss:$24 sps:$4 sm:$0xff]   ;;  %v18067_v46 = vld [vmem:[#allocation4 + $0xba4] ss:$24 sps:$4 sm:$0xff]   ;;  %v18103_v54 = vld [vmem:[#allocation4 + $0xa94] ss:$24 sps:$4 sm:$0xff]  }
0x1e6a   :  { %v11044_v26 = vadd.f32 %v19302_v25, %v19299_v1  ;;  %11682 = vmatpush1.bf16.msra.mxu0 %v18047_v24  ;;  %v18101_v24 = vld [vmem:[#allocation4 + $0xa90] ss:$24 sps:$4 sm:$0xff]  }
0x1e6b   :  { %11683 = vmatprep.subr.bf16.mxu0 %v18055_v29  ;;  %v18107_v29 = vld [vmem:[#allocation4 + $0xaf0] ss:$24 sps:$4 sm:$0xff]  }
0x1e6c   :  { %11045 = vadd.xlane.f32.xlu1 %v11044_v26  ;;  %11705 = vmatpush1.bf16.msra.mxu1 %v17996_v10  ;;  %v18052_v26 = vld [vmem:[#allocation4 + $0xb1c] ss:$24 sps:$4 sm:$0xff]   ;;  %v18065_v10 = vld [vmem:[#allocation4 + $0xba0] ss:$24 sps:$4 sm:$0xff]  }
0x1e6d   :  { %11706 = vmatprep.subr.bf16.mxu1 %v18004_v34  ;;  %v18073_v34 = vld [vmem:[#allocation4 + $0xbd4] ss:$24 sps:$4 sm:$0xff]  }
0x1e6e   :  { %11684 = vmatpush1.bf16.msra.mxu0 %v18053_v28  ;;  %v18109_v28 = vld [vmem:[#allocation4 + $0xaf4] ss:$24 sps:$4 sm:$0xff]  }
0x1e6f   :  { %11685 = vmatprep.subr.bf16.mxu0 %v18061_v12  ;;  %v18115_v12 = vld [vmem:[#allocation4 + $0xb54] ss:$24 sps:$4 sm:$0xff]  }
0x1e70   :  { %11707 = vmatpush1.bf16.msra.mxu1 %v18002_v38  ;;  %v18071_v38 = vld [vmem:[#allocation4 + $0xbd0] ss:$24 sps:$4 sm:$0xff]  }
0x1e71   :  { %11708 = vmatprep.subr.bf16.mxu1 %v18010_v20  ;;  %v18079_v20 = vld [vmem:[#allocation4 + $0x914] ss:$24 sps:$4 sm:$0xff]  }
0x1e72   :  { %11686 = vmatpush1.bf16.msra.mxu0 %v18059_v51  ;;  %v18118_v51 = vld [vmem:[#allocation4 + $0xb84] ss:$24 sps:$4 sm:$0xff]  }
0x1e73   :  { %11687 = vmatprep.subr.bf16.mxu0 %v18067_v46  ;;  %v18121_v46 = vld [vmem:[#allocation4 + $0xbb4] ss:$24 sps:$4 sm:$0xff]  }
0x1e74   :  { %11709 = vmatpush1.bf16.msra.mxu1 %v18008_v40 }
0x1e75   :  { %11710 = vmatprep.subr.bf16.mxu1 %v18016_v53  ;;  %v19313_v53 = vld [vmem:[#allocation2 + $0x68] sm:$0xff] }
0x1e76   :  { %11688 = vmatpush1.bf16.msra.mxu0 %v18065_v10  ;;  %v18124_v10 = vld [vmem:[#allocation4 + $0xbe4] ss:$24 sps:$4 sm:$0xff]  }
0x1e77   :  { %11689 = vmatprep.subr.bf16.mxu0 %v18073_v34 }
0x1e78   :  { %11711 = vmatpush1.bf16.msra.mxu1 %v18014_v62  ;;  %v11067_v62 = vrot.slane %v19313_v53, %v18831_v18 }
0x1e79   :  { %11712 = vmatprep.subr.bf16.mxu1 %v18022_v6 }
0x1e7a   :  { %11690 = vmatpush1.bf16.msra.mxu0 %v18071_v38 }
0x1e7b   :  { %11741 = vmatprep.subr.bf16.mxu0 %v18079_v20 }
0x1e7c   :  { %11713 = vmatpush1.bf16.msra.mxu1 %v18020_v8  ;;  %v11077_v8 = vrot.slane %v19313_v53, %v18834_v19 }
0x1e7d   :  { %11714 = vmatprep.subr.bf16.mxu1 %v18028_v5  ;;  %v11073_v5 = vrot.slane %v19315_v60, %v18834_v19 }
0x1e80   :  { %11715 = vmatpush1.bf16.msra.mxu1 %v18026_v47 }
0x1e81   :  { %11716 = vmatprep.subr.bf16.mxu1 %v18034_v2 }
0x1e84   :  { %11717 = vmatpush1.bf16.msra.mxu1 %v18032_v45  ;;  %v18077_v45 = vld [vmem:[#allocation4 + $0x910] ss:$24 sps:$4 sm:$0xff]  }
0x1e85   :  { %11718 = vmatprep.subr.bf16.mxu1 %v18040_v59  ;;  %v18082_v59 = vld [vmem:[#allocation4 + $0x944] ss:$24 sps:$4 sm:$0xff]  }
0x1e88   :  { %11719 = vmatpush1.bf16.msra.mxu1 %v18038_v16  ;;  %v18085_v16 = vld [vmem:[#allocation4 + $0x974] ss:$24 sps:$4 sm:$0xff]  }
0x1e89   :  { %11720 = vmatprep.subr.bf16.mxu1 %v18046_v3  ;;  %v18100_v3 = vld [vmem:[#allocation4 + $0xa64] ss:$24 sps:$4 sm:$0xff]  }
0x1e8c   :  { %11721 = vmatpush1.bf16.msra.mxu1 %v18044_v21  ;;  %v18098_v21 = vld [vmem:[#allocation4 + $0xa60] ss:$24 sps:$4 sm:$0xff]  }
0x1e8d   :  { %11722 = vmatprep.subr.bf16.mxu1 %v18052_v26  ;;  %v18106_v26 = vld [vmem:[#allocation4 + $0xac4] ss:$24 sps:$4 sm:$0xff]  }
0x1e90   :  { %11723 = vmatpush1.bf16.msra.mxu1 %v18050_v27  ;;  %v18104_v27 = vld [vmem:[#allocation4 + $0xac0] ss:$24 sps:$4 sm:$0xff]  }
0x1e91   :  { %11724 = vmatprep.subr.bf16.mxu1 %v18058_v31  ;;  %v18110_v31 = vld [vmem:[#allocation4 + $0xb20] ss:$24 sps:$4 sm:$0xff]  }
0x1e94   :  { %11725 = vmatpush1.bf16.msra.mxu1 %v18056_v30  ;;  %v18112_v30 = vld [vmem:[#allocation4 + $0xb24] ss:$24 sps:$4 sm:$0xff]  }
0x1e95   :  { %11726 = vmatprep.subr.bf16.mxu1 %v18064_v9  ;;  %v18113_v9 = vld [vmem:[#allocation4 + $0xb50] ss:$24 sps:$4 sm:$0xff]  }
0x1e98   :  { %11727 = vmatpush1.bf16.msra.mxu1 %v18062_v32  ;;  %v18116_v32 = vld [vmem:[#allocation4 + $0xb80] ss:$24 sps:$4 sm:$0xff]  }
0x1e99   :  { %11728 = vmatprep.subr.bf16.mxu1 %v18070_v49  ;;  %v18119_v49 = vld [vmem:[#allocation4 + $0xbb0] ss:$24 sps:$4 sm:$0xff]  }
0x1e9c   :  { %11729 = vmatpush1.bf16.msra.mxu1 %v18068_v33  ;;  %v18122_v33 = vld [vmem:[#allocation4 + $0xbe0] ss:$24 sps:$4 sm:$0xff]  }
0x1e9d   :  { %11730 = vmatprep.subr.bf16.mxu1 %v18076_v35 }
0x1ea0   :  { %11731 = vmatpush1.bf16.msra.mxu1 %v18074_v37 }
0x1ea1   :  { %16752 = vmatprep.subr.mxu1 %v18670_v0 }
0x1ef9   :  { %v11046_v44 = vpop.xlane.xlu1 %11045 }
0x1efa   :  { %v11047_v17 = vmul.f32 0.00390625, %v11046_v44  ;;  %v18086_v44 = vld [vmem:[#allocation4 + $0x9a0] ss:$24 sps:$4 sm:$0xff]  }
0x1efc   :  { %v19307_v42 = vsub.f32 %v19299_v1, %v11047_v17  ;;  %v11049_v55 = vsub.f32 %v19302_v25, %v11047_v17  ;;  %v18091_v17 = vld [vmem:[#allocation4 + $0x9d4] ss:$24 sps:$4 sm:$0xff]  }
0x1efe   :  { %v11050_v39 = vmul.f32 %v19307_v42, %v19307_v42  ;;  %v11051_v23 = vmul.f32 %v11049_v55, %v11049_v55 }
0x1f00   :  { %v11052_v22 = vadd.f32 %v11051_v23, %v11050_v39  ;;  %v18092_v39 = vld [vmem:[#allocation4 + $0xa00] ss:$24 sps:$4 sm:$0xff]   ;;  %v18097_v23 = vld [vmem:[#allocation4 + $0xa34] ss:$24 sps:$4 sm:$0xff]  }
0x1f02   :  { %11053 = vadd.xlane.f32.xlu1 %v11052_v22  ;;  %v18095_v22 = vld [vmem:[#allocation4 + $0xa30] ss:$24 sps:$4 sm:$0xff]  }
0x1f8f   :  { %v11054_v14 = vpop.xlane.xlu1 %11053 }
0x1f90   :  { %v11055_v40 = vmul.f32 0.00390625, %v11054_v14 }
0x1f92   :  { %v11056_v41 = vadd.f32 1e-05, %v11055_v40 }
0x1f94   :  { %18473 = vrsqrt.f32 %v11056_v41 }
0x1f9e   :  { %v18474_v6 = vpop.eup %18473 }
0x1f9f   :  { %v11059_v7 = vmul.f32 %v18474_v6, %v11049_v55  ;;  %v11058_v56 = vmul.f32 %v18474_v6, %v19307_v42  ;;  %v18089_v42 = vld [vmem:[#allocation4 + $0x9d0] ss:$24 sps:$4 sm:$0xff]   ;;  %v18094_v55 = vld [vmem:[#allocation4 + $0xa04] ss:$24 sps:$4 sm:$0xff]  }
0x1fa1   :  { %v11069_v11 = vmul.f32 %v11067_v62, %v11059_v7  ;;  %v11068_v47 = vmul.f32 %v11063_v4, %v11058_v56 }
0x1fa3   :  { %v11079_v15 = vadd.f32 %v11077_v8, %v11069_v11  ;;  %v11078_v2 = vadd.f32 %v11073_v5, %v11068_v47 }
0x1fa5   :  { %v11081_v13 = vpack.c.bf16 %v11079_v15, %v11079_v15  ;;  %v19326_v50 = vpack.c.bf16 %v11078_v2, %v11078_v2 }
0x1fa7   :  { %11691 = vmatprep.mubr.bf16.mxu0 %v11081_v13  ;;  %11732 = vmatprep.mubr.bf16.mxu1 %v11081_v13 }
0x1fa8   :  { %11692 = vmatmul.mubr.bf16.vlgmr.msra.gmra.mrb[84].mxu0 %v19326_v50  ;;  %11733 = vmatmul.mubr.bf16.vlgmr.msra.gmra.mrb[112].mxu1 %v19326_v50 }
0x1fa9   :  { %11742 = vmatpush1.bf16.msra.mxu0 %v18077_v45  ;;  %11773 = vmatprep.mubr.bf16.mxu0 %v11081_v13 }
0x1faa   :  { %11743 = vmatprep.subr.bf16.mxu0 %v18082_v59  ;;  %16754 = vmatprep.mubr.msk.f32.mxu1 %vm18671_vm0, %v18670_v0 }
0x1fad   :  { %11744 = vmatpush1.bf16.msra.mxu0 %v18080_v61 }
0x1fae   :  { %11745 = vmatprep.subr.bf16.mxu0 %v18085_v16  ;;  %v18511_v16 = vld [vmem:[%s19461_s1] sm:$0xff] }
0x1fb1   :  { %11746 = vmatpush1.bf16.msra.mxu0 %v18083_v48 }
0x1fb2   :  { %11747 = vmatprep.subr.bf16.mxu0 %v18088_v43 }
0x1fb5   :  { %11748 = vmatpush1.bf16.msra.mxu0 %v18086_v44 }
0x1fb6   :  { %11749 = vmatprep.subr.bf16.mxu0 %v18091_v17 }
0x1fb9   :  { %11750 = vmatpush1.bf16.msra.mxu0 %v18089_v42 }
0x1fba   :  { %11751 = vmatprep.subr.bf16.mxu0 %v18094_v55 }
0x1fbd   :  { %11752 = vmatpush1.bf16.msra.mxu0 %v18092_v39 }
0x1fbe   :  { %11753 = vmatprep.subr.bf16.mxu0 %v18097_v23 }
0x1fc1   :  { %11754 = vmatpush1.bf16.msra.mxu0 %v18095_v22 }
0x1fc2   :  { %11755 = vmatprep.subr.bf16.mxu0 %v18100_v3 }
0x1fc5   :  { %11756 = vmatpush1.bf16.msra.mxu0 %v18098_v21 }
0x1fc6   :  { %11757 = vmatprep.subr.bf16.mxu0 %v18103_v54 }
0x1fc9   :  { %11758 = vmatpush1.bf16.msra.mxu0 %v18101_v24 }
0x1fca   :  { %11759 = vmatprep.subr.bf16.mxu0 %v18106_v26 }
0x1fcd   :  { %11760 = vmatpush1.bf16.msra.mxu0 %v18104_v27 }
0x1fce   :  { %11761 = vmatprep.subr.bf16.mxu0 %v18109_v28 }
0x1fd1   :  { %11762 = vmatpush1.bf16.msra.mxu0 %v18107_v29 }
0x1fd2   :  { %11763 = vmatprep.subr.bf16.mxu0 %v18112_v30 }
0x1fd5   :  { %11764 = vmatpush1.bf16.msra.mxu0 %v18110_v31 }
0x1fd6   :  { %11765 = vmatprep.subr.bf16.mxu0 %v18115_v12 }
0x1fd9   :  { %11766 = vmatpush1.bf16.msra.mxu0 %v18113_v9 }
0x1fda   :  { %11767 = vmatprep.subr.bf16.mxu0 %v18118_v51 }
0x1fdd   :  { %11768 = vmatpush1.bf16.msra.mxu0 %v18116_v32 }
0x1fde   :  { %11769 = vmatprep.subr.bf16.mxu0 %v18121_v46 }
0x1fe1   :  { %11770 = vmatpush1.bf16.msra.mxu0 %v18119_v49 }
0x1fe2   :  { %11771 = vmatprep.subr.bf16.mxu0 %v18124_v10 }
0x1fe5   :  { %11772 = vmatpush1.bf16.msra.mxu0 %v18122_v33 }
0x1fe6   :  { %16757 = vmatprep.subr.mxu0 %v18670_v0 }
0x1fe8   :  { %11774 = vmatmul.mubr.bf16.vlgmr.msra.gmra.mrb[88].mxu0 %v19326_v50 }
0x1fe9   :  { %16759 = vmatprep.mubr.msk.f32.mxu0 %vm18671_vm0, %v18670_v0 }
0x207b   :  { %v11693_v34 = vpop.f32.mrb[84].mxu0  ;;  %v11734_v35 = vpop.f32.mrb[112].mxu1 }
0x207c   :  { %11789 = vrot.lane.b32.xlu1 %v11734_v35, %s18672_s7  ;;  %v11736_v38 = vpop.f32.mrb[113].mxu1  ;;  %16753 = vmatpush3.xpose.msk.msra.mxu1 %vm892_vm1, %v11734_v35  ;;  %v11695_v37 = vpop.f32.mrb[85].mxu0 }
0x207d   :  { %11783 = vrot.lane.b32.xlu0 %v11693_v34, %s18672_s7  ;;  %v11697_v20 = vpop.f32.mrb[86].mxu0  ;;  %v11738_v14 = vpop.f32.mrb[114].mxu1  ;;  %16762 = vmatprep.subr.mxu1 %v18670_v0 }
0x207e   :  { %v11698_v40 = vpop.f32.mrb[87].mxu0  ;;  %v11739_v41 = vpop.f32.mrb[115].mxu1 }
0x207f   :  { %16755 = vmatmul.mubr.msk.f32.vlgmr.msra.gmra.mrb[90].mxu1 %vm892_vm1, %v11693_v34 }
0x2080   :  { %16763 = vmatpush3.xpose.msk.msra.mxu1 %vm892_vm1, %v11736_v38  ;;  %16764 = vmatprep.mubr.msk.f32.mxu1 %vm18671_vm0, %v18670_v0 }
0x2081   :  { %11792 = vrot.lane.b32.xlu0 %v11736_v38, %s18672_s7  ;;  %16772 = vmatprep.subr.mxu1 %v18670_v0 }
0x2083   :  { %16765 = vmatmul.mubr.msk.f32.vlgmr.msra.gmra.mrb[116].mxu1 %vm892_vm1, %v11695_v37 }
0x2084   :  { %16774 = vmatprep.mubr.msk.f32.mxu1 %vm18671_vm0, %v18670_v0 }
0x2085   :  { %11786 = vrot.lane.b32.xlu0 %v11695_v37, %s18672_s7 }
0x20bb   :  { %v11775_v62 = vpop.f32.mrb[88].mxu0 }
0x20bc   :  { %v19350_v4 = vpop.f32.mrb[89].mxu0  ;;  %16773 = vmatpush3.msra.mxu1 %v11775_v62 }
0x20bd   :  { %v11779_v6 = vpop.f32.mrb[90].mxu0  ;;  %16782 = vmatprep.subr.mxu1 %v18670_v0 }
0x20be   :  { %v11780_v7 = vpop.f32.mrb[91].mxu0 }
0x20ee   :  { %v11790_v8 = vpop.permute.xlu1 %11789 }
0x20ef   :  { %v11784_v56 = vpop.permute.xlu0 %11783  ;;  %16758 = vmatpush3.xpose.msk.msra.mxu0 %vm892_vm1, %v11790_v8 }
0x20f0   :  { %16767 = vmatprep.subr.mxu0 %v18670_v0 }
0x20f2   :  { %16760 = vmatmul.mubr.msk.f32.vlgmr.msra.gmra.mrb[66].mxu0 %vm892_vm1, %v11784_v56 }
0x20f3   :  { %v11793_v5 = vpop.permute.xlu0 %11792  ;;  %16769 = vmatprep.mubr.msk.f32.mxu0 %vm18671_vm0, %v18670_v0 }
0x20f4   :  { %16768 = vmatpush3.xpose.msk.msra.mxu0 %vm892_vm1, %v11793_v5 }
0x20f5   :  { %16777 = vmatprep.subr.mxu0 %v18670_v0 }
0x20f7   :  { %v11787_v11 = vpop.permute.xlu0 %11786 }
0x20f8   :  { %16770 = vmatmul.mubr.msk.f32.vlgmr.msra.gmra.mrb[92].mxu0 %vm892_vm1, %v11787_v11 }
0x20f9   :  { %16779 = vmatprep.mubr.msk.f32.mxu0 %vm18671_vm0, %v18670_v0 }
0x2152   :  { %v11872_v47 = vpop.f32.mrb[90].mxu1 }
0x2153   :  { %v16756_v15 = vpop.f32.mrb[91].mxu1  ;;  %v12098_v50 = vmul.f32 0.0625, %v11872_v47 }
0x2155   :  { %v12102_v17 = vadd.f32 %v18511_v16, %v12098_v50  ;;  %v18127_v50 = vld [vmem:[#allocation6 + $0x304] ss:$8 sps:$4 sm:$0xff]  }
0x2156   :  { %v12020_v2 = vpop.f32.mrb[116].mxu1 }
0x2157   :  { %v16766_v13 = vpop.f32.mrb[117].mxu1  ;;  %v12100_v43 = vmul.f32 0.0625, %v12020_v2  ;;  %v12106_v23 = vsel %vm1197_vm2, %v12102_v17, -inf }
0x2159   :  { %v12104_v3 = vadd.f32 %v18511_v16, %v12100_v43  ;;  %v18136_v43 = vld [vmem:[#allocation6 + $0x334] ss:$8 sps:$4 sm:$0xff]  }
0x215b   :  { %v12112_v54 = vsel %vm1197_vm2, %v12104_v3, -inf }
0x21c5   :  { %v11946_v45 = vpop.f32.mrb[66].mxu0 }
0x21c6   :  { %v12099_v59 = vmul.f32 0.0625, %v11946_v45  ;;  %v16761_v61 = vpop.f32.mrb[67].mxu0  ;;  %v18125_v45 = vld [vmem:[#allocation6 + $0x300] ss:$8 sps:$4 sm:$0xff]  }
0x21c7   :  { %v18128_v61 = vld [vmem:[#allocation6 + $0x310] ss:$8 sps:$4 sm:$0xff]  }
0x21c8   :  { %v12103_v48 = vadd.f32 %v18511_v16, %v12099_v59  ;;  %v18130_v59 = vld [vmem:[#allocation6 + $0x314] ss:$8 sps:$4 sm:$0xff]  }
0x21ca   :  { %v12109_v44 = vsel %vm1197_vm2, %v12103_v48, -inf }
0x21cb   :  { %v12094_v42 = vpop.f32.mrb[92].mxu0  ;;  %12110 = vmax.xlane.f32.xlu0 %v12109_v44  ;;  %v18137_v44 = vld [vmem:[#allocation6 + $0x340] ss:$8 sps:$4 sm:$0xff]  }
0x21cc   :  { %v12101_v55 = vmul.f32 0.0625, %v12094_v42  ;;  %v16771_v39 = vpop.f32.mrb[93].mxu0  ;;  %v18140_v42 = vld [vmem:[#allocation6 + $0x350] ss:$8 sps:$4 sm:$0xff]  }
0x21cd   :  { %v18143_v39 = vld [vmem:[#allocation6 + $0x360] ss:$8 sps:$4 sm:$0xff]  }
0x21ce   :  { %v12105_v22 = vadd.f32 %v18511_v16, %v12101_v55  ;;  %v18133_v16 = vld [vmem:[#allocation6 + $0x324] ss:$8 sps:$4 sm:$0xff]  }
0x21cf   :  { %12107 = vmax.xlane.f32.xlu0 %v12106_v23  ;;  %v18145_v55 = vld [vmem:[#allocation6 + $0x364] ss:$8 sps:$4 sm:$0xff]   ;;  %v18148_v23 = vld [vmem:[#allocation6 + $0x374] ss:$8 sps:$4 sm:$0xff]  }
0x21d0   :  { %v12115_v21 = vsel %vm1197_vm2, %v12105_v22, -inf }
0x21d1   :  { %12116 = vmax.xlane.f32.xlu1 %v12115_v21  ;;  %v18149_v21 = vld [vmem:[#allocation6 + $0x380] ss:$8 sps:$4 sm:$0xff]  }
0x21d3   :  { %12113 = vmax.xlane.f32.xlu0 %v12112_v54  ;;  %v18154_v54 = vld [vmem:[#allocation6 + $0x394] ss:$8 sps:$4 sm:$0xff]  }
0x2258   :  { %v12111_v24 = vpop.xlane.xlu0 %12110 }
0x2259   :  { %v12119_v26 = vsub.f32 %v12103_v48, %v12111_v24  ;;  %v18131_v48 = vld [vmem:[#allocation6 + $0x320] ss:$8 sps:$4 sm:$0xff]   ;;  %v18152_v24 = vld [vmem:[#allocation6 + $0x390] ss:$8 sps:$4 sm:$0xff]  }
0x225b   :  { %v12124_v27 = vmul.f32 1.442695, %v12119_v26  ;;  %v18157_v26 = vld [vmem:[#allocation6 + $0x3a4] ss:$8 sps:$4 sm:$0xff]  }
0x225c   :  { %v12108_v32 = vpop.xlane.xlu0 %12107 }
0x225d   :  { %18475 = vpow2.f32 %v12124_v27  ;;  %v12118_v46 = vsub.f32 %v12102_v17, %v12108_v32  ;;  %v18142_v17 = vld [vmem:[#allocation6 + $0x354] ss:$8 sps:$4 sm:$0xff]   ;;  %v18155_v27 = vld [vmem:[#allocation6 + $0x3a0] ss:$8 sps:$4 sm:$0xff]  }
0x225e   :  { %v12117_v28 = vpop.xlane.xlu1 %12116  ;;  %v18167_v32 = vld [vmem:[#allocation6 + $0x3e0] ss:$8 sps:$4 sm:$0xff]  }
0x225f   :  { %v12121_v29 = vsub.f32 %v12105_v22, %v12117_v28  ;;  %v12122_v10 = vmul.f32 1.442695, %v12118_v46  ;;  %v18146_v22 = vld [vmem:[#allocation6 + $0x370] ss:$8 sps:$4 sm:$0xff]   ;;  %v18160_v28 = vld [vmem:[#allocation6 + $0x3b4] ss:$8 sps:$4 sm:$0xff]  }
0x2260   :  { %v12114_v49 = vpop.xlane.xlu0 %12113  ;;  %v18172_v46 = vld [vmem:[#allocation6 + $0x3f4] ss:$8 sps:$4 sm:$0xff]  }
0x2261   :  { %v12128_v30 = vmul.f32 1.442695, %v12121_v29  ;;  %v12120_v33 = vsub.f32 %v12104_v3, %v12114_v49  ;;  %v18151_v3 = vld [vmem:[#allocation6 + $0x384] ss:$8 sps:$4 sm:$0xff]   ;;  %v18158_v29 = vld [vmem:[#allocation6 + $0x3b0] ss:$8 sps:$4 sm:$0xff]  }
0x2262   :  { %v18170_v49 = vld [vmem:[#allocation6 + $0x3f0] ss:$8 sps:$4 sm:$0xff]  }
0x2263   :  { %18477 = vpow2.f32 %v12128_v30  ;;  %v12126_v34 = vmul.f32 1.442695, %v12120_v33  ;;  %v18163_v30 = vld [vmem:[#allocation6 + $0x3c4] ss:$8 sps:$4 sm:$0xff]  }
0x2264   :  { %18479 = vpow2.f32 %v12122_v10 }
0x2265   :  { %18481 = vpow2.f32 %v12126_v34 }
0x2267   :  { %v18476_v31 = vpop.eup %18475 }
0x2268   :  { %v12133_v12 = vsel %vm1197_vm2, %v18476_v31, 0.0 }
0x2269   :  { %12134 = vadd.xlane.f32.xlu1 %v12133_v12  ;;  %v18166_v12 = vld [vmem:[#allocation6 + $0x3d4] ss:$8 sps:$4 sm:$0xff]  }
0x226d   :  { %v18478_v9 = vpop.eup %18477 }
0x226e   :  { %v12139_v51 = vsel %vm1197_vm2, %v18478_v9, 0.0  ;;  %v18480_v35 = vpop.eup %18479 }
0x226f   :  { %12140 = vadd.xlane.f32.xlu0 %v12139_v51  ;;  %v12130_v38 = vsel %vm1197_vm2, %v18480_v35, 0.0  ;;  %v18482_v37 = vpop.eup %18481  ;;  %v18169_v51 = vld [vmem:[#allocation6 + $0x3e4] ss:$8 sps:$4 sm:$0xff]  }
0x2270   :  { %v12136_v20 = vsel %vm1197_vm2, %v18482_v37, 0.0 }
0x227a   :  { %11795 = vrot.lane.b32.xlu1 %v11775_v62, %s18672_s7 }
0x2285   :  { %11799 = vrot.lane.b32.xlu0 %v19350_v4, %s18672_s7 }
0x229e   :  { %12131 = vadd.xlane.f32.xlu1 %v12130_v38 }
0x22a4   :  { %12137 = vadd.xlane.f32.xlu0 %v12136_v20 }
0x22f6   :  { %v12135_v14 = vpop.xlane.xlu1 %12134 }
0x22f7   :  { %18483 = vrcp.f32 %v12135_v14 }
0x22fa   :  { %v11796_v40 = vpop.permute.xlu1 %11795 }
0x22fb   :  { %16778 = vmatpush3.msra.mxu0 %v11796_v40 }
0x22fc   :  { %v12141_v41 = vpop.xlane.xlu0 %12140  ;;  %16787 = vmatprep.subr.mxu0 %v18670_v0 }
0x22fd   :  { %18485 = vrcp.f32 %v12141_v41 }
0x2300   :  { %v11800_v7 = vpop.permute.xlu0 %11799 }
0x2301   :  { %v18484_v62 = vpop.eup %18483 }
0x2302   :  { %v12147_v6 = vmul.f32 %v18484_v62, %v18476_v31  ;;  %v18161_v31 = vld [vmem:[#allocation6 + $0x3c0] ss:$8 sps:$4 sm:$0xff]  }
0x2304   :  { %16780 = vmatmul.mubr.msk.f32.vlgmr.msra.gmra.mrb[94].mxu0 %vm1197_vm2, %v12147_v6 }
0x2305   :  { %16788 = vmatpush3.msra.mxu0 %v11800_v7  ;;  %16789 = vmatprep.mubr.msk.f32.mxu0 %vm18671_vm0, %v18670_v0 }
0x2307   :  { %v18486_v8 = vpop.eup %18485 }
0x2308   :  { %v12149_v56 = vmul.f32 %v18486_v8, %v18478_v9  ;;  %v18164_v9 = vld [vmem:[#allocation6 + $0x3d0] ss:$8 sps:$4 sm:$0xff]  }
0x230a   :  { %16790 = vmatmul.mubr.msk.f32.vlgmr.msra.gmra.mrb[96].mxu0 %vm1197_vm2, %v12149_v56 }
0x232b   :  { %v12132_v5 = vpop.xlane.xlu1 %12131 }
0x232c   :  { %18487 = vrcp.f32 %v12132_v5 }
0x2331   :  { %v12138_v11 = vpop.xlane.xlu0 %12137 }
0x2332   :  { %18489 = vrcp.f32 %v12138_v11  ;;  %v12490_v11 = vrot.slane %v19315_v60, %v18915_v63  ;;  %v12737_v60 = vld [vmem:[#allocation7 + $0xc00] sm:$0xff] }
0x2336   :  { %v18488_v47 = vpop.eup %18487 }
0x2337   :  { %v12146_v15 = vmul.f32 %v18488_v47, %v18480_v35  ;;  %v12494_v47 = vrot.slane %v19313_v53, %v18915_v63 }
0x2339   :  { %16775 = vmatmul.mubr.msk.f32.vlgmr.msra.gmra.mrb[118].mxu1 %vm1197_vm2, %v12146_v15 }
0x233a   :  { %16783 = vmatpush3.msra.mxu1 %v19350_v4  ;;  %16784 = vmatprep.mubr.msk.f32.mxu1 %vm18671_vm0, %v18670_v0  ;;  %v18134_v4 = vld [vmem:[#allocation6 + $0x330] ss:$8 sps:$4 sm:$0xff]   ;;  %v18139_v0 = vld [vmem:[#allocation6 + $0x344] ss:$8 sps:$4 sm:$0xff]  }
0x233b   :  { %12655 = vmatprep.subr.bf16.mxu1 %v18127_v50 }
0x233c   :  { %v18490_v2 = vpop.eup %18489 }
0x233d   :  { %v12148_v13 = vmul.f32 %v18490_v2, %v18482_v37 }
0x233f   :  { %16785 = vmatmul.mubr.msk.f32.vlgmr.msra.gmra.mrb[120].mxu1 %vm1197_vm2, %v12148_v13 }
0x2340   :  { %12656 = vmatpush1.bf16.msra.mxu1 %v18125_v45 }
0x2341   :  { %12657 = vmatprep.subr.bf16.mxu1 %v18130_v59 }
0x2344   :  { %12658 = vmatpush1.bf16.msra.mxu1 %v18128_v61 }
0x2345   :  { %12659 = vmatprep.subr.bf16.mxu1 %v18133_v16 }
0x2348   :  { %12660 = vmatpush1.bf16.msra.mxu1 %v18131_v48 }
0x2349   :  { %12661 = vmatprep.subr.bf16.mxu1 %v18136_v43  ;;  %v12741_v43 = vld [vmem:[#allocation7 + $0xc20] sm:$0xff] }
0x234a   :  { %v16280_v53 = vcombine.low %v12737_v60, %v12741_v43 }
0x234c   :  { %12662 = vmatpush1.bf16.msra.mxu1 %v18134_v4  ;;  %v12738_v4 = vld [vmem:[#allocation7 + $0xc08] sm:$0xff] }
0x234d   :  { %12663 = vmatprep.subr.bf16.mxu1 %v18139_v0  ;;  %v16281_v0 = vcombine.high %v12737_v60, %v12741_v43  ;;  %v12797_v60 = vld [vmem:[#allocation7 + $0xde0] sm:$0xff]  ;;  %v12794_v43 = vld [vmem:[#allocation7 + $0xdc8] sm:$0xff] }
0x234f   :  { %13537 = vmatprep.subr.bf16.mxu0 %v16281_v0 }
0x2350   :  { %12664 = vmatpush1.bf16.msra.mxu1 %v18137_v44  ;;  %v12742_v44 = vld [vmem:[#allocation7 + $0xc28] sm:$0xff]  ;;  %13538 = vmatpush1.bf16.msra.mxu0 %v16280_v53 }
0x2351   :  { %12665 = vmatprep.subr.bf16.mxu1 %v18142_v17  ;;  %v12745_v17 = vld [vmem:[#allocation7 + $0xc40] sm:$0xff] }
0x2354   :  { %12666 = vmatpush1.bf16.msra.mxu1 %v18140_v42  ;;  %v12749_v42 = vld [vmem:[#allocation7 + $0xc60] sm:$0xff] }
0x2355   :  { %12667 = vmatprep.subr.bf16.mxu1 %v18145_v55  ;;  %v16282_v55 = vcombine.low %v12738_v4, %v12742_v44 }
0x2358   :  { %12668 = vmatpush1.bf16.msra.mxu1 %v18143_v39  ;;  %v16283_v39 = vcombine.high %v12738_v4, %v12742_v44  ;;  %v12798_v4 = vld [vmem:[#allocation7 + $0xde8] sm:$0xff] }
0x2359   :  { %12669 = vmatprep.subr.bf16.mxu1 %v18148_v23  ;;  %v12746_v23 = vld [vmem:[#allocation7 + $0xc48] sm:$0xff] }
0x235c   :  { %12670 = vmatpush1.bf16.msra.mxu1 %v18146_v22  ;;  %v12750_v22 = vld [vmem:[#allocation7 + $0xc68] sm:$0xff] }
0x235d   :  { %12671 = vmatprep.subr.bf16.mxu1 %v18151_v3  ;;  %v12753_v3 = vld [vmem:[#allocation7 + $0xc80] sm:$0xff] }
0x2360   :  { %12672 = vmatpush1.bf16.msra.mxu1 %v18149_v21  ;;  %v12757_v21 = vld [vmem:[#allocation7 + $0xca0] sm:$0xff] }
0x2361   :  { %12673 = vmatprep.subr.bf16.mxu1 %v18154_v54  ;;  %v12754_v54 = vld [vmem:[#allocation7 + $0xc88] sm:$0xff] }
0x2364   :  { %12674 = vmatpush1.bf16.msra.mxu1 %v18152_v24  ;;  %v12758_v24 = vld [vmem:[#allocation7 + $0xca8] sm:$0xff] }
0x2365   :  { %12675 = vmatprep.subr.bf16.mxu1 %v18157_v26  ;;  %v16288_v26 = vcombine.low %v12745_v17, %v12749_v42 }
0x2368   :  { %12676 = vmatpush1.bf16.msra.mxu1 %v18155_v27  ;;  %v16290_v27 = vcombine.low %v12746_v23, %v12750_v22 }
0x2369   :  { %12677 = vmatprep.subr.bf16.mxu1 %v18160_v28  ;;  %v16297_v28 = vcombine.high %v12753_v3, %v12757_v21 }
0x236c   :  { %12678 = vmatpush1.bf16.msra.mxu1 %v18158_v29  ;;  %v16299_v29 = vcombine.high %v12754_v54, %v12758_v24 }
0x236d   :  { %12679 = vmatprep.subr.bf16.mxu1 %v18163_v30  ;;  %v12761_v30 = vld [vmem:[#allocation7 + $0xcc0] sm:$0xff] }
0x2370   :  { %12680 = vmatpush1.bf16.msra.mxu1 %v18161_v31  ;;  %v12765_v31 = vld [vmem:[#allocation7 + $0xce0] sm:$0xff] }
0x2371   :  { %12681 = vmatprep.subr.bf16.mxu1 %v18166_v12  ;;  %v12762_v12 = vld [vmem:[#allocation7 + $0xcc8] sm:$0xff] }
0x2374   :  { %12682 = vmatpush1.bf16.msra.mxu1 %v18164_v9  ;;  %v12766_v9 = vld [vmem:[#allocation7 + $0xce8] sm:$0xff] }
0x2375   :  { %12683 = vmatprep.subr.bf16.mxu1 %v18169_v51  ;;  %v16296_v51 = vcombine.low %v12753_v3, %v12757_v21  ;;  %v12809_v21 = vld [vmem:[#allocation7 + $0xe40] sm:$0xff] }
0x2378   :  { %12684 = vmatpush1.bf16.msra.mxu1 %v18167_v32  ;;  %v16298_v32 = vcombine.low %v12754_v54, %v12758_v24  ;;  %v12813_v54 = vld [vmem:[#allocation7 + $0xe60] sm:$0xff]  ;;  %v12810_v24 = vld [vmem:[#allocation7 + $0xe48] sm:$0xff] }
0x2379   :  { %12685 = vmatprep.subr.bf16.mxu1 %v18172_v46  ;;  %v16305_v46 = vcombine.high %v12761_v30, %v12765_v31 }
0x237c   :  { %12686 = vmatpush1.bf16.msra.mxu1 %v18170_v49  ;;  %v16307_v49 = vcombine.high %v12762_v12, %v12766_v9 }
0x237d   :  { %13578 = vmatprep.subr.bf16.mxu1 %v16283_v39  ;;  %v12802_v39 = vld [vmem:[#allocation7 + $0xe08] sm:$0xff] }
0x23d7   :  { %v12292_v10 = vpop.f32.mrb[94].mxu0 }
0x23d8   :  { %v16781_v33 = vpop.f32.mrb[95].mxu0 }
0x23d9   :  { %v12773_v33 = vld [vmem:[#allocation7 + $0xd20] sm:$0xff] }
0x23dd   :  { %v12438_v34 = vpop.f32.mrb[96].mxu0 }
0x23de   :  { %v16824_v35 = vpack.i.bf16 %v12292_v10, %v12438_v34  ;;  %v16791_v38 = vpop.f32.mrb[97].mxu0  ;;  %v12769_v10 = vld [vmem:[#allocation7 + $0xd00] sm:$0xff]  ;;  %v12770_v34 = vld [vmem:[#allocation7 + $0xd08] sm:$0xff] }
0x23df   :  { %v16304_v38 = vcombine.low %v12761_v30, %v12765_v31  ;;  %v12817_v31 = vld [vmem:[#allocation7 + $0xe80] sm:$0xff] }
0x23e0   :  { %16825 = vrot.lane.b32.xlu1 %v16824_v35, %s18672_s7  ;;  %v12774_v35 = vld [vmem:[#allocation7 + $0xd28] sm:$0xff] }
0x240c   :  { %v12219_v37 = vpop.f32.mrb[118].mxu1 }
0x240d   :  { %v16776_v20 = vpop.f32.mrb[119].mxu1 }
0x240e   :  { %v16313_v20 = vcombine.high %v12769_v10, %v12773_v33 }
0x2412   :  { %v12365_v14 = vpop.f32.mrb[120].mxu1 }
0x2413   :  { %v16786_v40 = vpop.f32.mrb[121].mxu1 }
0x2414   :  { %v12777_v40 = vld [vmem:[#allocation7 + $0xd40] sm:$0xff] }
0x2452   :  { %v16826_v41 = vpop.permute.xlu1 %16825 }
0x2453   :  { %v16828_v62 = vunpack.i.h.bf16 %v16826_v41  ;;  %v16827_v6 = vunpack.i.l.bf16 %v16826_v41  ;;  %v12781_v41 = vld [vmem:[#allocation7 + $0xd60] sm:$0xff] }
0x2455   :  { %v12450_v7 = vsel %vm892_vm1, %v12219_v37, %v16828_v62  ;;  %v12451_v8 = vsel %vm892_vm1, %v12365_v14, %v16827_v6  ;;  %v16306_v37 = vcombine.low %v12762_v12, %v12766_v9  ;;  %v16315_v14 = vcombine.high %v12770_v34, %v12774_v35  ;;  %v12778_v62 = vld [vmem:[#allocation7 + $0xd48] sm:$0xff]  ;;  %v12821_v12 = vld [vmem:[#allocation7 + $0xea0] sm:$0xff] }
0x2456   :  { %v12452_v56 = vpack.c.bf16 %v12450_v7, %v12450_v7  ;;  %v12453_v5 = vpack.c.bf16 %v12451_v8, %v12451_v8  ;;  %v12782_v6 = vld [vmem:[#allocation7 + $0xd68] sm:$0xff]  ;;  %v16312_v7 = vcombine.low %v12769_v10, %v12773_v33  ;;  %v16314_v8 = vcombine.low %v12770_v34, %v12774_v35 }
0x2457   :  { %v12818_v9 = vld [vmem:[#allocation7 + $0xe88] sm:$0xff]  ;;  %v16360_v33 = vcombine.low %v12817_v31, %v12821_v12 }
0x2458   :  { %12687 = vmatprep.mubr.bf16.mxu1 %v12453_v5  ;;  %v16323_v5 = vcombine.high %v12778_v62, %v12782_v6 }
0x2459   :  { %12688 = vmatmul.mubr.bf16.vlgmr.msra.gmra.mrb[124].mxu1 %v12452_v56  ;;  %v16321_v56 = vcombine.high %v12777_v40, %v12781_v41 }
0x245a   :  { %13579 = vmatpush1.bf16.msra.mxu1 %v16282_v55  ;;  %v12805_v55 = vld [vmem:[#allocation7 + $0xe20] sm:$0xff] }
0x252c   :  { %v12689_v15 = vpop.f32.mrb[124].mxu1 }
0x252d   :  { %v12690_v2 = vadd.f32 %v12689_v15, %v12490_v11  ;;  %v12691_v13 = vpop.f32.mrb[125].mxu1  ;;  %v12785_v11 = vld [vmem:[#allocation7 + $0xd80] sm:$0xff]  ;;  %v12786_v15 = vld [vmem:[#allocation7 + $0xd88] sm:$0xff] }
0x252e   :  { %v12692_v45 = vadd.f32 %v12691_v13, %v12494_v47  ;;  %v12693_v50 = vpop.f32.mrb[126].mxu1  ;;  %v12789_v47 = vld [vmem:[#allocation7 + $0xda0] sm:$0xff]  ;;  %v16320_v13 = vcombine.low %v12777_v40, %v12781_v41 }
0x252f   :  { %v19395_v59 = vadd.f32 %v12690_v2, %v19299_v1  ;;  %v12694_v61 = vpop.f32.mrb[127].mxu1  ;;  %v16289_v1 = vcombine.high %v12745_v17, %v12749_v42  ;;  %v12790_v2 = vld [vmem:[#allocation7 + $0xda8] sm:$0xff]  ;;  %v16329_v50 = vcombine.high %v12785_v11, %v12789_v47  ;;  %v16328_v53 = vcombine.low %v12785_v11, %v12789_v47  ;;  %v12801_v42 = vld [vmem:[#allocation7 + $0xe00] sm:$0xff] }
0x2530   :  { %v19398_v16 = vadd.f32 %v12692_v45, %v19302_v25  ;;  %v16291_v25 = vcombine.high %v12746_v23, %v12750_v22  ;;  %v16322_v45 = vcombine.low %v12778_v62, %v12782_v6  ;;  %v16331_v61 = vcombine.high %v12786_v15, %v12790_v2  ;;  %v12825_v62 = vld [vmem:[#allocation7 + $0xec0] sm:$0xff] }
0x2531   :  { %13539 = vmatprep.subr.bf16.mxu0 %v16289_v1  ;;  %v16330_v0 = vcombine.low %v12786_v15, %v12790_v2  ;;  %v16339_v17 = vcombine.high %v12794_v43, %v12798_v4  ;;  %v12806_v1 = vld [vmem:[#allocation7 + $0xe28] sm:$0xff]  ;;  %v16338_v22 = vcombine.low %v12794_v43, %v12798_v4  ;;  %v16345_v3 = vcombine.high %v12801_v42, %v12805_v55  ;;  %v12829_v6 = vld [vmem:[#allocation7 + $0xee0] sm:$0xff] }
0x2532   :  { %v12698_v48 = vadd.f32 %v19398_v16, %v19395_v59  ;;  %13580 = vmatprep.subr.bf16.mxu1 %v16291_v25  ;;  %13540 = vmatpush1.bf16.msra.mxu0 %v16288_v26  ;;  %v16347_v25 = vcombine.high %v12802_v39, %v12806_v1  ;;  %v12814_v26 = vld [vmem:[#allocation7 + $0xe68] sm:$0xff]  ;;  %v12833_v15 = vld [vmem:[#allocation7 + $0xf00] sm:$0xff] }
0x2533   :  { %13581 = vmatpush1.bf16.msra.mxu1 %v16290_v27  ;;  %13541 = vmatprep.subr.bf16.mxu0 %v16297_v28  ;;  %v16344_v27 = vcombine.low %v12801_v42, %v12805_v55  ;;  %v16346_v28 = vcombine.low %v12802_v39, %v12806_v1  ;;  %v16355_v30 = vcombine.high %v12810_v24, %v12814_v26  ;;  %v12837_v2 = vld [vmem:[#allocation7 + $0xf20] sm:$0xff]  ;;  %v12850_v39 = vld [vmem:[#allocation7 + $0xf88] sm:$0xff] }
0x2534   :  { %12699 = vadd.xlane.f32.xlu0 %v12698_v48  ;;  %13582 = vmatprep.subr.bf16.mxu1 %v16299_v29  ;;  %v12793_v48 = vld [vmem:[#allocation7 + $0xdc0] sm:$0xff]  ;;  %v16353_v29 = vcombine.high %v12809_v21, %v12813_v54  ;;  %v12854_v1 = vld [vmem:[#allocation7 + $0xfa8] sm:$0xff] }
0x2535   :  { %v16337_v44 = vcombine.high %v12793_v48, %v12797_v60  ;;  %v16336_v23 = vcombine.low %v12793_v48, %v12797_v60  ;;  %v12841_v48 = vld [vmem:[#allocation7 + $0xf40] sm:$0xff] }
0x2536   :  { %13542 = vmatpush1.bf16.msra.mxu0 %v16296_v51  ;;  %v12822_v51 = vld [vmem:[#allocation7 + $0xea8] sm:$0xff]  ;;  %v12845_v60 = vld [vmem:[#allocation7 + $0xf60] sm:$0xff] }
0x2537   :  { %13583 = vmatpush1.bf16.msra.mxu1 %v16298_v32  ;;  %13543 = vmatprep.subr.bf16.mxu0 %v16305_v46  ;;  %v16352_v32 = vcombine.low %v12809_v21, %v12813_v54  ;;  %v16354_v46 = vcombine.low %v12810_v24, %v12814_v26  ;;  %v16363_v10 = vcombine.high %v12818_v9, %v12822_v51  ;;  %v12853_v55 = vld [vmem:[#allocation7 + $0xfa0] sm:$0xff]  ;;  %v12858_v24 = vld [vmem:[#allocation7 + $0xfc8] sm:$0xff] }
0x2538   :  { %13584 = vmatprep.subr.bf16.mxu1 %v16307_v49  ;;  %v16361_v49 = vcombine.high %v12817_v31, %v12821_v12  ;;  %v16362_v34 = vcombine.low %v12818_v9, %v12822_v51  ;;  %v12857_v21 = vld [vmem:[#allocation7 + $0xfc0] sm:$0xff]  ;;  %v12862_v26 = vld [vmem:[#allocation7 + $0xfe8] sm:$0xff]  ;;  %v12739_v9 = vld [vmem:[#allocation7 + $0xc10] sm:$0xff] }
0x2539   :  { %v12861_v54 = vld [vmem:[#allocation7 + $0xfe0] sm:$0xff]  ;;  %v16402_v12 = vcombine.low %v12858_v24, %v12862_v26  ;;  %v12743_v51 = vld [vmem:[#allocation7 + $0xc30] sm:$0xff] }
0x253a   :  { %13544 = vmatpush1.bf16.msra.mxu0 %v16304_v38  ;;  %v16400_v31 = vcombine.low %v12857_v21, %v12861_v54 }
0x253b   :  { %13585 = vmatpush1.bf16.msra.mxu1 %v16306_v37  ;;  %13545 = vmatprep.subr.bf16.mxu0 %v16313_v20 }
0x253c   :  { %13586 = vmatprep.subr.bf16.mxu1 %v16315_v14 }
0x253e   :  { %13546 = vmatpush1.bf16.msra.mxu0 %v16312_v7  ;;  %v12826_v7 = vld [vmem:[#allocation7 + $0xec8] sm:$0xff] }
0x253f   :  { %13587 = vmatpush1.bf16.msra.mxu1 %v16314_v8  ;;  %13547 = vmatprep.subr.bf16.mxu0 %v16321_v56  ;;  %v16369_v8 = vcombine.high %v12825_v62, %v12829_v6  ;;  %v12830_v56 = vld [vmem:[#allocation7 + $0xee8] sm:$0xff] }
0x2540   :  { %13588 = vmatprep.subr.bf16.mxu1 %v16323_v5  ;;  %v16368_v5 = vcombine.low %v12825_v62, %v12829_v6  ;;  %v16370_v11 = vcombine.low %v12826_v7, %v12830_v56  ;;  %v16371_v47 = vcombine.high %v12826_v7, %v12830_v56  ;;  %v19416_v62 = vld [vmem:[#allocation2 + $0x60] sm:$0xff] }
0x2541   :  { %v12717_v6 = vrot.slane %v19416_v62, %v18948_v57 }
0x2542   :  { %13548 = vmatpush1.bf16.msra.mxu0 %v16320_v13  ;;  %v12834_v13 = vld [vmem:[#allocation7 + $0xf08] sm:$0xff] }
0x2543   :  { %13589 = vmatpush1.bf16.msra.mxu1 %v16322_v45  ;;  %13549 = vmatprep.subr.bf16.mxu0 %v16329_v50  ;;  %v16376_v45 = vcombine.low %v12833_v15, %v12837_v2  ;;  %v16377_v50 = vcombine.high %v12833_v15, %v12837_v2 }
0x2544   :  { %13590 = vmatprep.subr.bf16.mxu1 %v16331_v61  ;;  %v12838_v61 = vld [vmem:[#allocation7 + $0xf28] sm:$0xff] }
0x2545   :  { %v16378_v43 = vcombine.low %v12834_v13, %v12838_v61  ;;  %v16379_v4 = vcombine.high %v12834_v13, %v12838_v61  ;;  %v12748_v61 = vld [vmem:[#allocation7 + $0xc58] sm:$0xff] }
0x2546   :  { %13550 = vmatpush1.bf16.msra.mxu0 %v16328_v53  ;;  %v16385_v53 = vcombine.high %v12841_v48, %v12845_v60 }
0x2547   :  { %13591 = vmatpush1.bf16.msra.mxu1 %v16330_v0  ;;  %13551 = vmatprep.subr.bf16.mxu0 %v16337_v44  ;;  %v12842_v0 = vld [vmem:[#allocation7 + $0xf48] sm:$0xff] }
0x2548   :  { %13592 = vmatprep.subr.bf16.mxu1 %v16339_v17  ;;  %v12846_v44 = vld [vmem:[#allocation7 + $0xf68] sm:$0xff]  ;;  %v12849_v17 = vld [vmem:[#allocation7 + $0xf80] sm:$0xff] }
0x2549   :  { %v16387_v42 = vcombine.high %v12842_v0, %v12846_v44 }
0x254a   :  { %13552 = vmatpush1.bf16.msra.mxu0 %v16336_v23  ;;  %v16384_v23 = vcombine.low %v12841_v48, %v12845_v60  ;;  %v12752_v48 = vld [vmem:[#allocation7 + $0xc78] sm:$0xff] }
0x254b   :  { %13593 = vmatpush1.bf16.msra.mxu1 %v16338_v22  ;;  %13553 = vmatprep.subr.bf16.mxu0 %v16345_v3  ;;  %v16386_v22 = vcombine.low %v12842_v0, %v12846_v44  ;;  %v16393_v3 = vcombine.high %v12849_v17, %v12853_v55  ;;  %v12760_v0 = vld [vmem:[#allocation7 + $0xcb8] sm:$0xff]  ;;  %v16294_v44 = vcombine.low %v12748_v61, %v12752_v48 }
0x254c   :  { %13594 = vmatprep.subr.bf16.mxu1 %v16347_v25  ;;  %v16395_v25 = vcombine.high %v12850_v39, %v12854_v1 }
0x254e   :  { %13554 = vmatpush1.bf16.msra.mxu0 %v16344_v27  ;;  %v16392_v27 = vcombine.low %v12849_v17, %v12853_v55  ;;  %v12763_v55 = vld [vmem:[#allocation7 + $0xcd0] sm:$0xff] }
0x254f   :  { %13595 = vmatpush1.bf16.msra.mxu1 %v16346_v28  ;;  %13555 = vmatprep.subr.bf16.mxu0 %v16353_v29  ;;  %v16394_v28 = vcombine.low %v12850_v39, %v12854_v1  ;;  %v16401_v29 = vcombine.high %v12857_v21, %v12861_v54  ;;  %v12767_v39 = vld [vmem:[#allocation7 + $0xcf0] sm:$0xff]  ;;  %v12764_v1 = vld [vmem:[#allocation7 + $0xcd8] sm:$0xff] }
0x2550   :  { %13596 = vmatprep.subr.bf16.mxu1 %v16355_v30  ;;  %v16403_v30 = vcombine.high %v12858_v24, %v12862_v26  ;;  %v12771_v54 = vld [vmem:[#allocation7 + $0xd10] sm:$0xff]  ;;  %v12772_v26 = vld [vmem:[#allocation7 + $0xd18] sm:$0xff] }
0x2551   :  { %v12775_v24 = vld [vmem:[#allocation7 + $0xd30] sm:$0xff] }
0x2552   :  { %13556 = vmatpush1.bf16.msra.mxu0 %v16352_v32  ;;  %v12740_v32 = vld [vmem:[#allocation7 + $0xc18] sm:$0xff] }
0x2553   :  { %13597 = vmatpush1.bf16.msra.mxu1 %v16354_v46  ;;  %13557 = vmatprep.subr.bf16.mxu0 %v16361_v49  ;;  %v16285_v46 = vcombine.high %v12739_v9, %v12743_v51  ;;  %v12744_v49 = vld [vmem:[#allocation7 + $0xc38] sm:$0xff] }
0x2554   :  { %13598 = vmatprep.subr.bf16.mxu1 %v16363_v10  ;;  %v16284_v10 = vcombine.low %v12739_v9, %v12743_v51  ;;  %v12783_v9 = vld [vmem:[#allocation7 + $0xd70] sm:$0xff]  ;;  %v12780_v51 = vld [vmem:[#allocation7 + $0xd58] sm:$0xff] }
0x2556   :  { %13558 = vmatpush1.bf16.msra.mxu0 %v16360_v33  ;;  %v16286_v33 = vcombine.low %v12740_v32, %v12744_v49 }
0x2557   :  { %13599 = vmatpush1.bf16.msra.mxu1 %v16362_v34  ;;  %13559 = vmatprep.subr.bf16.mxu0 %v16369_v8  ;;  %v16287_v34 = vcombine.high %v12740_v32, %v12744_v49  ;;  %v12784_v32 = vld [vmem:[#allocation7 + $0xd78] sm:$0xff] }
0x2558   :  { %13600 = vmatprep.subr.bf16.mxu1 %v16371_v47 }
0x255a   :  { %13560 = vmatpush1.bf16.msra.mxu0 %v16368_v5 }
0x255b   :  { %13601 = vmatpush1.bf16.msra.mxu1 %v16370_v11  ;;  %13561 = vmatprep.subr.bf16.mxu0 %v16377_v50  ;;  %v12727_v11 = vrot.slane %v19416_v62, %v18951_v58  ;;  %v12751_v50 = vld [vmem:[#allocation7 + $0xc70] sm:$0xff] }
0x255c   :  { %13602 = vmatprep.subr.bf16.mxu1 %v16379_v4  ;;  %v16295_v4 = vcombine.high %v12748_v61, %v12752_v48  ;;  %v12807_v61 = vld [vmem:[#allocation7 + $0xe30] sm:$0xff]  ;;  %v12804_v48 = vld [vmem:[#allocation7 + $0xe18] sm:$0xff] }
0x255e   :  { %13562 = vmatpush1.bf16.msra.mxu0 %v16376_v45  ;;  %v12747_v45 = vld [vmem:[#allocation7 + $0xc50] sm:$0xff] }
0x255f   :  { %13603 = vmatpush1.bf16.msra.mxu1 %v16378_v43  ;;  %13563 = vmatprep.subr.bf16.mxu0 %v16385_v53  ;;  %v16293_v43 = vcombine.high %v12747_v45, %v12751_v50  ;;  %v12756_v53 = vld [vmem:[#allocation7 + $0xc98] sm:$0xff] }
0x2560   :  { %13604 = vmatprep.subr.bf16.mxu1 %v16387_v42  ;;  %v16303_v42 = vcombine.high %v12756_v53, %v12760_v0 }
0x2562   :  { %13564 = vmatpush1.bf16.msra.mxu0 %v16384_v23  ;;  %v12768_v23 = vld [vmem:[#allocation7 + $0xcf8] sm:$0xff] }
0x2563   :  { %13605 = vmatpush1.bf16.msra.mxu1 %v16386_v22  ;;  %13565 = vmatprep.subr.bf16.mxu0 %v16393_v3  ;;  %v16302_v3 = vcombine.low %v12756_v53, %v12760_v0  ;;  %v16311_v21 = vcombine.high %v12764_v1, %v12768_v23  ;;  %v12811_v53 = vld [vmem:[#allocation7 + $0xe50] sm:$0xff] }
0x2564   :  { %13606 = vmatprep.subr.bf16.mxu1 %v16395_v25  ;;  %v16309_v25 = vcombine.high %v12763_v55, %v12767_v39  ;;  %v12815_v0 = vld [vmem:[#allocation7 + $0xe70] sm:$0xff] }
0x2566   :  { %13566 = vmatpush1.bf16.msra.mxu0 %v16392_v27  ;;  %v12776_v27 = vld [vmem:[#allocation7 + $0xd38] sm:$0xff] }
0x2567   :  { %13607 = vmatpush1.bf16.msra.mxu1 %v16394_v28  ;;  %13567 = vmatprep.subr.bf16.mxu0 %v16401_v29  ;;  %v16308_v28 = vcombine.low %v12763_v55, %v12767_v39  ;;  %v16310_v29 = vcombine.low %v12764_v1, %v12768_v23  ;;  %v16318_v49 = vcombine.low %v12772_v26, %v12776_v27  ;;  %v12819_v1 = vld [vmem:[#allocation7 + $0xe90] sm:$0xff] }
0x2568   :  { %13608 = vmatprep.subr.bf16.mxu1 %v16403_v30  ;;  %v16317_v30 = vcombine.high %v12771_v54, %v12775_v24  ;;  %v16357_v55 = vcombine.high %v12811_v53, %v12815_v0  ;;  %v12823_v23 = vld [vmem:[#allocation7 + $0xeb0] sm:$0xff] }
0x256a   :  { %13568 = vmatpush1.bf16.msra.mxu0 %v16400_v31  ;;  %v16319_v31 = vcombine.high %v12772_v26, %v12776_v27  ;;  %v12827_v26 = vld [vmem:[#allocation7 + $0xed0] sm:$0xff] }
0x256b   :  { %13609 = vmatpush1.bf16.msra.mxu1 %v16402_v12  ;;  %13619 = vmatprep.subr.bf16.mxu0 %v16285_v46  ;;  %v12779_v12 = vld [vmem:[#allocation7 + $0xd50] sm:$0xff]  ;;  %v16316_v46 = vcombine.low %v12771_v54, %v12775_v24  ;;  %v16365_v54 = vcombine.high %v12819_v1, %v12823_v23 }
0x256c   :  { %13660 = vmatprep.subr.bf16.mxu1 %v16287_v34  ;;  %v12787_v34 = vld [vmem:[#allocation7 + $0xd90] sm:$0xff] }
0x256d   :  { %v12831_v27 = vld [vmem:[#allocation7 + $0xef0] sm:$0xff] }
0x25c1   :  { %v12700_v35 = vpop.xlane.xlu0 %12699 }
0x25c2   :  { %v12701_v38 = vmul.f32 0.00390625, %v12700_v35 }
0x25c4   :  { %v19403_v37 = vsub.f32 %v19395_v59, %v12701_v38  ;;  %v19406_v20 = vsub.f32 %v19398_v16, %v12701_v38 }
0x25c6   :  { %v12704_v14 = vmul.f32 %v19403_v37, %v19403_v37  ;;  %v12705_v40 = vmul.f32 %v19406_v20, %v19406_v20 }
0x25c8   :  { %v12706_v41 = vadd.f32 %v12705_v40, %v12704_v14  ;;  %v19412_v40 = vld [vmem:[#allocation2 + $0x68] sm:$0xff] }
0x25c9   :  { %v12731_v56 = vrot.slane %v19412_v40, %v18951_v58  ;;  %v16292_v58 = vcombine.low %v12747_v45, %v12751_v50  ;;  %v12803_v50 = vld [vmem:[#allocation7 + $0xe10] sm:$0xff] }
0x25ca   :  { %12707 = vadd.xlane.f32.xlu0 %v12706_v41  ;;  %v12721_v41 = vrot.slane %v19412_v40, %v18948_v57 }
0x2657   :  { %v12708_v35 = vpop.xlane.xlu0 %12707 }
0x2658   :  { %v12709_v38 = vmul.f32 0.00390625, %v12708_v35  ;;  %v12791_v35 = vld [vmem:[#allocation7 + $0xdb0] sm:$0xff] }
0x265a   :  { %v12710_v14 = vadd.f32 1e-05, %v12709_v38  ;;  %v12788_v38 = vld [vmem:[#allocation7 + $0xd98] sm:$0xff] }
0x265c   :  { %18491 = vrsqrt.f32 %v12710_v14  ;;  %v12792_v14 = vld [vmem:[#allocation7 + $0xdb8] sm:$0xff] }
0x2666   :  { %v18492_v7 = vpop.eup %18491 }
0x2667   :  { %v12713_v8 = vmul.f32 %v18492_v7, %v19406_v20  ;;  %v12712_v5 = vmul.f32 %v18492_v7, %v19403_v37  ;;  %v12755_v20 = vld [vmem:[#allocation7 + $0xc90] sm:$0xff]  ;;  %v16333_v7 = vcombine.high %v12787_v34, %v12791_v35 }
0x2668   :  { %v12759_v37 = vld [vmem:[#allocation7 + $0xcb0] sm:$0xff] }
0x2669   :  { %v12723_v47 = vmul.f32 %v12721_v41, %v12713_v8  ;;  %v12722_v15 = vmul.f32 %v12717_v6, %v12712_v5  ;;  %v16301_v17 = vcombine.high %v12755_v20, %v12759_v37  ;;  %v16300_v22 = vcombine.low %v12755_v20, %v12759_v37  ;;  %v12799_v5 = vld [vmem:[#allocation7 + $0xdf0] sm:$0xff] }
0x266a   :  { %v16324_v41 = vcombine.low %v12779_v12, %v12783_v9  ;;  %v16326_v6 = vcombine.low %v12780_v51, %v12784_v32  ;;  %v16335_v8 = vcombine.high %v12788_v38, %v12792_v14 }
0x266b   :  { %v12733_v2 = vadd.f32 %v12731_v56, %v12723_v47  ;;  %v12732_v13 = vadd.f32 %v12727_v11, %v12722_v15  ;;  %v12795_v56 = vld [vmem:[#allocation7 + $0xdd0] sm:$0xff]  ;;  %v12796_v11 = vld [vmem:[#allocation7 + $0xdd8] sm:$0xff]  ;;  %v16332_v15 = vcombine.low %v12787_v34, %v12791_v35 }
0x266c   :  { %v12800_v47 = vld [vmem:[#allocation7 + $0xdf8] sm:$0xff]  ;;  %v16340_v20 = vcombine.low %v12795_v56, %v12799_v5 }
0x266d   :  { %v12735_v57 = vpack.c.bf16 %v12733_v2, %v12733_v2  ;;  %v19426_v60 = vpack.c.bf16 %v12732_v13, %v12732_v13  ;;  %v16334_v2 = vcombine.low %v12788_v38, %v12792_v14  ;;  %v16341_v13 = vcombine.high %v12795_v56, %v12799_v5  ;;  %v12843_v38 = vld [vmem:[#allocation7 + $0xf50] sm:$0xff] }
0x266e   :  { %v16343_v45 = vcombine.high %v12796_v11, %v12800_v47  ;;  %v12847_v14 = vld [vmem:[#allocation7 + $0xf70] sm:$0xff] }
0x266f   :  { %13569 = vmatprep.mubr.bf16.mxu0 %v12735_v57  ;;  %13610 = vmatprep.mubr.bf16.mxu1 %v12735_v57  ;;  %v16389_v56 = vcombine.high %v12843_v38, %v12847_v14 }
0x2670   :  { %13570 = vmatmul.mubr.bf16.vlgmr.msra.gmra.mrb[100].mxu0 %v19426_v60  ;;  %13611 = vmatmul.mubr.bf16.vlgmr.msra.gmra.mrb[128].mxu1 %v19426_v60 }
0x2671   :  { %13620 = vmatpush1.bf16.msra.mxu0 %v16284_v10  ;;  %13661 = vmatpush1.bf16.msra.mxu1 %v16286_v33  ;;  %v16325_v10 = vcombine.high %v12779_v12, %v12783_v9  ;;  %v16327_v33 = vcombine.high %v12780_v51, %v12784_v32  ;;  %v16373_v12 = vcombine.high %v12827_v26, %v12831_v27  ;;  %v12835_v51 = vld [vmem:[#allocation7 + $0xf10] sm:$0xff] }
0x2672   :  { %13651 = vmatprep.mubr.bf16.mxu0 %v12735_v57  ;;  %13692 = vmatprep.mubr.bf16.mxu1 %v12735_v57  ;;  %v12808_v57 = vld [vmem:[#allocation7 + $0xe38] sm:$0xff]  ;;  %v12839_v32 = vld [vmem:[#allocation7 + $0xf30] sm:$0xff] }
0x2673   :  { %13621 = vmatprep.subr.bf16.mxu0 %v16293_v43  ;;  %13662 = vmatprep.subr.bf16.mxu1 %v16295_v4  ;;  %v16342_v43 = vcombine.low %v12796_v11, %v12800_v47  ;;  %v16349_v4 = vcombine.high %v12803_v50, %v12807_v61  ;;  %v16351_v37 = vcombine.high %v12804_v48, %v12808_v57  ;;  %v12851_v11 = vld [vmem:[#allocation7 + $0xf90] sm:$0xff] }
0x2674   :  { %v16381_v34 = vcombine.high %v12835_v51, %v12839_v32  ;;  %v12855_v47 = vld [vmem:[#allocation7 + $0xfb0] sm:$0xff] }
0x2675   :  { %13622 = vmatpush1.bf16.msra.mxu0 %v16292_v58  ;;  %13663 = vmatpush1.bf16.msra.mxu1 %v16294_v44  ;;  %v12812_v58 = vld [vmem:[#allocation7 + $0xe58] sm:$0xff] }
0x2676   :  { %13623 = vmatprep.subr.bf16.mxu0 %v16301_v17  ;;  %13664 = vmatprep.subr.bf16.mxu1 %v16303_v42  ;;  %v12816_v44 = vld [vmem:[#allocation7 + $0xe78] sm:$0xff]  ;;  %v16348_v17 = vcombine.low %v12803_v50, %v12807_v61  ;;  %v16350_v42 = vcombine.low %v12804_v48, %v12808_v57  ;;  %v16397_v50 = vcombine.high %v12851_v11, %v12855_v47  ;;  %v12859_v48 = vld [vmem:[#allocation7 + $0xfd0] sm:$0xff] }
0x2677   :  { %v16359_v39 = vcombine.high %v12812_v58, %v12816_v44  ;;  %v12863_v57 = vld [vmem:[#allocation7 + $0xff0] sm:$0xff] }
0x2679   :  { %13624 = vmatpush1.bf16.msra.mxu0 %v16300_v22  ;;  %13665 = vmatpush1.bf16.msra.mxu1 %v16302_v3  ;;  %v12820_v22 = vld [vmem:[#allocation7 + $0xe98] sm:$0xff] }
0x267a   :  { %13625 = vmatprep.subr.bf16.mxu0 %v16309_v25  ;;  %13666 = vmatprep.subr.bf16.mxu1 %v16311_v21  ;;  %v12824_v3 = vld [vmem:[#allocation7 + $0xeb8] sm:$0xff]  ;;  %v16356_v25 = vcombine.low %v12811_v53, %v12815_v0  ;;  %v16358_v21 = vcombine.low %v12812_v58, %v12816_v44  ;;  %v16405_v53 = vcombine.high %v12859_v48, %v12863_v57 }
0x267b   :  { %v16367_v24 = vcombine.high %v12820_v22, %v12824_v3  ;;  %v16404_v58 = vcombine.low %v12859_v48, %v12863_v57  ;;  %v18244_v48 = vld [vmem:[#allocation9 + $0xdb4] ss:$8 sps:$4 sm:$0xff]   ;;  %v18239_v57 = vld [vmem:[#allocation9 + $0xcb0] ss:$8 sps:$4 sm:$0xff]  }
0x267d   :  { %13626 = vmatpush1.bf16.msra.mxu0 %v16308_v28  ;;  %13667 = vmatpush1.bf16.msra.mxu1 %v16310_v29  ;;  %v12828_v28 = vld [vmem:[#allocation7 + $0xed8] sm:$0xff] }
0x267e   :  { %13627 = vmatprep.subr.bf16.mxu0 %v16317_v30  ;;  %13668 = vmatprep.subr.bf16.mxu1 %v16319_v31  ;;  %v12832_v29 = vld [vmem:[#allocation7 + $0xef8] sm:$0xff]  ;;  %v16364_v30 = vcombine.low %v12819_v1, %v12823_v23  ;;  %v16366_v31 = vcombine.low %v12820_v22, %v12824_v3 }
0x267f   :  { %v16375_v9 = vcombine.high %v12828_v28, %v12832_v29  ;;  %v18181_v1 = vld [vmem:[#allocation9 + $0xc14] ss:$8 sps:$4 sm:$0xff]   ;;  %v18179_v22 = vld [vmem:[#allocation9 + $0xc10] ss:$8 sps:$4 sm:$0xff]  }
0x2680   :  { %v18184_v23 = vld [vmem:[#allocation9 + $0xd14] ss:$8 sps:$4 sm:$0xff]   ;;  %v18182_v3 = vld [vmem:[#allocation9 + $0xd10] ss:$8 sps:$4 sm:$0xff]  }
0x2681   :  { %13628 = vmatpush1.bf16.msra.mxu0 %v16316_v46  ;;  %13669 = vmatpush1.bf16.msra.mxu1 %v16318_v49  ;;  %v12836_v46 = vld [vmem:[#allocation7 + $0xf18] sm:$0xff] }
0x2682   :  { %13629 = vmatprep.subr.bf16.mxu0 %v16325_v10  ;;  %13670 = vmatprep.subr.bf16.mxu1 %v16327_v33  ;;  %v12840_v49 = vld [vmem:[#allocation7 + $0xf38] sm:$0xff]  ;;  %v16372_v10 = vcombine.low %v12827_v26, %v12831_v27  ;;  %v16374_v33 = vcombine.low %v12828_v28, %v12832_v29  ;;  %v18199_v29 = vld [vmem:[#allocation9 + $0xc44] ss:$8 sps:$4 sm:$0xff]  }
0x2683   :  { %v16383_v35 = vcombine.high %v12836_v46, %v12840_v49  ;;  %v18193_v26 = vld [vmem:[#allocation9 + $0xc34] ss:$8 sps:$4 sm:$0xff]   ;;  %v18191_v28 = vld [vmem:[#allocation9 + $0xc30] ss:$8 sps:$4 sm:$0xff]  }
0x2684   :  { %v18196_v27 = vld [vmem:[#allocation9 + $0xd34] ss:$8 sps:$4 sm:$0xff]  }
0x2685   :  { %13630 = vmatpush1.bf16.msra.mxu0 %v16324_v41  ;;  %13671 = vmatpush1.bf16.msra.mxu1 %v16326_v6  ;;  %v12844_v41 = vld [vmem:[#allocation7 + $0xf58] sm:$0xff] }
0x2686   :  { %13631 = vmatprep.subr.bf16.mxu0 %v16333_v7  ;;  %13672 = vmatprep.subr.bf16.mxu1 %v16335_v8  ;;  %v12848_v6 = vld [vmem:[#allocation7 + $0xf78] sm:$0xff]  ;;  %v16380_v7 = vcombine.low %v12835_v51, %v12839_v32  ;;  %v16382_v8 = vcombine.low %v12836_v46, %v12840_v49  ;;  %v18211_v49 = vld [vmem:[#allocation9 + $0xc64] ss:$8 sps:$4 sm:$0xff]  }
0x2687   :  { %v16391_v5 = vcombine.high %v12844_v41, %v12848_v6  ;;  %v18208_v51 = vld [vmem:[#allocation9 + $0xd54] ss:$8 sps:$4 sm:$0xff]   ;;  %v18203_v32 = vld [vmem:[#allocation9 + $0xc50] ss:$8 sps:$4 sm:$0xff]  }
0x2688   :  { %v18206_v46 = vld [vmem:[#allocation9 + $0xd50] ss:$8 sps:$4 sm:$0xff]  }
0x2689   :  { %13632 = vmatpush1.bf16.msra.mxu0 %v16332_v15  ;;  %13673 = vmatpush1.bf16.msra.mxu1 %v16334_v2  ;;  %v12852_v15 = vld [vmem:[#allocation7 + $0xf98] sm:$0xff] }
0x268a   :  { %13633 = vmatprep.subr.bf16.mxu0 %v16341_v13  ;;  %13674 = vmatprep.subr.bf16.mxu1 %v16343_v45  ;;  %v12856_v2 = vld [vmem:[#allocation7 + $0xfb8] sm:$0xff]  ;;  %v16388_v13 = vcombine.low %v12843_v38, %v12847_v14  ;;  %v16390_v45 = vcombine.low %v12844_v41, %v12848_v6  ;;  %v18223_v6 = vld [vmem:[#allocation9 + $0xc84] ss:$8 sps:$4 sm:$0xff]  }
0x268b   :  { %v16399_v61 = vcombine.high %v12852_v15, %v12856_v2  ;;  %v18220_v38 = vld [vmem:[#allocation9 + $0xd74] ss:$8 sps:$4 sm:$0xff]   ;;  %v18215_v14 = vld [vmem:[#allocation9 + $0xc70] ss:$8 sps:$4 sm:$0xff]  }
0x268c   :  { %v18218_v41 = vld [vmem:[#allocation9 + $0xd70] ss:$8 sps:$4 sm:$0xff]  }
0x268d   :  { %13634 = vmatpush1.bf16.msra.mxu0 %v16340_v20  ;;  %13675 = vmatpush1.bf16.msra.mxu1 %v16342_v43  ;;  %v12860_v20 = vld [vmem:[#allocation7 + $0xfd8] sm:$0xff] }
0x268e   :  { %13635 = vmatprep.subr.bf16.mxu0 %v16349_v4  ;;  %13676 = vmatprep.subr.bf16.mxu1 %v16351_v37  ;;  %v12864_v43 = vld [vmem:[#allocation7 + $0xff8] sm:$0xff]  ;;  %v16396_v4 = vcombine.low %v12851_v11, %v12855_v47  ;;  %v16398_v37 = vcombine.low %v12852_v15, %v12856_v2  ;;  %v18235_v2 = vld [vmem:[#allocation9 + $0xca4] ss:$8 sps:$4 sm:$0xff]  }
0x268f   :  { %v16407_v0 = vcombine.high %v12860_v20, %v12864_v43  ;;  %v16406_v44 = vcombine.low %v12860_v20, %v12864_v43  ;;  %v18232_v11 = vld [vmem:[#allocation9 + $0xd94] ss:$8 sps:$4 sm:$0xff]   ;;  %v18227_v47 = vld [vmem:[#allocation9 + $0xc90] ss:$8 sps:$4 sm:$0xff]   ;;  %v18247_v43 = vld [vmem:[#allocation9 + $0xcc4] ss:$8 sps:$4 sm:$0xff]  }
0x2690   :  { %v18230_v15 = vld [vmem:[#allocation9 + $0xd90] ss:$8 sps:$4 sm:$0xff]  }
0x2691   :  { %13636 = vmatpush1.bf16.msra.mxu0 %v16348_v17  ;;  %13677 = vmatpush1.bf16.msra.mxu1 %v16350_v42  ;;  %v18175_v17 = vld [vmem:[#allocation9 + $0xc04] ss:$8 sps:$4 sm:$0xff]   ;;  %v18242_v20 = vld [vmem:[#allocation9 + $0xdb0] ss:$8 sps:$4 sm:$0xff]  }
0x2692   :  { %13637 = vmatprep.subr.bf16.mxu0 %v16357_v55  ;;  %13678 = vmatprep.subr.bf16.mxu1 %v16359_v39  ;;  %v18178_v42 = vld [vmem:[#allocation9 + $0xd04] ss:$8 sps:$4 sm:$0xff]   ;;  %v18173_v55 = vld [vmem:[#allocation9 + $0xc00] ss:$8 sps:$4 sm:$0xff]  }
0x2693   :  { %v18176_v39 = vld [vmem:[#allocation9 + $0xd00] ss:$8 sps:$4 sm:$0xff]  }
0x2695   :  { %13638 = vmatpush1.bf16.msra.mxu0 %v16356_v25  ;;  %13679 = vmatpush1.bf16.msra.mxu1 %v16358_v21  ;;  %v18187_v25 = vld [vmem:[#allocation9 + $0xc24] ss:$8 sps:$4 sm:$0xff]  }
0x2696   :  { %13639 = vmatprep.subr.bf16.mxu0 %v16365_v54  ;;  %13680 = vmatprep.subr.bf16.mxu1 %v16367_v24  ;;  %v18190_v21 = vld [vmem:[#allocation9 + $0xd24] ss:$8 sps:$4 sm:$0xff]   ;;  %v18185_v54 = vld [vmem:[#allocation9 + $0xc20] ss:$8 sps:$4 sm:$0xff]  }
0x2697   :  { %v18188_v24 = vld [vmem:[#allocation9 + $0xd20] ss:$8 sps:$4 sm:$0xff]  }
0x2699   :  { %13640 = vmatpush1.bf16.msra.mxu0 %v16364_v30  ;;  %13681 = vmatpush1.bf16.msra.mxu1 %v16366_v31  ;;  %v18202_v30 = vld [vmem:[#allocation9 + $0xd44] ss:$8 sps:$4 sm:$0xff]   ;;  %v18197_v31 = vld [vmem:[#allocation9 + $0xc40] ss:$8 sps:$4 sm:$0xff]  }
0x269a   :  { %13641 = vmatprep.subr.bf16.mxu0 %v16373_v12  ;;  %13682 = vmatprep.subr.bf16.mxu1 %v16375_v9  ;;  %v18200_v12 = vld [vmem:[#allocation9 + $0xd40] ss:$8 sps:$4 sm:$0xff]   ;;  %v18205_v9 = vld [vmem:[#allocation9 + $0xc54] ss:$8 sps:$4 sm:$0xff]  }
0x269d   :  { %13642 = vmatpush1.bf16.msra.mxu0 %v16372_v10  ;;  %13683 = vmatpush1.bf16.msra.mxu1 %v16374_v33  ;;  %v18214_v10 = vld [vmem:[#allocation9 + $0xd64] ss:$8 sps:$4 sm:$0xff]   ;;  %v18209_v33 = vld [vmem:[#allocation9 + $0xc60] ss:$8 sps:$4 sm:$0xff]  }
0x269e   :  { %13643 = vmatprep.subr.bf16.mxu0 %v16381_v34  ;;  %13684 = vmatprep.subr.bf16.mxu1 %v16383_v35  ;;  %v18212_v34 = vld [vmem:[#allocation9 + $0xd60] ss:$8 sps:$4 sm:$0xff]   ;;  %v18217_v35 = vld [vmem:[#allocation9 + $0xc74] ss:$8 sps:$4 sm:$0xff]  }
0x26a1   :  { %13644 = vmatpush1.bf16.msra.mxu0 %v16380_v7  ;;  %13685 = vmatpush1.bf16.msra.mxu1 %v16382_v8  ;;  %v18226_v7 = vld [vmem:[#allocation9 + $0xd84] ss:$8 sps:$4 sm:$0xff]   ;;  %v18221_v8 = vld [vmem:[#allocation9 + $0xc80] ss:$8 sps:$4 sm:$0xff]  }
0x26a2   :  { %13645 = vmatprep.subr.bf16.mxu0 %v16389_v56  ;;  %13686 = vmatprep.subr.bf16.mxu1 %v16391_v5  ;;  %v18224_v56 = vld [vmem:[#allocation9 + $0xd80] ss:$8 sps:$4 sm:$0xff]   ;;  %v18229_v5 = vld [vmem:[#allocation9 + $0xc94] ss:$8 sps:$4 sm:$0xff]  }
0x26a5   :  { %13646 = vmatpush1.bf16.msra.mxu0 %v16388_v13  ;;  %13687 = vmatpush1.bf16.msra.mxu1 %v16390_v45  ;;  %v18238_v13 = vld [vmem:[#allocation9 + $0xda4] ss:$8 sps:$4 sm:$0xff]   ;;  %v18233_v45 = vld [vmem:[#allocation9 + $0xca0] ss:$8 sps:$4 sm:$0xff]  }
0x26a6   :  { %13647 = vmatprep.subr.bf16.mxu0 %v16397_v50  ;;  %13688 = vmatprep.subr.bf16.mxu1 %v16399_v61  ;;  %v18236_v50 = vld [vmem:[#allocation9 + $0xda0] ss:$8 sps:$4 sm:$0xff]   ;;  %v18241_v61 = vld [vmem:[#allocation9 + $0xcb4] ss:$8 sps:$4 sm:$0xff]  }
0x26a9   :  { %13648 = vmatpush1.bf16.msra.mxu0 %v16396_v4  ;;  %13689 = vmatpush1.bf16.msra.mxu1 %v16398_v37  ;;  %v18250_v4 = vld [vmem:[#allocation9 + $0xdc4] ss:$8 sps:$4 sm:$0xff]   ;;  %v18245_v37 = vld [vmem:[#allocation9 + $0xcc0] ss:$8 sps:$4 sm:$0xff]  }
0x26aa   :  { %13649 = vmatprep.subr.bf16.mxu0 %v16405_v53  ;;  %13690 = vmatprep.subr.bf16.mxu1 %v16407_v0  ;;  %v18248_v53 = vld [vmem:[#allocation9 + $0xdc0] ss:$8 sps:$4 sm:$0xff]   ;;  %v18253_v0 = vld [vmem:[#allocation9 + $0xcd4] ss:$8 sps:$4 sm:$0xff]  }
0x26ad   :  { %13650 = vmatpush1.bf16.msra.mxu0 %v16404_v58  ;;  %13691 = vmatpush1.bf16.msra.mxu1 %v16406_v44  ;;  %v18256_v58 = vld [vmem:[#allocation9 + $0xdd4] ss:$8 sps:$4 sm:$0xff]   ;;  %v18251_v44 = vld [vmem:[#allocation9 + $0xcd0] ss:$8 sps:$4 sm:$0xff]  }
0x26ae   :  { %14494 = vmatprep.subr.bf16.mxu0 %v18175_v17  ;;  %14535 = vmatprep.subr.bf16.mxu1 %v18178_v42  ;;  %v18254_v17 = vld [vmem:[#allocation9 + $0xdd0] ss:$8 sps:$4 sm:$0xff]   ;;  %v18259_v42 = vld [vmem:[#allocation9 + $0xce4] ss:$8 sps:$4 sm:$0xff]  }
0x26b0   :  { %13652 = vmatmul.mubr.bf16.vlgmr.msra.gmra.mrb[104].mxu0 %v19426_v60  ;;  %13693 = vmatmul.mubr.bf16.vlgmr.msra.gmra.mrb[132].mxu1 %v19426_v60  ;;  %v18194_v60 = vld [vmem:[#allocation9 + $0xd30] ss:$8 sps:$4 sm:$0xff]  }
0x26b1   :  { %14495 = vmatpush1.bf16.msra.mxu0 %v18173_v55  ;;  %14536 = vmatpush1.bf16.msra.mxu1 %v18176_v39  ;;  %v18262_v55 = vld [vmem:[#allocation9 + $0xde4] ss:$8 sps:$4 sm:$0xff]   ;;  %v18257_v39 = vld [vmem:[#allocation9 + $0xce0] ss:$8 sps:$4 sm:$0xff]  }
0x26b2   :  { %14496 = vmatprep.subr.bf16.mxu0 %v18181_v1  ;;  %14537 = vmatprep.subr.bf16.mxu1 %v18184_v23  ;;  %v18260_v1 = vld [vmem:[#allocation9 + $0xde0] ss:$8 sps:$4 sm:$0xff]   ;;  %v18265_v23 = vld [vmem:[#allocation9 + $0xcf4] ss:$8 sps:$4 sm:$0xff]  }
0x26b5   :  { %14497 = vmatpush1.bf16.msra.mxu0 %v18179_v22  ;;  %14538 = vmatpush1.bf16.msra.mxu1 %v18182_v3  ;;  %v18268_v22 = vld [vmem:[#allocation9 + $0xdf4] ss:$8 sps:$4 sm:$0xff]   ;;  %v18263_v3 = vld [vmem:[#allocation9 + $0xcf0] ss:$8 sps:$4 sm:$0xff]  }
0x26b6   :  { %14498 = vmatprep.subr.bf16.mxu0 %v18187_v25  ;;  %14539 = vmatprep.subr.bf16.mxu1 %v18190_v21  ;;  %v18266_v25 = vld [vmem:[#allocation9 + $0xdf0] ss:$8 sps:$4 sm:$0xff]   ;;  %v18271_v21 = vld [vmem:[#allocation9 + $0xe04] ss:$8 sps:$4 sm:$0xff]  }
0x26b9   :  { %14499 = vmatpush1.bf16.msra.mxu0 %v18185_v54  ;;  %14540 = vmatpush1.bf16.msra.mxu1 %v18188_v24  ;;  %v18274_v54 = vld [vmem:[#allocation9 + $0xf04] ss:$8 sps:$4 sm:$0xff]   ;;  %v11030_v24 = vrot.slane %v19416_v62, 1 }
0x26ba   :  { %14500 = vmatprep.subr.bf16.mxu0 %v18193_v26  ;;  %14541 = vmatprep.subr.bf16.mxu1 %v18196_v27  ;;  %v11031_v26 = vrot.slane %v19412_v40, 1  ;;  %v12868_v27 = vrot.slane %v19416_v62, %v18970_v36 }
0x26bd   :  { %14501 = vmatpush1.bf16.msra.mxu0 %v18191_v28  ;;  %14542 = vmatpush1.bf16.msra.mxu1 %v18194_v60  ;;  %v12876_v28 = vrot.slane %v11030_v24, %v18970_v36  ;;  %v12872_v60 = vrot.slane %v19412_v40, %v18970_v36  ;;  %v18322_v24 = vld [vmem:[#allocation9 + $0xf84] ss:$8 sps:$4 sm:$0xff]  }
0x26be   :  { %14502 = vmatprep.subr.bf16.mxu0 %v18199_v29  ;;  %14543 = vmatprep.subr.bf16.mxu1 %v18202_v30  ;;  %v12880_v29 = vrot.slane %v11031_v26, %v18970_v36  ;;  %v18317_v26 = vld [vmem:[#allocation9 + $0xe80] ss:$8 sps:$4 sm:$0xff]  }
0x26c1   :  { %14503 = vmatpush1.bf16.msra.mxu0 %v18197_v31  ;;  %14544 = vmatpush1.bf16.msra.mxu1 %v18200_v12 }
0x26c2   :  { %14504 = vmatprep.subr.bf16.mxu0 %v18205_v9  ;;  %14545 = vmatprep.subr.bf16.mxu1 %v18208_v51 }
0x26c5   :  { %14505 = vmatpush1.bf16.msra.mxu0 %v18203_v32  ;;  %14546 = vmatpush1.bf16.msra.mxu1 %v18206_v46 }
0x26c6   :  { %14506 = vmatprep.subr.bf16.mxu0 %v18211_v49  ;;  %14547 = vmatprep.subr.bf16.mxu1 %v18214_v10 }
0x26c9   :  { %14507 = vmatpush1.bf16.msra.mxu0 %v18209_v33  ;;  %14548 = vmatpush1.bf16.msra.mxu1 %v18212_v34 }
0x26ca   :  { %14508 = vmatprep.subr.bf16.mxu0 %v18217_v35  ;;  %14549 = vmatprep.subr.bf16.mxu1 %v18220_v38 }
0x26cd   :  { %14509 = vmatpush1.bf16.msra.mxu0 %v18215_v14  ;;  %14550 = vmatpush1.bf16.msra.mxu1 %v18218_v41 }
0x26ce   :  { %14510 = vmatprep.subr.bf16.mxu0 %v18223_v6  ;;  %14551 = vmatprep.subr.bf16.mxu1 %v18226_v7  ;;  %v18269_v7 = vld [vmem:[#allocation9 + $0xe00] ss:$8 sps:$4 sm:$0xff]  }
0x26d1   :  { %14511 = vmatpush1.bf16.msra.mxu0 %v18221_v8  ;;  %14552 = vmatpush1.bf16.msra.mxu1 %v18224_v56  ;;  %v18272_v8 = vld [vmem:[#allocation9 + $0xf00] ss:$8 sps:$4 sm:$0xff]  }
0x26d2   :  { %14512 = vmatprep.subr.bf16.mxu0 %v18229_v5  ;;  %14553 = vmatprep.subr.bf16.mxu1 %v18232_v11  ;;  %v18277_v11 = vld [vmem:[#allocation9 + $0xe14] ss:$8 sps:$4 sm:$0xff]  }
0x26d5   :  { %14513 = vmatpush1.bf16.msra.mxu0 %v18227_v47  ;;  %14554 = vmatpush1.bf16.msra.mxu1 %v18230_v15  ;;  %v18280_v47 = vld [vmem:[#allocation9 + $0xf14] ss:$8 sps:$4 sm:$0xff]   ;;  %v18275_v15 = vld [vmem:[#allocation9 + $0xe10] ss:$8 sps:$4 sm:$0xff]  }
0x26d6   :  { %14514 = vmatprep.subr.bf16.mxu0 %v18235_v2  ;;  %14555 = vmatprep.subr.bf16.mxu1 %v18238_v13  ;;  %v18278_v2 = vld [vmem:[#allocation9 + $0xf10] ss:$8 sps:$4 sm:$0xff]   ;;  %v18283_v13 = vld [vmem:[#allocation9 + $0xe24] ss:$8 sps:$4 sm:$0xff]  }
0x26d9   :  { %14515 = vmatpush1.bf16.msra.mxu0 %v18233_v45  ;;  %14556 = vmatpush1.bf16.msra.mxu1 %v18236_v50  ;;  %v18286_v45 = vld [vmem:[#allocation9 + $0xf24] ss:$8 sps:$4 sm:$0xff]   ;;  %v18281_v50 = vld [vmem:[#allocation9 + $0xe20] ss:$8 sps:$4 sm:$0xff]  }
0x26da   :  { %14516 = vmatprep.subr.bf16.mxu0 %v18241_v61  ;;  %14557 = vmatprep.subr.bf16.mxu1 %v18244_v48  ;;  %v18284_v61 = vld [vmem:[#allocation9 + $0xf20] ss:$8 sps:$4 sm:$0xff]   ;;  %v18289_v48 = vld [vmem:[#allocation9 + $0xe34] ss:$8 sps:$4 sm:$0xff]  }
0x26dd   :  { %14517 = vmatpush1.bf16.msra.mxu0 %v18239_v57  ;;  %14558 = vmatpush1.bf16.msra.mxu1 %v18242_v20  ;;  %v18292_v57 = vld [vmem:[#allocation9 + $0xf34] ss:$8 sps:$4 sm:$0xff]   ;;  %v18287_v20 = vld [vmem:[#allocation9 + $0xe30] ss:$8 sps:$4 sm:$0xff]  }
0x26de   :  { %14518 = vmatprep.subr.bf16.mxu0 %v18247_v43  ;;  %14559 = vmatprep.subr.bf16.mxu1 %v18250_v4  ;;  %v18290_v43 = vld [vmem:[#allocation9 + $0xf30] ss:$8 sps:$4 sm:$0xff]   ;;  %v18295_v4 = vld [vmem:[#allocation9 + $0xe44] ss:$8 sps:$4 sm:$0xff]  }
0x26e1   :  { %14519 = vmatpush1.bf16.msra.mxu0 %v18245_v37  ;;  %14560 = vmatpush1.bf16.msra.mxu1 %v18248_v53  ;;  %v18298_v37 = vld [vmem:[#allocation9 + $0xf44] ss:$8 sps:$4 sm:$0xff]   ;;  %v18293_v53 = vld [vmem:[#allocation9 + $0xe40] ss:$8 sps:$4 sm:$0xff]  }
0x26e2   :  { %14520 = vmatprep.subr.bf16.mxu0 %v18253_v0  ;;  %14561 = vmatprep.subr.bf16.mxu1 %v18256_v58  ;;  %v18296_v0 = vld [vmem:[#allocation9 + $0xf40] ss:$8 sps:$4 sm:$0xff]   ;;  %v18301_v58 = vld [vmem:[#allocation9 + $0xe54] ss:$8 sps:$4 sm:$0xff]  }
0x26e5   :  { %14521 = vmatpush1.bf16.msra.mxu0 %v18251_v44  ;;  %14562 = vmatpush1.bf16.msra.mxu1 %v18254_v17  ;;  %v18304_v44 = vld [vmem:[#allocation9 + $0xf54] ss:$8 sps:$4 sm:$0xff]   ;;  %v18299_v17 = vld [vmem:[#allocation9 + $0xe50] ss:$8 sps:$4 sm:$0xff]  }
0x26e6   :  { %14522 = vmatprep.subr.bf16.mxu0 %v18259_v42  ;;  %14563 = vmatprep.subr.bf16.mxu1 %v18262_v55  ;;  %v18302_v42 = vld [vmem:[#allocation9 + $0xf50] ss:$8 sps:$4 sm:$0xff]   ;;  %v18307_v55 = vld [vmem:[#allocation9 + $0xe64] ss:$8 sps:$4 sm:$0xff]  }
0x26e9   :  { %14523 = vmatpush1.bf16.msra.mxu0 %v18257_v39  ;;  %14564 = vmatpush1.bf16.msra.mxu1 %v18260_v1  ;;  %v18310_v39 = vld [vmem:[#allocation9 + $0xf64] ss:$8 sps:$4 sm:$0xff]   ;;  %v18305_v1 = vld [vmem:[#allocation9 + $0xe60] ss:$8 sps:$4 sm:$0xff]  }
0x26ea   :  { %14524 = vmatprep.subr.bf16.mxu0 %v18265_v23  ;;  %14565 = vmatprep.subr.bf16.mxu1 %v18268_v22  ;;  %v18308_v23 = vld [vmem:[#allocation9 + $0xf60] ss:$8 sps:$4 sm:$0xff]   ;;  %v18313_v22 = vld [vmem:[#allocation9 + $0xe74] ss:$8 sps:$4 sm:$0xff]  }
0x26ed   :  { %14525 = vmatpush1.bf16.msra.mxu0 %v18263_v3  ;;  %14566 = vmatpush1.bf16.msra.mxu1 %v18266_v25  ;;  %v18316_v3 = vld [vmem:[#allocation9 + $0xf74] ss:$8 sps:$4 sm:$0xff]   ;;  %v18311_v25 = vld [vmem:[#allocation9 + $0xe70] ss:$8 sps:$4 sm:$0xff]  }
0x26ee   :  { %14576 = vmatprep.subr.bf16.mxu0 %v18271_v21  ;;  %14617 = vmatprep.subr.bf16.mxu1 %v18274_v54  ;;  %v18314_v21 = vld [vmem:[#allocation9 + $0xf70] ss:$8 sps:$4 sm:$0xff]   ;;  %v18319_v54 = vld [vmem:[#allocation9 + $0xe84] ss:$8 sps:$4 sm:$0xff]  }
0x2743   :  { %v13571_v30 = vpop.f32.mrb[100].mxu0  ;;  %v13612_v31 = vpop.f32.mrb[128].mxu1 }
0x2744   :  { %v13572_v12 = vadd.f32 %v13571_v30, %v12868_v27  ;;  %v13613_v9 = vadd.f32 %v13612_v31, %v12876_v28  ;;  %v13573_v51 = vpop.f32.mrb[101].mxu0  ;;  %v13614_v32 = vpop.f32.mrb[129].mxu1  ;;  %v18320_v27 = vld [vmem:[#allocation9 + $0xf80] ss:$8 sps:$4 sm:$0xff]   ;;  %v18325_v28 = vld [vmem:[#allocation9 + $0xe94] ss:$8 sps:$4 sm:$0xff]  }
0x2745   :  { %v13574_v46 = vadd.f32 %v13573_v51, %v12872_v60  ;;  %v13615_v49 = vadd.f32 %v13614_v32, %v12880_v29  ;;  %v13575_v10 = vpop.f32.mrb[102].mxu0  ;;  %v13616_v33 = vpop.f32.mrb[130].mxu1  ;;  %v18328_v60 = vld [vmem:[#allocation9 + $0xf94] ss:$8 sps:$4 sm:$0xff]   ;;  %v18323_v29 = vld [vmem:[#allocation9 + $0xe90] ss:$8 sps:$4 sm:$0xff]  }
0x2746   :  { %v13701_v34 = vmax.f32 %v13572_v12, 0.0  ;;  %v13703_v35 = vmax.f32 %v13613_v9, 0.0  ;;  %v13576_v62 = vpop.f32.mrb[103].mxu0  ;;  %v13617_v38 = vpop.f32.mrb[131].mxu1  ;;  %v18326_v30 = vld [vmem:[#allocation9 + $0xf90] ss:$8 sps:$4 sm:$0xff]  }
0x2747   :  { %v13702_v14 = vmax.f32 %v13574_v46, 0.0  ;;  %v13704_v41 = vmax.f32 %v13615_v49, 0.0  ;;  %v18331_v31 = vld [vmem:[#allocation9 + $0xea4] ss:$8 sps:$4 sm:$0xff]   ;;  %v18329_v9 = vld [vmem:[#allocation9 + $0xea0] ss:$8 sps:$4 sm:$0xff]  }
0x2748   :  { %v13709_v56 = vpack.c.bf16 %v13701_v34, %v13701_v34  ;;  %v13711_v5 = vpack.c.bf16 %v13703_v35, %v13703_v35  ;;  %v18334_v12 = vld [vmem:[#allocation9 + $0xfa4] ss:$8 sps:$4 sm:$0xff]   ;;  %v18332_v51 = vld [vmem:[#allocation9 + $0xfa0] ss:$8 sps:$4 sm:$0xff]   ;;  %v18337_v32 = vld [vmem:[#allocation9 + $0xeb4] ss:$8 sps:$4 sm:$0xff]  }
0x2749   :  { %v13710_v6 = vpack.c.bf16 %v13702_v14, %v13702_v14  ;;  %v13712_v40 = vpack.c.bf16 %v13704_v41, %v13704_v41  ;;  %v18340_v46 = vld [vmem:[#allocation9 + $0xfb4] ss:$8 sps:$4 sm:$0xff]   ;;  %v18335_v49 = vld [vmem:[#allocation9 + $0xeb0] ss:$8 sps:$4 sm:$0xff]   ;;  %v18343_v33 = vld [vmem:[#allocation9 + $0xec4] ss:$8 sps:$4 sm:$0xff]  }
0x274a   :  { %v18338_v10 = vld [vmem:[#allocation9 + $0xfb0] ss:$8 sps:$4 sm:$0xff]   ;;  %v18346_v34 = vld [vmem:[#allocation9 + $0xfc4] ss:$8 sps:$4 sm:$0xff]   ;;  %v18341_v35 = vld [vmem:[#allocation9 + $0xec0] ss:$8 sps:$4 sm:$0xff]  }
0x274b   :  { %14526 = vmatprep.mubr.bf16.mxu0 %v13710_v6  ;;  %14567 = vmatprep.mubr.bf16.mxu1 %v13712_v40  ;;  %v18344_v62 = vld [vmem:[#allocation9 + $0xfc0] ss:$8 sps:$4 sm:$0xff]   ;;  %v11026_v38 = vld [vmem:[#allocation2 + $0x70] sm:$0xf]  ;;  %v18349_v14 = vld [vmem:[#allocation9 + $0xed4] ss:$8 sps:$4 sm:$0xff]  }
0x274c   :  { %14527 = vmatmul.mubr.bf16.vlgmr.msra.gmra.mrb[108].mxu0 %v13709_v56  ;;  %14568 = vmatmul.mubr.bf16.vlgmr.msra.gmra.mrb[136].mxu1 %v13711_v5  ;;  %v18352_v41 = vld [vmem:[#allocation9 + $0xfd4] ss:$8 sps:$4 sm:$0xff]   ;;  %v11027_v6 = vld [vmem:[#allocation2 + $0x78] sm:$0xf]  ;;  %v11036_v40 = vrot.slane %v11026_v38, 2 }
0x274d   :  { %14577 = vmatpush1.bf16.msra.mxu0 %v18269_v7  ;;  %14618 = vmatpush1.bf16.msra.mxu1 %v18272_v8  ;;  %v11040_v7 = vrot.slane %v11026_v38, 3  ;;  %v18347_v8 = vld [vmem:[#allocation9 + $0xed0] ss:$8 sps:$4 sm:$0xff]   ;;  %v11037_v5 = vrot.slane %v11027_v6, 2 }
0x274e   :  { %14578 = vmatprep.subr.bf16.mxu0 %v18277_v11  ;;  %14619 = vmatprep.subr.bf16.mxu1 %v18280_v47  ;;  %v18350_v56 = vld [vmem:[#allocation9 + $0xfd0] ss:$8 sps:$4 sm:$0xff]   ;;  %v11041_v11 = vrot.slane %v11027_v6, 3  ;;  %v18355_v47 = vld [vmem:[#allocation9 + $0xee4] ss:$8 sps:$4 sm:$0xff]  }
0x2751   :  { %14579 = vmatpush1.bf16.msra.mxu0 %v18275_v15  ;;  %14620 = vmatpush1.bf16.msra.mxu1 %v18278_v2  ;;  %v18358_v15 = vld [vmem:[#allocation9 + $0xfe4] ss:$8 sps:$4 sm:$0xff]   ;;  %v12884_v2 = vrot.slane %v11036_v40, %v18970_v36 }
0x2752   :  { %14580 = vmatprep.subr.bf16.mxu0 %v18283_v13  ;;  %14621 = vmatprep.subr.bf16.mxu1 %v18286_v45  ;;  %v12892_v13 = vrot.slane %v11040_v7, %v18970_v36  ;;  %v12888_v45 = vrot.slane %v11037_v5, %v18970_v36 }
0x2755   :  { %14581 = vmatpush1.bf16.msra.mxu0 %v18281_v50  ;;  %14622 = vmatpush1.bf16.msra.mxu1 %v18284_v61  ;;  %v12896_v50 = vrot.slane %v11041_v11, %v18970_v36  ;;  %v18353_v61 = vld [vmem:[#allocation9 + $0xee0] ss:$8 sps:$4 sm:$0xff]   ;;  %v18362_v36 = vld [vmem:[#allocation9 + $0xff0] ss:$8 sps:$4 sm:$0xff]  }
0x2756   :  { %14582 = vmatprep.subr.bf16.mxu0 %v18289_v48  ;;  %14623 = vmatprep.subr.bf16.mxu1 %v18292_v57  ;;  %v18356_v48 = vld [vmem:[#allocation9 + $0xfe0] ss:$8 sps:$4 sm:$0xff]   ;;  %v18361_v57 = vld [vmem:[#allocation9 + $0xef4] ss:$8 sps:$4 sm:$0xff]  }
0x2759   :  { %14583 = vmatpush1.bf16.msra.mxu0 %v18287_v20  ;;  %14624 = vmatpush1.bf16.msra.mxu1 %v18290_v43  ;;  %v18364_v20 = vld [vmem:[#allocation9 + $0xff4] ss:$8 sps:$4 sm:$0xff]  }
0x275a   :  { %14584 = vmatprep.subr.bf16.mxu0 %v18295_v4  ;;  %14625 = vmatprep.subr.bf16.mxu1 %v18298_v37 }
0x275d   :  { %14585 = vmatpush1.bf16.msra.mxu0 %v18293_v53  ;;  %14626 = vmatpush1.bf16.msra.mxu1 %v18296_v0 }
0x275e   :  { %14586 = vmatprep.subr.bf16.mxu0 %v18301_v58  ;;  %14627 = vmatprep.subr.bf16.mxu1 %v18304_v44 }
0x2761   :  { %14587 = vmatpush1.bf16.msra.mxu0 %v18299_v17  ;;  %14628 = vmatpush1.bf16.msra.mxu1 %v18302_v42 }
0x2762   :  { %14588 = vmatprep.subr.bf16.mxu0 %v18307_v55  ;;  %14629 = vmatprep.subr.bf16.mxu1 %v18310_v39  ;;  %v18359_v39 = vld [vmem:[#allocation9 + $0xef0] ss:$8 sps:$4 sm:$0xff]  }
0x2765   :  { %14589 = vmatpush1.bf16.msra.mxu0 %v18305_v1  ;;  %14630 = vmatpush1.bf16.msra.mxu1 %v18308_v23 }
0x2766   :  { %14590 = vmatprep.subr.bf16.mxu0 %v18313_v22  ;;  %14631 = vmatprep.subr.bf16.mxu1 %v18316_v3 }
0x2769   :  { %14591 = vmatpush1.bf16.msra.mxu0 %v18311_v25  ;;  %14632 = vmatpush1.bf16.msra.mxu1 %v18314_v21 }
0x276a   :  { %14592 = vmatprep.subr.bf16.mxu0 %v18319_v54  ;;  %14633 = vmatprep.subr.bf16.mxu1 %v18322_v24 }
0x276d   :  { %14593 = vmatpush1.bf16.msra.mxu0 %v18317_v26  ;;  %14634 = vmatpush1.bf16.msra.mxu1 %v18320_v27 }
0x276e   :  { %14594 = vmatprep.subr.bf16.mxu0 %v18325_v28  ;;  %14635 = vmatprep.subr.bf16.mxu1 %v18328_v60  ;;  %v18514_v28 = vld [vmem:[#allocation2 + $0x60] sm:$0xff] }
0x276f   :  { %v13849_v60 = vrot.slane %v18514_v28, %v18989_v52  ;;  %v18398_v28 = vld [vmem:[#allocation10 + $0xb0] ss:$8 sps:$4 sm:$0xff]  }
0x2771   :  { %14595 = vmatpush1.bf16.msra.mxu0 %v18323_v29  ;;  %14636 = vmatpush1.bf16.msra.mxu1 %v18326_v30  ;;  %v18515_v29 = vld [vmem:[#allocation2 + $0x68] sm:$0xff] }
0x2772   :  { %14596 = vmatprep.subr.bf16.mxu0 %v18331_v31  ;;  %14637 = vmatprep.subr.bf16.mxu1 %v18334_v12  ;;  %v13853_v30 = vrot.slane %v18515_v29, %v18989_v52  ;;  %v18401_v29 = vld [vmem:[#allocation10 + $0xc0] ss:$8 sps:$4 sm:$0xff]  }
0x2775   :  { %14597 = vmatpush1.bf16.msra.mxu0 %v18329_v9  ;;  %14638 = vmatpush1.bf16.msra.mxu1 %v18332_v51 }
0x2776   :  { %14598 = vmatprep.subr.bf16.mxu0 %v18337_v32  ;;  %14639 = vmatprep.subr.bf16.mxu1 %v18340_v46 }
0x2779   :  { %14599 = vmatpush1.bf16.msra.mxu0 %v18335_v49  ;;  %14640 = vmatpush1.bf16.msra.mxu1 %v18338_v10 }
0x277a   :  { %14600 = vmatprep.subr.bf16.mxu0 %v18343_v33  ;;  %14641 = vmatprep.subr.bf16.mxu1 %v18346_v34 }
0x277d   :  { %14601 = vmatpush1.bf16.msra.mxu0 %v18341_v35  ;;  %14642 = vmatpush1.bf16.msra.mxu1 %v18344_v62 }
0x277e   :  { %14602 = vmatprep.subr.bf16.mxu0 %v18349_v14  ;;  %14643 = vmatprep.subr.bf16.mxu1 %v18352_v41 }
0x2781   :  { %14603 = vmatpush1.bf16.msra.mxu0 %v18347_v8  ;;  %14644 = vmatpush1.bf16.msra.mxu1 %v18350_v56 }
0x2782   :  { %14604 = vmatprep.subr.bf16.mxu0 %v18355_v47  ;;  %14645 = vmatprep.subr.bf16.mxu1 %v18358_v15 }
0x2783   :  { %v13653_v43 = vpop.f32.mrb[104].mxu0  ;;  %v13694_v4 = vpop.f32.mrb[132].mxu1 }
0x2784   :  { %v13654_v37 = vadd.f32 %v13653_v43, %v12884_v2  ;;  %v13695_v53 = vadd.f32 %v13694_v4, %v12892_v13  ;;  %v13655_v0 = vpop.f32.mrb[105].mxu0  ;;  %v13696_v58 = vpop.f32.mrb[133].mxu1  ;;  %v18376_v43 = vld [vmem:[#allocation10 + $0x34] ss:$8 sps:$4 sm:$0xff]   ;;  %v18374_v4 = vld [vmem:[#allocation10 + $0x30] ss:$8 sps:$4 sm:$0xff]  }
0x2785   :  { %v13656_v44 = vadd.f32 %v13655_v0, %v12888_v45  ;;  %v13697_v17 = vadd.f32 %v13696_v58, %v12896_v50  ;;  %v13657_v42 = vpop.f32.mrb[106].mxu0  ;;  %v13698_v55 = vpop.f32.mrb[134].mxu1  ;;  %14605 = vmatpush1.bf16.msra.mxu0 %v18353_v61  ;;  %14646 = vmatpush1.bf16.msra.mxu1 %v18356_v48  ;;  %v18365_v45 = vld [vmem:[#allocation10] ss:$8 sps:$4 sm:$0xff]   ;;  %v18367_v50 = vld [vmem:[#allocation10 + $0x4] ss:$8 sps:$4 sm:$0xff]  }
0x2786   :  { %v13705_v1 = vmax.f32 %v13654_v37, 0.0  ;;  %v13707_v23 = vmax.f32 %v13695_v53, 0.0  ;;  %v13658_v22 = vpop.f32.mrb[107].mxu0  ;;  %v13699_v3 = vpop.f32.mrb[135].mxu1  ;;  %14606 = vmatprep.subr.bf16.mxu0 %v18361_v57  ;;  %14647 = vmatprep.subr.bf16.mxu1 %v18364_v20  ;;  %v18370_v61 = vld [vmem:[#allocation10 + $0x14] ss:$8 sps:$4 sm:$0xff]  }
0x2787   :  { %v13706_v25 = vmax.f32 %v13656_v44, 0.0  ;;  %v13708_v21 = vmax.f32 %v13697_v17, 0.0  ;;  %v18368_v48 = vld [vmem:[#allocation10 + $0x10] ss:$8 sps:$4 sm:$0xff]   ;;  %v18373_v57 = vld [vmem:[#allocation10 + $0x24] ss:$8 sps:$4 sm:$0xff]  }
0x2788   :  { %v13713_v26 = vpack.c.bf16 %v13705_v1, %v13705_v1  ;;  %v13715_v27 = vpack.c.bf16 %v13707_v23, %v13707_v23  ;;  %v18371_v20 = vld [vmem:[#allocation10 + $0x20] ss:$8 sps:$4 sm:$0xff]   ;;  %v18382_v37 = vld [vmem:[#allocation10 + $0x54] ss:$8 sps:$4 sm:$0xff]   ;;  %v18380_v53 = vld [vmem:[#allocation10 + $0x50] ss:$8 sps:$4 sm:$0xff]  }
0x2789   :  { %v13714_v54 = vpack.c.bf16 %v13706_v25, %v13706_v25  ;;  %v13716_v24 = vpack.c.bf16 %v13708_v21, %v13708_v21  ;;  %14607 = vmatpush1.bf16.msra.mxu0 %v18359_v39  ;;  %14648 = vmatpush1.bf16.msra.mxu1 %v18362_v36  ;;  %v18385_v0 = vld [vmem:[#allocation10 + $0x64] ss:$8 sps:$4 sm:$0xff]   ;;  %v18383_v58 = vld [vmem:[#allocation10 + $0x60] ss:$8 sps:$4 sm:$0xff]   ;;  %v18388_v44 = vld [vmem:[#allocation10 + $0x74] ss:$8 sps:$4 sm:$0xff]  }
0x278a   :  { %14901 = vmatprep.subr.bf16.mxu0 %v18367_v50  ;;  %v18386_v17 = vld [vmem:[#allocation10 + $0x70] ss:$8 sps:$4 sm:$0xff]   ;;  %v18391_v42 = vld [vmem:[#allocation10 + $0x84] ss:$8 sps:$4 sm:$0xff]   ;;  %v18389_v55 = vld [vmem:[#allocation10 + $0x80] ss:$8 sps:$4 sm:$0xff]  }
0x278b   :  { %14608 = vmatprep.mubr.bf16.mxu0 %v13714_v54  ;;  %14649 = vmatprep.mubr.bf16.mxu1 %v13716_v24  ;;  %v18394_v39 = vld [vmem:[#allocation10 + $0x94] ss:$8 sps:$4 sm:$0xff]   ;;  %v18392_v36 = vld [vmem:[#allocation10 + $0x90] ss:$8 sps:$4 sm:$0xff]   ;;  %v18397_v24 = vld [vmem:[#allocation10 + $0xa4] ss:$8 sps:$4 sm:$0xff]  }
0x278c   :  { %14609 = vmatmul.mubr.bf16.vlgmr.msra.gmra.mrb[112].mxu0 %v13713_v26  ;;  %14650 = vmatmul.mubr.bf16.vlgmr.msra.gmra.mrb[140].mxu1 %v13715_v27  ;;  %v18395_v26 = vld [vmem:[#allocation10 + $0xa0] ss:$8 sps:$4 sm:$0xff]   ;;  %v18400_v27 = vld [vmem:[#allocation10 + $0xb4] ss:$8 sps:$4 sm:$0xff]  }
0x278d   :  { %14902 = vmatpush1.bf16.msra.mxu0 %v18365_v45 }
0x278e   :  { %14903 = vmatprep.subr.bf16.mxu0 %v18370_v61 }
0x2791   :  { %14904 = vmatpush1.bf16.msra.mxu0 %v18368_v48 }
0x2792   :  { %14905 = vmatprep.subr.bf16.mxu0 %v18373_v57 }
0x2795   :  { %14906 = vmatpush1.bf16.msra.mxu0 %v18371_v20 }
0x2796   :  { %14907 = vmatprep.subr.bf16.mxu0 %v18376_v43 }
0x2799   :  { %14908 = vmatpush1.bf16.msra.mxu0 %v18374_v4 }
0x281f   :  { %v14528_v31 = vpop.f32.mrb[108].mxu0  ;;  %v14569_v12 = vpop.f32.mrb[136].mxu1 }
0x2820   :  { %v14529_v9 = vadd.f32 %v14528_v31, %v13849_v60  ;;  %v14530_v51 = vpop.f32.mrb[109].mxu0  ;;  %v14571_v32 = vpop.f32.mrb[137].mxu1  ;;  %v18403_v60 = vld [vmem:[#allocation10 + $0xc4] ss:$8 sps:$4 sm:$0xff]   ;;  %v18404_v31 = vld [vmem:[#allocation10 + $0xd0] ss:$8 sps:$4 sm:$0xff]  }
0x2821   :  { %v14531_v46 = vadd.f32 %v14530_v51, %v13853_v30  ;;  %v14532_v49 = vpop.f32.mrb[110].mxu0  ;;  %v14573_v10 = vpop.f32.mrb[138].mxu1  ;;  %v18406_v30 = vld [vmem:[#allocation10 + $0xd4] ss:$8 sps:$4 sm:$0xff]  }
0x2822   :  { %v14570_v33 = vadd.f32 %v14569_v12, %v14529_v9  ;;  %v14533_v34 = vpop.f32.mrb[111].mxu0  ;;  %v14574_v35 = vpop.f32.mrb[139].mxu1  ;;  %v18409_v12 = vld [vmem:[#allocation10 + $0xe4] ss:$8 sps:$4 sm:$0xff]   ;;  %v18407_v9 = vld [vmem:[#allocation10 + $0xe0] ss:$8 sps:$4 sm:$0xff]  }
0x2823   :  { %v14572_v62 = vadd.f32 %v14571_v32, %v14531_v46  ;;  %v18412_v51 = vld [vmem:[#allocation10 + $0xf4] ss:$8 sps:$4 sm:$0xff]   ;;  %v18410_v32 = vld [vmem:[#allocation10 + $0xf0] ss:$8 sps:$4 sm:$0xff]   ;;  %v14661_v34 = vld [vmem:[#allocation2 + $0x80] sm:$0xff] }
0x285f   :  { %v14610_v38 = vpop.f32.mrb[112].mxu0  ;;  %v14651_v14 = vpop.f32.mrb[140].mxu1 }
0x2860   :  { %v14611_v41 = vadd.f32 %v14610_v38, %v14570_v33  ;;  %v14612_v6 = vpop.f32.mrb[113].mxu0  ;;  %v14653_v40 = vpop.f32.mrb[141].mxu1  ;;  %v14662_v33 = vld [vmem:[#allocation2 + $0x88] sm:$0xff] }
0x2861   :  { %v14613_v7 = vadd.f32 %v14612_v6, %v14572_v62  ;;  %v14614_v8 = vpop.f32.mrb[114].mxu0  ;;  %v14655_v52 = vpop.f32.mrb[142].mxu1  ;;  %v14686_v35 = vrot.slane %v14662_v33, %v18831_v18  ;;  %v14682_v62 = vrot.slane %v14661_v34, %v18831_v18  ;;  %v14696_v6 = vrot.slane %v14662_v33, %v18834_v19 }
0x2862   :  { %v14652_v56 = vadd.f32 %v14651_v14, %v14611_v41  ;;  %v14615_v5 = vpop.f32.mrb[115].mxu0  ;;  %v14656_v11 = vpop.f32.mrb[143].mxu1 }
0x2863   :  { %v14654_v47 = vadd.f32 %v14653_v40, %v14613_v7  ;;  %v14692_v40 = vrot.slane %v14661_v34, %v18834_v19 }
0x2864   :  { %v14658_v15 = vadd.f32 %v14652_v56, %v19395_v59  ;;  %v18379_v59 = vld [vmem:[#allocation10 + $0x44] ss:$8 sps:$4 sm:$0xff]  }
0x2865   :  { %v14659_v2 = vadd.f32 %v14654_v47, %v19398_v16  ;;  %v18377_v16 = vld [vmem:[#allocation10 + $0x40] ss:$8 sps:$4 sm:$0xff]   ;;  %14909 = vmatprep.subr.bf16.mxu0 %v18379_v59  ;;  %v14736_v47 = vrot.slane %v14661_v34, %v18915_v63 }
0x2866   :  { %14910 = vmatpush1.bf16.msra.mxu0 %v18377_v16 }
0x2867   :  { %v14663_v13 = vadd.f32 %v14659_v2, %v14658_v15  ;;  %14911 = vmatprep.subr.bf16.mxu0 %v18382_v37 }
0x2869   :  { %14664 = vadd.xlane.f32.xlu0 %v14663_v13 }
0x286a   :  { %14912 = vmatpush1.bf16.msra.mxu0 %v18380_v53 }
0x286b   :  { %14913 = vmatprep.subr.bf16.mxu0 %v18385_v0 }
0x286e   :  { %14914 = vmatpush1.bf16.msra.mxu0 %v18383_v58 }
0x286f   :  { %14915 = vmatprep.subr.bf16.mxu0 %v18388_v44 }
0x2872   :  { %14916 = vmatpush1.bf16.msra.mxu0 %v18386_v17 }
0x2873   :  { %14917 = vmatprep.subr.bf16.mxu0 %v18391_v42 }
0x2876   :  { %14918 = vmatpush1.bf16.msra.mxu0 %v18389_v55 }
0x2877   :  { %14919 = vmatprep.subr.bf16.mxu0 %v18394_v39 }
0x287a   :  { %14920 = vmatpush1.bf16.msra.mxu0 %v18392_v36 }
0x287b   :  { %14921 = vmatprep.subr.bf16.mxu0 %v18397_v24 }
0x287e   :  { %14922 = vmatpush1.bf16.msra.mxu0 %v18395_v26 }
0x287f   :  { %14923 = vmatprep.subr.bf16.mxu0 %v18400_v27 }
0x2882   :  { %14924 = vmatpush1.bf16.msra.mxu0 %v18398_v28 }
0x2883   :  { %14925 = vmatprep.subr.bf16.mxu0 %v18403_v60 }
0x2886   :  { %14926 = vmatpush1.bf16.msra.mxu0 %v18401_v29 }
0x2887   :  { %14927 = vmatprep.subr.bf16.mxu0 %v18406_v30 }
0x288a   :  { %14928 = vmatpush1.bf16.msra.mxu0 %v18404_v31 }
0x288b   :  { %14929 = vmatprep.subr.bf16.mxu0 %v18409_v12 }
0x288e   :  { %14930 = vmatpush1.bf16.msra.mxu0 %v18407_v9 }
0x288f   :  { %14931 = vmatprep.subr.bf16.mxu0 %v18412_v51 }
0x2892   :  { %14932 = vmatpush1.bf16.msra.mxu0 %v18410_v32 }
0x28f6   :  { %v14665_v1 = vpop.xlane.xlu0 %14664 }
0x28f7   :  { %v14666_v23 = vmul.f32 0.00390625, %v14665_v1 }
0x28f9   :  { %v14667_v22 = vsub.f32 %v14658_v15, %v14666_v23  ;;  %v14668_v3 = vsub.f32 %v14659_v2, %v14666_v23  ;;  %v14740_v15 = vrot.slane %v14662_v33, %v18915_v63 }
0x28fb   :  { %v14669_v25 = vmul.f32 %v14667_v22, %v14667_v22  ;;  %v14670_v21 = vmul.f32 %v14668_v3, %v14668_v3 }
0x28fd   :  { %v14671_v54 = vadd.f32 %v14670_v21, %v14669_v25 }
0x28ff   :  { %14672 = vadd.xlane.f32.xlu0 %v14671_v54 }
0x298c   :  { %v14673_v46 = vpop.xlane.xlu0 %14672 }
0x298d   :  { %v14674_v49 = vmul.f32 0.00390625, %v14673_v46 }
0x298f   :  { %v14675_v10 = vadd.f32 1e-05, %v14674_v49 }
0x2991   :  { %18493 = vrsqrt.f32 %v14675_v10 }
0x299b   :  { %v18494_v38 = vpop.eup %18493 }
0x299c   :  { %v14677_v14 = vmul.f32 %v18494_v38, %v14667_v22  ;;  %v14678_v41 = vmul.f32 %v18494_v38, %v14668_v3 }
0x299e   :  { %v14688_v7 = vmul.f32 %v14686_v35, %v14678_v41  ;;  %v14687_v8 = vmul.f32 %v14682_v62, %v14677_v14 }
0x29a0   :  { %v14698_v52 = vadd.f32 %v14696_v6, %v14688_v7  ;;  %v14697_v56 = vadd.f32 %v14692_v40, %v14687_v8 }
0x29a2   :  { %v14700_v5 = vpack.c.bf16 %v14698_v52, %v14698_v52  ;;  %v14699_v11 = vpack.c.bf16 %v14697_v56, %v14697_v56 }
0x29a4   :  { %14933 = vmatprep.mubr.bf16.mxu0 %v14700_v5 }
0x29a5   :  { %14934 = vmatmul.mubr.bf16.vlgmr.msra.gmra.mrb[116].mxu0 %v14699_v11 }
0x2a78   :  { %v14935_v18 = vpop.f32.mrb[116].mxu0 }
0x2a79   :  { %v14936_v2 = vadd.f32 %v14935_v18, %v14736_v47  ;;  %v14937_v13 = vpop.f32.mrb[117].mxu0 }
0x2a7a   :  { %v14938_v45 = vadd.f32 %v14937_v13, %v14740_v15  ;;  %v14939_v50 = vpop.f32.mrb[118].mxu0 }
0x2a7b   :  { %14942 = vst [vmem:[%s19468_s8] sm:$0xff] %v14936_v2  ;;  %v14940_v19 = vpop.f32.mrb[119].mxu0 }
0x2a7c   :  { %14943 = vst [vmem:[%s19468_s8 + $0x8] sm:$0xff] %v14938_v45 }
0x2a7d   :  { %14948 = vsyncpa [#allocation3], 1 }
0x2a7e   :  { %14949 = vsyncpa [#allocation5], 1 }
0x2a7f   :  { %14950 = vsyncpa [#allocation8], 1 }
0x2a80   :  { %14951 = vsyncpa [#allocation11], 1 }

</bundles_post_ra>
